<compile_context>
chip_gen: v5e
topology: v5e:2x2
jax: 0.10.0
libtpu: 0.0.40
codegen_flags: <defaults>
</compile_context>

<pallas_src>
import functools
import re

import jax
import jax.numpy as jnp
from jax import lax
from jax.experimental import pallas as pl
from jax.experimental.pallas import tpu as pltpu


def _round_up(x, m):
    return ((x + m - 1) // m) * m


def _pick_tile(dim, align, cap):
    """Largest multiple of `align` <= cap that divides round_up(dim, align)."""
    d = _round_up(max(dim, 1), align)
    best = align
    t = align
    while t <= min(cap, d):
        if d % t == 0:
            best = t
        t += align
    return best


def _tpu_generation():
    try:
        kind = jax.devices()[0].device_kind.lower()
        m = re.search(r"(\d+)", kind)
        if m:
            return int(m.group(1))
    except Exception:
        pass
    return 6


@functools.lru_cache(maxsize=None)
def _chip_config():
    gen = _tpu_generation()
    if gen >= 7:
        # v7x: 64 MiB VMEM / TC, 2 TensorCores -> smaller tiles, tight budgets.
        return dict(mm=dict(tn=256, tv=512, tk=512, vmem_limit=48 * 2**20),
                    rec_vmem_limit=48 * 2**20, rec_budget=40 * 2**20)
    # v5e / v6e: 128 MiB VMEM, 1 TC -> bigger tiles amortize grid overhead.
    return dict(mm=dict(tn=512, tv=1024, tk=1024, vmem_limit=96 * 2**20),
                rec_vmem_limit=96 * 2**20, rec_budget=80 * 2**20)


# ----------------------------------------------------------------------------
# Tiled matmul + bias:  (N, K) @ (K, V) + (1, V) -> (N, V)
# Used for the per-layer input projection (x @ W_ih^T + b) and the decoder.
# ----------------------------------------------------------------------------
def _matmul_bias_kernel(x_ref, w_ref, b_ref, o_ref, acc_ref):
    k = pl.program_id(2)

    @pl.when(k == 0)
    def _():
        acc_ref[...] = jnp.zeros_like(acc_ref)

    acc_ref[...] += jnp.dot(x_ref[...], w_ref[...],
                            preferred_element_type=jnp.float32)

    @pl.when(k == pl.num_programs(2) - 1)
    def _():
        o_ref[...] = (acc_ref[...]
                      + b_ref[...].astype(jnp.float32)).astype(o_ref.dtype)


def matmul_bias(x, w, b, out_dtype=jnp.float32, *, tn=512, tv=512, tk=512,
                vmem_limit=64 * 2**20):
    """x: (N, K); w: (K, V); b: (1, V) -> (N, V) in out_dtype.

    Tiles are chosen as divisors of the (alignment-rounded) dims, so in the
    common case (pre-padded weights, aligned activations) no per-call padding
    happens at all; a zero-pad fallback keeps it correct for any shape.
    """
    N, K = x.shape
    Kw, V = w.shape
    assert K == Kw and b.shape == (1, V)
    if x.dtype != w.dtype:
        x = x.astype(w.dtype)

    tn = _pick_tile(N, 8, tn)
    tv = _pick_tile(V, 128, tv)
    tk = _pick_tile(K, 128, tk)
    Np, Vp, Kp = _round_up(N, tn), _round_up(V, tv), _round_up(K, tk)

    xp = jnp.pad(x, ((0, Np - N), (0, Kp - K))) if (Np, Kp) != (N, K) else x
    wp = jnp.pad(w, ((0, Kp - K), (0, Vp - V))) if (Kp, Vp) != (K, V) else w
    bp = jnp.pad(b, ((0, 0), (0, Vp - V))) if Vp != V else b

    out = pl.pallas_call(
        _matmul_bias_kernel,
        out_shape=jax.ShapeDtypeStruct((Np, Vp), out_dtype),
        grid=(Np // tn, Vp // tv, Kp // tk),
        in_specs=[
            pl.BlockSpec((tn, tk), lambda i, j, k: (i, k)),
            pl.BlockSpec((tk, tv), lambda i, j, k: (k, j)),
            pl.BlockSpec((1, tv), lambda i, j, k: (0, j)),
        ],
        out_specs=pl.BlockSpec((tn, tv), lambda i, j, k: (i, j)),
        scratch_shapes=[pltpu.VMEM((tn, tv), jnp.float32)],
        compiler_params=pltpu.CompilerParams(
            dimension_semantics=("parallel", "parallel", "arbitrary"),
            vmem_limit_bytes=vmem_limit),
    )(xp, wp, bp)

    if (Np, Vp) != (N, V):
        out = out[:N, :V]
    return out


# ----------------------------------------------------------------------------
# LSTM recurrence: consumes precomputed gate inputs xg = x @ W_ih^T + b_sum
# (bf16), only does h @ W_hh^T + nonlinearities per step.
# Grid = (batch_blocks "parallel", time_chunks "arbitrary"); within a chunk a
# fully unrolled lax.fori_loop keeps h/c hot in f32 VMEM scratch.  W_hh is
# copied HBM->VMEM exactly once per batch block (single copy, no pipeline
# double-buffer).  Time is cdiv-chunked; tail steps are masked with pl.when.
# ----------------------------------------------------------------------------
def _lstm_recurrence_kernel(xg_ref, h0_ref, c0_ref, whh_hbm_ref,
                            out_ref, hN_ref, cN_ref,
                            h_sc, c_sc, whh_sc, dma_sem,
                            *, seq_len, need_mask):
    chunk = pl.program_id(1)

    @pl.when(chunk == 0)
    def _():
        h_sc[...] = h0_ref[...].astype(jnp.float32)
        c_sc[...] = c0_ref[...].astype(jnp.float32)
        # W_hh^T resident in VMEM for the whole time sweep (single copy).
        cp = pltpu.make_async_copy(whh_hbm_ref, whh_sc, dma_sem)
        cp.start()
        cp.wait()

    T = xg_ref.shape[0]
    H = h_sc.shape[-1]
    whh = whh_sc[...]                      # hoisted out of the time loop

    def step(t, carry):
        del carry
        h = h_sc[...]
        c = c_sc[...]
        # gates = (x W_ih^T + b_ih + b_hh) [precomputed, bf16] + h W_hh^T
        gates = (xg_ref[t].astype(jnp.float32)
                 + jnp.dot(h.astype(whh.dtype), whh,
                           preferred_element_type=jnp.float32))
        # PyTorch gate order [i, f, g, o]; H-aligned slices stay lane-tiled.
        i_g = jax.nn.sigmoid(gates[:, 0 * H:1 * H])
        f_g = jax.nn.sigmoid(gates[:, 1 * H:2 * H])
        g_g = jnp.tanh(gates[:, 2 * H:3 * H])
        o_g = jax.nn.sigmoid(gates[:, 3 * H:4 * H])
        c_new = f_g * c + i_g * g_g
        h_new = o_g * jnp.tanh(c_new)

        if need_mask:
            # Tail steps of the last (padded) chunk must not touch the state.
            @pl.when(chunk * T + t < seq_len)
            def _():
                c_sc[...] = c_new
                h_sc[...] = h_new
        else:
            c_sc[...] = c_new
            h_sc[...] = h_new
        out_ref[t] = h_new.astype(out_ref.dtype)   # padded rows never consumed
        return 0

    lax.fori_loop(0, T, step, 0, unroll=True)

    # Final hidden state written only once, on the last chunk of this block.
    @pl.when(chunk == pl.num_programs(1) - 1)
    def _():
        hN_ref[...] = h_sc[...].astype(hN_ref.dtype)
        cN_ref[...] = c_sc[...].astype(cN_ref.dtype)


def _pick_t_chunk(S, Bb, H, budget_bytes, cap=16):
    """Largest time chunk (<= cap) whose VMEM working set fits the budget."""
    t = max(1, min(cap, S))

    def need(tc):
        return (2 * tc * Bb * 4 * H * 2      # xg chunks (bf16, double-buffered)
                + 2 * tc * Bb * H * 2        # out chunks (bf16, double-buffered)
                + H * 4 * H * 2              # W_hh^T resident (single copy)
                + 2 * Bb * H * 4             # h/c f32 scratch
                + 8 * Bb * H * 4)            # h0/c0 in + hN/cN out blocks

    while t > 1 and need(t) > budget_bytes:
        t -= 1
    return t


def lstm_recurrence(xg, h0, c0, w_hh_t, *, seq_len, t_chunk, n_bblocks,
                    vmem_limit, out_dtype=jnp.bfloat16):
    """xg: (Sp, B, 4H) bf16 precomputed gate inputs (Sp = S padded to t_chunk);
    h0/c0: (B, H) f32; w_hh_t: (H, 4H) bf16.
    Returns (outputs (Sp, B, H) out_dtype, h_last f32, c_last f32)."""
    Sp, B, G = xg.shape
    H = h0.shape[-1]
    assert G == 4 * H and Sp % t_chunk == 0 and B % n_bblocks == 0
    Bb = B // n_bblocks
    n_chunks = Sp // t_chunk

    kernel = functools.partial(_lstm_recurrence_kernel,
                               seq_len=seq_len, need_mask=(seq_len != Sp))
    out_shapes = (
        jax.ShapeDtypeStruct((Sp, B, H), out_dtype),
        jax.ShapeDtypeStruct((B, H), jnp.float32),
        jax.ShapeDtypeStruct((B, H), jnp.float32),
    )
    return pl.pallas_call(
        kernel,
        out_shape=out_shapes,
        grid=(n_bblocks, n_chunks),
        in_specs=[
            pl.BlockSpec((t_chunk, Bb, 4 * H), lambda b, s: (s, b, 0)),  # xg
            pl.BlockSpec((Bb, H), lambda b, s: (b, 0)),                  # h0
            pl.BlockSpec((Bb, H), lambda b, s: (b, 0)),                  # c0
            pl.BlockSpec(memory_space=pl.ANY),   # W_hh^T stays in HBM; DMA'd once
        ],
        out_specs=(
            pl.BlockSpec((t_chunk, Bb, H), lambda b, s: (s, b, 0)),      # outputs
            pl.BlockSpec((Bb, H), lambda b, s: (b, 0)),                  # h_last
            pl.BlockSpec((Bb, H), lambda b, s: (b, 0)),                  # c_last
        ),
        scratch_shapes=[
            pltpu.VMEM((Bb, H), jnp.float32),          # h
            pltpu.VMEM((Bb, H), jnp.float32),          # c
            pltpu.VMEM(w_hh_t.shape, w_hh_t.dtype),    # resident W_hh^T
            pltpu.SemaphoreType.DMA(()),               # W_hh copy semaphore
        ],
        compiler_params=pltpu.CompilerParams(
            dimension_semantics=("parallel", "arbitrary"),
            vmem_limit_bytes=vmem_limit),
    )(xg, h0, c0, w_hh_t)


# ----------------------------------------------------------------------------
# Model: parameters + forward
# ----------------------------------------------------------------------------
def init_params(key, ntoken, ninp, nhid, nlayers):
    initrange = 0.1
    keys = jax.random.split(key, 2 + 4 * nlayers)
    params = {}
    # encoder / decoder: uniform(-0.1, 0.1), decoder bias zeroed (init_weights).
    # Weights are stored bf16 (MXU-native); decoder weight/bias pre-padded to a
    # lane multiple once here so no per-call jnp.pad of vocab-sized tensors.
    params["enc_w"] = jax.random.uniform(
        keys[0], (ntoken, ninp), jnp.float32, -initrange, initrange
    ).astype(jnp.bfloat16)
    v_pad = _round_up(ntoken, 128)
    dec_w = jax.random.uniform(keys[1], (nhid, ntoken), jnp.float32,
                               -initrange, initrange)
    params["dec_w_t"] = jnp.pad(
        dec_w, ((0, 0), (0, v_pad - ntoken))).astype(jnp.bfloat16)
    params["dec_b"] = jnp.zeros((1, v_pad), jnp.float32)
    # LSTM: PyTorch default init uniform(-1/sqrt(nhid), 1/sqrt(nhid)).
    k = 1.0 / jnp.sqrt(jnp.float32(nhid))
    layers = []
    for l in range(nlayers):
        in_dim = ninp if l == 0 else nhid
        kw = keys[2 + 4 * l: 2 + 4 * (l + 1)]
        b_ih = jax.random.uniform(kw[2], (1, 4 * nhid), jnp.float32, -k, k)
        b_hh = jax.random.uniform(kw[3], (1, 4 * nhid), jnp.float32, -k, k)
        layers.append(dict(
            w_ih_t=jax.random.uniform(kw[0], (in_dim, 4 * nhid),
                                      jnp.float32, -k, k).astype(jnp.bfloat16),
            w_hh_t=jax.random.uniform(kw[1], (nhid, 4 * nhid),
                                      jnp.float32, -k, k).astype(jnp.bfloat16),
            b=b_ih + b_hh,          # biases pre-summed at init
        ))
    params["lstm"] = layers
    return params


@jax.jit
def rnn_model_forward(params, tokens, hidden):
    """tokens: (S, B) int32; hidden = (h0, c0) each (nlayers, B, nhid).
    Returns (decoded (S, B, ntoken) f32, (hN, cN))."""
    h0, c0 = hidden
    S, B = tokens.shape
    ntoken = params["enc_w"].shape[0]
    nhid = params["lstm"][0]["w_hh_t"].shape[0]

    cfg = _chip_config()
    # Batch-block split only when sublane-aligned halves exist (used by v7x's
    # 2nd TensorCore via the "parallel" grid axis; harmless on v5e/v6e).
    n_bb = 2 if (B % 32 == 0) else 1
    Bb = B // n_bb
    t_chunk = _pick_t_chunk(S, Bb, nhid, cfg["rec_budget"])
    Sp = _round_up(S, t_chunk)

    if Sp != S:
        tokens = jnp.pad(tokens, ((0, Sp - S), (0, 0)))  # pad time with token 0

    # Embedding lookup (glue, plain JAX gather, bf16); dropout = identity.
    x = jnp.take(params["enc_w"], tokens, axis=0)        # (Sp, B, ninp) bf16

    h_last, c_last = [], []
    for l, lp in enumerate(params["lstm"]):
        E = x.shape[-1]
        # Hoisted input projection: one big MXU matmul over all (Sp*B) rows,
        # emitted in bf16 (halves the dominant HBM stream of the recurrence).
        xg = matmul_bias(x.reshape(Sp * B, E), lp["w_ih_t"], lp["b"],
                         out_dtype=jnp.bfloat16, **cfg["mm"])
        xg = xg.reshape(Sp, B, 4 * nhid)
        x, hN, cN = lstm_recurrence(
            xg, h0[l], c0[l], lp["w_hh_t"],
            seq_len=S, t_chunk=t_chunk, n_bblocks=n_bb,
            vmem_limit=cfg["rec_vmem_limit"], out_dtype=jnp.bfloat16)
        h_last.append(hN)
        c_last.append(cN)
        # inter-layer dropout = identity (eval mode)

    if Sp != S:
        x = x[:S]                                        # drop padded steps
    H = x.shape[-1]
    # Decoder: tiled (N, V, K) matmul; kept f32 out to match PyTorch logits.
    # TODO(synk): emit bf16 / fuse log-softmax+loss to halve the (S*B,V) write.
    decoded = matmul_bias(x.reshape(S * B, H), params["dec_w_t"],
                          params["dec_b"], out_dtype=jnp.float32, **cfg["mm"])
    if decoded.shape[-1] != ntoken:
        decoded = decoded[:, :ntoken]
    decoded = decoded.reshape(S, B, ntoken)
    return decoded, (jnp.stack(h_last, 0), jnp.stack(c_last, 0))


def init_hidden(nlayers, bsz, nhid):
    return (jnp.zeros((nlayers, bsz, nhid), jnp.float32),
            jnp.zeros((nlayers, bsz, nhid), jnp.float32))


# ----------------------------------------------------------------------------
# Pure-JAX reference (f32) for a tolerance check against the bf16 kernels.
# ----------------------------------------------------------------------------
def _reference_forward(params, tokens, hidden):
    h0, c0 = hidden
    S, B = tokens.shape
    V = params["enc_w"].shape[0]
    x = jnp.take(params["enc_w"].astype(jnp.float32), tokens, axis=0)
    hs, cs = [], []
    for l, lp in enumerate(params["lstm"]):
        w_ih = lp["w_ih_t"].astype(jnp.float32)
        w_hh = lp["w_hh_t"].astype(jnp.float32)
        b = lp["b"]
        H = w_hh.shape[0]
        h, c = h0[l], c0[l]
        outs = []
        for t in range(S):
            gates = x[t] @ w_ih + b + h @ w_hh
            i = jax.nn.sigmoid(gates[:, 0 * H:1 * H])
            f = jax.nn.sigmoid(gates[:, 1 * H:2 * H])
            g = jnp.tanh(gates[:, 2 * H:3 * H])
            o = jax.nn.sigmoid(gates[:, 3 * H:4 * H])
            c = f * c + i * g
            h = o * jnp.tanh(c)
            outs.append(h)
        x = jnp.stack(outs, 0)
        hs.append(h)
        cs.append(c)
    dec_w = params["dec_w_t"].astype(jnp.float32)[:, :V]
    dec_b = params["dec_b"][:, :V]
    dec = x.reshape(S * B, -1) @ dec_w + dec_b
    return dec.reshape(S, B, V), (jnp.stack(hs, 0), jnp.stack(cs, 0))


if __name__ == "__main__":
    # Small shapes; seq=20 is deliberately NOT a multiple of the 16-step time
    # chunk so the cdiv + masked-tail path and multi-chunk h/c carry are used.
    ntoken, ninp, nhid, nlayers = 256, 128, 128, 2
    seq_len, batch = 20, 8

    key = jax.random.PRNGKey(0)
    k_param, k_tok = jax.random.split(key)
    params = init_params(k_param, ntoken, ninp, nhid, nlayers)
    tokens = jax.random.randint(k_tok, (seq_len, batch), 0, ntoken,
                                dtype=jnp.int32)
    hidden = init_hidden(nlayers, batch, nhid)

    decoded, (hN, cN) = rnn_model_forward(params, tokens, hidden)
    jax.block_until_ready((decoded, hN, cN))

    assert decoded.shape == (seq_len, batch, ntoken)
    assert hN.shape == (nlayers, batch, nhid)
    assert cN.shape == (nlayers, batch, nhid)
    assert bool(jnp.all(jnp.isfinite(decoded)))
    assert bool(jnp.all(jnp.isfinite(hN))) and bool(jnp.all(jnp.isfinite(cN)))

    # Tolerance check vs. f32 reference (bf16 weights/activations => loose tol).
    ref_dec, (ref_h, ref_c) = _reference_forward(params, tokens, hidden)
    assert float(jnp.max(jnp.abs(decoded - ref_dec))) < 0.1
    assert float(jnp.max(jnp.abs(hN - ref_h))) < 0.1
    assert float(jnp.max(jnp.abs(cN - ref_c))) < 0.1

    print("KERNEL_OK")
</pallas_src>

<mosaic_0001>
module attributes {stable_mosaic.version = 11 : i64} {
  func.func @_matmul_bias_kernel(%arg0: i32, %arg1: i32, %arg2: i32, %arg3: memref<256x128xbf16, #tpu.memory_space<vmem>>, %arg4: memref<128x512xbf16, #tpu.memory_space<vmem>>, %arg5: memref<1x512xf32, #tpu.memory_space<vmem>>, %arg6: memref<256x512xbf16, #tpu.memory_space<vmem>>, %arg7: memref<256x512xf32, #tpu.memory_space<vmem>>) attributes {dimension_semantics = [#tpu.dimension_semantics<parallel>, #tpu.dimension_semantics<parallel>, #tpu.dimension_semantics<arbitrary>], iteration_bounds = array<i64: 1, 1, 1>, scalar_prefetch = 0 : i64, scratch_operands = 1 : i64, tpu.core_type = #tpu.core_type<tc>, window_params = [{transform_indices = @transform_0, window_bounds = array<i64: 256, 128>}, {transform_indices = @transform_1, window_bounds = array<i64: 128, 512>}, {transform_indices = @transform_2, window_bounds = array<i64: 1, 512>}, {transform_indices = @transform_3, window_bounds = array<i64: 256, 512>}]} {
    %c0_i32 = arith.constant 0 : i32
    %0 = arith.cmpi eq, %arg2, %c0_i32 : i32
    %1 = arith.extui %0 : i1 to i32
    %c0_i32_0 = arith.constant 0 : i32
    %2 = arith.cmpi ne, %1, %c0_i32_0 : i32
    scf.if %2 {
      %cst_10 = arith.constant 0.000000e+00 : f32
      %12 = vector.broadcast %cst_10 : f32 to vector<256x512xf32>
      %c0_11 = arith.constant 0 : index
      %c0_12 = arith.constant 0 : index
      %13 = vector.load %arg7[%c0_11, %c0_12] : memref<256x512xf32, #tpu.memory_space<vmem>>, vector<256x512xf32>
      tpu.vector_store %arg7[%c0_11, %c0_12], %12 {strides = array<i32>} : memref<256x512xf32, #tpu.memory_space<vmem>>, vector<256x512xf32>,
    } else {
    }
    %c0 = arith.constant 0 : index
    %c0_1 = arith.constant 0 : index
    %3 = vector.load %arg7[%c0, %c0_1] : memref<256x512xf32, #tpu.memory_space<vmem>>, vector<256x512xf32>
    %c0_2 = arith.constant 0 : index
    %c0_3 = arith.constant 0 : index
    %4 = vector.load %arg3[%c0_2, %c0_3] : memref<256x128xbf16, #tpu.memory_space<vmem>>, vector<256x128xbf16>
    %c0_4 = arith.constant 0 : index
    %c0_5 = arith.constant 0 : index
    %5 = vector.load %arg4[%c0_4, %c0_5] : memref<128x512xbf16, #tpu.memory_space<vmem>>, vector<128x512xbf16>
    %cst = arith.constant dense<0.000000e+00> : vector<256x512xf32>
    %6 = tpu.matmul %4, %5, %cst {dimension_numbers = #tpu.dot_dimension_numbers<[1], [0], [0], [1], [0, 0, 1, 1], [], []>} : vector<256x128xbf16>, vector<128x512xbf16>, vector<256x512xf32> -> vector<256x512xf32>
    %7 = arith.addf %3, %6 : vector<256x512xf32>
    %c0_6 = arith.constant 0 : index
    %c0_7 = arith.constant 0 : index
    %8 = vector.load %arg7[%c0_6, %c0_7] : memref<256x512xf32, #tpu.memory_space<vmem>>, vector<256x512xf32>
    tpu.vector_store %arg7[%c0_6, %c0_7], %7 {strides = array<i32>} : memref<256x512xf32, #tpu.memory_space<vmem>>, vector<256x512xf32>,
    %c0_i32_8 = arith.constant 0 : i32
    %9 = arith.cmpi eq, %arg2, %c0_i32_8 : i32
    %10 = arith.extui %9 : i1 to i32
    %c0_i32_9 = arith.constant 0 : i32
    %11 = arith.cmpi ne, %10, %c0_i32_9 : i32
    scf.if %11 {
      %c0_10 = arith.constant 0 : index
      %c0_11 = arith.constant 0 : index
      %12 = vector.load %arg7[%c0_10, %c0_11] : memref<256x512xf32, #tpu.memory_space<vmem>>, vector<256x512xf32>
      %c0_12 = arith.constant 0 : index
      %c0_13 = arith.constant 0 : index
      %13 = vector.load %arg5[%c0_12, %c0_13] : memref<1x512xf32, #tpu.memory_space<vmem>>, vector<1x512xf32>
      %14 = vector.broadcast %13 : vector<1x512xf32> to vector<256x512xf32>
      %15 = arith.addf %12, %14 : vector<256x512xf32>
      %16 = arith.truncf %15 : vector<256x512xf32> to vector<256x512xbf16>
      %c0_14 = arith.constant 0 : index
      %c0_15 = arith.constant 0 : index
      %17 = vector.load %arg6[%c0_14, %c0_15] : memref<256x512xbf16, #tpu.memory_space<vmem>>, vector<256x512xbf16>
      tpu.vector_store %arg6[%c0_14, %c0_15], %16 {strides = array<i32>} : memref<256x512xbf16, #tpu.memory_space<vmem>>, vector<256x512xbf16>,
    } else {
    }
    return
  }
  func.func @transform_0(%arg0: i32, %arg1: i32, %arg2: i32) -> (i32, i32) {
    %c0_i32 = arith.constant 0 : i32
    return %arg0, %arg2 : i32, i32
  }
  func.func @transform_1(%arg0: i32, %arg1: i32, %arg2: i32) -> (i32, i32) {
    %c0_i32 = arith.constant 0 : i32
    return %arg2, %arg1 : i32, i32
  }
  func.func @transform_2(%arg0: i32, %arg1: i32, %arg2: i32) -> (i32, i32) {
    %c0_i32 = arith.constant 0 : i32
    %c0_i32_0 = arith.constant 0 : i32
    return %c0_i32, %arg1 : i32, i32
  }
  func.func @transform_3(%arg0: i32, %arg1: i32, %arg2: i32) -> (i32, i32) {
    %c0_i32 = arith.constant 0 : i32
    return %arg0, %arg1 : i32, i32
  }
}

module attributes {stable_mosaic.version = 11 : i64} {
  func.func @_matmul_bias_kernel(%arg0: i32, %arg1: i32, %arg2: i32, %arg3: memref<160x128xbf16, #tpu.memory_space<vmem>>, %arg4: memref<128x256xbf16, #tpu.memory_space<vmem>>, %arg5: memref<1x256xf32, #tpu.memory_space<vmem>>, %arg6: memref<160x256xf32, #tpu.memory_space<vmem>>, %arg7: memref<160x256xf32, #tpu.memory_space<vmem>>) attributes {dimension_semantics = [#tpu.dimension_semantics<parallel>, #tpu.dimension_semantics<parallel>, #tpu.dimension_semantics<arbitrary>], iteration_bounds = array<i64: 1, 1, 1>, scalar_prefetch = 0 : i64, scratch_operands = 1 : i64, tpu.core_type = #tpu.core_type<tc>, window_params = [{transform_indices = @transform_0, window_bounds = array<i64: 160, 128>}, {transform_indices = @transform_1, window_bounds = array<i64: 128, 256>}, {transform_indices = @transform_2, window_bounds = array<i64: 1, 256>}, {transform_indices = @transform_3, window_bounds = array<i64: 160, 256>}]} {
    %c0_i32 = arith.constant 0 : i32
    %0 = arith.cmpi eq, %arg2, %c0_i32 : i32
    %1 = arith.extui %0 : i1 to i32
    %c0_i32_0 = arith.constant 0 : i32
    %2 = arith.cmpi ne, %1, %c0_i32_0 : i32
    scf.if %2 {
      %cst_10 = arith.constant 0.000000e+00 : f32
      %12 = vector.broadcast %cst_10 : f32 to vector<160x256xf32>
      %c0_11 = arith.constant 0 : index
      %c0_12 = arith.constant 0 : index
      %13 = vector.load %arg7[%c0_11, %c0_12] : memref<160x256xf32, #tpu.memory_space<vmem>>, vector<160x256xf32>
      tpu.vector_store %arg7[%c0_11, %c0_12], %12 {strides = array<i32>} : memref<160x256xf32, #tpu.memory_space<vmem>>, vector<160x256xf32>,
    } else {
    }
    %c0 = arith.constant 0 : index
    %c0_1 = arith.constant 0 : index
    %3 = vector.load %arg7[%c0, %c0_1] : memref<160x256xf32, #tpu.memory_space<vmem>>, vector<160x256xf32>
    %c0_2 = arith.constant 0 : index
    %c0_3 = arith.constant 0 : index
    %4 = vector.load %arg3[%c0_2, %c0_3] : memref<160x128xbf16, #tpu.memory_space<vmem>>, vector<160x128xbf16>
    %c0_4 = arith.constant 0 : index
    %c0_5 = arith.constant 0 : index
    %5 = vector.load %arg4[%c0_4, %c0_5] : memref<128x256xbf16, #tpu.memory_space<vmem>>, vector<128x256xbf16>
    %cst = arith.constant dense<0.000000e+00> : vector<160x256xf32>
    %6 = tpu.matmul %4, %5, %cst {dimension_numbers = #tpu.dot_dimension_numbers<[1], [0], [0], [1], [0, 0, 1, 1], [], []>} : vector<160x128xbf16>, vector<128x256xbf16>, vector<160x256xf32> -> vector<160x256xf32>
    %7 = arith.addf %3, %6 : vector<160x256xf32>
    %c0_6 = arith.constant 0 : index
    %c0_7 = arith.constant 0 : index
    %8 = vector.load %arg7[%c0_6, %c0_7] : memref<160x256xf32, #tpu.memory_space<vmem>>, vector<160x256xf32>
    tpu.vector_store %arg7[%c0_6, %c0_7], %7 {strides = array<i32>} : memref<160x256xf32, #tpu.memory_space<vmem>>, vector<160x256xf32>,
    %c0_i32_8 = arith.constant 0 : i32
    %9 = arith.cmpi eq, %arg2, %c0_i32_8 : i32
    %10 = arith.extui %9 : i1 to i32
    %c0_i32_9 = arith.constant 0 : i32
    %11 = arith.cmpi ne, %10, %c0_i32_9 : i32
    scf.if %11 {
      %c0_10 = arith.constant 0 : index
      %c0_11 = arith.constant 0 : index
      %12 = vector.load %arg7[%c0_10, %c0_11] : memref<160x256xf32, #tpu.memory_space<vmem>>, vector<160x256xf32>
      %c0_12 = arith.constant 0 : index
      %c0_13 = arith.constant 0 : index
      %13 = vector.load %arg5[%c0_12, %c0_13] : memref<1x256xf32, #tpu.memory_space<vmem>>, vector<1x256xf32>
      %14 = vector.broadcast %13 : vector<1x256xf32> to vector<160x256xf32>
      %15 = arith.addf %12, %14 : vector<160x256xf32>
      %c0_14 = arith.constant 0 : index
      %c0_15 = arith.constant 0 : index
      %16 = vector.load %arg6[%c0_14, %c0_15] : memref<160x256xf32, #tpu.memory_space<vmem>>, vector<160x256xf32>
      tpu.vector_store %arg6[%c0_14, %c0_15], %15 {strides = array<i32>} : memref<160x256xf32, #tpu.memory_space<vmem>>, vector<160x256xf32>,
    } else {
    }
    return
  }
  func.func @transform_0(%arg0: i32, %arg1: i32, %arg2: i32) -> (i32, i32) {
    %c0_i32 = arith.constant 0 : i32
    return %arg0, %arg2 : i32, i32
  }
  func.func @transform_1(%arg0: i32, %arg1: i32, %arg2: i32) -> (i32, i32) {
    %c0_i32 = arith.constant 0 : i32
    return %arg2, %arg1 : i32, i32
  }
  func.func @transform_2(%arg0: i32, %arg1: i32, %arg2: i32) -> (i32, i32) {
    %c0_i32 = arith.constant 0 : i32
    %c0_i32_0 = arith.constant 0 : i32
    return %c0_i32, %arg1 : i32, i32
  }
  func.func @transform_3(%arg0: i32, %arg1: i32, %arg2: i32) -> (i32, i32) {
    %c0_i32 = arith.constant 0 : i32
    return %arg0, %arg1 : i32, i32
  }
}

module attributes {stable_mosaic.version = 11 : i64} {
  func.func @_lstm_recurrence_kernel(%arg0: i32, %arg1: i32, %arg2: memref<16x8x512xbf16, #tpu.memory_space<vmem>>, %arg3: memref<8x128xf32, #tpu.memory_space<vmem>>, %arg4: memref<8x128xf32, #tpu.memory_space<vmem>>, %arg5: memref<128x512xbf16, #tpu.memory_space<any>>, %arg6: memref<16x8x128xbf16, #tpu.memory_space<vmem>>, %arg7: memref<8x128xf32, #tpu.memory_space<vmem>>, %arg8: memref<8x128xf32, #tpu.memory_space<vmem>>, %arg9: memref<8x128xf32, #tpu.memory_space<vmem>>, %arg10: memref<8x128xf32, #tpu.memory_space<vmem>>, %arg11: memref<128x512xbf16, #tpu.memory_space<vmem>>, %arg12: memref<!tpu.dma_semaphore, #tpu.memory_space<semaphore_mem>>) attributes {dimension_semantics = [#tpu.dimension_semantics<parallel>, #tpu.dimension_semantics<arbitrary>], iteration_bounds = array<i64: 1, 2>, scalar_prefetch = 0 : i64, scratch_operands = 4 : i64, tpu.core_type = #tpu.core_type<tc>, window_params = [{transform_indices = @transform_0, window_bounds = array<i64: 16, 8, 512>}, {transform_indices = @transform_1, window_bounds = array<i64: 8, 128>}, {transform_indices = @transform_2, window_bounds = array<i64: 8, 128>}, {}, {transform_indices = @transform_4, window_bounds = array<i64: 16, 8, 128>}, {transform_indices = @transform_5, window_bounds = array<i64: 8, 128>}, {transform_indices = @transform_6, window_bounds = array<i64: 8, 128>}]} {
    %c0_i32 = arith.constant 0 : i32
    %0 = arith.cmpi eq, %arg1, %c0_i32 : i32
    %1 = arith.extui %0 : i1 to i32
    %c0_i32_0 = arith.constant 0 : i32
    %2 = arith.cmpi ne, %1, %c0_i32_0 : i32
    scf.if %2 {
      %c0_243 = arith.constant 0 : index
      %c0_244 = arith.constant 0 : index
      %711 = vector.load %arg3[%c0_243, %c0_244] : memref<8x128xf32, #tpu.memory_space<vmem>>, vector<8x128xf32>
      %c0_245 = arith.constant 0 : index
      %c0_246 = arith.constant 0 : index
      %712 = vector.load %arg9[%c0_245, %c0_246] : memref<8x128xf32, #tpu.memory_space<vmem>>, vector<8x128xf32>
      tpu.vector_store %arg9[%c0_245, %c0_246], %711 {strides = array<i32>} : memref<8x128xf32, #tpu.memory_space<vmem>>, vector<8x128xf32>,
      %c0_247 = arith.constant 0 : index
      %c0_248 = arith.constant 0 : index
      %713 = vector.load %arg4[%c0_247, %c0_248] : memref<8x128xf32, #tpu.memory_space<vmem>>, vector<8x128xf32>
      %c0_249 = arith.constant 0 : index
      %c0_250 = arith.constant 0 : index
      %714 = vector.load %arg10[%c0_249, %c0_250] : memref<8x128xf32, #tpu.memory_space<vmem>>, vector<8x128xf32>
      tpu.vector_store %arg10[%c0_249, %c0_250], %713 {strides = array<i32>} : memref<8x128xf32, #tpu.memory_space<vmem>>, vector<8x128xf32>,
      tpu.enqueue_dma source(%arg5 : memref<128x512xbf16, #tpu.memory_space<any>>) target(%arg11 : memref<128x512xbf16, #tpu.memory_space<vmem>>) target_semaphore(%arg12 : memref<!tpu.dma_semaphore, #tpu.memory_space<semaphore_mem>>)
      tpu.wait_dma2 semaphore(%arg12 : memref<!tpu.dma_semaphore, #tpu.memory_space<semaphore_mem>>) src(%arg5 : memref<128x512xbf16, #tpu.memory_space<any>>) dst(%arg11 : memref<128x512xbf16, #tpu.memory_space<vmem>>)
    } else {
    }
    %c0 = arith.constant 0 : index
    %c0_1 = arith.constant 0 : index
    %3 = vector.load %arg11[%c0, %c0_1] : memref<128x512xbf16, #tpu.memory_space<vmem>>, vector<128x512xbf16>
    %c0_i32_2 = arith.constant 0 : i32
    %c0_3 = arith.constant 0 : index
    %c0_4 = arith.constant 0 : index
    %4 = vector.load %arg9[%c0_3, %c0_4] : memref<8x128xf32, #tpu.memory_space<vmem>>, vector<8x128xf32>
    %c0_5 = arith.constant 0 : index
    %c0_6 = arith.constant 0 : index
    %5 = vector.load %arg10[%c0_5, %c0_6] : memref<8x128xf32, #tpu.memory_space<vmem>>, vector<8x128xf32>
    %6 = arith.index_cast %c0_i32_2 : i32 to index
    %c0_7 = arith.constant 0 : index
    %c0_8 = arith.constant 0 : index
    %7 = vector.load %arg2[%6, %c0_7, %c0_8] : memref<16x8x512xbf16, #tpu.memory_space<vmem>>, vector<1x8x512xbf16>
    %8 = vector.shape_cast %7 : vector<1x8x512xbf16> to vector<8x512xbf16>
    %9 = arith.extf %8 : vector<8x512xbf16> to vector<8x512xf32>
    %10 = arith.truncf %4 : vector<8x128xf32> to vector<8x128xbf16>
    %cst = arith.constant dense<0.000000e+00> : vector<8x512xf32>
    %11 = tpu.matmul %10, %3, %cst {dimension_numbers = #tpu.dot_dimension_numbers<[1], [0], [0], [1], [0, 0, 1, 1], [], []>} : vector<8x128xbf16>, vector<128x512xbf16>, vector<8x512xf32> -> vector<8x512xf32>
    %12 = arith.addf %9, %11 : vector<8x512xf32>
    %13 = vector.extract_strided_slice %12 {offsets = [0, 0], sizes = [8, 128], strides = [1, 1]} : vector<8x512xf32> to vector<8x128xf32>
    %14 = arith.negf %13 : vector<8x128xf32>
    %15 = math.exp %14 : vector<8x128xf32>
    %cst_9 = arith.constant 1.000000e+00 : f32
    %16 = vector.broadcast %cst_9 : f32 to vector<8x128xf32>
    %17 = arith.addf %16, %15 : vector<8x128xf32>
    %18 = arith.divf %16, %17 : vector<8x128xf32>
    %19 = vector.extract_strided_slice %12 {offsets = [0, 128], sizes = [8, 128], strides = [1, 1]} : vector<8x512xf32> to vector<8x128xf32>
    %20 = arith.negf %19 : vector<8x128xf32>
    %21 = math.exp %20 : vector<8x128xf32>
    %cst_10 = arith.constant 1.000000e+00 : f32
    %22 = vector.broadcast %cst_10 : f32 to vector<8x128xf32>
    %23 = arith.addf %22, %21 : vector<8x128xf32>
    %24 = arith.divf %22, %23 : vector<8x128xf32>
    %25 = vector.extract_strided_slice %12 {offsets = [0, 256], sizes = [8, 128], strides = [1, 1]} : vector<8x512xf32> to vector<8x128xf32>
    %26 = math.tanh %25 : vector<8x128xf32>
    %27 = vector.extract_strided_slice %12 {offsets = [0, 384], sizes = [8, 128], strides = [1, 1]} : vector<8x512xf32> to vector<8x128xf32>
    %28 = arith.negf %27 : vector<8x128xf32>
    %29 = math.exp %28 : vector<8x128xf32>
    %cst_11 = arith.constant 1.000000e+00 : f32
    %30 = vector.broadcast %cst_11 : f32 to vector<8x128xf32>
    %31 = arith.addf %30, %29 : vector<8x128xf32>
    %32 = arith.divf %30, %31 : vector<8x128xf32>
    %33 = arith.mulf %24, %5 : vector<8x128xf32>
    %34 = arith.mulf %18, %26 : vector<8x128xf32>
    %35 = arith.addf %33, %34 : vector<8x128xf32>
    %36 = math.tanh %35 : vector<8x128xf32>
    %37 = arith.mulf %32, %36 : vector<8x128xf32>
    %c16_i32 = arith.constant 16 : i32
    %38 = arith.muli %arg1, %c16_i32 : i32
    %39 = arith.addi %38, %c0_i32_2 : i32
    %c20_i32 = arith.constant 20 : i32
    %40 = arith.cmpi slt, %39, %c20_i32 : i32
    %41 = arith.extui %40 : i1 to i32
    %c0_i32_12 = arith.constant 0 : i32
    %42 = arith.cmpi ne, %41, %c0_i32_12 : i32
    scf.if %42 {
      %c0_243 = arith.constant 0 : index
      %c0_244 = arith.constant 0 : index
      %711 = vector.load %arg10[%c0_243, %c0_244] : memref<8x128xf32, #tpu.memory_space<vmem>>, vector<8x128xf32>
      tpu.vector_store %arg10[%c0_243, %c0_244], %35 {strides = array<i32>} : memref<8x128xf32, #tpu.memory_space<vmem>>, vector<8x128xf32>,
      %c0_245 = arith.constant 0 : index
      %c0_246 = arith.constant 0 : index
      %712 = vector.load %arg9[%c0_245, %c0_246] : memref<8x128xf32, #tpu.memory_space<vmem>>, vector<8x128xf32>
      tpu.vector_store %arg9[%c0_245, %c0_246], %37 {strides = array<i32>} : memref<8x128xf32, #tpu.memory_space<vmem>>, vector<8x128xf32>,
    } else {
    }
    %43 = arith.truncf %37 : vector<8x128xf32> to vector<8x128xbf16>
    %44 = arith.index_cast %c0_i32_2 : i32 to index
    %c0_13 = arith.constant 0 : index
    %c0_14 = arith.constant 0 : index
    %45 = vector.load %arg6[%44, %c0_13, %c0_14] : memref<16x8x128xbf16, #tpu.memory_space<vmem>>, vector<1x8x128xbf16>
    %46 = vector.shape_cast %45 : vector<1x8x128xbf16> to vector<8x128xbf16>
    %47 = vector.shape_cast %43 : vector<8x128xbf16> to vector<1x8x128xbf16>
    tpu.vector_store %arg6[%44, %c0_13, %c0_14], %47 {strides = array<i32>} : memref<16x8x128xbf16, #tpu.memory_space<vmem>>, vector<1x8x128xbf16>,
    %c1_i32 = arith.constant 1 : i32
    %c0_15 = arith.constant 0 : index
    %c0_16 = arith.constant 0 : index
    %48 = vector.load %arg9[%c0_15, %c0_16] : memref<8x128xf32, #tpu.memory_space<vmem>>, vector<8x128xf32>
    %c0_17 = arith.constant 0 : index
    %c0_18 = arith.constant 0 : index
    %49 = vector.load %arg10[%c0_17, %c0_18] : memref<8x128xf32, #tpu.memory_space<vmem>>, vector<8x128xf32>
    %50 = arith.index_cast %c1_i32 : i32 to index
    %c0_19 = arith.constant 0 : index
    %c0_20 = arith.constant 0 : index
    %51 = vector.load %arg2[%50, %c0_19, %c0_20] : memref<16x8x512xbf16, #tpu.memory_space<vmem>>, vector<1x8x512xbf16>
    %52 = vector.shape_cast %51 : vector<1x8x512xbf16> to vector<8x512xbf16>
    %53 = arith.extf %52 : vector<8x512xbf16> to vector<8x512xf32>
    %54 = arith.truncf %48 : vector<8x128xf32> to vector<8x128xbf16>
    %cst_21 = arith.constant dense<0.000000e+00> : vector<8x512xf32>
    %55 = tpu.matmul %54, %3, %cst_21 {dimension_numbers = #tpu.dot_dimension_numbers<[1], [0], [0], [1], [0, 0, 1, 1], [], []>} : vector<8x128xbf16>, vector<128x512xbf16>, vector<8x512xf32> -> vector<8x512xf32>
    %56 = arith.addf %53, %55 : vector<8x512xf32>
    %57 = vector.extract_strided_slice %56 {offsets = [0, 0], sizes = [8, 128], strides = [1, 1]} : vector<8x512xf32> to vector<8x128xf32>
    %58 = arith.negf %57 : vector<8x128xf32>
    %59 = math.exp %58 : vector<8x128xf32>
    %cst_22 = arith.constant 1.000000e+00 : f32
    %60 = vector.broadcast %cst_22 : f32 to vector<8x128xf32>
    %61 = arith.addf %60, %59 : vector<8x128xf32>
    %62 = arith.divf %60, %61 : vector<8x128xf32>
    %63 = vector.extract_strided_slice %56 {offsets = [0, 128], sizes = [8, 128], strides = [1, 1]} : vector<8x512xf32> to vector<8x128xf32>
    %64 = arith.negf %63 : vector<8x128xf32>
    %65 = math.exp %64 : vector<8x128xf32>
    %cst_23 = arith.constant 1.000000e+00 : f32
    %66 = vector.broadcast %cst_23 : f32 to vector<8x128xf32>
    %67 = arith.addf %66, %65 : vector<8x128xf32>
    %68 = arith.divf %66, %67 : vector<8x128xf32>
    %69 = vector.extract_strided_slice %56 {offsets = [0, 256], sizes = [8, 128], strides = [1, 1]} : vector<8x512xf32> to vector<8x128xf32>
    %70 = math.tanh %69 : vector<8x128xf32>
    %71 = vector.extract_strided_slice %56 {offsets = [0, 384], sizes = [8, 128], strides = [1, 1]} : vector<8x512xf32> to vector<8x128xf32>
    %72 = arith.negf %71 : vector<8x128xf32>
    %73 = math.exp %72 : vector<8x128xf32>
    %cst_24 = arith.constant 1.000000e+00 : f32
    %74 = vector.broadcast %cst_24 : f32 to vector<8x128xf32>
    %75 = arith.addf %74, %73 : vector<8x128xf32>
    %76 = arith.divf %74, %75 : vector<8x128xf32>
    %77 = arith.mulf %68, %49 : vector<8x128xf32>
    %78 = arith.mulf %62, %70 : vector<8x128xf32>
    %79 = arith.addf %77, %78 : vector<8x128xf32>
    %80 = math.tanh %79 : vector<8x128xf32>
    %81 = arith.mulf %76, %80 : vector<8x128xf32>
    %c16_i32_25 = arith.constant 16 : i32
    %82 = arith.muli %arg1, %c16_i32_25 : i32
    %83 = arith.addi %82, %c1_i32 : i32
    %c20_i32_26 = arith.constant 20 : i32
    %84 = arith.cmpi slt, %83, %c20_i32_26 : i32
    %85 = arith.extui %84 : i1 to i32
    %c0_i32_27 = arith.constant 0 : i32
    %86 = arith.cmpi ne, %85, %c0_i32_27 : i32
    scf.if %86 {
      %c0_243 = arith.constant 0 : index
      %c0_244 = arith.constant 0 : index
      %711 = vector.load %arg10[%c0_243, %c0_244] : memref<8x128xf32, #tpu.memory_space<vmem>>, vector<8x128xf32>
      tpu.vector_store %arg10[%c0_243, %c0_244], %79 {strides = array<i32>} : memref<8x128xf32, #tpu.memory_space<vmem>>, vector<8x128xf32>,
      %c0_245 = arith.constant 0 : index
      %c0_246 = arith.constant 0 : index
      %712 = vector.load %arg9[%c0_245, %c0_246] : memref<8x128xf32, #tpu.memory_space<vmem>>, vector<8x128xf32>
      tpu.vector_store %arg9[%c0_245, %c0_246], %81 {strides = array<i32>} : memref<8x128xf32, #tpu.memory_space<vmem>>, vector<8x128xf32>,
    } else {
    }
    %87 = arith.truncf %81 : vector<8x128xf32> to vector<8x128xbf16>
    %88 = arith.index_cast %c1_i32 : i32 to index
    %c0_28 = arith.constant 0 : index
    %c0_29 = arith.constant 0 : index
    %89 = vector.load %arg6[%88, %c0_28, %c0_29] : memref<16x8x128xbf16, #tpu.memory_space<vmem>>, vector<1x8x128xbf16>
    %90 = vector.shape_cast %89 : vector<1x8x128xbf16> to vector<8x128xbf16>
    %91 = vector.shape_cast %87 : vector<8x128xbf16> to vector<1x8x128xbf16>
    tpu.vector_store %arg6[%88, %c0_28, %c0_29], %91 {strides = array<i32>} : memref<16x8x128xbf16, #tpu.memory_space<vmem>>, vector<1x8x128xbf16>,
    %c2_i32 = arith.constant 2 : i32
    %c0_30 = arith.constant 0 : index
    %c0_31 = arith.constant 0 : index
    %92 = vector.load %arg9[%c0_30, %c0_31] : memref<8x128xf32, #tpu.memory_space<vmem>>, vector<8x128xf32>
    %c0_32 = arith.constant 0 : index
    %c0_33 = arith.constant 0 : index
    %93 = vector.load %arg10[%c0_32, %c0_33] : memref<8x128xf32, #tpu.memory_space<vmem>>, vector<8x128xf32>
    %94 = arith.index_cast %c2_i32 : i32 to index
    %c0_34 = arith.constant 0 : index
    %c0_35 = arith.constant 0 : index
    %95 = vector.load %arg2[%94, %c0_34, %c0_35] : memref<16x8x512xbf16, #tpu.memory_space<vmem>>, vector<1x8x512xbf16>
    %96 = vector.shape_cast %95 : vector<1x8x512xbf16> to vector<8x512xbf16>
    %97 = arith.extf %96 : vector<8x512xbf16> to vector<8x512xf32>
    %98 = arith.truncf %92 : vector<8x128xf32> to vector<8x128xbf16>
    %cst_36 = arith.constant dense<0.000000e+00> : vector<8x512xf32>
    %99 = tpu.matmul %98, %3, %cst_36 {dimension_numbers = #tpu.dot_dimension_numbers<[1], [0], [0], [1], [0, 0, 1, 1], [], []>} : vector<8x128xbf16>, vector<128x512xbf16>, vector<8x512xf32> -> vector<8x512xf32>
    %100 = arith.addf %97, %99 : vector<8x512xf32>
    %101 = vector.extract_strided_slice %100 {offsets = [0, 0], sizes = [8, 128], strides = [1, 1]} : vector<8x512xf32> to vector<8x128xf32>
    %102 = arith.negf %101 : vector<8x128xf32>
    %103 = math.exp %102 : vector<8x128xf32>
    %cst_37 = arith.constant 1.000000e+00 : f32
    %104 = vector.broadcast %cst_37 : f32 to vector<8x128xf32>
    %105 = arith.addf %104, %103 : vector<8x128xf32>
    %106 = arith.divf %104, %105 : vector<8x128xf32>
    %107 = vector.extract_strided_slice %100 {offsets = [0, 128], sizes = [8, 128], strides = [1, 1]} : vector<8x512xf32> to vector<8x128xf32>
    %108 = arith.negf %107 : vector<8x128xf32>
    %109 = math.exp %108 : vector<8x128xf32>
    %cst_38 = arith.constant 1.000000e+00 : f32
    %110 = vector.broadcast %cst_38 : f32 to vector<8x128xf32>
    %111 = arith.addf %110, %109 : vector<8x128xf32>
    %112 = arith.divf %110, %111 : vector<8x128xf32>
    %113 = vector.extract_strided_slice %100 {offsets = [0, 256], sizes = [8, 128], strides = [1, 1]} : vector<8x512xf32> to vector<8x128xf32>
    %114 = math.tanh %113 : vector<8x128xf32>
    %115 = vector.extract_strided_slice %100 {offsets = [0, 384], sizes = [8, 128], strides = [1, 1]} : vector<8x512xf32> to vector<8x128xf32>
    %116 = arith.negf %115 : vector<8x128xf32>
    %117 = math.exp %116 : vector<8x128xf32>
    %cst_39 = arith.constant 1.000000e+00 : f32
    %118 = vector.broadcast %cst_39 : f32 to vector<8x128xf32>
    %119 = arith.addf %118, %117 : vector<8x128xf32>
    %120 = arith.divf %118, %119 : vector<8x128xf32>
    %121 = arith.mulf %112, %93 : vector<8x128xf32>
    %122 = arith.mulf %106, %114 : vector<8x128xf32>
    %123 = arith.addf %121, %122 : vector<8x128xf32>
    %124 = math.tanh %123 : vector<8x128xf32>
    %125 = arith.mulf %120, %124 : vector<8x128xf32>
    %c16_i32_40 = arith.constant 16 : i32
    %126 = arith.muli %arg1, %c16_i32_40 : i32
    %127 = arith.addi %126, %c2_i32 : i32
    %c20_i32_41 = arith.constant 20 : i32
    %128 = arith.cmpi slt, %127, %c20_i32_41 : i32
    %129 = arith.extui %128 : i1 to i32
    %c0_i32_42 = arith.constant 0 : i32
    %130 = arith.cmpi ne, %129, %c0_i32_42 : i32
    scf.if %130 {
      %c0_243 = arith.constant 0 : index
      %c0_244 = arith.constant 0 : index
      %711 = vector.load %arg10[%c0_243, %c0_244] : memref<8x128xf32, #tpu.memory_space<vmem>>, vector<8x128xf32>
      tpu.vector_store %arg10[%c0_243, %c0_244], %123 {strides = array<i32>} : memref<8x128xf32, #tpu.memory_space<vmem>>, vector<8x128xf32>,
      %c0_245 = arith.constant 0 : index
      %c0_246 = arith.constant 0 : index
      %712 = vector.load %arg9[%c0_245, %c0_246] : memref<8x128xf32, #tpu.memory_space<vmem>>, vector<8x128xf32>
      tpu.vector_store %arg9[%c0_245, %c0_246], %125 {strides = array<i32>} : memref<8x128xf32, #tpu.memory_space<vmem>>, vector<8x128xf32>,
    } else {
    }
    %131 = arith.truncf %125 : vector<8x128xf32> to vector<8x128xbf16>
    %132 = arith.index_cast %c2_i32 : i32 to index
    %c0_43 = arith.constant 0 : index
    %c0_44 = arith.constant 0 : index
    %133 = vector.load %arg6[%132, %c0_43, %c0_44] : memref<16x8x128xbf16, #tpu.memory_space<vmem>>, vector<1x8x128xbf16>
    %134 = vector.shape_cast %133 : vector<1x8x128xbf16> to vector<8x128xbf16>
    %135 = vector.shape_cast %131 : vector<8x128xbf16> to vector<1x8x128xbf16>
    tpu.vector_store %arg6[%132, %c0_43, %c0_44], %135 {strides = array<i32>} : memref<16x8x128xbf16, #tpu.memory_space<vmem>>, vector<1x8x128xbf16>,
    %c3_i32 = arith.constant 3 : i32
    %c0_45 = arith.constant 0 : index
    %c0_46 = arith.constant 0 : index
    %136 = vector.load %arg9[%c0_45, %c0_46] : memref<8x128xf32, #tpu.memory_space<vmem>>, vector<8x128xf32>
    %c0_47 = arith.constant 0 : index
    %c0_48 = arith.constant 0 : index
    %137 = vector.load %arg10[%c0_47, %c0_48] : memref<8x128xf32, #tpu.memory_space<vmem>>, vector<8x128xf32>
    %138 = arith.index_cast %c3_i32 : i32 to index
    %c0_49 = arith.constant 0 : index
    %c0_50 = arith.constant 0 : index
    %139 = vector.load %arg2[%138, %c0_49, %c0_50] : memref<16x8x512xbf16, #tpu.memory_space<vmem>>, vector<1x8x512xbf16>
    %140 = vector.shape_cast %139 : vector<1x8x512xbf16> to vector<8x512xbf16>
    %141 = arith.extf %140 : vector<8x512xbf16> to vector<8x512xf32>
    %142 = arith.truncf %136 : vector<8x128xf32> to vector<8x128xbf16>
    %cst_51 = arith.constant dense<0.000000e+00> : vector<8x512xf32>
    %143 = tpu.matmul %142, %3, %cst_51 {dimension_numbers = #tpu.dot_dimension_numbers<[1], [0], [0], [1], [0, 0, 1, 1], [], []>} : vector<8x128xbf16>, vector<128x512xbf16>, vector<8x512xf32> -> vector<8x512xf32>
    %144 = arith.addf %141, %143 : vector<8x512xf32>
    %145 = vector.extract_strided_slice %144 {offsets = [0, 0], sizes = [8, 128], strides = [1, 1]} : vector<8x512xf32> to vector<8x128xf32>
    %146 = arith.negf %145 : vector<8x128xf32>
    %147 = math.exp %146 : vector<8x128xf32>
    %cst_52 = arith.constant 1.000000e+00 : f32
    %148 = vector.broadcast %cst_52 : f32 to vector<8x128xf32>
    %149 = arith.addf %148, %147 : vector<8x128xf32>
    %150 = arith.divf %148, %149 : vector<8x128xf32>
    %151 = vector.extract_strided_slice %144 {offsets = [0, 128], sizes = [8, 128], strides = [1, 1]} : vector<8x512xf32> to vector<8x128xf32>
    %152 = arith.negf %151 : vector<8x128xf32>
    %153 = math.exp %152 : vector<8x128xf32>
    %cst_53 = arith.constant 1.000000e+00 : f32
    %154 = vector.broadcast %cst_53 : f32 to vector<8x128xf32>
    %155 = arith.addf %154, %153 : vector<8x128xf32>
    %156 = arith.divf %154, %155 : vector<8x128xf32>
    %157 = vector.extract_strided_slice %144 {offsets = [0, 256], sizes = [8, 128], strides = [1, 1]} : vector<8x512xf32> to vector<8x128xf32>
    %158 = math.tanh %157 : vector<8x128xf32>
    %159 = vector.extract_strided_slice %144 {offsets = [0, 384], sizes = [8, 128], strides = [1, 1]} : vector<8x512xf32> to vector<8x128xf32>
    %160 = arith.negf %159 : vector<8x128xf32>
    %161 = math.exp %160 : vector<8x128xf32>
    %cst_54 = arith.constant 1.000000e+00 : f32
    %162 = vector.broadcast %cst_54 : f32 to vector<8x128xf32>
    %163 = arith.addf %162, %161 : vector<8x128xf32>
    %164 = arith.divf %162, %163 : vector<8x128xf32>
    %165 = arith.mulf %156, %137 : vector<8x128xf32>
    %166 = arith.mulf %150, %158 : vector<8x128xf32>
    %167 = arith.addf %165, %166 : vector<8x128xf32>
    %168 = math.tanh %167 : vector<8x128xf32>
    %169 = arith.mulf %164, %168 : vector<8x128xf32>
    %c16_i32_55 = arith.constant 16 : i32
    %170 = arith.muli %arg1, %c16_i32_55 : i32
    %171 = arith.addi %170, %c3_i32 : i32
    %c20_i32_56 = arith.constant 20 : i32
    %172 = arith.cmpi slt, %171, %c20_i32_56 : i32
    %173 = arith.extui %172 : i1 to i32
    %c0_i32_57 = arith.constant 0 : i32
    %174 = arith.cmpi ne, %173, %c0_i32_57 : i32
    scf.if %174 {
      %c0_243 = arith.constant 0 : index
      %c0_244 = arith.constant 0 : index
      %711 = vector.load %arg10[%c0_243, %c0_244] : memref<8x128xf32, #tpu.memory_space<vmem>>, vector<8x128xf32>
      tpu.vector_store %arg10[%c0_243, %c0_244], %167 {strides = array<i32>} : memref<8x128xf32, #tpu.memory_space<vmem>>, vector<8x128xf32>,
      %c0_245 = arith.constant 0 : index
      %c0_246 = arith.constant 0 : index
      %712 = vector.load %arg9[%c0_245, %c0_246] : memref<8x128xf32, #tpu.memory_space<vmem>>, vector<8x128xf32>
      tpu.vector_store %arg9[%c0_245, %c0_246], %169 {strides = array<i32>} : memref<8x128xf32, #tpu.memory_space<vmem>>, vector<8x128xf32>,
    } else {
    }
    %175 = arith.truncf %169 : vector<8x128xf32> to vector<8x128xbf16>
    %176 = arith.index_cast %c3_i32 : i32 to index
    %c0_58 = arith.constant 0 : index
    %c0_59 = arith.constant 0 : index
    %177 = vector.load %arg6[%176, %c0_58, %c0_59] : memref<16x8x128xbf16, #tpu.memory_space<vmem>>, vector<1x8x128xbf16>
    %178 = vector.shape_cast %177 : vector<1x8x128xbf16> to vector<8x128xbf16>
    %179 = vector.shape_cast %175 : vector<8x128xbf16> to vector<1x8x128xbf16>
    tpu.vector_store %arg6[%176, %c0_58, %c0_59], %179 {strides = array<i32>} : memref<16x8x128xbf16, #tpu.memory_space<vmem>>, vector<1x8x128xbf16>,
    %c4_i32 = arith.constant 4 : i32
    %c0_60 = arith.constant 0 : index
    %c0_61 = arith.constant 0 : index
    %180 = vector.load %arg9[%c0_60, %c0_61] : memref<8x128xf32, #tpu.memory_space<vmem>>, vector<8x128xf32>
    %c0_62 = arith.constant 0 : index
    %c0_63 = arith.constant 0 : index
    %181 = vector.load %arg10[%c0_62, %c0_63] : memref<8x128xf32, #tpu.memory_space<vmem>>, vector<8x128xf32>
    %182 = arith.index_cast %c4_i32 : i32 to index
    %c0_64 = arith.constant 0 : index
    %c0_65 = arith.constant 0 : index
    %183 = vector.load %arg2[%182, %c0_64, %c0_65] : memref<16x8x512xbf16, #tpu.memory_space<vmem>>, vector<1x8x512xbf16>
    %184 = vector.shape_cast %183 : vector<1x8x512xbf16> to vector<8x512xbf16>
    %185 = arith.extf %184 : vector<8x512xbf16> to vector<8x512xf32>
    %186 = arith.truncf %180 : vector<8x128xf32> to vector<8x128xbf16>
    %cst_66 = arith.constant dense<0.000000e+00> : vector<8x512xf32>
    %187 = tpu.matmul %186, %3, %cst_66 {dimension_numbers = #tpu.dot_dimension_numbers<[1], [0], [0], [1], [0, 0, 1, 1], [], []>} : vector<8x128xbf16>, vector<128x512xbf16>, vector<8x512xf32> -> vector<8x512xf32>
    %188 = arith.addf %185, %187 : vector<8x512xf32>
    %189 = vector.extract_strided_slice %188 {offsets = [0, 0], sizes = [8, 128], strides = [1, 1]} : vector<8x512xf32> to vector<8x128xf32>
    %190 = arith.negf %189 : vector<8x128xf32>
    %191 = math.exp %190 : vector<8x128xf32>
    %cst_67 = arith.constant 1.000000e+00 : f32
    %192 = vector.broadcast %cst_67 : f32 to vector<8x128xf32>
    %193 = arith.addf %192, %191 : vector<8x128xf32>
    %194 = arith.divf %192, %193 : vector<8x128xf32>
    %195 = vector.extract_strided_slice %188 {offsets = [0, 128], sizes = [8, 128], strides = [1, 1]} : vector<8x512xf32> to vector<8x128xf32>
    %196 = arith.negf %195 : vector<8x128xf32>
    %197 = math.exp %196 : vector<8x128xf32>
    %cst_68 = arith.constant 1.000000e+00 : f32
    %198 = vector.broadcast %cst_68 : f32 to vector<8x128xf32>
    %199 = arith.addf %198, %197 : vector<8x128xf32>
    %200 = arith.divf %198, %199 : vector<8x128xf32>
    %201 = vector.extract_strided_slice %188 {offsets = [0, 256], sizes = [8, 128], strides = [1, 1]} : vector<8x512xf32> to vector<8x128xf32>
    %202 = math.tanh %201 : vector<8x128xf32>
    %203 = vector.extract_strided_slice %188 {offsets = [0, 384], sizes = [8, 128], strides = [1, 1]} : vector<8x512xf32> to vector<8x128xf32>
    %204 = arith.negf %203 : vector<8x128xf32>
    %205 = math.exp %204 : vector<8x128xf32>
    %cst_69 = arith.constant 1.000000e+00 : f32
    %206 = vector.broadcast %cst_69 : f32 to vector<8x128xf32>
    %207 = arith.addf %206, %205 : vector<8x128xf32>
    %208 = arith.divf %206, %207 : vector<8x128xf32>
    %209 = arith.mulf %200, %181 : vector<8x128xf32>
    %210 = arith.mulf %194, %202 : vector<8x128xf32>
    %211 = arith.addf %209, %210 : vector<8x128xf32>
    %212 = math.tanh %211 : vector<8x128xf32>
    %213 = arith.mulf %208, %212 : vector<8x128xf32>
    %c16_i32_70 = arith.constant 16 : i32
    %214 = arith.muli %arg1, %c16_i32_70 : i32
    %215 = arith.addi %214, %c4_i32 : i32
    %c20_i32_71 = arith.constant 20 : i32
    %216 = arith.cmpi slt, %215, %c20_i32_71 : i32
    %217 = arith.extui %216 : i1 to i32
    %c0_i32_72 = arith.constant 0 : i32
    %218 = arith.cmpi ne, %217, %c0_i32_72 : i32
    scf.if %218 {
      %c0_243 = arith.constant 0 : index
      %c0_244 = arith.constant 0 : index
      %711 = vector.load %arg10[%c0_243, %c0_244] : memref<8x128xf32, #tpu.memory_space<vmem>>, vector<8x128xf32>
      tpu.vector_store %arg10[%c0_243, %c0_244], %211 {strides = array<i32>} : memref<8x128xf32, #tpu.memory_space<vmem>>, vector<8x128xf32>,
      %c0_245 = arith.constant 0 : index
      %c0_246 = arith.constant 0 : index
      %712 = vector.load %arg9[%c0_245, %c0_246] : memref<8x128xf32, #tpu.memory_space<vmem>>, vector<8x128xf32>
      tpu.vector_store %arg9[%c0_245, %c0_246], %213 {strides = array<i32>} : memref<8x128xf32, #tpu.memory_space<vmem>>, vector<8x128xf32>,
    } else {
    }
    %219 = arith.truncf %213 : vector<8x128xf32> to vector<8x128xbf16>
    %220 = arith.index_cast %c4_i32 : i32 to index
    %c0_73 = arith.constant 0 : index
    %c0_74 = arith.constant 0 : index
    %221 = vector.load %arg6[%220, %c0_73, %c0_74] : memref<16x8x128xbf16, #tpu.memory_space<vmem>>, vector<1x8x128xbf16>
    %222 = vector.shape_cast %221 : vector<1x8x128xbf16> to vector<8x128xbf16>
    %223 = vector.shape_cast %219 : vector<8x128xbf16> to vector<1x8x128xbf16>
    tpu.vector_store %arg6[%220, %c0_73, %c0_74], %223 {strides = array<i32>} : memref<16x8x128xbf16, #tpu.memory_space<vmem>>, vector<1x8x128xbf16>,
    %c5_i32 = arith.constant 5 : i32
    %c0_75 = arith.constant 0 : index
    %c0_76 = arith.constant 0 : index
    %224 = vector.load %arg9[%c0_75, %c0_76] : memref<8x128xf32, #tpu.memory_space<vmem>>, vector<8x128xf32>
    %c0_77 = arith.constant 0 : index
    %c0_78 = arith.constant 0 : index
    %225 = vector.load %arg10[%c0_77, %c0_78] : memref<8x128xf32, #tpu.memory_space<vmem>>, vector<8x128xf32>
    %226 = arith.index_cast %c5_i32 : i32 to index
    %c0_79 = arith.constant 0 : index
    %c0_80 = arith.constant 0 : index
    %227 = vector.load %arg2[%226, %c0_79, %c0_80] : memref<16x8x512xbf16, #tpu.memory_space<vmem>>, vector<1x8x512xbf16>
    %228 = vector.shape_cast %227 : vector<1x8x512xbf16> to vector<8x512xbf16>
    %229 = arith.extf %228 : vector<8x512xbf16> to vector<8x512xf32>
    %230 = arith.truncf %224 : vector<8x128xf32> to vector<8x128xbf16>
    %cst_81 = arith.constant dense<0.000000e+00> : vector<8x512xf32>
    %231 = tpu.matmul %230, %3, %cst_81 {dimension_numbers = #tpu.dot_dimension_numbers<[1], [0], [0], [1], [0, 0, 1, 1], [], []>} : vector<8x128xbf16>, vector<128x512xbf16>, vector<8x512xf32> -> vector<8x512xf32>
    %232 = arith.addf %229, %231 : vector<8x512xf32>
    %233 = vector.extract_strided_slice %232 {offsets = [0, 0], sizes = [8, 128], strides = [1, 1]} : vector<8x512xf32> to vector<8x128xf32>
    %234 = arith.negf %233 : vector<8x128xf32>
    %235 = math.exp %234 : vector<8x128xf32>
    %cst_82 = arith.constant 1.000000e+00 : f32
    %236 = vector.broadcast %cst_82 : f32 to vector<8x128xf32>
    %237 = arith.addf %236, %235 : vector<8x128xf32>
    %238 = arith.divf %236, %237 : vector<8x128xf32>
    %239 = vector.extract_strided_slice %232 {offsets = [0, 128], sizes = [8, 128], strides = [1, 1]} : vector<8x512xf32> to vector<8x128xf32>
    %240 = arith.negf %239 : vector<8x128xf32>
    %241 = math.exp %240 : vector<8x128xf32>
    %cst_83 = arith.constant 1.000000e+00 : f32
    %242 = vector.broadcast %cst_83 : f32 to vector<8x128xf32>
    %243 = arith.addf %242, %241 : vector<8x128xf32>
    %244 = arith.divf %242, %243 : vector<8x128xf32>
    %245 = vector.extract_strided_slice %232 {offsets = [0, 256], sizes = [8, 128], strides = [1, 1]} : vector<8x512xf32> to vector<8x128xf32>
    %246 = math.tanh %245 : vector<8x128xf32>
    %247 = vector.extract_strided_slice %232 {offsets = [0, 384], sizes = [8, 128], strides = [1, 1]} : vector<8x512xf32> to vector<8x128xf32>
    %248 = arith.negf %247 : vector<8x128xf32>
    %249 = math.exp %248 : vector<8x128xf32>
    %cst_84 = arith.constant 1.000000e+00 : f32
    %250 = vector.broadcast %cst_84 : f32 to vector<8x128xf32>
    %251 = arith.addf %250, %249 : vector<8x128xf32>
    %252 = arith.divf %250, %251 : vector<8x128xf32>
    %253 = arith.mulf %244, %225 : vector<8x128xf32>
    %254 = arith.mulf %238, %246 : vector<8x128xf32>
    %255 = arith.addf %253, %254 : vector<8x128xf32>
    %256 = math.tanh %255 : vector<8x128xf32>
    %257 = arith.mulf %252, %256 : vector<8x128xf32>
    %c16_i32_85 = arith.constant 16 : i32
    %258 = arith.muli %arg1, %c16_i32_85 : i32
    %259 = arith.addi %258, %c5_i32 : i32
    %c20_i32_86 = arith.constant 20 : i32
    %260 = arith.cmpi slt, %259, %c20_i32_86 : i32
    %261 = arith.extui %260 : i1 to i32
    %c0_i32_87 = arith.constant 0 : i32
    %262 = arith.cmpi ne, %261, %c0_i32_87 : i32
    scf.if %262 {
      %c0_243 = arith.constant 0 : index
      %c0_244 = arith.constant 0 : index
      %711 = vector.load %arg10[%c0_243, %c0_244] : memref<8x128xf32, #tpu.memory_space<vmem>>, vector<8x128xf32>
      tpu.vector_store %arg10[%c0_243, %c0_244], %255 {strides = array<i32>} : memref<8x128xf32, #tpu.memory_space<vmem>>, vector<8x128xf32>,
      %c0_245 = arith.constant 0 : index
      %c0_246 = arith.constant 0 : index
      %712 = vector.load %arg9[%c0_245, %c0_246] : memref<8x128xf32, #tpu.memory_space<vmem>>, vector<8x128xf32>
      tpu.vector_store %arg9[%c0_245, %c0_246], %257 {strides = array<i32>} : memref<8x128xf32, #tpu.memory_space<vmem>>, vector<8x128xf32>,
    } else {
    }
    %263 = arith.truncf %257 : vector<8x128xf32> to vector<8x128xbf16>
    %264 = arith.index_cast %c5_i32 : i32 to index
    %c0_88 = arith.constant 0 : index
    %c0_89 = arith.constant 0 : index
    %265 = vector.load %arg6[%264, %c0_88, %c0_89] : memref<16x8x128xbf16, #tpu.memory_space<vmem>>, vector<1x8x128xbf16>
    %266 = vector.shape_cast %265 : vector<1x8x128xbf16> to vector<8x128xbf16>
    %267 = vector.shape_cast %263 : vector<8x128xbf16> to vector<1x8x128xbf16>
    tpu.vector_store %arg6[%264, %c0_88, %c0_89], %267 {strides = array<i32>} : memref<16x8x128xbf16, #tpu.memory_space<vmem>>, vector<1x8x128xbf16>,
    %c6_i32 = arith.constant 6 : i32
    %c0_90 = arith.constant 0 : index
    %c0_91 = arith.constant 0 : index
    %268 = vector.load %arg9[%c0_90, %c0_91] : memref<8x128xf32, #tpu.memory_space<vmem>>, vector<8x128xf32>
    %c0_92 = arith.constant 0 : index
    %c0_93 = arith.constant 0 : index
    %269 = vector.load %arg10[%c0_92, %c0_93] : memref<8x128xf32, #tpu.memory_space<vmem>>, vector<8x128xf32>
    %270 = arith.index_cast %c6_i32 : i32 to index
    %c0_94 = arith.constant 0 : index
    %c0_95 = arith.constant 0 : index
    %271 = vector.load %arg2[%270, %c0_94, %c0_95] : memref<16x8x512xbf16, #tpu.memory_space<vmem>>, vector<1x8x512xbf16>
    %272 = vector.shape_cast %271 : vector<1x8x512xbf16> to vector<8x512xbf16>
    %273 = arith.extf %272 : vector<8x512xbf16> to vector<8x512xf32>
    %274 = arith.truncf %268 : vector<8x128xf32> to vector<8x128xbf16>
    %cst_96 = arith.constant dense<0.000000e+00> : vector<8x512xf32>
    %275 = tpu.matmul %274, %3, %cst_96 {dimension_numbers = #tpu.dot_dimension_numbers<[1], [0], [0], [1], [0, 0, 1, 1], [], []>} : vector<8x128xbf16>, vector<128x512xbf16>, vector<8x512xf32> -> vector<8x512xf32>
    %276 = arith.addf %273, %275 : vector<8x512xf32>
    %277 = vector.extract_strided_slice %276 {offsets = [0, 0], sizes = [8, 128], strides = [1, 1]} : vector<8x512xf32> to vector<8x128xf32>
    %278 = arith.negf %277 : vector<8x128xf32>
    %279 = math.exp %278 : vector<8x128xf32>
    %cst_97 = arith.constant 1.000000e+00 : f32
    %280 = vector.broadcast %cst_97 : f32 to vector<8x128xf32>
    %281 = arith.addf %280, %279 : vector<8x128xf32>
    %282 = arith.divf %280, %281 : vector<8x128xf32>
    %283 = vector.extract_strided_slice %276 {offsets = [0, 128], sizes = [8, 128], strides = [1, 1]} : vector<8x512xf32> to vector<8x128xf32>
    %284 = arith.negf %283 : vector<8x128xf32>
    %285 = math.exp %284 : vector<8x128xf32>
    %cst_98 = arith.constant 1.000000e+00 : f32
    %286 = vector.broadcast %cst_98 : f32 to vector<8x128xf32>
    %287 = arith.addf %286, %285 : vector<8x128xf32>
    %288 = arith.divf %286, %287 : vector<8x128xf32>
    %289 = vector.extract_strided_slice %276 {offsets = [0, 256], sizes = [8, 128], strides = [1, 1]} : vector<8x512xf32> to vector<8x128xf32>
    %290 = math.tanh %289 : vector<8x128xf32>
    %291 = vector.extract_strided_slice %276 {offsets = [0, 384], sizes = [8, 128], strides = [1, 1]} : vector<8x512xf32> to vector<8x128xf32>
    %292 = arith.negf %291 : vector<8x128xf32>
    %293 = math.exp %292 : vector<8x128xf32>
    %cst_99 = arith.constant 1.000000e+00 : f32
    %294 = vector.broadcast %cst_99 : f32 to vector<8x128xf32>
    %295 = arith.addf %294, %293 : vector<8x128xf32>
    %296 = arith.divf %294, %295 : vector<8x128xf32>
    %297 = arith.mulf %288, %269 : vector<8x128xf32>
    %298 = arith.mulf %282, %290 : vector<8x128xf32>
    %299 = arith.addf %297, %298 : vector<8x128xf32>
    %300 = math.tanh %299 : vector<8x128xf32>
    %301 = arith.mulf %296, %300 : vector<8x128xf32>
    %c16_i32_100 = arith.constant 16 : i32
    %302 = arith.muli %arg1, %c16_i32_100 : i32
    %303 = arith.addi %302, %c6_i32 : i32
    %c20_i32_101 = arith.constant 20 : i32
    %304 = arith.cmpi slt, %303, %c20_i32_101 : i32
    %305 = arith.extui %304 : i1 to i32
    %c0_i32_102 = arith.constant 0 : i32
    %306 = arith.cmpi ne, %305, %c0_i32_102 : i32
    scf.if %306 {
      %c0_243 = arith.constant 0 : index
      %c0_244 = arith.constant 0 : index
      %711 = vector.load %arg10[%c0_243, %c0_244] : memref<8x128xf32, #tpu.memory_space<vmem>>, vector<8x128xf32>
      tpu.vector_store %arg10[%c0_243, %c0_244], %299 {strides = array<i32>} : memref<8x128xf32, #tpu.memory_space<vmem>>, vector<8x128xf32>,
      %c0_245 = arith.constant 0 : index
      %c0_246 = arith.constant 0 : index
      %712 = vector.load %arg9[%c0_245, %c0_246] : memref<8x128xf32, #tpu.memory_space<vmem>>, vector<8x128xf32>
      tpu.vector_store %arg9[%c0_245, %c0_246], %301 {strides = array<i32>} : memref<8x128xf32, #tpu.memory_space<vmem>>, vector<8x128xf32>,
    } else {
    }
    %307 = arith.truncf %301 : vector<8x128xf32> to vector<8x128xbf16>
    %308 = arith.index_cast %c6_i32 : i32 to index
    %c0_103 = arith.constant 0 : index
    %c0_104 = arith.constant 0 : index
    %309 = vector.load %arg6[%308, %c0_103, %c0_104] : memref<16x8x128xbf16, #tpu.memory_space<vmem>>, vector<1x8x128xbf16>
    %310 = vector.shape_cast %309 : vector<1x8x128xbf16> to vector<8x128xbf16>
    %311 = vector.shape_cast %307 : vector<8x128xbf16> to vector<1x8x128xbf16>
    tpu.vector_store %arg6[%308, %c0_103, %c0_104], %311 {strides = array<i32>} : memref<16x8x128xbf16, #tpu.memory_space<vmem>>, vector<1x8x128xbf16>,
    %c7_i32 = arith.constant 7 : i32
    %c0_105 = arith.constant 0 : index
    %c0_106 = arith.constant 0 : index
    %312 = vector.load %arg9[%c0_105, %c0_106] : memref<8x128xf32, #tpu.memory_space<vmem>>, vector<8x128xf32>
    %c0_107 = arith.constant 0 : index
    %c0_108 = arith.constant 0 : index
    %313 = vector.load %arg10[%c0_107, %c0_108] : memref<8x128xf32, #tpu.memory_space<vmem>>, vector<8x128xf32>
    %314 = arith.index_cast %c7_i32 : i32 to index
    %c0_109 = arith.constant 0 : index
    %c0_110 = arith.constant 0 : index
    %315 = vector.load %arg2[%314, %c0_109, %c0_110] : memref<16x8x512xbf16, #tpu.memory_space<vmem>>, vector<1x8x512xbf16>
    %316 = vector.shape_cast %315 : vector<1x8x512xbf16> to vector<8x512xbf16>
    %317 = arith.extf %316 : vector<8x512xbf16> to vector<8x512xf32>
    %318 = arith.truncf %312 : vector<8x128xf32> to vector<8x128xbf16>
    %cst_111 = arith.constant dense<0.000000e+00> : vector<8x512xf32>
    %319 = tpu.matmul %318, %3, %cst_111 {dimension_numbers = #tpu.dot_dimension_numbers<[1], [0], [0], [1], [0, 0, 1, 1], [], []>} : vector<8x128xbf16>, vector<128x512xbf16>, vector<8x512xf32> -> vector<8x512xf32>
    %320 = arith.addf %317, %319 : vector<8x512xf32>
    %321 = vector.extract_strided_slice %320 {offsets = [0, 0], sizes = [8, 128], strides = [1, 1]} : vector<8x512xf32> to vector<8x128xf32>
    %322 = arith.negf %321 : vector<8x128xf32>
    %323 = math.exp %322 : vector<8x128xf32>
    %cst_112 = arith.constant 1.000000e+00 : f32
    %324 = vector.broadcast %cst_112 : f32 to vector<8x128xf32>
    %325 = arith.addf %324, %323 : vector<8x128xf32>
    %326 = arith.divf %324, %325 : vector<8x128xf32>
    %327 = vector.extract_strided_slice %320 {offsets = [0, 128], sizes = [8, 128], strides = [1, 1]} : vector<8x512xf32> to vector<8x128xf32>
    %328 = arith.negf %327 : vector<8x128xf32>
    %329 = math.exp %328 : vector<8x128xf32>
    %cst_113 = arith.constant 1.000000e+00 : f32
    %330 = vector.broadcast %cst_113 : f32 to vector<8x128xf32>
    %331 = arith.addf %330, %329 : vector<8x128xf32>
    %332 = arith.divf %330, %331 : vector<8x128xf32>
    %333 = vector.extract_strided_slice %320 {offsets = [0, 256], sizes = [8, 128], strides = [1, 1]} : vector<8x512xf32> to vector<8x128xf32>
    %334 = math.tanh %333 : vector<8x128xf32>
    %335 = vector.extract_strided_slice %320 {offsets = [0, 384], sizes = [8, 128], strides = [1, 1]} : vector<8x512xf32> to vector<8x128xf32>
    %336 = arith.negf %335 : vector<8x128xf32>
    %337 = math.exp %336 : vector<8x128xf32>
    %cst_114 = arith.constant 1.000000e+00 : f32
    %338 = vector.broadcast %cst_114 : f32 to vector<8x128xf32>
    %339 = arith.addf %338, %337 : vector<8x128xf32>
    %340 = arith.divf %338, %339 : vector<8x128xf32>
    %341 = arith.mulf %332, %313 : vector<8x128xf32>
    %342 = arith.mulf %326, %334 : vector<8x128xf32>
    %343 = arith.addf %341, %342 : vector<8x128xf32>
    %344 = math.tanh %343 : vector<8x128xf32>
    %345 = arith.mulf %340, %344 : vector<8x128xf32>
    %c16_i32_115 = arith.constant 16 : i32
    %346 = arith.muli %arg1, %c16_i32_115 : i32
    %347 = arith.addi %346, %c7_i32 : i32
    %c20_i32_116 = arith.constant 20 : i32
    %348 = arith.cmpi slt, %347, %c20_i32_116 : i32
    %349 = arith.extui %348 : i1 to i32
    %c0_i32_117 = arith.constant 0 : i32
    %350 = arith.cmpi ne, %349, %c0_i32_117 : i32
    scf.if %350 {
      %c0_243 = arith.constant 0 : index
      %c0_244 = arith.constant 0 : index
      %711 = vector.load %arg10[%c0_243, %c0_244] : memref<8x128xf32, #tpu.memory_space<vmem>>, vector<8x128xf32>
      tpu.vector_store %arg10[%c0_243, %c0_244], %343 {strides = array<i32>} : memref<8x128xf32, #tpu.memory_space<vmem>>, vector<8x128xf32>,
      %c0_245 = arith.constant 0 : index
      %c0_246 = arith.constant 0 : index
      %712 = vector.load %arg9[%c0_245, %c0_246] : memref<8x128xf32, #tpu.memory_space<vmem>>, vector<8x128xf32>
      tpu.vector_store %arg9[%c0_245, %c0_246], %345 {strides = array<i32>} : memref<8x128xf32, #tpu.memory_space<vmem>>, vector<8x128xf32>,
    } else {
    }
    %351 = arith.truncf %345 : vector<8x128xf32> to vector<8x128xbf16>
    %352 = arith.index_cast %c7_i32 : i32 to index
    %c0_118 = arith.constant 0 : index
    %c0_119 = arith.constant 0 : index
    %353 = vector.load %arg6[%352, %c0_118, %c0_119] : memref<16x8x128xbf16, #tpu.memory_space<vmem>>, vector<1x8x128xbf16>
    %354 = vector.shape_cast %353 : vector<1x8x128xbf16> to vector<8x128xbf16>
    %355 = vector.shape_cast %351 : vector<8x128xbf16> to vector<1x8x128xbf16>
    tpu.vector_store %arg6[%352, %c0_118, %c0_119], %355 {strides = array<i32>} : memref<16x8x128xbf16, #tpu.memory_space<vmem>>, vector<1x8x128xbf16>,
    %c8_i32 = arith.constant 8 : i32
    %c0_120 = arith.constant 0 : index
    %c0_121 = arith.constant 0 : index
    %356 = vector.load %arg9[%c0_120, %c0_121] : memref<8x128xf32, #tpu.memory_space<vmem>>, vector<8x128xf32>
    %c0_122 = arith.constant 0 : index
    %c0_123 = arith.constant 0 : index
    %357 = vector.load %arg10[%c0_122, %c0_123] : memref<8x128xf32, #tpu.memory_space<vmem>>, vector<8x128xf32>
    %358 = arith.index_cast %c8_i32 : i32 to index
    %c0_124 = arith.constant 0 : index
    %c0_125 = arith.constant 0 : index
    %359 = vector.load %arg2[%358, %c0_124, %c0_125] : memref<16x8x512xbf16, #tpu.memory_space<vmem>>, vector<1x8x512xbf16>
    %360 = vector.shape_cast %359 : vector<1x8x512xbf16> to vector<8x512xbf16>
    %361 = arith.extf %360 : vector<8x512xbf16> to vector<8x512xf32>
    %362 = arith.truncf %356 : vector<8x128xf32> to vector<8x128xbf16>
    %cst_126 = arith.constant dense<0.000000e+00> : vector<8x512xf32>
    %363 = tpu.matmul %362, %3, %cst_126 {dimension_numbers = #tpu.dot_dimension_numbers<[1], [0], [0], [1], [0, 0, 1, 1], [], []>} : vector<8x128xbf16>, vector<128x512xbf16>, vector<8x512xf32> -> vector<8x512xf32>
    %364 = arith.addf %361, %363 : vector<8x512xf32>
    %365 = vector.extract_strided_slice %364 {offsets = [0, 0], sizes = [8, 128], strides = [1, 1]} : vector<8x512xf32> to vector<8x128xf32>
    %366 = arith.negf %365 : vector<8x128xf32>
    %367 = math.exp %366 : vector<8x128xf32>
    %cst_127 = arith.constant 1.000000e+00 : f32
    %368 = vector.broadcast %cst_127 : f32 to vector<8x128xf32>
    %369 = arith.addf %368, %367 : vector<8x128xf32>
    %370 = arith.divf %368, %369 : vector<8x128xf32>
    %371 = vector.extract_strided_slice %364 {offsets = [0, 128], sizes = [8, 128], strides = [1, 1]} : vector<8x512xf32> to vector<8x128xf32>
    %372 = arith.negf %371 : vector<8x128xf32>
    %373 = math.exp %372 : vector<8x128xf32>
    %cst_128 = arith.constant 1.000000e+00 : f32
    %374 = vector.broadcast %cst_128 : f32 to vector<8x128xf32>
    %375 = arith.addf %374, %373 : vector<8x128xf32>
    %376 = arith.divf %374, %375 : vector<8x128xf32>
    %377 = vector.extract_strided_slice %364 {offsets = [0, 256], sizes = [8, 128], strides = [1, 1]} : vector<8x512xf32> to vector<8x128xf32>
    %378 = math.tanh %377 : vector<8x128xf32>
    %379 = vector.extract_strided_slice %364 {offsets = [0, 384], sizes = [8, 128], strides = [1, 1]} : vector<8x512xf32> to vector<8x128xf32>
    %380 = arith.negf %379 : vector<8x128xf32>
    %381 = math.exp %380 : vector<8x128xf32>
    %cst_129 = arith.constant 1.000000e+00 : f32
    %382 = vector.broadcast %cst_129 : f32 to vector<8x128xf32>
    %383 = arith.addf %382, %381 : vector<8x128xf32>
    %384 = arith.divf %382, %383 : vector<8x128xf32>
    %385 = arith.mulf %376, %357 : vector<8x128xf32>
    %386 = arith.mulf %370, %378 : vector<8x128xf32>
    %387 = arith.addf %385, %386 : vector<8x128xf32>
    %388 = math.tanh %387 : vector<8x128xf32>
    %389 = arith.mulf %384, %388 : vector<8x128xf32>
    %c16_i32_130 = arith.constant 16 : i32
    %390 = arith.muli %arg1, %c16_i32_130 : i32
    %391 = arith.addi %390, %c8_i32 : i32
    %c20_i32_131 = arith.constant 20 : i32
    %392 = arith.cmpi slt, %391, %c20_i32_131 : i32
    %393 = arith.extui %392 : i1 to i32
    %c0_i32_132 = arith.constant 0 : i32
    %394 = arith.cmpi ne, %393, %c0_i32_132 : i32
    scf.if %394 {
      %c0_243 = arith.constant 0 : index
      %c0_244 = arith.constant 0 : index
      %711 = vector.load %arg10[%c0_243, %c0_244] : memref<8x128xf32, #tpu.memory_space<vmem>>, vector<8x128xf32>
      tpu.vector_store %arg10[%c0_243, %c0_244], %387 {strides = array<i32>} : memref<8x128xf32, #tpu.memory_space<vmem>>, vector<8x128xf32>,
      %c0_245 = arith.constant 0 : index
      %c0_246 = arith.constant 0 : index
      %712 = vector.load %arg9[%c0_245, %c0_246] : memref<8x128xf32, #tpu.memory_space<vmem>>, vector<8x128xf32>
      tpu.vector_store %arg9[%c0_245, %c0_246], %389 {strides = array<i32>} : memref<8x128xf32, #tpu.memory_space<vmem>>, vector<8x128xf32>,
    } else {
    }
    %395 = arith.truncf %389 : vector<8x128xf32> to vector<8x128xbf16>
    %396 = arith.index_cast %c8_i32 : i32 to index
    %c0_133 = arith.constant 0 : index
    %c0_134 = arith.constant 0 : index
    %397 = vector.load %arg6[%396, %c0_133, %c0_134] : memref<16x8x128xbf16, #tpu.memory_space<vmem>>, vector<1x8x128xbf16>
    %398 = vector.shape_cast %397 : vector<1x8x128xbf16> to vector<8x128xbf16>
    %399 = vector.shape_cast %395 : vector<8x128xbf16> to vector<1x8x128xbf16>
    tpu.vector_store %arg6[%396, %c0_133, %c0_134], %399 {strides = array<i32>} : memref<16x8x128xbf16, #tpu.memory_space<vmem>>, vector<1x8x128xbf16>,
    %c9_i32 = arith.constant 9 : i32
    %c0_135 = arith.constant 0 : index
    %c0_136 = arith.constant 0 : index
    %400 = vector.load %arg9[%c0_135, %c0_136] : memref<8x128xf32, #tpu.memory_space<vmem>>, vector<8x128xf32>
    %c0_137 = arith.constant 0 : index
    %c0_138 = arith.constant 0 : index
    %401 = vector.load %arg10[%c0_137, %c0_138] : memref<8x128xf32, #tpu.memory_space<vmem>>, vector<8x128xf32>
    %402 = arith.index_cast %c9_i32 : i32 to index
    %c0_139 = arith.constant 0 : index
    %c0_140 = arith.constant 0 : index
    %403 = vector.load %arg2[%402, %c0_139, %c0_140] : memref<16x8x512xbf16, #tpu.memory_space<vmem>>, vector<1x8x512xbf16>
    %404 = vector.shape_cast %403 : vector<1x8x512xbf16> to vector<8x512xbf16>
    %405 = arith.extf %404 : vector<8x512xbf16> to vector<8x512xf32>
    %406 = arith.truncf %400 : vector<8x128xf32> to vector<8x128xbf16>
    %cst_141 = arith.constant dense<0.000000e+00> : vector<8x512xf32>
    %407 = tpu.matmul %406, %3, %cst_141 {dimension_numbers = #tpu.dot_dimension_numbers<[1], [0], [0], [1], [0, 0, 1, 1], [], []>} : vector<8x128xbf16>, vector<128x512xbf16>, vector<8x512xf32> -> vector<8x512xf32>
    %408 = arith.addf %405, %407 : vector<8x512xf32>
    %409 = vector.extract_strided_slice %408 {offsets = [0, 0], sizes = [8, 128], strides = [1, 1]} : vector<8x512xf32> to vector<8x128xf32>
    %410 = arith.negf %409 : vector<8x128xf32>
    %411 = math.exp %410 : vector<8x128xf32>
    %cst_142 = arith.constant 1.000000e+00 : f32
    %412 = vector.broadcast %cst_142 : f32 to vector<8x128xf32>
    %413 = arith.addf %412, %411 : vector<8x128xf32>
    %414 = arith.divf %412, %413 : vector<8x128xf32>
    %415 = vector.extract_strided_slice %408 {offsets = [0, 128], sizes = [8, 128], strides = [1, 1]} : vector<8x512xf32> to vector<8x128xf32>
    %416 = arith.negf %415 : vector<8x128xf32>
    %417 = math.exp %416 : vector<8x128xf32>
    %cst_143 = arith.constant 1.000000e+00 : f32
    %418 = vector.broadcast %cst_143 : f32 to vector<8x128xf32>
    %419 = arith.addf %418, %417 : vector<8x128xf32>
    %420 = arith.divf %418, %419 : vector<8x128xf32>
    %421 = vector.extract_strided_slice %408 {offsets = [0, 256], sizes = [8, 128], strides = [1, 1]} : vector<8x512xf32> to vector<8x128xf32>
    %422 = math.tanh %421 : vector<8x128xf32>
    %423 = vector.extract_strided_slice %408 {offsets = [0, 384], sizes = [8, 128], strides = [1, 1]} : vector<8x512xf32> to vector<8x128xf32>
    %424 = arith.negf %423 : vector<8x128xf32>
    %425 = math.exp %424 : vector<8x128xf32>
    %cst_144 = arith.constant 1.000000e+00 : f32
    %426 = vector.broadcast %cst_144 : f32 to vector<8x128xf32>
    %427 = arith.addf %426, %425 : vector<8x128xf32>
    %428 = arith.divf %426, %427 : vector<8x128xf32>
    %429 = arith.mulf %420, %401 : vector<8x128xf32>
    %430 = arith.mulf %414, %422 : vector<8x128xf32>
    %431 = arith.addf %429, %430 : vector<8x128xf32>
    %432 = math.tanh %431 : vector<8x128xf32>
    %433 = arith.mulf %428, %432 : vector<8x128xf32>
    %c16_i32_145 = arith.constant 16 : i32
    %434 = arith.muli %arg1, %c16_i32_145 : i32
    %435 = arith.addi %434, %c9_i32 : i32
    %c20_i32_146 = arith.constant 20 : i32
    %436 = arith.cmpi slt, %435, %c20_i32_146 : i32
    %437 = arith.extui %436 : i1 to i32
    %c0_i32_147 = arith.constant 0 : i32
    %438 = arith.cmpi ne, %437, %c0_i32_147 : i32
    scf.if %438 {
      %c0_243 = arith.constant 0 : index
      %c0_244 = arith.constant 0 : index
      %711 = vector.load %arg10[%c0_243, %c0_244] : memref<8x128xf32, #tpu.memory_space<vmem>>, vector<8x128xf32>
      tpu.vector_store %arg10[%c0_243, %c0_244], %431 {strides = array<i32>} : memref<8x128xf32, #tpu.memory_space<vmem>>, vector<8x128xf32>,
      %c0_245 = arith.constant 0 : index
      %c0_246 = arith.constant 0 : index
      %712 = vector.load %arg9[%c0_245, %c0_246] : memref<8x128xf32, #tpu.memory_space<vmem>>, vector<8x128xf32>
      tpu.vector_store %arg9[%c0_245, %c0_246], %433 {strides = array<i32>} : memref<8x128xf32, #tpu.memory_space<vmem>>, vector<8x128xf32>,
    } else {
    }
    %439 = arith.truncf %433 : vector<8x128xf32> to vector<8x128xbf16>
    %440 = arith.index_cast %c9_i32 : i32 to index
    %c0_148 = arith.constant 0 : index
    %c0_149 = arith.constant 0 : index
    %441 = vector.load %arg6[%440, %c0_148, %c0_149] : memref<16x8x128xbf16, #tpu.memory_space<vmem>>, vector<1x8x128xbf16>
    %442 = vector.shape_cast %441 : vector<1x8x128xbf16> to vector<8x128xbf16>
    %443 = vector.shape_cast %439 : vector<8x128xbf16> to vector<1x8x128xbf16>
    tpu.vector_store %arg6[%440, %c0_148, %c0_149], %443 {strides = array<i32>} : memref<16x8x128xbf16, #tpu.memory_space<vmem>>, vector<1x8x128xbf16>,
    %c10_i32 = arith.constant 10 : i32
    %c0_150 = arith.constant 0 : index
    %c0_151 = arith.constant 0 : index
    %444 = vector.load %arg9[%c0_150, %c0_151] : memref<8x128xf32, #tpu.memory_space<vmem>>, vector<8x128xf32>
    %c0_152 = arith.constant 0 : index
    %c0_153 = arith.constant 0 : index
    %445 = vector.load %arg10[%c0_152, %c0_153] : memref<8x128xf32, #tpu.memory_space<vmem>>, vector<8x128xf32>
    %446 = arith.index_cast %c10_i32 : i32 to index
    %c0_154 = arith.constant 0 : index
    %c0_155 = arith.constant 0 : index
    %447 = vector.load %arg2[%446, %c0_154, %c0_155] : memref<16x8x512xbf16, #tpu.memory_space<vmem>>, vector<1x8x512xbf16>
    %448 = vector.shape_cast %447 : vector<1x8x512xbf16> to vector<8x512xbf16>
    %449 = arith.extf %448 : vector<8x512xbf16> to vector<8x512xf32>
    %450 = arith.truncf %444 : vector<8x128xf32> to vector<8x128xbf16>
    %cst_156 = arith.constant dense<0.000000e+00> : vector<8x512xf32>
    %451 = tpu.matmul %450, %3, %cst_156 {dimension_numbers = #tpu.dot_dimension_numbers<[1], [0], [0], [1], [0, 0, 1, 1], [], []>} : vector<8x128xbf16>, vector<128x512xbf16>, vector<8x512xf32> -> vector<8x512xf32>
    %452 = arith.addf %449, %451 : vector<8x512xf32>
    %453 = vector.extract_strided_slice %452 {offsets = [0, 0], sizes = [8, 128], strides = [1, 1]} : vector<8x512xf32> to vector<8x128xf32>
    %454 = arith.negf %453 : vector<8x128xf32>
    %455 = math.exp %454 : vector<8x128xf32>
    %cst_157 = arith.constant 1.000000e+00 : f32
    %456 = vector.broadcast %cst_157 : f32 to vector<8x128xf32>
    %457 = arith.addf %456, %455 : vector<8x128xf32>
    %458 = arith.divf %456, %457 : vector<8x128xf32>
    %459 = vector.extract_strided_slice %452 {offsets = [0, 128], sizes = [8, 128], strides = [1, 1]} : vector<8x512xf32> to vector<8x128xf32>
    %460 = arith.negf %459 : vector<8x128xf32>
    %461 = math.exp %460 : vector<8x128xf32>
    %cst_158 = arith.constant 1.000000e+00 : f32
    %462 = vector.broadcast %cst_158 : f32 to vector<8x128xf32>
    %463 = arith.addf %462, %461 : vector<8x128xf32>
    %464 = arith.divf %462, %463 : vector<8x128xf32>
    %465 = vector.extract_strided_slice %452 {offsets = [0, 256], sizes = [8, 128], strides = [1, 1]} : vector<8x512xf32> to vector<8x128xf32>
    %466 = math.tanh %465 : vector<8x128xf32>
    %467 = vector.extract_strided_slice %452 {offsets = [0, 384], sizes = [8, 128], strides = [1, 1]} : vector<8x512xf32> to vector<8x128xf32>
    %468 = arith.negf %467 : vector<8x128xf32>
    %469 = math.exp %468 : vector<8x128xf32>
    %cst_159 = arith.constant 1.000000e+00 : f32
    %470 = vector.broadcast %cst_159 : f32 to vector<8x128xf32>
    %471 = arith.addf %470, %469 : vector<8x128xf32>
    %472 = arith.divf %470, %471 : vector<8x128xf32>
    %473 = arith.mulf %464, %445 : vector<8x128xf32>
    %474 = arith.mulf %458, %466 : vector<8x128xf32>
    %475 = arith.addf %473, %474 : vector<8x128xf32>
    %476 = math.tanh %475 : vector<8x128xf32>
    %477 = arith.mulf %472, %476 : vector<8x128xf32>
    %c16_i32_160 = arith.constant 16 : i32
    %478 = arith.muli %arg1, %c16_i32_160 : i32
    %479 = arith.addi %478, %c10_i32 : i32
    %c20_i32_161 = arith.constant 20 : i32
    %480 = arith.cmpi slt, %479, %c20_i32_161 : i32
    %481 = arith.extui %480 : i1 to i32
    %c0_i32_162 = arith.constant 0 : i32
    %482 = arith.cmpi ne, %481, %c0_i32_162 : i32
    scf.if %482 {
      %c0_243 = arith.constant 0 : index
      %c0_244 = arith.constant 0 : index
      %711 = vector.load %arg10[%c0_243, %c0_244] : memref<8x128xf32, #tpu.memory_space<vmem>>, vector<8x128xf32>
      tpu.vector_store %arg10[%c0_243, %c0_244], %475 {strides = array<i32>} : memref<8x128xf32, #tpu.memory_space<vmem>>, vector<8x128xf32>,
      %c0_245 = arith.constant 0 : index
      %c0_246 = arith.constant 0 : index
      %712 = vector.load %arg9[%c0_245, %c0_246] : memref<8x128xf32, #tpu.memory_space<vmem>>, vector<8x128xf32>
      tpu.vector_store %arg9[%c0_245, %c0_246], %477 {strides = array<i32>} : memref<8x128xf32, #tpu.memory_space<vmem>>, vector<8x128xf32>,
    } else {
    }
    %483 = arith.truncf %477 : vector<8x128xf32> to vector<8x128xbf16>
    %484 = arith.index_cast %c10_i32 : i32 to index
    %c0_163 = arith.constant 0 : index
    %c0_164 = arith.constant 0 : index
    %485 = vector.load %arg6[%484, %c0_163, %c0_164] : memref<16x8x128xbf16, #tpu.memory_space<vmem>>, vector<1x8x128xbf16>
    %486 = vector.shape_cast %485 : vector<1x8x128xbf16> to vector<8x128xbf16>
    %487 = vector.shape_cast %483 : vector<8x128xbf16> to vector<1x8x128xbf16>
    tpu.vector_store %arg6[%484, %c0_163, %c0_164], %487 {strides = array<i32>} : memref<16x8x128xbf16, #tpu.memory_space<vmem>>, vector<1x8x128xbf16>,
    %c11_i32 = arith.constant 11 : i32
    %c0_165 = arith.constant 0 : index
    %c0_166 = arith.constant 0 : index
    %488 = vector.load %arg9[%c0_165, %c0_166] : memref<8x128xf32, #tpu.memory_space<vmem>>, vector<8x128xf32>
    %c0_167 = arith.constant 0 : index
    %c0_168 = arith.constant 0 : index
    %489 = vector.load %arg10[%c0_167, %c0_168] : memref<8x128xf32, #tpu.memory_space<vmem>>, vector<8x128xf32>
    %490 = arith.index_cast %c11_i32 : i32 to index
    %c0_169 = arith.constant 0 : index
    %c0_170 = arith.constant 0 : index
    %491 = vector.load %arg2[%490, %c0_169, %c0_170] : memref<16x8x512xbf16, #tpu.memory_space<vmem>>, vector<1x8x512xbf16>
    %492 = vector.shape_cast %491 : vector<1x8x512xbf16> to vector<8x512xbf16>
    %493 = arith.extf %492 : vector<8x512xbf16> to vector<8x512xf32>
    %494 = arith.truncf %488 : vector<8x128xf32> to vector<8x128xbf16>
    %cst_171 = arith.constant dense<0.000000e+00> : vector<8x512xf32>
    %495 = tpu.matmul %494, %3, %cst_171 {dimension_numbers = #tpu.dot_dimension_numbers<[1], [0], [0], [1], [0, 0, 1, 1], [], []>} : vector<8x128xbf16>, vector<128x512xbf16>, vector<8x512xf32> -> vector<8x512xf32>
    %496 = arith.addf %493, %495 : vector<8x512xf32>
    %497 = vector.extract_strided_slice %496 {offsets = [0, 0], sizes = [8, 128], strides = [1, 1]} : vector<8x512xf32> to vector<8x128xf32>
    %498 = arith.negf %497 : vector<8x128xf32>
    %499 = math.exp %498 : vector<8x128xf32>
    %cst_172 = arith.constant 1.000000e+00 : f32
    %500 = vector.broadcast %cst_172 : f32 to vector<8x128xf32>
    %501 = arith.addf %500, %499 : vector<8x128xf32>
    %502 = arith.divf %500, %501 : vector<8x128xf32>
    %503 = vector.extract_strided_slice %496 {offsets = [0, 128], sizes = [8, 128], strides = [1, 1]} : vector<8x512xf32> to vector<8x128xf32>
    %504 = arith.negf %503 : vector<8x128xf32>
    %505 = math.exp %504 : vector<8x128xf32>
    %cst_173 = arith.constant 1.000000e+00 : f32
    %506 = vector.broadcast %cst_173 : f32 to vector<8x128xf32>
    %507 = arith.addf %506, %505 : vector<8x128xf32>
    %508 = arith.divf %506, %507 : vector<8x128xf32>
    %509 = vector.extract_strided_slice %496 {offsets = [0, 256], sizes = [8, 128], strides = [1, 1]} : vector<8x512xf32> to vector<8x128xf32>
    %510 = math.tanh %509 : vector<8x128xf32>
    %511 = vector.extract_strided_slice %496 {offsets = [0, 384], sizes = [8, 128], strides = [1, 1]} : vector<8x512xf32> to vector<8x128xf32>
    %512 = arith.negf %511 : vector<8x128xf32>
    %513 = math.exp %512 : vector<8x128xf32>
    %cst_174 = arith.constant 1.000000e+00 : f32
    %514 = vector.broadcast %cst_174 : f32 to vector<8x128xf32>
    %515 = arith.addf %514, %513 : vector<8x128xf32>
    %516 = arith.divf %514, %515 : vector<8x128xf32>
    %517 = arith.mulf %508, %489 : vector<8x128xf32>
    %518 = arith.mulf %502, %510 : vector<8x128xf32>
    %519 = arith.addf %517, %518 : vector<8x128xf32>
    %520 = math.tanh %519 : vector<8x128xf32>
    %521 = arith.mulf %516, %520 : vector<8x128xf32>
    %c16_i32_175 = arith.constant 16 : i32
    %522 = arith.muli %arg1, %c16_i32_175 : i32
    %523 = arith.addi %522, %c11_i32 : i32
    %c20_i32_176 = arith.constant 20 : i32
    %524 = arith.cmpi slt, %523, %c20_i32_176 : i32
    %525 = arith.extui %524 : i1 to i32
    %c0_i32_177 = arith.constant 0 : i32
    %526 = arith.cmpi ne, %525, %c0_i32_177 : i32
    scf.if %526 {
      %c0_243 = arith.constant 0 : index
      %c0_244 = arith.constant 0 : index
      %711 = vector.load %arg10[%c0_243, %c0_244] : memref<8x128xf32, #tpu.memory_space<vmem>>, vector<8x128xf32>
      tpu.vector_store %arg10[%c0_243, %c0_244], %519 {strides = array<i32>} : memref<8x128xf32, #tpu.memory_space<vmem>>, vector<8x128xf32>,
      %c0_245 = arith.constant 0 : index
      %c0_246 = arith.constant 0 : index
      %712 = vector.load %arg9[%c0_245, %c0_246] : memref<8x128xf32, #tpu.memory_space<vmem>>, vector<8x128xf32>
      tpu.vector_store %arg9[%c0_245, %c0_246], %521 {strides = array<i32>} : memref<8x128xf32, #tpu.memory_space<vmem>>, vector<8x128xf32>,
    } else {
    }
    %527 = arith.truncf %521 : vector<8x128xf32> to vector<8x128xbf16>
    %528 = arith.index_cast %c11_i32 : i32 to index
    %c0_178 = arith.constant 0 : index
    %c0_179 = arith.constant 0 : index
    %529 = vector.load %arg6[%528, %c0_178, %c0_179] : memref<16x8x128xbf16, #tpu.memory_space<vmem>>, vector<1x8x128xbf16>
    %530 = vector.shape_cast %529 : vector<1x8x128xbf16> to vector<8x128xbf16>
    %531 = vector.shape_cast %527 : vector<8x128xbf16> to vector<1x8x128xbf16>
    tpu.vector_store %arg6[%528, %c0_178, %c0_179], %531 {strides = array<i32>} : memref<16x8x128xbf16, #tpu.memory_space<vmem>>, vector<1x8x128xbf16>,
    %c12_i32 = arith.constant 12 : i32
    %c0_180 = arith.constant 0 : index
    %c0_181 = arith.constant 0 : index
    %532 = vector.load %arg9[%c0_180, %c0_181] : memref<8x128xf32, #tpu.memory_space<vmem>>, vector<8x128xf32>
    %c0_182 = arith.constant 0 : index
    %c0_183 = arith.constant 0 : index
    %533 = vector.load %arg10[%c0_182, %c0_183] : memref<8x128xf32, #tpu.memory_space<vmem>>, vector<8x128xf32>
    %534 = arith.index_cast %c12_i32 : i32 to index
    %c0_184 = arith.constant 0 : index
    %c0_185 = arith.constant 0 : index
    %535 = vector.load %arg2[%534, %c0_184, %c0_185] : memref<16x8x512xbf16, #tpu.memory_space<vmem>>, vector<1x8x512xbf16>
    %536 = vector.shape_cast %535 : vector<1x8x512xbf16> to vector<8x512xbf16>
    %537 = arith.extf %536 : vector<8x512xbf16> to vector<8x512xf32>
    %538 = arith.truncf %532 : vector<8x128xf32> to vector<8x128xbf16>
    %cst_186 = arith.constant dense<0.000000e+00> : vector<8x512xf32>
    %539 = tpu.matmul %538, %3, %cst_186 {dimension_numbers = #tpu.dot_dimension_numbers<[1], [0], [0], [1], [0, 0, 1, 1], [], []>} : vector<8x128xbf16>, vector<128x512xbf16>, vector<8x512xf32> -> vector<8x512xf32>
    %540 = arith.addf %537, %539 : vector<8x512xf32>
    %541 = vector.extract_strided_slice %540 {offsets = [0, 0], sizes = [8, 128], strides = [1, 1]} : vector<8x512xf32> to vector<8x128xf32>
    %542 = arith.negf %541 : vector<8x128xf32>
    %543 = math.exp %542 : vector<8x128xf32>
    %cst_187 = arith.constant 1.000000e+00 : f32
    %544 = vector.broadcast %cst_187 : f32 to vector<8x128xf32>
    %545 = arith.addf %544, %543 : vector<8x128xf32>
    %546 = arith.divf %544, %545 : vector<8x128xf32>
    %547 = vector.extract_strided_slice %540 {offsets = [0, 128], sizes = [8, 128], strides = [1, 1]} : vector<8x512xf32> to vector<8x128xf32>
    %548 = arith.negf %547 : vector<8x128xf32>
    %549 = math.exp %548 : vector<8x128xf32>
    %cst_188 = arith.constant 1.000000e+00 : f32
    %550 = vector.broadcast %cst_188 : f32 to vector<8x128xf32>
    %551 = arith.addf %550, %549 : vector<8x128xf32>
    %552 = arith.divf %550, %551 : vector<8x128xf32>
    %553 = vector.extract_strided_slice %540 {offsets = [0, 256], sizes = [8, 128], strides = [1, 1]} : vector<8x512xf32> to vector<8x128xf32>
    %554 = math.tanh %553 : vector<8x128xf32>
    %555 = vector.extract_strided_slice %540 {offsets = [0, 384], sizes = [8, 128], strides = [1, 1]} : vector<8x512xf32> to vector<8x128xf32>
    %556 = arith.negf %555 : vector<8x128xf32>
    %557 = math.exp %556 : vector<8x128xf32>
    %cst_189 = arith.constant 1.000000e+00 : f32
    %558 = vector.broadcast %cst_189 : f32 to vector<8x128xf32>
    %559 = arith.addf %558, %557 : vector<8x128xf32>
    %560 = arith.divf %558, %559 : vector<8x128xf32>
    %561 = arith.mulf %552, %533 : vector<8x128xf32>
    %562 = arith.mulf %546, %554 : vector<8x128xf32>
    %563 = arith.addf %561, %562 : vector<8x128xf32>
    %564 = math.tanh %563 : vector<8x128xf32>
    %565 = arith.mulf %560, %564 : vector<8x128xf32>
    %c16_i32_190 = arith.constant 16 : i32
    %566 = arith.muli %arg1, %c16_i32_190 : i32
    %567 = arith.addi %566, %c12_i32 : i32
    %c20_i32_191 = arith.constant 20 : i32
    %568 = arith.cmpi slt, %567, %c20_i32_191 : i32
    %569 = arith.extui %568 : i1 to i32
    %c0_i32_192 = arith.constant 0 : i32
    %570 = arith.cmpi ne, %569, %c0_i32_192 : i32
    scf.if %570 {
      %c0_243 = arith.constant 0 : index
      %c0_244 = arith.constant 0 : index
      %711 = vector.load %arg10[%c0_243, %c0_244] : memref<8x128xf32, #tpu.memory_space<vmem>>, vector<8x128xf32>
      tpu.vector_store %arg10[%c0_243, %c0_244], %563 {strides = array<i32>} : memref<8x128xf32, #tpu.memory_space<vmem>>, vector<8x128xf32>,
      %c0_245 = arith.constant 0 : index
      %c0_246 = arith.constant 0 : index
      %712 = vector.load %arg9[%c0_245, %c0_246] : memref<8x128xf32, #tpu.memory_space<vmem>>, vector<8x128xf32>
      tpu.vector_store %arg9[%c0_245, %c0_246], %565 {strides = array<i32>} : memref<8x128xf32, #tpu.memory_space<vmem>>, vector<8x128xf32>,
    } else {
    }
    %571 = arith.truncf %565 : vector<8x128xf32> to vector<8x128xbf16>
    %572 = arith.index_cast %c12_i32 : i32 to index
    %c0_193 = arith.constant 0 : index
    %c0_194 = arith.constant 0 : index
    %573 = vector.load %arg6[%572, %c0_193, %c0_194] : memref<16x8x128xbf16, #tpu.memory_space<vmem>>, vector<1x8x128xbf16>
    %574 = vector.shape_cast %573 : vector<1x8x128xbf16> to vector<8x128xbf16>
    %575 = vector.shape_cast %571 : vector<8x128xbf16> to vector<1x8x128xbf16>
    tpu.vector_store %arg6[%572, %c0_193, %c0_194], %575 {strides = array<i32>} : memref<16x8x128xbf16, #tpu.memory_space<vmem>>, vector<1x8x128xbf16>,
    %c13_i32 = arith.constant 13 : i32
    %c0_195 = arith.constant 0 : index
    %c0_196 = arith.constant 0 : index
    %576 = vector.load %arg9[%c0_195, %c0_196] : memref<8x128xf32, #tpu.memory_space<vmem>>, vector<8x128xf32>
    %c0_197 = arith.constant 0 : index
    %c0_198 = arith.constant 0 : index
    %577 = vector.load %arg10[%c0_197, %c0_198] : memref<8x128xf32, #tpu.memory_space<vmem>>, vector<8x128xf32>
    %578 = arith.index_cast %c13_i32 : i32 to index
    %c0_199 = arith.constant 0 : index
    %c0_200 = arith.constant 0 : index
    %579 = vector.load %arg2[%578, %c0_199, %c0_200] : memref<16x8x512xbf16, #tpu.memory_space<vmem>>, vector<1x8x512xbf16>
    %580 = vector.shape_cast %579 : vector<1x8x512xbf16> to vector<8x512xbf16>
    %581 = arith.extf %580 : vector<8x512xbf16> to vector<8x512xf32>
    %582 = arith.truncf %576 : vector<8x128xf32> to vector<8x128xbf16>
    %cst_201 = arith.constant dense<0.000000e+00> : vector<8x512xf32>
    %583 = tpu.matmul %582, %3, %cst_201 {dimension_numbers = #tpu.dot_dimension_numbers<[1], [0], [0], [1], [0, 0, 1, 1], [], []>} : vector<8x128xbf16>, vector<128x512xbf16>, vector<8x512xf32> -> vector<8x512xf32>
    %584 = arith.addf %581, %583 : vector<8x512xf32>
    %585 = vector.extract_strided_slice %584 {offsets = [0, 0], sizes = [8, 128], strides = [1, 1]} : vector<8x512xf32> to vector<8x128xf32>
    %586 = arith.negf %585 : vector<8x128xf32>
    %587 = math.exp %586 : vector<8x128xf32>
    %cst_202 = arith.constant 1.000000e+00 : f32
    %588 = vector.broadcast %cst_202 : f32 to vector<8x128xf32>
    %589 = arith.addf %588, %587 : vector<8x128xf32>
    %590 = arith.divf %588, %589 : vector<8x128xf32>
    %591 = vector.extract_strided_slice %584 {offsets = [0, 128], sizes = [8, 128], strides = [1, 1]} : vector<8x512xf32> to vector<8x128xf32>
    %592 = arith.negf %591 : vector<8x128xf32>
    %593 = math.exp %592 : vector<8x128xf32>
    %cst_203 = arith.constant 1.000000e+00 : f32
    %594 = vector.broadcast %cst_203 : f32 to vector<8x128xf32>
    %595 = arith.addf %594, %593 : vector<8x128xf32>
    %596 = arith.divf %594, %595 : vector<8x128xf32>
    %597 = vector.extract_strided_slice %584 {offsets = [0, 256], sizes = [8, 128], strides = [1, 1]} : vector<8x512xf32> to vector<8x128xf32>
    %598 = math.tanh %597 : vector<8x128xf32>
    %599 = vector.extract_strided_slice %584 {offsets = [0, 384], sizes = [8, 128], strides = [1, 1]} : vector<8x512xf32> to vector<8x128xf32>
    %600 = arith.negf %599 : vector<8x128xf32>
    %601 = math.exp %600 : vector<8x128xf32>
    %cst_204 = arith.constant 1.000000e+00 : f32
    %602 = vector.broadcast %cst_204 : f32 to vector<8x128xf32>
    %603 = arith.addf %602, %601 : vector<8x128xf32>
    %604 = arith.divf %602, %603 : vector<8x128xf32>
    %605 = arith.mulf %596, %577 : vector<8x128xf32>
    %606 = arith.mulf %590, %598 : vector<8x128xf32>
    %607 = arith.addf %605, %606 : vector<8x128xf32>
    %608 = math.tanh %607 : vector<8x128xf32>
    %609 = arith.mulf %604, %608 : vector<8x128xf32>
    %c16_i32_205 = arith.constant 16 : i32
    %610 = arith.muli %arg1, %c16_i32_205 : i32
    %611 = arith.addi %610, %c13_i32 : i32
    %c20_i32_206 = arith.constant 20 : i32
    %612 = arith.cmpi slt, %611, %c20_i32_206 : i32
    %613 = arith.extui %612 : i1 to i32
    %c0_i32_207 = arith.constant 0 : i32
    %614 = arith.cmpi ne, %613, %c0_i32_207 : i32
    scf.if %614 {
      %c0_243 = arith.constant 0 : index
      %c0_244 = arith.constant 0 : index
      %711 = vector.load %arg10[%c0_243, %c0_244] : memref<8x128xf32, #tpu.memory_space<vmem>>, vector<8x128xf32>
      tpu.vector_store %arg10[%c0_243, %c0_244], %607 {strides = array<i32>} : memref<8x128xf32, #tpu.memory_space<vmem>>, vector<8x128xf32>,
      %c0_245 = arith.constant 0 : index
      %c0_246 = arith.constant 0 : index
      %712 = vector.load %arg9[%c0_245, %c0_246] : memref<8x128xf32, #tpu.memory_space<vmem>>, vector<8x128xf32>
      tpu.vector_store %arg9[%c0_245, %c0_246], %609 {strides = array<i32>} : memref<8x128xf32, #tpu.memory_space<vmem>>, vector<8x128xf32>,
    } else {
    }
    %615 = arith.truncf %609 : vector<8x128xf32> to vector<8x128xbf16>
    %616 = arith.index_cast %c13_i32 : i32 to index
    %c0_208 = arith.constant 0 : index
    %c0_209 = arith.constant 0 : index
    %617 = vector.load %arg6[%616, %c0_208, %c0_209] : memref<16x8x128xbf16, #tpu.memory_space<vmem>>, vector<1x8x128xbf16>
    %618 = vector.shape_cast %617 : vector<1x8x128xbf16> to vector<8x128xbf16>
    %619 = vector.shape_cast %615 : vector<8x128xbf16> to vector<1x8x128xbf16>
    tpu.vector_store %arg6[%616, %c0_208, %c0_209], %619 {strides = array<i32>} : memref<16x8x128xbf16, #tpu.memory_space<vmem>>, vector<1x8x128xbf16>,
    %c14_i32 = arith.constant 14 : i32
    %c0_210 = arith.constant 0 : index
    %c0_211 = arith.constant 0 : index
    %620 = vector.load %arg9[%c0_210, %c0_211] : memref<8x128xf32, #tpu.memory_space<vmem>>, vector<8x128xf32>
    %c0_212 = arith.constant 0 : index
    %c0_213 = arith.constant 0 : index
    %621 = vector.load %arg10[%c0_212, %c0_213] : memref<8x128xf32, #tpu.memory_space<vmem>>, vector<8x128xf32>
    %622 = arith.index_cast %c14_i32 : i32 to index
    %c0_214 = arith.constant 0 : index
    %c0_215 = arith.constant 0 : index
    %623 = vector.load %arg2[%622, %c0_214, %c0_215] : memref<16x8x512xbf16, #tpu.memory_space<vmem>>, vector<1x8x512xbf16>
    %624 = vector.shape_cast %623 : vector<1x8x512xbf16> to vector<8x512xbf16>
    %625 = arith.extf %624 : vector<8x512xbf16> to vector<8x512xf32>
    %626 = arith.truncf %620 : vector<8x128xf32> to vector<8x128xbf16>
    %cst_216 = arith.constant dense<0.000000e+00> : vector<8x512xf32>
    %627 = tpu.matmul %626, %3, %cst_216 {dimension_numbers = #tpu.dot_dimension_numbers<[1], [0], [0], [1], [0, 0, 1, 1], [], []>} : vector<8x128xbf16>, vector<128x512xbf16>, vector<8x512xf32> -> vector<8x512xf32>
    %628 = arith.addf %625, %627 : vector<8x512xf32>
    %629 = vector.extract_strided_slice %628 {offsets = [0, 0], sizes = [8, 128], strides = [1, 1]} : vector<8x512xf32> to vector<8x128xf32>
    %630 = arith.negf %629 : vector<8x128xf32>
    %631 = math.exp %630 : vector<8x128xf32>
    %cst_217 = arith.constant 1.000000e+00 : f32
    %632 = vector.broadcast %cst_217 : f32 to vector<8x128xf32>
    %633 = arith.addf %632, %631 : vector<8x128xf32>
    %634 = arith.divf %632, %633 : vector<8x128xf32>
    %635 = vector.extract_strided_slice %628 {offsets = [0, 128], sizes = [8, 128], strides = [1, 1]} : vector<8x512xf32> to vector<8x128xf32>
    %636 = arith.negf %635 : vector<8x128xf32>
    %637 = math.exp %636 : vector<8x128xf32>
    %cst_218 = arith.constant 1.000000e+00 : f32
    %638 = vector.broadcast %cst_218 : f32 to vector<8x128xf32>
    %639 = arith.addf %638, %637 : vector<8x128xf32>
    %640 = arith.divf %638, %639 : vector<8x128xf32>
    %641 = vector.extract_strided_slice %628 {offsets = [0, 256], sizes = [8, 128], strides = [1, 1]} : vector<8x512xf32> to vector<8x128xf32>
    %642 = math.tanh %641 : vector<8x128xf32>
    %643 = vector.extract_strided_slice %628 {offsets = [0, 384], sizes = [8, 128], strides = [1, 1]} : vector<8x512xf32> to vector<8x128xf32>
    %644 = arith.negf %643 : vector<8x128xf32>
    %645 = math.exp %644 : vector<8x128xf32>
    %cst_219 = arith.constant 1.000000e+00 : f32
    %646 = vector.broadcast %cst_219 : f32 to vector<8x128xf32>
    %647 = arith.addf %646, %645 : vector<8x128xf32>
    %648 = arith.divf %646, %647 : vector<8x128xf32>
    %649 = arith.mulf %640, %621 : vector<8x128xf32>
    %650 = arith.mulf %634, %642 : vector<8x128xf32>
    %651 = arith.addf %649, %650 : vector<8x128xf32>
    %652 = math.tanh %651 : vector<8x128xf32>
    %653 = arith.mulf %648, %652 : vector<8x128xf32>
    %c16_i32_220 = arith.constant 16 : i32
    %654 = arith.muli %arg1, %c16_i32_220 : i32
    %655 = arith.addi %654, %c14_i32 : i32
    %c20_i32_221 = arith.constant 20 : i32
    %656 = arith.cmpi slt, %655, %c20_i32_221 : i32
    %657 = arith.extui %656 : i1 to i32
    %c0_i32_222 = arith.constant 0 : i32
    %658 = arith.cmpi ne, %657, %c0_i32_222 : i32
    scf.if %658 {
      %c0_243 = arith.constant 0 : index
      %c0_244 = arith.constant 0 : index
      %711 = vector.load %arg10[%c0_243, %c0_244] : memref<8x128xf32, #tpu.memory_space<vmem>>, vector<8x128xf32>
      tpu.vector_store %arg10[%c0_243, %c0_244], %651 {strides = array<i32>} : memref<8x128xf32, #tpu.memory_space<vmem>>, vector<8x128xf32>,
      %c0_245 = arith.constant 0 : index
      %c0_246 = arith.constant 0 : index
      %712 = vector.load %arg9[%c0_245, %c0_246] : memref<8x128xf32, #tpu.memory_space<vmem>>, vector<8x128xf32>
      tpu.vector_store %arg9[%c0_245, %c0_246], %653 {strides = array<i32>} : memref<8x128xf32, #tpu.memory_space<vmem>>, vector<8x128xf32>,
    } else {
    }
    %659 = arith.truncf %653 : vector<8x128xf32> to vector<8x128xbf16>
    %660 = arith.index_cast %c14_i32 : i32 to index
    %c0_223 = arith.constant 0 : index
    %c0_224 = arith.constant 0 : index
    %661 = vector.load %arg6[%660, %c0_223, %c0_224] : memref<16x8x128xbf16, #tpu.memory_space<vmem>>, vector<1x8x128xbf16>
    %662 = vector.shape_cast %661 : vector<1x8x128xbf16> to vector<8x128xbf16>
    %663 = vector.shape_cast %659 : vector<8x128xbf16> to vector<1x8x128xbf16>
    tpu.vector_store %arg6[%660, %c0_223, %c0_224], %663 {strides = array<i32>} : memref<16x8x128xbf16, #tpu.memory_space<vmem>>, vector<1x8x128xbf16>,
    %c15_i32 = arith.constant 15 : i32
    %c0_225 = arith.constant 0 : index
    %c0_226 = arith.constant 0 : index
    %664 = vector.load %arg9[%c0_225, %c0_226] : memref<8x128xf32, #tpu.memory_space<vmem>>, vector<8x128xf32>
    %c0_227 = arith.constant 0 : index
    %c0_228 = arith.constant 0 : index
    %665 = vector.load %arg10[%c0_227, %c0_228] : memref<8x128xf32, #tpu.memory_space<vmem>>, vector<8x128xf32>
    %666 = arith.index_cast %c15_i32 : i32 to index
    %c0_229 = arith.constant 0 : index
    %c0_230 = arith.constant 0 : index
    %667 = vector.load %arg2[%666, %c0_229, %c0_230] : memref<16x8x512xbf16, #tpu.memory_space<vmem>>, vector<1x8x512xbf16>
    %668 = vector.shape_cast %667 : vector<1x8x512xbf16> to vector<8x512xbf16>
    %669 = arith.extf %668 : vector<8x512xbf16> to vector<8x512xf32>
    %670 = arith.truncf %664 : vector<8x128xf32> to vector<8x128xbf16>
    %cst_231 = arith.constant dense<0.000000e+00> : vector<8x512xf32>
    %671 = tpu.matmul %670, %3, %cst_231 {dimension_numbers = #tpu.dot_dimension_numbers<[1], [0], [0], [1], [0, 0, 1, 1], [], []>} : vector<8x128xbf16>, vector<128x512xbf16>, vector<8x512xf32> -> vector<8x512xf32>
    %672 = arith.addf %669, %671 : vector<8x512xf32>
    %673 = vector.extract_strided_slice %672 {offsets = [0, 0], sizes = [8, 128], strides = [1, 1]} : vector<8x512xf32> to vector<8x128xf32>
    %674 = arith.negf %673 : vector<8x128xf32>
    %675 = math.exp %674 : vector<8x128xf32>
    %cst_232 = arith.constant 1.000000e+00 : f32
    %676 = vector.broadcast %cst_232 : f32 to vector<8x128xf32>
    %677 = arith.addf %676, %675 : vector<8x128xf32>
    %678 = arith.divf %676, %677 : vector<8x128xf32>
    %679 = vector.extract_strided_slice %672 {offsets = [0, 128], sizes = [8, 128], strides = [1, 1]} : vector<8x512xf32> to vector<8x128xf32>
    %680 = arith.negf %679 : vector<8x128xf32>
    %681 = math.exp %680 : vector<8x128xf32>
    %cst_233 = arith.constant 1.000000e+00 : f32
    %682 = vector.broadcast %cst_233 : f32 to vector<8x128xf32>
    %683 = arith.addf %682, %681 : vector<8x128xf32>
    %684 = arith.divf %682, %683 : vector<8x128xf32>
    %685 = vector.extract_strided_slice %672 {offsets = [0, 256], sizes = [8, 128], strides = [1, 1]} : vector<8x512xf32> to vector<8x128xf32>
    %686 = math.tanh %685 : vector<8x128xf32>
    %687 = vector.extract_strided_slice %672 {offsets = [0, 384], sizes = [8, 128], strides = [1, 1]} : vector<8x512xf32> to vector<8x128xf32>
    %688 = arith.negf %687 : vector<8x128xf32>
    %689 = math.exp %688 : vector<8x128xf32>
    %cst_234 = arith.constant 1.000000e+00 : f32
    %690 = vector.broadcast %cst_234 : f32 to vector<8x128xf32>
    %691 = arith.addf %690, %689 : vector<8x128xf32>
    %692 = arith.divf %690, %691 : vector<8x128xf32>
    %693 = arith.mulf %684, %665 : vector<8x128xf32>
    %694 = arith.mulf %678, %686 : vector<8x128xf32>
    %695 = arith.addf %693, %694 : vector<8x128xf32>
    %696 = math.tanh %695 : vector<8x128xf32>
    %697 = arith.mulf %692, %696 : vector<8x128xf32>
    %c16_i32_235 = arith.constant 16 : i32
    %698 = arith.muli %arg1, %c16_i32_235 : i32
    %699 = arith.addi %698, %c15_i32 : i32
    %c20_i32_236 = arith.constant 20 : i32
    %700 = arith.cmpi slt, %699, %c20_i32_236 : i32
    %701 = arith.extui %700 : i1 to i32
    %c0_i32_237 = arith.constant 0 : i32
    %702 = arith.cmpi ne, %701, %c0_i32_237 : i32
    scf.if %702 {
      %c0_243 = arith.constant 0 : index
      %c0_244 = arith.constant 0 : index
      %711 = vector.load %arg10[%c0_243, %c0_244] : memref<8x128xf32, #tpu.memory_space<vmem>>, vector<8x128xf32>
      tpu.vector_store %arg10[%c0_243, %c0_244], %695 {strides = array<i32>} : memref<8x128xf32, #tpu.memory_space<vmem>>, vector<8x128xf32>,
      %c0_245 = arith.constant 0 : index
      %c0_246 = arith.constant 0 : index
      %712 = vector.load %arg9[%c0_245, %c0_246] : memref<8x128xf32, #tpu.memory_space<vmem>>, vector<8x128xf32>
      tpu.vector_store %arg9[%c0_245, %c0_246], %697 {strides = array<i32>} : memref<8x128xf32, #tpu.memory_space<vmem>>, vector<8x128xf32>,
    } else {
    }
    %703 = arith.truncf %697 : vector<8x128xf32> to vector<8x128xbf16>
    %704 = arith.index_cast %c15_i32 : i32 to index
    %c0_238 = arith.constant 0 : index
    %c0_239 = arith.constant 0 : index
    %705 = vector.load %arg6[%704, %c0_238, %c0_239] : memref<16x8x128xbf16, #tpu.memory_space<vmem>>, vector<1x8x128xbf16>
    %706 = vector.shape_cast %705 : vector<1x8x128xbf16> to vector<8x128xbf16>
    %707 = vector.shape_cast %703 : vector<8x128xbf16> to vector<1x8x128xbf16>
    tpu.vector_store %arg6[%704, %c0_238, %c0_239], %707 {strides = array<i32>} : memref<16x8x128xbf16, #tpu.memory_space<vmem>>, vector<1x8x128xbf16>,
    %c16_i32_240 = arith.constant 16 : i32
    %c1_i32_241 = arith.constant 1 : i32
    %708 = arith.cmpi eq, %arg1, %c1_i32_241 : i32
    %709 = arith.extui %708 : i1 to i32
    %c0_i32_242 = arith.constant 0 : i32
    %710 = arith.cmpi ne, %709, %c0_i32_242 : i32
    scf.if %710 {
      %c0_243 = arith.constant 0 : index
      %c0_244 = arith.constant 0 : index
      %711 = vector.load %arg9[%c0_243, %c0_244] : memref<8x128xf32, #tpu.memory_space<vmem>>, vector<8x128xf32>
      %c0_245 = arith.constant 0 : index
      %c0_246 = arith.constant 0 : index
      %712 = vector.load %arg7[%c0_245, %c0_246] : memref<8x128xf32, #tpu.memory_space<vmem>>, vector<8x128xf32>
      tpu.vector_store %arg7[%c0_245, %c0_246], %711 {strides = array<i32>} : memref<8x128xf32, #tpu.memory_space<vmem>>, vector<8x128xf32>,
      %c0_247 = arith.constant 0 : index
      %c0_248 = arith.constant 0 : index
      %713 = vector.load %arg10[%c0_247, %c0_248] : memref<8x128xf32, #tpu.memory_space<vmem>>, vector<8x128xf32>
      %c0_249 = arith.constant 0 : index
      %c0_250 = arith.constant 0 : index
      %714 = vector.load %arg8[%c0_249, %c0_250] : memref<8x128xf32, #tpu.memory_space<vmem>>, vector<8x128xf32>
      tpu.vector_store %arg8[%c0_249, %c0_250], %713 {strides = array<i32>} : memref<8x128xf32, #tpu.memory_space<vmem>>, vector<8x128xf32>,
    } else {
    }
    return
  }
  func.func @transform_0(%arg0: i32, %arg1: i32) -> (i32, i32, i32) {
    %c0_i32 = arith.constant 0 : i32
    %c0_i32_0 = arith.constant 0 : i32
    return %arg1, %arg0, %c0_i32 : i32, i32, i32
  }
  func.func @transform_1(%arg0: i32, %arg1: i32) -> (i32, i32) {
    %c0_i32 = arith.constant 0 : i32
    %c0_i32_0 = arith.constant 0 : i32
    return %arg0, %c0_i32 : i32, i32
  }
  func.func @transform_2(%arg0: i32, %arg1: i32) -> (i32, i32) {
    %c0_i32 = arith.constant 0 : i32
    %c0_i32_0 = arith.constant 0 : i32
    return %arg0, %c0_i32 : i32, i32
  }
  func.func @transform_4(%arg0: i32, %arg1: i32) -> (i32, i32, i32) {
    %c0_i32 = arith.constant 0 : i32
    %c0_i32_0 = arith.constant 0 : i32
    return %arg1, %arg0, %c0_i32 : i32, i32, i32
  }
  func.func @transform_5(%arg0: i32, %arg1: i32) -> (i32, i32) {
    %c0_i32 = arith.constant 0 : i32
    %c0_i32_0 = arith.constant 0 : i32
    return %arg0, %c0_i32 : i32, i32
  }
  func.func @transform_6(%arg0: i32, %arg1: i32) -> (i32, i32) {
    %c0_i32 = arith.constant 0 : i32
    %c0_i32_0 = arith.constant 0 : i32
    return %arg0, %c0_i32 : i32, i32
  }
}

</mosaic_0001>

<bundles_post_ra>
// kernel: rnn_model_forward.9
= control target key start
LH: loop header
LB: loop body
LE: loop exit
PB: predicated region body
PF: predicated region fallthrough
CT: control target
= control target key end

     0   :  { %s994_s0 = inlined_call_operand.vmem [shape: bf16[160,128], index: 0, kind: input, shape index: {}]   ;;  %s995_s1 = inlined_call_operand.vmem [shape: bf16[128,256], index: 1, kind: input, shape index: {}]   ;;  %s996_s2 = inlined_call_operand.vmem [shape: f32[1,256], index: 2, kind: input, shape index: {}]   ;;  %s997_s3 = inlined_call_operand.hbm [shape: f32[160,256], index: 3, kind: output, shape index: {}]  }
   0x1   :  { %v718_v0 = vld [vmem:[%s995_s1 + $0x70] sm:$0xf]  ;;  %v749_v1 = vld [vmem:[%s995_s1 + $0x74] sm:$0xf0]  ;;  %v748_v2 = vld [vmem:[%s995_s1 + $0x74] sm:$0xf] }
   0x2   :  { %v719_v3 = vor.u32 %v749_v1, %v718_v0  ;;  %v720_v4 = vld [vmem:[%s995_s1 + $0x78] sm:$0xf0]  ;;  %v710_v5 = vld [vmem:[%s995_s1 + $0x60] sm:$0xf]  ;;  %v747_v6 = vld [vmem:[%s995_s1 + $0x64] sm:$0xf0] }
   0x3   :  { %v723_v7 = vor.u32 %v748_v2, %v720_v4  ;;  %v746_v8 = vld [vmem:[%s995_s1 + $0x64] sm:$0xf]  ;;  %v712_v9 = vld [vmem:[%s995_s1 + $0x68] sm:$0xf0]  ;;  %v711_v10 = vor.u32 %v747_v6, %v710_v5  ;;  %v702_v12 = vld [vmem:[%s995_s1 + $0x50] sm:$0xf] }
   0x4   :  { %275 = vmatpush.bf16.msra.mxu0 %v719_v3  ;;  %750 = vmatpush.bf16.msra.mxu2 %v719_v3  ;;  %v715_v11 = vor.u32 %v746_v8, %v712_v9  ;;  %v745_v13 = vld [vmem:[%s995_s1 + $0x54] sm:$0xf0]  ;;  %v744_v14 = vld [vmem:[%s995_s1 + $0x54] sm:$0xf]  ;;  %v704_v15 = vld [vmem:[%s995_s1 + $0x58] sm:$0xf0] }
   0x5   :  { %334 = vmatpush.bf16.msra.mxu1 %v723_v7  ;;  %758 = vmatpush.bf16.msra.mxu3 %v723_v7  ;;  %v703_v16 = vor.u32 %v745_v13, %v702_v12  ;;  %v707_v17 = vor.u32 %v744_v14, %v704_v15  ;;  %v694_v18 = vld [vmem:[%s995_s1 + $0x40] sm:$0xf]  ;;  %v743_v19 = vld [vmem:[%s995_s1 + $0x44] sm:$0xf0]  ;;  %v742_v20 = vld [vmem:[%s995_s1 + $0x44] sm:$0xf] }
   0x6   :  { %v696_v21 = vld [vmem:[%s995_s1 + $0x48] sm:$0xf0]  ;;  %v695_v22 = vor.u32 %v743_v19, %v694_v18 }
   0x8   :  { %276 = vmatpush.bf16.msra.mxu0 %v711_v10  ;;  %751 = vmatpush.bf16.msra.mxu2 %v711_v10 }
   0x9   :  { %335 = vmatpush.bf16.msra.mxu1 %v715_v11  ;;  %759 = vmatpush.bf16.msra.mxu3 %v715_v11 }
   0xc   :  { %277 = vmatpush.bf16.msra.mxu0 %v703_v16  ;;  %752 = vmatpush.bf16.msra.mxu2 %v703_v16 }
   0xd   :  { %8 = vsyncpa [#allocation4], 0  ;;  %336 = vmatpush.bf16.msra.mxu1 %v707_v17  ;;  %760 = vmatpush.bf16.msra.mxu3 %v707_v17  ;;  %v699_v23 = vor.u32 %v742_v20, %v696_v21  ;;  %v686_v24 = vld [vmem:[%s995_s1 + $0x30] sm:$0xf]  ;;  %v741_v25 = vld [vmem:[%s995_s1 + $0x34] sm:$0xf0] }
   0xe   :  { %v740_v26 = vld [vmem:[%s995_s1 + $0x34] sm:$0xf]  ;;  %v688_v27 = vld [vmem:[%s995_s1 + $0x38] sm:$0xf0]  ;;  %v687_v28 = vor.u32 %v741_v25, %v686_v24  ;;  %v678_v30 = vld [vmem:[%s995_s1 + $0x20] sm:$0xf] }
   0xf   :  { %v691_v29 = vor.u32 %v740_v26, %v688_v27  ;;  %v739_v31 = vld [vmem:[%s995_s1 + $0x24] sm:$0xf0]  ;;  %v738_v32 = vld [vmem:[%s995_s1 + $0x24] sm:$0xf]  ;;  %v680_v33 = vld [vmem:[%s995_s1 + $0x28] sm:$0xf0] }
  0x10   :  { %278 = vmatpush.bf16.msra.mxu0 %v695_v22  ;;  %753 = vmatpush.bf16.msra.mxu2 %v695_v22  ;;  %v679_v34 = vor.u32 %v739_v31, %v678_v30  ;;  %v683_v35 = vor.u32 %v738_v32, %v680_v33  ;;  %v670_v36 = vld [vmem:[%s995_s1 + $0x10] sm:$0xf]  ;;  %v737_v37 = vld [vmem:[%s995_s1 + $0x14] sm:$0xf0]  ;;  %v736_v38 = vld [vmem:[%s995_s1 + $0x14] sm:$0xf] }
  0x11   :  { %337 = vmatpush.bf16.msra.mxu1 %v699_v23  ;;  %761 = vmatpush.bf16.msra.mxu3 %v699_v23  ;;  %v672_v39 = vld [vmem:[%s995_s1 + $0x18] sm:$0xf0]  ;;  %v671_v40 = vor.u32 %v737_v37, %v670_v36  ;;  %v662_v42 = vld [vmem:[%s995_s1] sm:$0xf]  ;;  %v735_v43 = vld [vmem:[%s995_s1 + $0x4] sm:$0xf0] }
  0x12   :  { %v675_v41 = vor.u32 %v736_v38, %v672_v39  ;;  %v734_v44 = vld [vmem:[%s995_s1 + $0x4] sm:$0xf]  ;;  %v664_v45 = vld [vmem:[%s995_s1 + $0x8] sm:$0xf0]  ;;  %v663_v46 = vor.u32 %v735_v43, %v662_v42  ;;  %v730_v51 = vld [vmem:[%s994_s0 + $0x30] sm:$0xff]  ;;  %s608_s18 = sshll.u32 %s997_s3, 4  ;;  %s609_s18 = int_to_ptr.hbm [resolvable:$true] %s608_s18 }
  0x13   :  { %v667_v47 = vor.u32 %v734_v44, %v664_v45  ;;  %v724_v48 = vld [vmem:[%s994_s0] sm:$0xff]  ;;  %v729_v49 = vld [vmem:[%s994_s0 + $0x28] sm:$0xff]  ;;  %v726_v52 = vld [vmem:[%s994_s0 + $0x10] sm:$0xff]  ;;  %s796_s19 = smov 256   ;;  %s797_s20 = smov 16  }
  0x14   :  { %279 = vmatpush.bf16.msra.mxu0 %v687_v28  ;;  %754 = vmatpush.bf16.msra.mxu2 %v687_v28  ;;  %v725_v50 = vld [vmem:[%s994_s0 + $0x8] sm:$0xff]  ;;  %v731_v53 = vld [vmem:[%s994_s0 + $0x38] sm:$0xff]  ;;  %v732_v55 = vld [vmem:[%s994_s0 + $0x40] sm:$0xff] }
  0x15   :  { %338 = vmatpush.bf16.msra.mxu1 %v691_v29  ;;  %762 = vmatpush.bf16.msra.mxu3 %v691_v29  ;;  %v727_v54 = vld [vmem:[%s994_s0 + $0x18] sm:$0xff]  ;;  %v728_v56 = vld [vmem:[%s994_s0 + $0x20] sm:$0xff]  ;;  %v733_v57 = vld [vmem:[%s994_s0 + $0x48] sm:$0xff]  ;;  %s795_s0 = smov [#allocation3]  }
  0x16   :  { %v516_v58 = vld [vmem:[%s996_s2] sm:$0x3]  ;;  %s606_s2 = sshll.u32 %s795_s0, 4  ;;  %s607_s2 = int_to_ptr.vmem [resolvable:$true] %s606_s2 }
  0x17   :  { %v947_v59 = vperm.slane %v516_v58, 0  ;;  %v949_v60 = vperm.slane %v516_v58, 1 }
  0x18   :  { %280 = vmatpush.bf16.msra.mxu0 %v679_v34  ;;  %755 = vmatpush.bf16.msra.mxu2 %v679_v34 }
  0x19   :  { %339 = vmatpush.bf16.msra.mxu1 %v683_v35  ;;  %763 = vmatpush.bf16.msra.mxu3 %v683_v35 }
  0x1c   :  { %281 = vmatpush.bf16.msra.mxu0 %v671_v40  ;;  %756 = vmatpush.bf16.msra.mxu2 %v671_v40 }
  0x1d   :  { %340 = vmatpush.bf16.msra.mxu1 %v675_v41  ;;  %764 = vmatpush.bf16.msra.mxu3 %v675_v41 }
  0x20   :  { %282 = vmatpush.bf16.msra.mxu0 %v663_v46  ;;  %757 = vmatpush.bf16.msra.mxu2 %v663_v46 }
  0x21   :  { %341 = vmatpush.bf16.msra.mxu1 %v667_v47  ;;  %765 = vmatpush.bf16.msra.mxu3 %v667_v47 }
  0x23   :  { %283 = vmatmul.bf16.vlgmr.msra.gmra.mxu0 %v724_v48  ;;  %308 = vmatmul.bf16.vlgmr.msra.gmra.mxu2 %v729_v49 }
  0x24   :  { %342 = vmatmul.bf16.vlgmr.msra.gmra.mxu1 %v724_v48  ;;  %367 = vmatmul.bf16.vlgmr.msra.gmra.mxu3 %v729_v49 }
  0x33   :  { %288 = vmatmul.bf16.gmra.mxu0 %v725_v50  ;;  %313 = vmatmul.bf16.gmra.mxu2 %v730_v51 }
  0x34   :  { %347 = vmatmul.bf16.gmra.mxu1 %v725_v50  ;;  %372 = vmatmul.bf16.gmra.mxu3 %v730_v51 }
  0x43   :  { %293 = vmatmul.bf16.gmra.mxu0 %v726_v52  ;;  %318 = vmatmul.bf16.gmra.mxu2 %v731_v53 }
  0x44   :  { %352 = vmatmul.bf16.gmra.mxu1 %v726_v52  ;;  %377 = vmatmul.bf16.gmra.mxu3 %v731_v53 }
  0x53   :  { %298 = vmatmul.bf16.gmra.mxu0 %v727_v54  ;;  %323 = vmatmul.bf16.gmra.mxu2 %v732_v55 }
  0x54   :  { %357 = vmatmul.bf16.gmra.mxu1 %v727_v54  ;;  %382 = vmatmul.bf16.gmra.mxu3 %v732_v55 }
  0x63   :  { %303 = vmatmul.bf16.gmra.mxu0 %v728_v56  ;;  %328 = vmatmul.bf16.gmra.mxu2 %v733_v57 }
  0x64   :  { %362 = vmatmul.bf16.gmra.mxu1 %v728_v56  ;;  %387 = vmatmul.bf16.gmra.mxu3 %v733_v57 }
  0xa0   :  { %v284_v61 = vpop.f32.mrf.mxu0 }
  0xa1   :  { %v522_v62 = vadd.f32 %v947_v59, %v284_v61  ;;  %v343_v63 = vpop.f32.mrf.mxu1 }
  0xa2   :  { %v523_v0 = vadd.f32 %v949_v60, %v343_v63 }
  0xa3   :  { %562 = vst [vmem:[#allocation3] sm:$0xff] %v522_v62 }
  0xa4   :  { %563 = vst [vmem:[#allocation3 + $0x8] sm:$0xff] %v523_v0 }
  0xa6   :  { %v309_v1 = vpop.f32.mrf.mxu2 }
  0xa7   :  { %v542_v2 = vadd.f32 %v947_v59, %v309_v1  ;;  %v368_v3 = vpop.f32.mrf.mxu3 }
  0xa8   :  { %v543_v4 = vadd.f32 %v949_v60, %v368_v3  ;;  %v286_v5 = vpop.f32.mrf.mxu0 }
  0xa9   :  { %582 = vst [vmem:[#allocation3 + $0xa0] sm:$0xff] %v542_v2  ;;  %v524_v6 = vadd.f32 %v947_v59, %v286_v5  ;;  %v345_v7 = vpop.f32.mrf.mxu1 }
  0xaa   :  { %583 = vst [vmem:[#allocation3 + $0xa8] sm:$0xff] %v543_v4  ;;  %v525_v8 = vadd.f32 %v949_v60, %v345_v7 }
  0xab   :  { %564 = vst [vmem:[#allocation3 + $0x10] sm:$0xff] %v524_v6 }
  0xac   :  { %565 = vst [vmem:[#allocation3 + $0x18] sm:$0xff] %v525_v8 }
  0xae   :  { %v311_v9 = vpop.f32.mrf.mxu2 }
  0xaf   :  { %v544_v10 = vadd.f32 %v947_v59, %v311_v9  ;;  %v370_v11 = vpop.f32.mrf.mxu3 }
  0xb0   :  { %v545_v12 = vadd.f32 %v949_v60, %v370_v11  ;;  %v289_v13 = vpop.f32.mrf.mxu0 }
  0xb1   :  { %584 = vst [vmem:[#allocation3 + $0xb0] sm:$0xff] %v544_v10  ;;  %v526_v14 = vadd.f32 %v947_v59, %v289_v13  ;;  %v348_v15 = vpop.f32.mrf.mxu1 }
  0xb2   :  { %585 = vst [vmem:[#allocation3 + $0xb8] sm:$0xff] %v545_v12  ;;  %v527_v16 = vadd.f32 %v949_v60, %v348_v15 }
  0xb3   :  { %566 = vst [vmem:[#allocation3 + $0x20] sm:$0xff] %v526_v14 }
  0xb4   :  { %567 = vst [vmem:[#allocation3 + $0x28] sm:$0xff] %v527_v16 }
  0xb6   :  { %v314_v17 = vpop.f32.mrf.mxu2 }
  0xb7   :  { %v546_v18 = vadd.f32 %v947_v59, %v314_v17  ;;  %v373_v19 = vpop.f32.mrf.mxu3 }
  0xb8   :  { %v547_v20 = vadd.f32 %v949_v60, %v373_v19  ;;  %v291_v21 = vpop.f32.mrf.mxu0 }
  0xb9   :  { %586 = vst [vmem:[#allocation3 + $0xc0] sm:$0xff] %v546_v18  ;;  %v528_v22 = vadd.f32 %v947_v59, %v291_v21  ;;  %v350_v23 = vpop.f32.mrf.mxu1 }
  0xba   :  { %587 = vst [vmem:[#allocation3 + $0xc8] sm:$0xff] %v547_v20  ;;  %v529_v24 = vadd.f32 %v949_v60, %v350_v23 }
  0xbb   :  { %568 = vst [vmem:[#allocation3 + $0x30] sm:$0xff] %v528_v22 }
  0xbc   :  { %569 = vst [vmem:[#allocation3 + $0x38] sm:$0xff] %v529_v24 }
  0xbe   :  { %v316_v25 = vpop.f32.mrf.mxu2 }
  0xbf   :  { %v548_v26 = vadd.f32 %v947_v59, %v316_v25  ;;  %v375_v27 = vpop.f32.mrf.mxu3 }
  0xc0   :  { %v549_v28 = vadd.f32 %v949_v60, %v375_v27  ;;  %v294_v29 = vpop.f32.mrf.mxu0 }
  0xc1   :  { %588 = vst [vmem:[#allocation3 + $0xd0] sm:$0xff] %v548_v26  ;;  %v530_v30 = vadd.f32 %v947_v59, %v294_v29  ;;  %v353_v31 = vpop.f32.mrf.mxu1 }
  0xc2   :  { %589 = vst [vmem:[#allocation3 + $0xd8] sm:$0xff] %v549_v28  ;;  %v531_v32 = vadd.f32 %v949_v60, %v353_v31 }
  0xc3   :  { %570 = vst [vmem:[#allocation3 + $0x40] sm:$0xff] %v530_v30 }
  0xc4   :  { %571 = vst [vmem:[#allocation3 + $0x48] sm:$0xff] %v531_v32 }
  0xc6   :  { %v319_v33 = vpop.f32.mrf.mxu2 }
  0xc7   :  { %v550_v34 = vadd.f32 %v947_v59, %v319_v33  ;;  %v378_v35 = vpop.f32.mrf.mxu3 }
  0xc8   :  { %v551_v36 = vadd.f32 %v949_v60, %v378_v35  ;;  %v296_v37 = vpop.f32.mrf.mxu0 }
  0xc9   :  { %590 = vst [vmem:[#allocation3 + $0xe0] sm:$0xff] %v550_v34  ;;  %v532_v38 = vadd.f32 %v947_v59, %v296_v37  ;;  %v355_v39 = vpop.f32.mrf.mxu1 }
  0xca   :  { %591 = vst [vmem:[#allocation3 + $0xe8] sm:$0xff] %v551_v36  ;;  %v533_v40 = vadd.f32 %v949_v60, %v355_v39 }
  0xcb   :  { %572 = vst [vmem:[#allocation3 + $0x50] sm:$0xff] %v532_v38 }
  0xcc   :  { %573 = vst [vmem:[#allocation3 + $0x58] sm:$0xff] %v533_v40 }
  0xce   :  { %v321_v41 = vpop.f32.mrf.mxu2 }
  0xcf   :  { %v552_v42 = vadd.f32 %v947_v59, %v321_v41  ;;  %v380_v43 = vpop.f32.mrf.mxu3 }
  0xd0   :  { %v553_v44 = vadd.f32 %v949_v60, %v380_v43  ;;  %v299_v45 = vpop.f32.mrf.mxu0 }
  0xd1   :  { %592 = vst [vmem:[#allocation3 + $0xf0] sm:$0xff] %v552_v42  ;;  %v534_v46 = vadd.f32 %v947_v59, %v299_v45  ;;  %v358_v47 = vpop.f32.mrf.mxu1 }
  0xd2   :  { %593 = vst [vmem:[#allocation3 + $0xf8] sm:$0xff] %v553_v44  ;;  %v535_v48 = vadd.f32 %v949_v60, %v358_v47 }
  0xd3   :  { %574 = vst [vmem:[#allocation3 + $0x60] sm:$0xff] %v534_v46 }
  0xd4   :  { %575 = vst [vmem:[#allocation3 + $0x68] sm:$0xff] %v535_v48 }
  0xd6   :  { %v324_v49 = vpop.f32.mrf.mxu2 }
  0xd7   :  { %v554_v50 = vadd.f32 %v947_v59, %v324_v49  ;;  %v383_v51 = vpop.f32.mrf.mxu3 }
  0xd8   :  { %v555_v52 = vadd.f32 %v949_v60, %v383_v51  ;;  %v301_v53 = vpop.f32.mrf.mxu0 }
  0xd9   :  { %594 = vst [vmem:[#allocation3 + $0x100] sm:$0xff] %v554_v50  ;;  %v536_v54 = vadd.f32 %v947_v59, %v301_v53  ;;  %v360_v55 = vpop.f32.mrf.mxu1 }
  0xda   :  { %595 = vst [vmem:[#allocation3 + $0x108] sm:$0xff] %v555_v52  ;;  %v537_v56 = vadd.f32 %v949_v60, %v360_v55 }
  0xdb   :  { %576 = vst [vmem:[#allocation3 + $0x70] sm:$0xff] %v536_v54 }
  0xdc   :  { %577 = vst [vmem:[#allocation3 + $0x78] sm:$0xff] %v537_v56 }
  0xde   :  { %v326_v57 = vpop.f32.mrf.mxu2 }
  0xdf   :  { %v556_v58 = vadd.f32 %v947_v59, %v326_v57  ;;  %v385_v61 = vpop.f32.mrf.mxu3 }
  0xe0   :  { %v557_v62 = vadd.f32 %v949_v60, %v385_v61  ;;  %v304_v63 = vpop.f32.mrf.mxu0 }
  0xe1   :  { %596 = vst [vmem:[#allocation3 + $0x110] sm:$0xff] %v556_v58  ;;  %v538_v0 = vadd.f32 %v947_v59, %v304_v63  ;;  %v363_v1 = vpop.f32.mrf.mxu1 }
  0xe2   :  { %597 = vst [vmem:[#allocation3 + $0x118] sm:$0xff] %v557_v62  ;;  %v539_v2 = vadd.f32 %v949_v60, %v363_v1 }
  0xe3   :  { %578 = vst [vmem:[#allocation3 + $0x80] sm:$0xff] %v538_v0 }
  0xe4   :  { %579 = vst [vmem:[#allocation3 + $0x88] sm:$0xff] %v539_v2 }
  0xe6   :  { %v329_v3 = vpop.f32.mrf.mxu2 }
  0xe7   :  { %v558_v4 = vadd.f32 %v947_v59, %v329_v3  ;;  %v388_v5 = vpop.f32.mrf.mxu3 }
  0xe8   :  { %v559_v6 = vadd.f32 %v949_v60, %v388_v5  ;;  %v306_v7 = vpop.f32.mrf.mxu0 }
  0xe9   :  { %598 = vst [vmem:[#allocation3 + $0x120] sm:$0xff] %v558_v4  ;;  %v540_v8 = vadd.f32 %v947_v59, %v306_v7  ;;  %v365_v9 = vpop.f32.mrf.mxu1 }
  0xea   :  { %599 = vst [vmem:[#allocation3 + $0x128] sm:$0xff] %v559_v6  ;;  %v541_v10 = vadd.f32 %v949_v60, %v365_v9 }
  0xeb   :  { %580 = vst [vmem:[#allocation3 + $0x90] sm:$0xff] %v540_v8 }
  0xec   :  { %581 = vst [vmem:[#allocation3 + $0x98] sm:$0xff] %v541_v10 }
  0xee   :  { %v331_v11 = vpop.f32.mrf.mxu2 }
  0xef   :  { %v560_v12 = vadd.f32 %v947_v59, %v331_v11  ;;  %v390_v13 = vpop.f32.mrf.mxu3 }
  0xf0   :  { %v561_v14 = vadd.f32 %v949_v60, %v390_v13 }
  0xf1   :  { %600 = vst [vmem:[#allocation3 + $0x130] sm:$0xff] %v560_v12 }
  0xf2   :  { %601 = vst [vmem:[#allocation3 + $0x138] sm:$0xff] %v561_v14 }
  0xf3   :  { %614 = dma.vmem_to_hbm [thread:$0]  %s607_s2, 5120, %s609_s18, [#allocation4], %s796_s19, %s796_s19, %s797_s20  }
  0xf4   :  { %793 = dma.done.wait [#allocation4], 5120  }
  0xf5   :  { %794 = vsyncadd [#allocation4], 4294962176 }
  0xf6   :  { %619 = vsyncpa [#allocation4], 1 }

// kernel: rnn_model_forward.5
= control target key start
LH: loop header
LB: loop body
LE: loop exit
PB: predicated region body
PF: predicated region fallthrough
CT: control target
= control target key end

     0   :  { %s2438_s1 = inlined_call_operand.vmem [shape: bf16[128,512], index: 1, kind: input, shape index: {}]   ;;  %s2439_s0 = inlined_call_operand.vmem [shape: bf16[256,128], index: 0, kind: input, shape index: {}]   ;;  %s2440_s2 = inlined_call_operand.vmem [shape: f32[1,512], index: 2, kind: input, shape index: {}]   ;;  %s2441_s3 = inlined_call_operand.vmem [shape: bf16[256,512], index: 3, kind: output, shape index: {}]  }
   0x1   :  { %v1785_v0 = vld [vmem:[%s2438_s1 + $0xe0] sm:$0xf]  ;;  %v1845_v1 = vld [vmem:[%s2438_s1 + $0xec] sm:$0xf0]  ;;  %v1843_v2 = vld [vmem:[%s2438_s1 + $0xe4] sm:$0xf] }
   0x2   :  { %v1786_v3 = vor.u32 %v1845_v1, %v1785_v0  ;;  %v1787_v4 = vld [vmem:[%s2438_s1 + $0xf0] sm:$0xf0]  ;;  %v1793_v5 = vld [vmem:[%s2438_s1 + $0xe8] sm:$0xf]  ;;  %v1846_v6 = vld [vmem:[%s2438_s1 + $0xf4] sm:$0xf0] }
   0x3   :  { %v1790_v7 = vor.u32 %v1843_v2, %v1787_v4  ;;  %v1794_v8 = vor.u32 %v1846_v6, %v1793_v5  ;;  %v1844_v9 = vld [vmem:[%s2438_s1 + $0xec] sm:$0xf]  ;;  %v1795_v10 = vld [vmem:[%s2438_s1 + $0xf8] sm:$0xf0]  ;;  %v1769_v11 = vld [vmem:[%s2438_s1 + $0xc0] sm:$0xf] }
   0x4   :  { %594 = vmatpush.bf16.msra.mxu0 %v1786_v3  ;;  %v1798_v12 = vor.u32 %v1844_v9, %v1795_v10  ;;  %v1841_v13 = vld [vmem:[%s2438_s1 + $0xcc] sm:$0xf0]  ;;  %v1839_v14 = vld [vmem:[%s2438_s1 + $0xc4] sm:$0xf]  ;;  %v1771_v15 = vld [vmem:[%s2438_s1 + $0xd0] sm:$0xf0] }
   0x5   :  { %683 = vmatpush.bf16.msra.mxu1 %v1790_v7  ;;  %772 = vmatpush.bf16.msra.mxu2 %v1794_v8  ;;  %v1770_v16 = vor.u32 %v1841_v13, %v1769_v11  ;;  %v1774_v17 = vor.u32 %v1839_v14, %v1771_v15  ;;  %v1777_v18 = vld [vmem:[%s2438_s1 + $0xc8] sm:$0xf]  ;;  %v1842_v19 = vld [vmem:[%s2438_s1 + $0xd4] sm:$0xf0]  ;;  %v1840_v20 = vld [vmem:[%s2438_s1 + $0xcc] sm:$0xf] }
   0x6   :  { %861 = vmatpush.bf16.msra.mxu3 %v1798_v12  ;;  %v1778_v21 = vor.u32 %v1842_v19, %v1777_v18  ;;  %v1779_v22 = vld [vmem:[%s2438_s1 + $0xd8] sm:$0xf0]  ;;  %v1753_v23 = vld [vmem:[%s2438_s1 + $0xa0] sm:$0xf]  ;;  %v1837_v24 = vld [vmem:[%s2438_s1 + $0xac] sm:$0xf0] }
   0x7   :  { %v1782_v25 = vor.u32 %v1840_v20, %v1779_v22  ;;  %v1835_v26 = vld [vmem:[%s2438_s1 + $0xa4] sm:$0xf]  ;;  %v1755_v27 = vld [vmem:[%s2438_s1 + $0xb0] sm:$0xf0]  ;;  %v1761_v28 = vld [vmem:[%s2438_s1 + $0xa8] sm:$0xf]  ;;  %v1754_v29 = vor.u32 %v1837_v24, %v1753_v23 }
   0x8   :  { %595 = vmatpush.bf16.msra.mxu0 %v1770_v16  ;;  %v1838_v30 = vld [vmem:[%s2438_s1 + $0xb4] sm:$0xf0]  ;;  %v1836_v31 = vld [vmem:[%s2438_s1 + $0xac] sm:$0xf]  ;;  %v1763_v32 = vld [vmem:[%s2438_s1 + $0xb8] sm:$0xf0]  ;;  %v1758_v33 = vor.u32 %v1835_v26, %v1755_v27 }
   0x9   :  { %684 = vmatpush.bf16.msra.mxu1 %v1774_v17  ;;  %773 = vmatpush.bf16.msra.mxu2 %v1778_v21  ;;  %v1762_v34 = vor.u32 %v1838_v30, %v1761_v28  ;;  %v1737_v35 = vld [vmem:[%s2438_s1 + $0x80] sm:$0xf]  ;;  %v1833_v36 = vld [vmem:[%s2438_s1 + $0x8c] sm:$0xf0]  ;;  %v1831_v37 = vld [vmem:[%s2438_s1 + $0x84] sm:$0xf]  ;;  %v1766_v38 = vor.u32 %v1836_v31, %v1763_v32 }
   0xa   :  { %862 = vmatpush.bf16.msra.mxu3 %v1782_v25  ;;  %v1739_v39 = vld [vmem:[%s2438_s1 + $0x90] sm:$0xf0]  ;;  %v1745_v40 = vld [vmem:[%s2438_s1 + $0x88] sm:$0xf]  ;;  %v1834_v41 = vld [vmem:[%s2438_s1 + $0x94] sm:$0xf0]  ;;  %v1738_v44 = vor.u32 %v1833_v36, %v1737_v35 }
   0xb   :  { %v1832_v42 = vld [vmem:[%s2438_s1 + $0x8c] sm:$0xf]  ;;  %v1747_v43 = vld [vmem:[%s2438_s1 + $0x98] sm:$0xf0]  ;;  %v1742_v45 = vor.u32 %v1831_v37, %v1739_v39  ;;  %v1746_v46 = vor.u32 %v1834_v41, %v1745_v40  ;;  %v1721_v47 = vld [vmem:[%s2438_s1 + $0x60] sm:$0xf] }
   0xc   :  { %596 = vmatpush.bf16.msra.mxu0 %v1754_v29  ;;  %v1829_v48 = vld [vmem:[%s2438_s1 + $0x6c] sm:$0xf0]  ;;  %v1827_v49 = vld [vmem:[%s2438_s1 + $0x64] sm:$0xf]  ;;  %v1750_v50 = vor.u32 %v1832_v42, %v1747_v43  ;;  %v1723_v51 = vld [vmem:[%s2438_s1 + $0x70] sm:$0xf0] }
   0xd   :  { %685 = vmatpush.bf16.msra.mxu1 %v1758_v33  ;;  %774 = vmatpush.bf16.msra.mxu2 %v1762_v34  ;;  %v1729_v52 = vld [vmem:[%s2438_s1 + $0x68] sm:$0xf]  ;;  %v1830_v53 = vld [vmem:[%s2438_s1 + $0x74] sm:$0xf0]  ;;  %v1828_v54 = vld [vmem:[%s2438_s1 + $0x6c] sm:$0xf]  ;;  %v1722_v56 = vor.u32 %v1829_v48, %v1721_v47  ;;  %v1726_v57 = vor.u32 %v1827_v49, %v1723_v51 }
   0xe   :  { %863 = vmatpush.bf16.msra.mxu3 %v1766_v38  ;;  %v1731_v55 = vld [vmem:[%s2438_s1 + $0x78] sm:$0xf0]  ;;  %v1730_v58 = vor.u32 %v1830_v53, %v1729_v52  ;;  %v1705_v59 = vld [vmem:[%s2438_s1 + $0x40] sm:$0xf]  ;;  %v1825_v60 = vld [vmem:[%s2438_s1 + $0x4c] sm:$0xf0] }
   0xf   :  { %v1823_v61 = vld [vmem:[%s2438_s1 + $0x44] sm:$0xf]  ;;  %v1734_v62 = vor.u32 %v1828_v54, %v1731_v55  ;;  %v1707_v63 = vld [vmem:[%s2438_s1 + $0x50] sm:$0xf0]  ;;  %v1713_v0 = vld [vmem:[%s2438_s1 + $0x48] sm:$0xf]  ;;  %v1706_v4 = vor.u32 %v1825_v60, %v1705_v59 }
  0x10   :  { %597 = vmatpush.bf16.msra.mxu0 %v1738_v44  ;;  %v1826_v1 = vld [vmem:[%s2438_s1 + $0x54] sm:$0xf0]  ;;  %v1824_v2 = vld [vmem:[%s2438_s1 + $0x4c] sm:$0xf]  ;;  %v1715_v3 = vld [vmem:[%s2438_s1 + $0x58] sm:$0xf0]  ;;  %v1710_v5 = vor.u32 %v1823_v61, %v1707_v63 }
  0x11   :  { %686 = vmatpush.bf16.msra.mxu1 %v1742_v45  ;;  %775 = vmatpush.bf16.msra.mxu2 %v1746_v46  ;;  %v1714_v6 = vor.u32 %v1826_v1, %v1713_v0  ;;  %v1689_v7 = vld [vmem:[%s2438_s1 + $0x20] sm:$0xf]  ;;  %v1821_v8 = vld [vmem:[%s2438_s1 + $0x2c] sm:$0xf0]  ;;  %v1819_v9 = vld [vmem:[%s2438_s1 + $0x24] sm:$0xf]  ;;  %v1718_v10 = vor.u32 %v1824_v2, %v1715_v3 }
  0x12   :  { %864 = vmatpush.bf16.msra.mxu3 %v1750_v50  ;;  %v1691_v11 = vld [vmem:[%s2438_s1 + $0x30] sm:$0xf0]  ;;  %v1697_v12 = vld [vmem:[%s2438_s1 + $0x28] sm:$0xf]  ;;  %v1822_v13 = vld [vmem:[%s2438_s1 + $0x34] sm:$0xf0]  ;;  %v1690_v16 = vor.u32 %v1821_v8, %v1689_v7 }
  0x13   :  { %v1820_v14 = vld [vmem:[%s2438_s1 + $0x2c] sm:$0xf]  ;;  %v1699_v15 = vld [vmem:[%s2438_s1 + $0x38] sm:$0xf0]  ;;  %v1694_v17 = vor.u32 %v1819_v9, %v1691_v11  ;;  %v1698_v18 = vor.u32 %v1822_v13, %v1697_v12  ;;  %v1673_v19 = vld [vmem:[%s2438_s1] sm:$0xf] }
  0x14   :  { %598 = vmatpush.bf16.msra.mxu0 %v1722_v56  ;;  %v1817_v20 = vld [vmem:[%s2438_s1 + $0xc] sm:$0xf0]  ;;  %v1815_v21 = vld [vmem:[%s2438_s1 + $0x4] sm:$0xf]  ;;  %v1702_v22 = vor.u32 %v1820_v14, %v1699_v15  ;;  %v1675_v23 = vld [vmem:[%s2438_s1 + $0x10] sm:$0xf0] }
  0x15   :  { %687 = vmatpush.bf16.msra.mxu1 %v1726_v57  ;;  %776 = vmatpush.bf16.msra.mxu2 %v1730_v58  ;;  %v1681_v24 = vld [vmem:[%s2438_s1 + $0x8] sm:$0xf]  ;;  %v1818_v25 = vld [vmem:[%s2438_s1 + $0x14] sm:$0xf0]  ;;  %v1816_v26 = vld [vmem:[%s2438_s1 + $0xc] sm:$0xf]  ;;  %v1674_v28 = vor.u32 %v1817_v20, %v1673_v19  ;;  %v1678_v29 = vor.u32 %v1815_v21, %v1675_v23 }
  0x16   :  { %865 = vmatpush.bf16.msra.mxu3 %v1734_v62  ;;  %v1683_v27 = vld [vmem:[%s2438_s1 + $0x18] sm:$0xf0]  ;;  %v1682_v30 = vor.u32 %v1818_v25, %v1681_v24  ;;  %v1799_v32 = vld [vmem:[%s2439_s0] sm:$0xff]  ;;  %v1800_v33 = vld [vmem:[%s2439_s0 + $0x8] sm:$0xff] }
  0x17   :  { %v1686_v31 = vor.u32 %v1816_v26, %v1683_v27  ;;  %v1801_v34 = vld [vmem:[%s2439_s0 + $0x10] sm:$0xff]  ;;  %v1802_v35 = vld [vmem:[%s2439_s0 + $0x18] sm:$0xff]  ;;  %v1803_v36 = vld [vmem:[%s2439_s0 + $0x20] sm:$0xff] }
  0x18   :  { %599 = vmatpush.bf16.msra.mxu0 %v1706_v4  ;;  %v1804_v37 = vld [vmem:[%s2439_s0 + $0x28] sm:$0xff]  ;;  %v1805_v38 = vld [vmem:[%s2439_s0 + $0x30] sm:$0xff]  ;;  %v1806_v39 = vld [vmem:[%s2439_s0 + $0x38] sm:$0xff] }
  0x19   :  { %688 = vmatpush.bf16.msra.mxu1 %v1710_v5  ;;  %777 = vmatpush.bf16.msra.mxu2 %v1714_v6  ;;  %v1337_v40 = vld [vmem:[%s2440_s2] sm:$0xf]  ;;  %v1808_v62 = vld [vmem:[%s2439_s0 + $0x48] sm:$0xff]  ;;  %v1809_v19 = vld [vmem:[%s2439_s0 + $0x50] sm:$0xff] }
  0x1a   :  { %866 = vmatpush.bf16.msra.mxu3 %v1718_v10  ;;  %v2086_v41 = vperm.slane %v1337_v40, 0  ;;  %v2088_v42 = vperm.slane %v1337_v40, 1  ;;  %v1807_v43 = vld [vmem:[%s2439_s0 + $0x40] sm:$0xff]  ;;  %v2095_v49 = vperm.slane %v1337_v40, 2  ;;  %v2097_v50 = vperm.slane %v1337_v40, 3  ;;  %v1810_v40 = vld [vmem:[%s2439_s0 + $0x58] sm:$0xff] }
  0x1c   :  { %600 = vmatpush.bf16.msra.mxu0 %v1690_v16 }
  0x1d   :  { %689 = vmatpush.bf16.msra.mxu1 %v1694_v17  ;;  %778 = vmatpush.bf16.msra.mxu2 %v1698_v18 }
  0x1e   :  { %867 = vmatpush.bf16.msra.mxu3 %v1702_v22 }
  0x20   :  { %601 = vmatpush.bf16.msra.mxu0 %v1674_v28 }
  0x21   :  { %690 = vmatpush.bf16.msra.mxu1 %v1678_v29  ;;  %779 = vmatpush.bf16.msra.mxu2 %v1682_v30 }
  0x22   :  { %868 = vmatpush.bf16.msra.mxu3 %v1686_v31 }
  0x23   :  { %602 = vmatmul.bf16.vlgmr.msra.gmra.mxu0 %v1799_v32 }
  0x24   :  { %691 = vmatmul.bf16.vlgmr.msra.gmra.mxu1 %v1799_v32  ;;  %780 = vmatmul.bf16.vlgmr.msra.gmra.mxu2 %v1799_v32 }
  0x25   :  { %869 = vmatmul.bf16.vlgmr.msra.gmra.mxu3 %v1799_v32 }
  0x33   :  { %607 = vmatmul.bf16.gmra.mxu0 %v1800_v33 }
  0x34   :  { %696 = vmatmul.bf16.gmra.mxu1 %v1800_v33  ;;  %785 = vmatmul.bf16.gmra.mxu2 %v1800_v33 }
  0x35   :  { %874 = vmatmul.bf16.gmra.mxu3 %v1800_v33 }
  0x43   :  { %612 = vmatmul.bf16.gmra.mxu0 %v1801_v34 }
  0x44   :  { %701 = vmatmul.bf16.gmra.mxu1 %v1801_v34  ;;  %790 = vmatmul.bf16.gmra.mxu2 %v1801_v34 }
  0x45   :  { %879 = vmatmul.bf16.gmra.mxu3 %v1801_v34 }
  0x53   :  { %617 = vmatmul.bf16.gmra.mxu0 %v1802_v35 }
  0x54   :  { %706 = vmatmul.bf16.gmra.mxu1 %v1802_v35  ;;  %795 = vmatmul.bf16.gmra.mxu2 %v1802_v35 }
  0x55   :  { %884 = vmatmul.bf16.gmra.mxu3 %v1802_v35 }
  0x63   :  { %622 = vmatmul.bf16.gmra.mxu0 %v1803_v36 }
  0x64   :  { %711 = vmatmul.bf16.gmra.mxu1 %v1803_v36  ;;  %800 = vmatmul.bf16.gmra.mxu2 %v1803_v36 }
  0x65   :  { %889 = vmatmul.bf16.gmra.mxu3 %v1803_v36 }
  0x73   :  { %627 = vmatmul.bf16.gmra.mxu0 %v1804_v37 }
  0x74   :  { %716 = vmatmul.bf16.gmra.mxu1 %v1804_v37  ;;  %805 = vmatmul.bf16.gmra.mxu2 %v1804_v37 }
  0x75   :  { %894 = vmatmul.bf16.gmra.mxu3 %v1804_v37 }
  0x83   :  { %632 = vmatmul.bf16.gmra.mxu0 %v1805_v38 }
  0x84   :  { %721 = vmatmul.bf16.gmra.mxu1 %v1805_v38  ;;  %810 = vmatmul.bf16.gmra.mxu2 %v1805_v38 }
  0x85   :  { %899 = vmatmul.bf16.gmra.mxu3 %v1805_v38 }
  0x93   :  { %637 = vmatmul.bf16.gmra.mxu0 %v1806_v39 }
  0x94   :  { %726 = vmatmul.bf16.gmra.mxu1 %v1806_v39  ;;  %815 = vmatmul.bf16.gmra.mxu2 %v1806_v39 }
  0x95   :  { %904 = vmatmul.bf16.gmra.mxu3 %v1806_v39 }
  0xa0   :  { %v603_v44 = vpop.f32.mrf.mxu0 }
  0xa1   :  { %v1347_v45 = vadd.f32 %v2086_v41, %v603_v44  ;;  %v692_v46 = vpop.f32.mrf.mxu1 }
  0xa2   :  { %v1348_v47 = vadd.f32 %v2088_v42, %v692_v46 }
  0xa3   :  { %642 = vmatmul.bf16.gmra.mxu0 %v1807_v43 }
  0xa4   :  { %v1475_v48 = vpack.c.bf16 %v1348_v47, %v1347_v45  ;;  %731 = vmatmul.bf16.gmra.mxu1 %v1807_v43  ;;  %820 = vmatmul.bf16.gmra.mxu2 %v1807_v43 }
  0xa5   :  { %909 = vmatmul.bf16.gmra.mxu3 %v1807_v43 }
  0xa6   :  { %1539 = vst [vmem:[%s2441_s3] sm:$0xff] %v1475_v48 }
  0xa7   :  { %v781_v51 = vpop.f32.mrf.mxu2 }
  0xa8   :  { %v1349_v52 = vadd.f32 %v2095_v49, %v781_v51  ;;  %v870_v53 = vpop.f32.mrf.mxu3  ;;  %v605_v54 = vpop.f32.mrf.mxu0 }
  0xa9   :  { %v1350_v55 = vadd.f32 %v2097_v50, %v870_v53  ;;  %v1351_v56 = vadd.f32 %v2086_v41, %v605_v54  ;;  %v694_v57 = vpop.f32.mrf.mxu1 }
  0xaa   :  { %v1352_v58 = vadd.f32 %v2088_v42, %v694_v57 }
  0xab   :  { %v1476_v59 = vpack.c.bf16 %v1350_v55, %v1349_v52 }
  0xac   :  { %v1477_v60 = vpack.c.bf16 %v1352_v58, %v1351_v56 }
  0xad   :  { %1540 = vst [vmem:[%s2441_s3 + $0x8] sm:$0xff] %v1476_v59 }
  0xae   :  { %1541 = vst [vmem:[%s2441_s3 + $0x10] sm:$0xff] %v1477_v60 }
  0xaf   :  { %v783_v61 = vpop.f32.mrf.mxu2 }
  0xb0   :  { %v1353_v63 = vadd.f32 %v2095_v49, %v783_v61  ;;  %v872_v0 = vpop.f32.mrf.mxu3  ;;  %v608_v1 = vpop.f32.mrf.mxu0 }
  0xb1   :  { %v1354_v2 = vadd.f32 %v2097_v50, %v872_v0  ;;  %v1355_v3 = vadd.f32 %v2086_v41, %v608_v1  ;;  %v697_v4 = vpop.f32.mrf.mxu1  ;;  %v1811_v1 = vld [vmem:[%s2439_s0 + $0x60] sm:$0xff] }
  0xb2   :  { %v1356_v5 = vadd.f32 %v2088_v42, %v697_v4 }
  0xb3   :  { %v1478_v6 = vpack.c.bf16 %v1354_v2, %v1353_v63  ;;  %647 = vmatmul.bf16.gmra.mxu0 %v1808_v62 }
  0xb4   :  { %v1479_v7 = vpack.c.bf16 %v1356_v5, %v1355_v3  ;;  %736 = vmatmul.bf16.gmra.mxu1 %v1808_v62  ;;  %825 = vmatmul.bf16.gmra.mxu2 %v1808_v62 }
  0xb5   :  { %1542 = vst [vmem:[%s2441_s3 + $0x18] sm:$0xff] %v1478_v6  ;;  %914 = vmatmul.bf16.gmra.mxu3 %v1808_v62 }
  0xb6   :  { %1543 = vst [vmem:[%s2441_s3 + $0x20] sm:$0xff] %v1479_v7 }
  0xb7   :  { %v786_v8 = vpop.f32.mrf.mxu2 }
  0xb8   :  { %v1357_v9 = vadd.f32 %v2095_v49, %v786_v8  ;;  %v875_v10 = vpop.f32.mrf.mxu3  ;;  %v610_v11 = vpop.f32.mrf.mxu0 }
  0xb9   :  { %v1358_v12 = vadd.f32 %v2097_v50, %v875_v10  ;;  %v1359_v13 = vadd.f32 %v2086_v41, %v610_v11  ;;  %v699_v14 = vpop.f32.mrf.mxu1 }
  0xba   :  { %v1360_v15 = vadd.f32 %v2088_v42, %v699_v14 }
  0xbb   :  { %v1480_v16 = vpack.c.bf16 %v1358_v12, %v1357_v9 }
  0xbc   :  { %v1481_v17 = vpack.c.bf16 %v1360_v15, %v1359_v13 }
  0xbd   :  { %1544 = vst [vmem:[%s2441_s3 + $0x28] sm:$0xff] %v1480_v16 }
  0xbe   :  { %1545 = vst [vmem:[%s2441_s3 + $0x30] sm:$0xff] %v1481_v17 }
  0xbf   :  { %v788_v18 = vpop.f32.mrf.mxu2 }
  0xc0   :  { %v1361_v20 = vadd.f32 %v2095_v49, %v788_v18  ;;  %v877_v21 = vpop.f32.mrf.mxu3  ;;  %v613_v22 = vpop.f32.mrf.mxu0 }
  0xc1   :  { %v1362_v23 = vadd.f32 %v2097_v50, %v877_v21  ;;  %v1363_v24 = vadd.f32 %v2086_v41, %v613_v22  ;;  %v702_v25 = vpop.f32.mrf.mxu1  ;;  %v1812_v22 = vld [vmem:[%s2439_s0 + $0x68] sm:$0xff] }
  0xc2   :  { %v1364_v26 = vadd.f32 %v2088_v42, %v702_v25 }
  0xc3   :  { %v1482_v27 = vpack.c.bf16 %v1362_v23, %v1361_v20  ;;  %652 = vmatmul.bf16.gmra.mxu0 %v1809_v19 }
  0xc4   :  { %v1483_v28 = vpack.c.bf16 %v1364_v26, %v1363_v24  ;;  %741 = vmatmul.bf16.gmra.mxu1 %v1809_v19  ;;  %830 = vmatmul.bf16.gmra.mxu2 %v1809_v19 }
  0xc5   :  { %1546 = vst [vmem:[%s2441_s3 + $0x38] sm:$0xff] %v1482_v27  ;;  %919 = vmatmul.bf16.gmra.mxu3 %v1809_v19 }
  0xc6   :  { %1547 = vst [vmem:[%s2441_s3 + $0x40] sm:$0xff] %v1483_v28 }
  0xc7   :  { %v791_v29 = vpop.f32.mrf.mxu2 }
  0xc8   :  { %v1365_v30 = vadd.f32 %v2095_v49, %v791_v29  ;;  %v880_v31 = vpop.f32.mrf.mxu3  ;;  %v615_v32 = vpop.f32.mrf.mxu0 }
  0xc9   :  { %v1366_v33 = vadd.f32 %v2097_v50, %v880_v31  ;;  %v1367_v34 = vadd.f32 %v2086_v41, %v615_v32  ;;  %v704_v35 = vpop.f32.mrf.mxu1 }
  0xca   :  { %v1368_v36 = vadd.f32 %v2088_v42, %v704_v35 }
  0xcb   :  { %v1484_v37 = vpack.c.bf16 %v1366_v33, %v1365_v30 }
  0xcc   :  { %v1485_v38 = vpack.c.bf16 %v1368_v36, %v1367_v34 }
  0xcd   :  { %1548 = vst [vmem:[%s2441_s3 + $0x48] sm:$0xff] %v1484_v37 }
  0xce   :  { %1549 = vst [vmem:[%s2441_s3 + $0x50] sm:$0xff] %v1485_v38 }
  0xcf   :  { %v793_v39 = vpop.f32.mrf.mxu2 }
  0xd0   :  { %v1369_v43 = vadd.f32 %v2095_v49, %v793_v39  ;;  %v882_v44 = vpop.f32.mrf.mxu3  ;;  %v618_v45 = vpop.f32.mrf.mxu0 }
  0xd1   :  { %v1370_v46 = vadd.f32 %v2097_v50, %v882_v44  ;;  %v1371_v47 = vadd.f32 %v2086_v41, %v618_v45  ;;  %v707_v48 = vpop.f32.mrf.mxu1  ;;  %v1813_v45 = vld [vmem:[%s2439_s0 + $0x70] sm:$0xff] }
  0xd2   :  { %v1372_v51 = vadd.f32 %v2088_v42, %v707_v48 }
  0xd3   :  { %v1486_v52 = vpack.c.bf16 %v1370_v46, %v1369_v43  ;;  %657 = vmatmul.bf16.gmra.mxu0 %v1810_v40 }
  0xd4   :  { %v1487_v53 = vpack.c.bf16 %v1372_v51, %v1371_v47  ;;  %746 = vmatmul.bf16.gmra.mxu1 %v1810_v40  ;;  %835 = vmatmul.bf16.gmra.mxu2 %v1810_v40 }
  0xd5   :  { %1550 = vst [vmem:[%s2441_s3 + $0x58] sm:$0xff] %v1486_v52  ;;  %924 = vmatmul.bf16.gmra.mxu3 %v1810_v40 }
  0xd6   :  { %1551 = vst [vmem:[%s2441_s3 + $0x60] sm:$0xff] %v1487_v53 }
  0xd7   :  { %v796_v54 = vpop.f32.mrf.mxu2 }
  0xd8   :  { %v1373_v55 = vadd.f32 %v2095_v49, %v796_v54  ;;  %v885_v56 = vpop.f32.mrf.mxu3  ;;  %v620_v57 = vpop.f32.mrf.mxu0 }
  0xd9   :  { %v1374_v58 = vadd.f32 %v2097_v50, %v885_v56  ;;  %v1375_v59 = vadd.f32 %v2086_v41, %v620_v57  ;;  %v709_v60 = vpop.f32.mrf.mxu1 }
  0xda   :  { %v1376_v61 = vadd.f32 %v2088_v42, %v709_v60 }
  0xdb   :  { %v1488_v62 = vpack.c.bf16 %v1374_v58, %v1373_v55 }
  0xdc   :  { %v1489_v63 = vpack.c.bf16 %v1376_v61, %v1375_v59 }
  0xdd   :  { %1552 = vst [vmem:[%s2441_s3 + $0x68] sm:$0xff] %v1488_v62 }
  0xde   :  { %1553 = vst [vmem:[%s2441_s3 + $0x70] sm:$0xff] %v1489_v63 }
  0xdf   :  { %v798_v0 = vpop.f32.mrf.mxu2 }
  0xe0   :  { %v1377_v2 = vadd.f32 %v2095_v49, %v798_v0  ;;  %v887_v3 = vpop.f32.mrf.mxu3  ;;  %v623_v4 = vpop.f32.mrf.mxu0 }
  0xe1   :  { %v1378_v5 = vadd.f32 %v2097_v50, %v887_v3  ;;  %v1379_v6 = vadd.f32 %v2086_v41, %v623_v4  ;;  %v712_v7 = vpop.f32.mrf.mxu1  ;;  %v1814_v4 = vld [vmem:[%s2439_s0 + $0x78] sm:$0xff] }
  0xe2   :  { %v1380_v8 = vadd.f32 %v2088_v42, %v712_v7 }
  0xe3   :  { %v1490_v9 = vpack.c.bf16 %v1378_v5, %v1377_v2  ;;  %662 = vmatmul.bf16.gmra.mxu0 %v1811_v1 }
  0xe4   :  { %v1491_v10 = vpack.c.bf16 %v1380_v8, %v1379_v6  ;;  %751 = vmatmul.bf16.gmra.mxu1 %v1811_v1  ;;  %840 = vmatmul.bf16.gmra.mxu2 %v1811_v1 }
  0xe5   :  { %1554 = vst [vmem:[%s2441_s3 + $0x78] sm:$0xff] %v1490_v9  ;;  %929 = vmatmul.bf16.gmra.mxu3 %v1811_v1 }
  0xe6   :  { %1555 = vst [vmem:[%s2441_s3 + $0x80] sm:$0xff] %v1491_v10 }
  0xe7   :  { %v801_v11 = vpop.f32.mrf.mxu2 }
  0xe8   :  { %v1381_v12 = vadd.f32 %v2095_v49, %v801_v11  ;;  %v890_v13 = vpop.f32.mrf.mxu3  ;;  %v625_v14 = vpop.f32.mrf.mxu0 }
  0xe9   :  { %v1382_v15 = vadd.f32 %v2097_v50, %v890_v13  ;;  %v1383_v16 = vadd.f32 %v2086_v41, %v625_v14  ;;  %v714_v17 = vpop.f32.mrf.mxu1 }
  0xea   :  { %v1384_v18 = vadd.f32 %v2088_v42, %v714_v17 }
  0xeb   :  { %v1492_v19 = vpack.c.bf16 %v1382_v15, %v1381_v12 }
  0xec   :  { %v1493_v20 = vpack.c.bf16 %v1384_v18, %v1383_v16 }
  0xed   :  { %1556 = vst [vmem:[%s2441_s3 + $0x88] sm:$0xff] %v1492_v19 }
  0xee   :  { %1557 = vst [vmem:[%s2441_s3 + $0x90] sm:$0xff] %v1493_v20 }
  0xef   :  { %v803_v21 = vpop.f32.mrf.mxu2 }
  0xf0   :  { %v1385_v23 = vadd.f32 %v2095_v49, %v803_v21  ;;  %v892_v24 = vpop.f32.mrf.mxu3  ;;  %v628_v25 = vpop.f32.mrf.mxu0 }
  0xf1   :  { %v1386_v26 = vadd.f32 %v2097_v50, %v892_v24  ;;  %v1387_v27 = vadd.f32 %v2086_v41, %v628_v25  ;;  %v717_v28 = vpop.f32.mrf.mxu1 }
  0xf2   :  { %v1388_v29 = vadd.f32 %v2088_v42, %v717_v28 }
  0xf3   :  { %v1494_v30 = vpack.c.bf16 %v1386_v26, %v1385_v23  ;;  %667 = vmatmul.bf16.gmra.mxu0 %v1812_v22 }
  0xf4   :  { %v1495_v31 = vpack.c.bf16 %v1388_v29, %v1387_v27  ;;  %756 = vmatmul.bf16.gmra.mxu1 %v1812_v22  ;;  %845 = vmatmul.bf16.gmra.mxu2 %v1812_v22 }
  0xf5   :  { %1558 = vst [vmem:[%s2441_s3 + $0x98] sm:$0xff] %v1494_v30  ;;  %934 = vmatmul.bf16.gmra.mxu3 %v1812_v22 }
  0xf6   :  { %1559 = vst [vmem:[%s2441_s3 + $0xa0] sm:$0xff] %v1495_v31 }
  0xf7   :  { %v806_v32 = vpop.f32.mrf.mxu2 }
  0xf8   :  { %v1389_v33 = vadd.f32 %v2095_v49, %v806_v32  ;;  %v895_v34 = vpop.f32.mrf.mxu3  ;;  %v630_v35 = vpop.f32.mrf.mxu0 }
  0xf9   :  { %v1390_v36 = vadd.f32 %v2097_v50, %v895_v34  ;;  %v1391_v37 = vadd.f32 %v2086_v41, %v630_v35  ;;  %v719_v38 = vpop.f32.mrf.mxu1 }
  0xfa   :  { %v1392_v39 = vadd.f32 %v2088_v42, %v719_v38 }
  0xfb   :  { %v1496_v40 = vpack.c.bf16 %v1390_v36, %v1389_v33 }
  0xfc   :  { %v1497_v43 = vpack.c.bf16 %v1392_v39, %v1391_v37 }
  0xfd   :  { %1560 = vst [vmem:[%s2441_s3 + $0xa8] sm:$0xff] %v1496_v40 }
  0xfe   :  { %1561 = vst [vmem:[%s2441_s3 + $0xb0] sm:$0xff] %v1497_v43 }
  0xff   :  { %v808_v44 = vpop.f32.mrf.mxu2 }
 0x100   :  { %v1393_v46 = vadd.f32 %v2095_v49, %v808_v44  ;;  %v897_v47 = vpop.f32.mrf.mxu3  ;;  %v633_v48 = vpop.f32.mrf.mxu0 }
 0x101   :  { %v1394_v51 = vadd.f32 %v2097_v50, %v897_v47  ;;  %v1395_v52 = vadd.f32 %v2086_v41, %v633_v48  ;;  %v722_v53 = vpop.f32.mrf.mxu1 }
 0x102   :  { %v1396_v54 = vadd.f32 %v2088_v42, %v722_v53 }
 0x103   :  { %v1498_v55 = vpack.c.bf16 %v1394_v51, %v1393_v46  ;;  %672 = vmatmul.bf16.gmra.mxu0 %v1813_v45 }
 0x104   :  { %v1499_v56 = vpack.c.bf16 %v1396_v54, %v1395_v52  ;;  %761 = vmatmul.bf16.gmra.mxu1 %v1813_v45  ;;  %850 = vmatmul.bf16.gmra.mxu2 %v1813_v45 }
 0x105   :  { %1562 = vst [vmem:[%s2441_s3 + $0xb8] sm:$0xff] %v1498_v55  ;;  %939 = vmatmul.bf16.gmra.mxu3 %v1813_v45 }
 0x106   :  { %1563 = vst [vmem:[%s2441_s3 + $0xc0] sm:$0xff] %v1499_v56 }
 0x107   :  { %v811_v57 = vpop.f32.mrf.mxu2 }
 0x108   :  { %v1397_v58 = vadd.f32 %v2095_v49, %v811_v57  ;;  %v900_v59 = vpop.f32.mrf.mxu3  ;;  %v635_v60 = vpop.f32.mrf.mxu0 }
 0x109   :  { %v1398_v61 = vadd.f32 %v2097_v50, %v900_v59  ;;  %v1399_v62 = vadd.f32 %v2086_v41, %v635_v60  ;;  %v724_v63 = vpop.f32.mrf.mxu1 }
 0x10a   :  { %v1400_v0 = vadd.f32 %v2088_v42, %v724_v63 }
 0x10b   :  { %v1500_v1 = vpack.c.bf16 %v1398_v61, %v1397_v58 }
 0x10c   :  { %v1501_v2 = vpack.c.bf16 %v1400_v0, %v1399_v62 }
 0x10d   :  { %1564 = vst [vmem:[%s2441_s3 + $0xc8] sm:$0xff] %v1500_v1 }
 0x10e   :  { %1565 = vst [vmem:[%s2441_s3 + $0xd0] sm:$0xff] %v1501_v2 }
 0x10f   :  { %v813_v3 = vpop.f32.mrf.mxu2 }
 0x110   :  { %v1401_v5 = vadd.f32 %v2095_v49, %v813_v3  ;;  %v902_v6 = vpop.f32.mrf.mxu3  ;;  %v638_v7 = vpop.f32.mrf.mxu0 }
 0x111   :  { %v1402_v8 = vadd.f32 %v2097_v50, %v902_v6  ;;  %v1403_v9 = vadd.f32 %v2086_v41, %v638_v7  ;;  %v727_v10 = vpop.f32.mrf.mxu1 }
 0x112   :  { %v1404_v11 = vadd.f32 %v2088_v42, %v727_v10 }
 0x113   :  { %v1502_v12 = vpack.c.bf16 %v1402_v8, %v1401_v5  ;;  %677 = vmatmul.bf16.gmra.mxu0 %v1814_v4 }
 0x114   :  { %v1503_v13 = vpack.c.bf16 %v1404_v11, %v1403_v9  ;;  %766 = vmatmul.bf16.gmra.mxu1 %v1814_v4  ;;  %855 = vmatmul.bf16.gmra.mxu2 %v1814_v4 }
 0x115   :  { %1566 = vst [vmem:[%s2441_s3 + $0xd8] sm:$0xff] %v1502_v12  ;;  %944 = vmatmul.bf16.gmra.mxu3 %v1814_v4 }
 0x116   :  { %1567 = vst [vmem:[%s2441_s3 + $0xe0] sm:$0xff] %v1503_v13 }
 0x117   :  { %v816_v14 = vpop.f32.mrf.mxu2 }
 0x118   :  { %v1405_v15 = vadd.f32 %v2095_v49, %v816_v14  ;;  %v905_v16 = vpop.f32.mrf.mxu3  ;;  %v640_v17 = vpop.f32.mrf.mxu0 }
 0x119   :  { %v1406_v18 = vadd.f32 %v2097_v50, %v905_v16  ;;  %v1407_v19 = vadd.f32 %v2086_v41, %v640_v17  ;;  %v729_v20 = vpop.f32.mrf.mxu1 }
 0x11a   :  { %v1408_v21 = vadd.f32 %v2088_v42, %v729_v20 }
 0x11b   :  { %v1504_v22 = vpack.c.bf16 %v1406_v18, %v1405_v15 }
 0x11c   :  { %v1505_v23 = vpack.c.bf16 %v1408_v21, %v1407_v19 }
 0x11d   :  { %1568 = vst [vmem:[%s2441_s3 + $0xe8] sm:$0xff] %v1504_v22 }
 0x11e   :  { %1569 = vst [vmem:[%s2441_s3 + $0xf0] sm:$0xff] %v1505_v23 }
 0x11f   :  { %v818_v24 = vpop.f32.mrf.mxu2 }
 0x120   :  { %v1409_v25 = vadd.f32 %v2095_v49, %v818_v24  ;;  %v907_v26 = vpop.f32.mrf.mxu3  ;;  %v643_v27 = vpop.f32.mrf.mxu0 }
 0x121   :  { %v1410_v28 = vadd.f32 %v2097_v50, %v907_v26  ;;  %v1411_v29 = vadd.f32 %v2086_v41, %v643_v27  ;;  %v732_v30 = vpop.f32.mrf.mxu1 }
 0x122   :  { %v1412_v31 = vadd.f32 %v2088_v42, %v732_v30 }
 0x123   :  { %v1506_v32 = vpack.c.bf16 %v1410_v28, %v1409_v25 }
 0x124   :  { %v1507_v33 = vpack.c.bf16 %v1412_v31, %v1411_v29 }
 0x125   :  { %1570 = vst [vmem:[%s2441_s3 + $0xf8] sm:$0xff] %v1506_v32 }
 0x126   :  { %1571 = vst [vmem:[%s2441_s3 + $0x100] sm:$0xff] %v1507_v33 }
 0x127   :  { %v821_v34 = vpop.f32.mrf.mxu2 }
 0x128   :  { %v1413_v35 = vadd.f32 %v2095_v49, %v821_v34  ;;  %v910_v36 = vpop.f32.mrf.mxu3  ;;  %v645_v37 = vpop.f32.mrf.mxu0 }
 0x129   :  { %v1414_v38 = vadd.f32 %v2097_v50, %v910_v36  ;;  %v1415_v39 = vadd.f32 %v2086_v41, %v645_v37  ;;  %v734_v40 = vpop.f32.mrf.mxu1 }
 0x12a   :  { %v1416_v43 = vadd.f32 %v2088_v42, %v734_v40 }
 0x12b   :  { %v1508_v44 = vpack.c.bf16 %v1414_v38, %v1413_v35 }
 0x12c   :  { %v1509_v45 = vpack.c.bf16 %v1416_v43, %v1415_v39 }
 0x12d   :  { %1572 = vst [vmem:[%s2441_s3 + $0x108] sm:$0xff] %v1508_v44 }
 0x12e   :  { %1573 = vst [vmem:[%s2441_s3 + $0x110] sm:$0xff] %v1509_v45 }
 0x12f   :  { %v823_v46 = vpop.f32.mrf.mxu2 }
 0x130   :  { %v1417_v47 = vadd.f32 %v2095_v49, %v823_v46  ;;  %v912_v48 = vpop.f32.mrf.mxu3  ;;  %v648_v51 = vpop.f32.mrf.mxu0 }
 0x131   :  { %v1418_v52 = vadd.f32 %v2097_v50, %v912_v48  ;;  %v1419_v53 = vadd.f32 %v2086_v41, %v648_v51  ;;  %v737_v54 = vpop.f32.mrf.mxu1 }
 0x132   :  { %v1420_v55 = vadd.f32 %v2088_v42, %v737_v54 }
 0x133   :  { %v1510_v56 = vpack.c.bf16 %v1418_v52, %v1417_v47 }
 0x134   :  { %v1511_v57 = vpack.c.bf16 %v1420_v55, %v1419_v53 }
 0x135   :  { %1574 = vst [vmem:[%s2441_s3 + $0x118] sm:$0xff] %v1510_v56 }
 0x136   :  { %1575 = vst [vmem:[%s2441_s3 + $0x120] sm:$0xff] %v1511_v57 }
 0x137   :  { %v826_v58 = vpop.f32.mrf.mxu2 }
 0x138   :  { %v1421_v59 = vadd.f32 %v2095_v49, %v826_v58  ;;  %v915_v60 = vpop.f32.mrf.mxu3  ;;  %v650_v61 = vpop.f32.mrf.mxu0 }
 0x139   :  { %v1422_v62 = vadd.f32 %v2097_v50, %v915_v60  ;;  %v1423_v63 = vadd.f32 %v2086_v41, %v650_v61  ;;  %v739_v0 = vpop.f32.mrf.mxu1 }
 0x13a   :  { %v1424_v1 = vadd.f32 %v2088_v42, %v739_v0 }
 0x13b   :  { %v1512_v2 = vpack.c.bf16 %v1422_v62, %v1421_v59 }
 0x13c   :  { %v1513_v3 = vpack.c.bf16 %v1424_v1, %v1423_v63 }
 0x13d   :  { %1576 = vst [vmem:[%s2441_s3 + $0x128] sm:$0xff] %v1512_v2 }
 0x13e   :  { %1577 = vst [vmem:[%s2441_s3 + $0x130] sm:$0xff] %v1513_v3 }
 0x13f   :  { %v828_v4 = vpop.f32.mrf.mxu2 }
 0x140   :  { %v1425_v5 = vadd.f32 %v2095_v49, %v828_v4  ;;  %v917_v6 = vpop.f32.mrf.mxu3  ;;  %v653_v7 = vpop.f32.mrf.mxu0 }
 0x141   :  { %v1426_v8 = vadd.f32 %v2097_v50, %v917_v6  ;;  %v1427_v9 = vadd.f32 %v2086_v41, %v653_v7  ;;  %v742_v10 = vpop.f32.mrf.mxu1 }
 0x142   :  { %v1428_v11 = vadd.f32 %v2088_v42, %v742_v10 }
 0x143   :  { %v1514_v12 = vpack.c.bf16 %v1426_v8, %v1425_v5 }
 0x144   :  { %v1515_v13 = vpack.c.bf16 %v1428_v11, %v1427_v9 }
 0x145   :  { %1578 = vst [vmem:[%s2441_s3 + $0x138] sm:$0xff] %v1514_v12 }
 0x146   :  { %1579 = vst [vmem:[%s2441_s3 + $0x140] sm:$0xff] %v1515_v13 }
 0x147   :  { %v831_v14 = vpop.f32.mrf.mxu2 }
 0x148   :  { %v1429_v15 = vadd.f32 %v2095_v49, %v831_v14  ;;  %v920_v16 = vpop.f32.mrf.mxu3  ;;  %v655_v17 = vpop.f32.mrf.mxu0 }
 0x149   :  { %v1430_v18 = vadd.f32 %v2097_v50, %v920_v16  ;;  %v1431_v19 = vadd.f32 %v2086_v41, %v655_v17  ;;  %v744_v20 = vpop.f32.mrf.mxu1 }
 0x14a   :  { %v1432_v21 = vadd.f32 %v2088_v42, %v744_v20 }
 0x14b   :  { %v1516_v22 = vpack.c.bf16 %v1430_v18, %v1429_v15 }
 0x14c   :  { %v1517_v23 = vpack.c.bf16 %v1432_v21, %v1431_v19 }
 0x14d   :  { %1580 = vst [vmem:[%s2441_s3 + $0x148] sm:$0xff] %v1516_v22 }
 0x14e   :  { %1581 = vst [vmem:[%s2441_s3 + $0x150] sm:$0xff] %v1517_v23 }
 0x14f   :  { %v833_v24 = vpop.f32.mrf.mxu2 }
 0x150   :  { %v1433_v25 = vadd.f32 %v2095_v49, %v833_v24  ;;  %v922_v26 = vpop.f32.mrf.mxu3  ;;  %v658_v27 = vpop.f32.mrf.mxu0 }
 0x151   :  { %v1434_v28 = vadd.f32 %v2097_v50, %v922_v26  ;;  %v1435_v29 = vadd.f32 %v2086_v41, %v658_v27  ;;  %v747_v30 = vpop.f32.mrf.mxu1 }
 0x152   :  { %v1436_v31 = vadd.f32 %v2088_v42, %v747_v30 }
 0x153   :  { %v1518_v32 = vpack.c.bf16 %v1434_v28, %v1433_v25 }
 0x154   :  { %v1519_v33 = vpack.c.bf16 %v1436_v31, %v1435_v29 }
 0x155   :  { %1582 = vst [vmem:[%s2441_s3 + $0x158] sm:$0xff] %v1518_v32 }
 0x156   :  { %1583 = vst [vmem:[%s2441_s3 + $0x160] sm:$0xff] %v1519_v33 }
 0x157   :  { %v836_v34 = vpop.f32.mrf.mxu2 }
 0x158   :  { %v1437_v35 = vadd.f32 %v2095_v49, %v836_v34  ;;  %v925_v36 = vpop.f32.mrf.mxu3  ;;  %v660_v37 = vpop.f32.mrf.mxu0 }
 0x159   :  { %v1438_v38 = vadd.f32 %v2097_v50, %v925_v36  ;;  %v1439_v39 = vadd.f32 %v2086_v41, %v660_v37  ;;  %v749_v40 = vpop.f32.mrf.mxu1 }
 0x15a   :  { %v1440_v43 = vadd.f32 %v2088_v42, %v749_v40 }
 0x15b   :  { %v1520_v44 = vpack.c.bf16 %v1438_v38, %v1437_v35 }
 0x15c   :  { %v1521_v45 = vpack.c.bf16 %v1440_v43, %v1439_v39 }
 0x15d   :  { %1584 = vst [vmem:[%s2441_s3 + $0x168] sm:$0xff] %v1520_v44 }
 0x15e   :  { %1585 = vst [vmem:[%s2441_s3 + $0x170] sm:$0xff] %v1521_v45 }
 0x15f   :  { %v838_v46 = vpop.f32.mrf.mxu2 }
 0x160   :  { %v1441_v47 = vadd.f32 %v2095_v49, %v838_v46  ;;  %v927_v48 = vpop.f32.mrf.mxu3  ;;  %v663_v51 = vpop.f32.mrf.mxu0 }
 0x161   :  { %v1442_v52 = vadd.f32 %v2097_v50, %v927_v48  ;;  %v1443_v53 = vadd.f32 %v2086_v41, %v663_v51  ;;  %v752_v54 = vpop.f32.mrf.mxu1 }
 0x162   :  { %v1444_v55 = vadd.f32 %v2088_v42, %v752_v54 }
 0x163   :  { %v1522_v56 = vpack.c.bf16 %v1442_v52, %v1441_v47 }
 0x164   :  { %v1523_v57 = vpack.c.bf16 %v1444_v55, %v1443_v53 }
 0x165   :  { %1586 = vst [vmem:[%s2441_s3 + $0x178] sm:$0xff] %v1522_v56 }
 0x166   :  { %1587 = vst [vmem:[%s2441_s3 + $0x180] sm:$0xff] %v1523_v57 }
 0x167   :  { %v841_v58 = vpop.f32.mrf.mxu2 }
 0x168   :  { %v1445_v59 = vadd.f32 %v2095_v49, %v841_v58  ;;  %v930_v60 = vpop.f32.mrf.mxu3  ;;  %v665_v61 = vpop.f32.mrf.mxu0 }
 0x169   :  { %v1446_v62 = vadd.f32 %v2097_v50, %v930_v60  ;;  %v1447_v63 = vadd.f32 %v2086_v41, %v665_v61  ;;  %v754_v0 = vpop.f32.mrf.mxu1 }
 0x16a   :  { %v1448_v1 = vadd.f32 %v2088_v42, %v754_v0 }
 0x16b   :  { %v1524_v2 = vpack.c.bf16 %v1446_v62, %v1445_v59 }
 0x16c   :  { %v1525_v3 = vpack.c.bf16 %v1448_v1, %v1447_v63 }
 0x16d   :  { %1588 = vst [vmem:[%s2441_s3 + $0x188] sm:$0xff] %v1524_v2 }
 0x16e   :  { %1589 = vst [vmem:[%s2441_s3 + $0x190] sm:$0xff] %v1525_v3 }
 0x16f   :  { %v843_v4 = vpop.f32.mrf.mxu2 }
 0x170   :  { %v1449_v5 = vadd.f32 %v2095_v49, %v843_v4  ;;  %v932_v6 = vpop.f32.mrf.mxu3  ;;  %v668_v7 = vpop.f32.mrf.mxu0 }
 0x171   :  { %v1450_v8 = vadd.f32 %v2097_v50, %v932_v6  ;;  %v1451_v9 = vadd.f32 %v2086_v41, %v668_v7  ;;  %v757_v10 = vpop.f32.mrf.mxu1 }
 0x172   :  { %v1452_v11 = vadd.f32 %v2088_v42, %v757_v10 }
 0x173   :  { %v1526_v12 = vpack.c.bf16 %v1450_v8, %v1449_v5 }
 0x174   :  { %v1527_v13 = vpack.c.bf16 %v1452_v11, %v1451_v9 }
 0x175   :  { %1590 = vst [vmem:[%s2441_s3 + $0x198] sm:$0xff] %v1526_v12 }
 0x176   :  { %1591 = vst [vmem:[%s2441_s3 + $0x1a0] sm:$0xff] %v1527_v13 }
 0x177   :  { %v846_v14 = vpop.f32.mrf.mxu2 }
 0x178   :  { %v1453_v15 = vadd.f32 %v2095_v49, %v846_v14  ;;  %v935_v16 = vpop.f32.mrf.mxu3  ;;  %v670_v17 = vpop.f32.mrf.mxu0 }
 0x179   :  { %v1454_v18 = vadd.f32 %v2097_v50, %v935_v16  ;;  %v1455_v19 = vadd.f32 %v2086_v41, %v670_v17  ;;  %v759_v20 = vpop.f32.mrf.mxu1 }
 0x17a   :  { %v1456_v21 = vadd.f32 %v2088_v42, %v759_v20 }
 0x17b   :  { %v1528_v22 = vpack.c.bf16 %v1454_v18, %v1453_v15 }
 0x17c   :  { %v1529_v23 = vpack.c.bf16 %v1456_v21, %v1455_v19 }
 0x17d   :  { %1592 = vst [vmem:[%s2441_s3 + $0x1a8] sm:$0xff] %v1528_v22 }
 0x17e   :  { %1593 = vst [vmem:[%s2441_s3 + $0x1b0] sm:$0xff] %v1529_v23 }
 0x17f   :  { %v848_v24 = vpop.f32.mrf.mxu2 }
 0x180   :  { %v1457_v25 = vadd.f32 %v2095_v49, %v848_v24  ;;  %v937_v26 = vpop.f32.mrf.mxu3  ;;  %v673_v27 = vpop.f32.mrf.mxu0 }
 0x181   :  { %v1458_v28 = vadd.f32 %v2097_v50, %v937_v26  ;;  %v1459_v29 = vadd.f32 %v2086_v41, %v673_v27  ;;  %v762_v30 = vpop.f32.mrf.mxu1 }
 0x182   :  { %v1460_v31 = vadd.f32 %v2088_v42, %v762_v30 }
 0x183   :  { %v1530_v32 = vpack.c.bf16 %v1458_v28, %v1457_v25 }
 0x184   :  { %v1531_v33 = vpack.c.bf16 %v1460_v31, %v1459_v29 }
 0x185   :  { %1594 = vst [vmem:[%s2441_s3 + $0x1b8] sm:$0xff] %v1530_v32 }
 0x186   :  { %1595 = vst [vmem:[%s2441_s3 + $0x1c0] sm:$0xff] %v1531_v33 }
 0x187   :  { %v851_v34 = vpop.f32.mrf.mxu2 }
 0x188   :  { %v1461_v35 = vadd.f32 %v2095_v49, %v851_v34  ;;  %v940_v36 = vpop.f32.mrf.mxu3  ;;  %v675_v37 = vpop.f32.mrf.mxu0 }
 0x189   :  { %v1462_v38 = vadd.f32 %v2097_v50, %v940_v36  ;;  %v1463_v39 = vadd.f32 %v2086_v41, %v675_v37  ;;  %v764_v40 = vpop.f32.mrf.mxu1 }
 0x18a   :  { %v1464_v43 = vadd.f32 %v2088_v42, %v764_v40 }
 0x18b   :  { %v1532_v44 = vpack.c.bf16 %v1462_v38, %v1461_v35 }
 0x18c   :  { %v1533_v45 = vpack.c.bf16 %v1464_v43, %v1463_v39 }
 0x18d   :  { %1596 = vst [vmem:[%s2441_s3 + $0x1c8] sm:$0xff] %v1532_v44 }
 0x18e   :  { %1597 = vst [vmem:[%s2441_s3 + $0x1d0] sm:$0xff] %v1533_v45 }
 0x18f   :  { %v853_v46 = vpop.f32.mrf.mxu2 }
 0x190   :  { %v1465_v47 = vadd.f32 %v2095_v49, %v853_v46  ;;  %v942_v48 = vpop.f32.mrf.mxu3  ;;  %v678_v51 = vpop.f32.mrf.mxu0 }
 0x191   :  { %v1466_v52 = vadd.f32 %v2097_v50, %v942_v48  ;;  %v1467_v53 = vadd.f32 %v2086_v41, %v678_v51  ;;  %v767_v54 = vpop.f32.mrf.mxu1 }
 0x192   :  { %v1468_v55 = vadd.f32 %v2088_v42, %v767_v54 }
 0x193   :  { %v1534_v56 = vpack.c.bf16 %v1466_v52, %v1465_v47 }
 0x194   :  { %v1535_v57 = vpack.c.bf16 %v1468_v55, %v1467_v53 }
 0x195   :  { %1598 = vst [vmem:[%s2441_s3 + $0x1d8] sm:$0xff] %v1534_v56 }
 0x196   :  { %1599 = vst [vmem:[%s2441_s3 + $0x1e0] sm:$0xff] %v1535_v57 }
 0x197   :  { %v856_v58 = vpop.f32.mrf.mxu2 }
 0x198   :  { %v1469_v59 = vadd.f32 %v2095_v49, %v856_v58  ;;  %v945_v60 = vpop.f32.mrf.mxu3  ;;  %v680_v61 = vpop.f32.mrf.mxu0 }
 0x199   :  { %v1470_v62 = vadd.f32 %v2097_v50, %v945_v60  ;;  %v1471_v63 = vadd.f32 %v2086_v41, %v680_v61  ;;  %v769_v0 = vpop.f32.mrf.mxu1 }
 0x19a   :  { %v1472_v1 = vadd.f32 %v2088_v42, %v769_v0 }
 0x19b   :  { %v1536_v2 = vpack.c.bf16 %v1470_v62, %v1469_v59 }
 0x19c   :  { %v1537_v3 = vpack.c.bf16 %v1472_v1, %v1471_v63 }
 0x19d   :  { %1600 = vst [vmem:[%s2441_s3 + $0x1e8] sm:$0xff] %v1536_v2 }
 0x19e   :  { %1601 = vst [vmem:[%s2441_s3 + $0x1f0] sm:$0xff] %v1537_v3 }
 0x19f   :  { %v858_v4 = vpop.f32.mrf.mxu2 }
 0x1a0   :  { %v1473_v5 = vadd.f32 %v2095_v49, %v858_v4  ;;  %v947_v6 = vpop.f32.mrf.mxu3 }
 0x1a1   :  { %v1474_v7 = vadd.f32 %v2097_v50, %v947_v6 }
 0x1a3   :  { %v1538_v41 = vpack.c.bf16 %v1474_v7, %v1473_v5 }
 0x1a5   :  { %1602 = vst [vmem:[%s2441_s3 + $0x1f8] sm:$0xff] %v1538_v41 }

// kernel: rnn_model_forward.6
= control target key start
LH: loop header
LB: loop body
LE: loop exit
PB: predicated region body
PF: predicated region fallthrough
CT: control target
= control target key end

     0   :  { %s3646_s21 = smov 0   ;;  %s3648_s22 = smov 0   ;;  %s4470_s0 = inlined_call_operand.vmem [shape: bf16[32,8,512], index: 0, kind: input, shape index: {}]   ;;  %s4471_s1 = inlined_call_operand.vmem [shape: f32[8,128], index: 1, kind: input, shape index: {}]   ;;  %s4472_s2 = inlined_call_operand.vmem [shape: f32[8,128], index: 2, kind: input, shape index: {}]   ;;  %s4473_s3 = inlined_call_operand.vmem [shape: bf16[128,512], index: 3, kind: input, shape index: {}]   ;;  %s4474_s4 = inlined_call_operand.vmem [shape: bf16[32,8,128], index: 4, kind: output, shape index: {0}]   ;;  %s4475_s5 = inlined_call_operand.vmem [shape: f32[8,128], index: 5, kind: output, shape index: {1}]   ;;  %s4476_s6 = inlined_call_operand.vmem [shape: f32[8,128], index: 6, kind: output, shape index: {2}]  }
   0x1   :  { %s3650_s23 = smov 0  }
   0x2 LB: > { %s26_s24 = sadd.s32 1, %s3605_s22  ;;  %p3021_p0 = scmp.ge.s32.totalorder %s3609_s23, 1  ;;  %s3609_s23 = sphi %s3650_s23, %s17_s23   ;;  %s3605_s22 = sphi %s3648_s22, %s4478_s22   ;;  %s3601_s21 = sphi %s3646_s21, %s4477_s21  }
   0x3   : > { %p27_p1 = scmp.ge.s32.totalorder %s26_s24, 2  ;;  %p233_p2 = scmp.lt.s32.totalorder %s3609_s23, 3 }
   0x5   : > { %s4480_s24 = smov (%p27_p1, %s26_s24), 0  ;;  %p234_p3 = pnand %p3021_p0, %p233_p2 }
   0x6   : > { %s3667_s25 = sshll.u32 (!%p234_p3), %s3601_s21, 4  ;;  %p3027_p5 = scmp.ne.s32.totalorder (!%p234_p3), %s3601_s21, 0 }
   0x7   : > { %237 = sbr.rel (%p234_p3) target bundleno = 3303 (0xce7), region = 32  ;;  %p286_p4 = scmp.lt.s32.totalorder (!%p234_p3), %s3667_s25, 31 }
   0xc   : > { %s287_s26 = scalar_select %p286_p4, %s3667_s25, 31 }
   0xd   : > { %324 = sbr.rel (%p3027_p5) target bundleno = 56 (0x38), region = 36 }
   0xe   : > { %s3272_s27 = sshll.u32 %s287_s26, 4  ;;  %s3026_s28 = sshll.u32 %s287_s26, 2 }
   0xf   : > { %s3674_s7 = scalar_lea.vmem %s4470_s0, %s3272_s27  ;;  %s3679_s10 = scalar_lea.vmem %s4474_s4, %s3026_s28 }
  0x12   : > { %v325_v0 = vld [vmem:[%s4471_s1] sm:$0xff]  ;;  %v341_v3 = vld [vmem:[%s4473_s3 + $0x8] sm:$0xff]  ;;  %v343_v4 = vld [vmem:[%s4473_s3 + $0x10] sm:$0xff] }
  0x13   : > { %v327_v1 = vld [vmem:[%s4472_s2] sm:$0xff]  ;;  %326 = vst [vmem:[#allocation2] sm:$0xff] %v325_v0  ;;  %v345_v5 = vld [vmem:[%s4473_s3 + $0x18] sm:$0xff]  ;;  %v349_v7 = vld [vmem:[%s4473_s3 + $0x28] sm:$0xff] }
  0x14   : > { %v339_v2 = vld [vmem:[%s4473_s3] sm:$0xff]  ;;  %328 = vst [vmem:[#allocation3] sm:$0xff] %v327_v1  ;;  %v351_v8 = vld [vmem:[%s4473_s3 + $0x30] sm:$0xff]  ;;  %v353_v9 = vld [vmem:[%s4473_s3 + $0x38] sm:$0xff] }
  0x15   : > { %340 = vst [vmem:[#allocation4] sm:$0xff] %v339_v2  ;;  %v347_v6 = vld [vmem:[%s4473_s3 + $0x20] sm:$0xff]  ;;  %v357_v11 = vld [vmem:[%s4473_s3 + $0x48] sm:$0xff]  ;;  %v359_v12 = vld [vmem:[%s4473_s3 + $0x50] sm:$0xff] }
  0x16   : > { %342 = vst [vmem:[#allocation4 + $0x8] sm:$0xff] %v341_v3  ;;  %v355_v10 = vld [vmem:[%s4473_s3 + $0x40] sm:$0xff]  ;;  %v361_v13 = vld [vmem:[%s4473_s3 + $0x58] sm:$0xff]  ;;  %v365_v15 = vld [vmem:[%s4473_s3 + $0x68] sm:$0xff] }
  0x17   : > { %344 = vst [vmem:[#allocation4 + $0x10] sm:$0xff] %v343_v4  ;;  %v363_v14 = vld [vmem:[%s4473_s3 + $0x60] sm:$0xff]  ;;  %v367_v16 = vld [vmem:[%s4473_s3 + $0x70] sm:$0xff]  ;;  %v369_v17 = vld [vmem:[%s4473_s3 + $0x78] sm:$0xff] }
  0x18   : > { %346 = vst [vmem:[#allocation4 + $0x18] sm:$0xff] %v345_v5  ;;  %v371_v18 = vld [vmem:[%s4473_s3 + $0x80] sm:$0xff]  ;;  %v373_v19 = vld [vmem:[%s4473_s3 + $0x88] sm:$0xff]  ;;  %v375_v20 = vld [vmem:[%s4473_s3 + $0x90] sm:$0xff] }
  0x19   : > { %348 = vst [vmem:[#allocation4 + $0x20] sm:$0xff] %v347_v6  ;;  %v377_v21 = vld [vmem:[%s4473_s3 + $0x98] sm:$0xff]  ;;  %v379_v22 = vld [vmem:[%s4473_s3 + $0xa0] sm:$0xff]  ;;  %v381_v23 = vld [vmem:[%s4473_s3 + $0xa8] sm:$0xff] }
  0x1a   : > { %350 = vst [vmem:[#allocation4 + $0x28] sm:$0xff] %v349_v7  ;;  %v383_v24 = vld [vmem:[%s4473_s3 + $0xb0] sm:$0xff]  ;;  %v385_v25 = vld [vmem:[%s4473_s3 + $0xb8] sm:$0xff]  ;;  %v387_v26 = vld [vmem:[%s4473_s3 + $0xc0] sm:$0xff] }
  0x1b   : > { %352 = vst [vmem:[#allocation4 + $0x30] sm:$0xff] %v351_v8  ;;  %v389_v27 = vld [vmem:[%s4473_s3 + $0xc8] sm:$0xff]  ;;  %v391_v28 = vld [vmem:[%s4473_s3 + $0xd0] sm:$0xff]  ;;  %v393_v29 = vld [vmem:[%s4473_s3 + $0xd8] sm:$0xff] }
  0x1c   : > { %354 = vst [vmem:[#allocation4 + $0x38] sm:$0xff] %v353_v9  ;;  %v395_v30 = vld [vmem:[%s4473_s3 + $0xe0] sm:$0xff]  ;;  %v397_v31 = vld [vmem:[%s4473_s3 + $0xe8] sm:$0xff]  ;;  %v399_v32 = vld [vmem:[%s4473_s3 + $0xf0] sm:$0xff] }
  0x1d   : > { %356 = vst [vmem:[#allocation4 + $0x40] sm:$0xff] %v355_v10  ;;  %v401_v33 = vld [vmem:[%s4473_s3 + $0xf8] sm:$0xff] }
  0x1e   : > { %358 = vst [vmem:[#allocation4 + $0x48] sm:$0xff] %v357_v11 }
  0x1f   : > { %360 = vst [vmem:[#allocation4 + $0x50] sm:$0xff] %v359_v12 }
  0x20   : > { %362 = vst [vmem:[#allocation4 + $0x58] sm:$0xff] %v361_v13 }
  0x21   : > { %364 = vst [vmem:[#allocation4 + $0x60] sm:$0xff] %v363_v14 }
  0x22   : > { %366 = vst [vmem:[#allocation4 + $0x68] sm:$0xff] %v365_v15 }
  0x23   : > { %368 = vst [vmem:[#allocation4 + $0x70] sm:$0xff] %v367_v16 }
  0x24   : > { %370 = vst [vmem:[#allocation4 + $0x78] sm:$0xff] %v369_v17 }
  0x25   : > { %372 = vst [vmem:[#allocation4 + $0x80] sm:$0xff] %v371_v18 }
  0x26   : > { %374 = vst [vmem:[#allocation4 + $0x88] sm:$0xff] %v373_v19 }
  0x27   : > { %376 = vst [vmem:[#allocation4 + $0x90] sm:$0xff] %v375_v20 }
  0x28   : > { %378 = vst [vmem:[#allocation4 + $0x98] sm:$0xff] %v377_v21 }
  0x29   : > { %380 = vst [vmem:[#allocation4 + $0xa0] sm:$0xff] %v379_v22 }
  0x2a   : > { %382 = vst [vmem:[#allocation4 + $0xa8] sm:$0xff] %v381_v23 }
  0x2b   : > { %384 = vst [vmem:[#allocation4 + $0xb0] sm:$0xff] %v383_v24 }
  0x2c   : > { %386 = vst [vmem:[#allocation4 + $0xb8] sm:$0xff] %v385_v25 }
  0x2d   : > { %388 = vst [vmem:[#allocation4 + $0xc0] sm:$0xff] %v387_v26 }
  0x2e   : > { %390 = vst [vmem:[#allocation4 + $0xc8] sm:$0xff] %v389_v27 }
  0x2f   : > { %392 = vst [vmem:[#allocation4 + $0xd0] sm:$0xff] %v391_v28 }
  0x30   : > { %394 = vst [vmem:[#allocation4 + $0xd8] sm:$0xff] %v393_v29 }
  0x31   : > { %396 = vst [vmem:[#allocation4 + $0xe0] sm:$0xff] %v395_v30 }
  0x32   : > { %398 = vst [vmem:[#allocation4 + $0xe8] sm:$0xff] %v397_v31 }
  0x33   : > { %400 = vst [vmem:[#allocation4 + $0xf0] sm:$0xff] %v399_v32 }
  0x34   : > { %402 = vst [vmem:[#allocation4 + $0xf8] sm:$0xff] %v401_v33 }
  0x35   : > { %408 = vsyncadd [#allocation5], 4096 }
  0x36   : > { %3597 = dma.done.wait [#allocation5], 4096 }
  0x37   : > { %3598 = vsyncadd [#allocation5], 4294963200 }
  0x38 PF: > { %v3142_v34 = vld [vmem:[#allocation4 + $0xe0] sm:$0xf]  ;;  %v3301_v36 = vld [vmem:[#allocation4 + $0xe4] sm:$0xf]  ;;  %v3299_v44 = vld [vmem:[#allocation4 + $0xcc] sm:$0xf0] }
  0x39   : > { %v3302_v39 = vld [vmem:[#allocation4 + $0xec] sm:$0xf]  ;;  %v3126_v43 = vld [vmem:[#allocation4 + $0xc0] sm:$0xf]  ;;  %v3297_v45 = vld [vmem:[#allocation4 + $0xc4] sm:$0xf] }
  0x3a   : > { %v3303_v35 = vld [vmem:[#allocation4 + $0xec] sm:$0xf0]  ;;  %v3144_v38 = vld [vmem:[#allocation4 + $0xf0] sm:$0xf0]  ;;  %v3791_v46 = vor.u32 %v3299_v44, %v3126_v43  ;;  %v3298_v48 = vld [vmem:[#allocation4 + $0xcc] sm:$0xf] }
  0x3b   : > { %v3784_v37 = vor.u32 %v3303_v35, %v3142_v34  ;;  %v3152_v40 = vld [vmem:[#allocation4 + $0xf8] sm:$0xf0]  ;;  %v3786_v41 = vor.u32 %v3301_v36, %v3144_v38  ;;  %v3128_v47 = vld [vmem:[#allocation4 + $0xd0] sm:$0xf0]  ;;  %v3150_v52 = vld [vmem:[#allocation4 + $0xe8] sm:$0xf] }
  0x3c   : > { %v3788_v42 = vor.u32 %v3302_v39, %v3152_v40  ;;  %v3136_v49 = vld [vmem:[#allocation4 + $0xd8] sm:$0xf0]  ;;  %v3795_v50 = vor.u32 %v3297_v45, %v3128_v47  ;;  %v3304_v53 = vld [vmem:[#allocation4 + $0xf4] sm:$0xf0]  ;;  %v3110_v54 = vld [vmem:[#allocation4 + $0xa0] sm:$0xf] }
  0x3d   : > { %614 = vmatpush.bf16.msra.mxu0 %v3784_v37  ;;  %627 = vmatpush.bf16.msra.mxu1 %v3786_v41  ;;  %v3797_v51 = vor.u32 %v3298_v48, %v3136_v49  ;;  %v3799_v55 = vor.u32 %v3304_v53, %v3150_v52  ;;  %v3295_v56 = vld [vmem:[#allocation4 + $0xac] sm:$0xf0]  ;;  %v3293_v57 = vld [vmem:[#allocation4 + $0xa4] sm:$0xf]  ;;  %v3112_v58 = vld [vmem:[#allocation4 + $0xb0] sm:$0xf0] }
  0x3e   : > { %653 = vmatpush.bf16.msra.mxu3 %v3788_v42  ;;  %v3294_v59 = vld [vmem:[#allocation4 + $0xac] sm:$0xf]  ;;  %v3120_v60 = vld [vmem:[#allocation4 + $0xb8] sm:$0xf0]  ;;  %v3134_v61 = vld [vmem:[#allocation4 + $0xc8] sm:$0xf]  ;;  %v3803_v62 = vor.u32 %v3295_v56, %v3110_v54  ;;  %v3807_v2 = vor.u32 %v3293_v57, %v3112_v58 }
  0x3f   : > { %640 = vmatpush.bf16.msra.mxu2 %v3799_v55  ;;  %v3300_v63 = vld [vmem:[#allocation4 + $0xd4] sm:$0xf0]  ;;  %v3094_v0 = vld [vmem:[#allocation4 + $0x80] sm:$0xf]  ;;  %v3291_v1 = vld [vmem:[#allocation4 + $0x8c] sm:$0xf0]  ;;  %v3809_v3 = vor.u32 %v3294_v59, %v3120_v60 }
  0x40   : > { %v3811_v4 = vor.u32 %v3300_v63, %v3134_v61  ;;  %v3289_v5 = vld [vmem:[#allocation4 + $0x84] sm:$0xf]  ;;  %v3096_v6 = vld [vmem:[#allocation4 + $0x90] sm:$0xf0]  ;;  %v3290_v7 = vld [vmem:[#allocation4 + $0x8c] sm:$0xf]  ;;  %v3815_v11 = vor.u32 %v3291_v1, %v3094_v0 }
  0x41   : > { %615 = vmatpush.bf16.msra.mxu0 %v3791_v46  ;;  %628 = vmatpush.bf16.msra.mxu1 %v3795_v50  ;;  %v3104_v8 = vld [vmem:[#allocation4 + $0x98] sm:$0xf0]  ;;  %v3118_v9 = vld [vmem:[#allocation4 + $0xa8] sm:$0xf]  ;;  %v3296_v10 = vld [vmem:[#allocation4 + $0xb4] sm:$0xf0]  ;;  %v3821_v15 = vor.u32 %v3289_v5, %v3096_v6 }
  0x42   : > { %654 = vmatpush.bf16.msra.mxu3 %v3797_v51  ;;  %v3817_v12 = vor.u32 %v3296_v10, %v3118_v9  ;;  %v3078_v13 = vld [vmem:[#allocation4 + $0x60] sm:$0xf]  ;;  %v3287_v14 = vld [vmem:[#allocation4 + $0x6c] sm:$0xf0]  ;;  %v3823_v16 = vor.u32 %v3290_v7, %v3104_v8  ;;  %v3285_v17 = vld [vmem:[#allocation4 + $0x64] sm:$0xf] }
  0x43   : > { %641 = vmatpush.bf16.msra.mxu2 %v3811_v4  ;;  %v3102_v18 = vld [vmem:[#allocation4 + $0x88] sm:$0xf]  ;;  %v3292_v19 = vld [vmem:[#allocation4 + $0x94] sm:$0xf0]  ;;  %v3080_v20 = vld [vmem:[#allocation4 + $0x70] sm:$0xf0]  ;;  %v3827_v23 = vor.u32 %v3287_v14, %v3078_v13 }
  0x44   : > { %v3286_v21 = vld [vmem:[#allocation4 + $0x6c] sm:$0xf]  ;;  %v3088_v22 = vld [vmem:[#allocation4 + $0x78] sm:$0xf0]  ;;  %v3829_v24 = vor.u32 %v3292_v19, %v3102_v18  ;;  %v3062_v25 = vld [vmem:[#allocation4 + $0x40] sm:$0xf]  ;;  %v3833_v27 = vor.u32 %v3285_v17, %v3080_v20 }
  0x45   : > { %616 = vmatpush.bf16.msra.mxu0 %v3803_v62  ;;  %629 = vmatpush.bf16.msra.mxu1 %v3807_v2  ;;  %v3283_v26 = vld [vmem:[#allocation4 + $0x4c] sm:$0xf0]  ;;  %v3835_v28 = vor.u32 %v3286_v21, %v3088_v22  ;;  %v3281_v29 = vld [vmem:[#allocation4 + $0x44] sm:$0xf]  ;;  %v3086_v30 = vld [vmem:[#allocation4 + $0x68] sm:$0xf] }
  0x46   : > { %655 = vmatpush.bf16.msra.mxu3 %v3809_v3  ;;  %v3288_v31 = vld [vmem:[#allocation4 + $0x74] sm:$0xf0]  ;;  %v3064_v32 = vld [vmem:[#allocation4 + $0x50] sm:$0xf0]  ;;  %v3282_v33 = vld [vmem:[#allocation4 + $0x4c] sm:$0xf]  ;;  %v3839_v35 = vor.u32 %v3283_v26, %v3062_v25 }
  0x47   : > { %642 = vmatpush.bf16.msra.mxu2 %v3817_v12  ;;  %v3072_v34 = vld [vmem:[#allocation4 + $0x58] sm:$0xf0]  ;;  %v3841_v36 = vor.u32 %v3288_v31, %v3086_v30  ;;  %v3046_v38 = vld [vmem:[#allocation4 + $0x20] sm:$0xf]  ;;  %v3279_v39 = vld [vmem:[#allocation4 + $0x2c] sm:$0xf0]  ;;  %v3845_v40 = vor.u32 %v3281_v29, %v3064_v32 }
  0x48   : > { %v3847_v43 = vor.u32 %v3282_v33, %v3072_v34  ;;  %v3277_v44 = vld [vmem:[#allocation4 + $0x24] sm:$0xf]  ;;  %v3070_v45 = vld [vmem:[#allocation4 + $0x48] sm:$0xf]  ;;  %v3284_v47 = vld [vmem:[#allocation4 + $0x54] sm:$0xf0]  ;;  %v3851_v53 = vor.u32 %v3279_v39, %v3046_v38 }
  0x49   : > { %617 = vmatpush.bf16.msra.mxu0 %v3815_v11  ;;  %630 = vmatpush.bf16.msra.mxu1 %v3821_v15  ;;  %v3048_v48 = vld [vmem:[#allocation4 + $0x30] sm:$0xf0]  ;;  %v3278_v49 = vld [vmem:[#allocation4 + $0x2c] sm:$0xf]  ;;  %v3056_v52 = vld [vmem:[#allocation4 + $0x38] sm:$0xf0]  ;;  %v3853_v54 = vor.u32 %v3284_v47, %v3070_v45 }
  0x4a   : > { %656 = vmatpush.bf16.msra.mxu3 %v3823_v16  ;;  %v3030_v56 = vld [vmem:[#allocation4] sm:$0xf]  ;;  %v3275_v57 = vld [vmem:[#allocation4 + $0xc] sm:$0xf0]  ;;  %v3857_v58 = vor.u32 %v3277_v44, %v3048_v48  ;;  %v3859_v59 = vor.u32 %v3278_v49, %v3056_v52  ;;  %v3273_v60 = vld [vmem:[#allocation4 + $0x4] sm:$0xf] }
  0x4b   : > { %643 = vmatpush.bf16.msra.mxu2 %v3829_v24  ;;  %v3054_v61 = vld [vmem:[#allocation4 + $0x28] sm:$0xf]  ;;  %v3280_v63 = vld [vmem:[#allocation4 + $0x34] sm:$0xf0]  ;;  %v3032_v0 = vld [vmem:[#allocation4 + $0x10] sm:$0xf0]  ;;  %v3863_v6 = vor.u32 %v3275_v57, %v3030_v56 }
  0x4c   : > { %v3274_v1 = vld [vmem:[#allocation4 + $0xc] sm:$0xf]  ;;  %v3040_v5 = vld [vmem:[#allocation4 + $0x18] sm:$0xf0]  ;;  %v445_v7 = vld [vmem:[#allocation2] sm:$0xff]  ;;  %v3865_v8 = vor.u32 %v3280_v63, %v3054_v61  ;;  %v3869_v9 = vor.u32 %v3273_v60, %v3032_v0  ;;  %p3160_p6 = scmp.ge.s32.totalorder %s3667_s25, 20 }
  0x4d   : > { %618 = vmatpush.bf16.msra.mxu0 %v3827_v23  ;;  %631 = vmatpush.bf16.msra.mxu1 %v3833_v27  ;;  %v3871_v10 = vor.u32 %v3274_v1, %v3040_v5  ;;  %v3038_v13 = vld [vmem:[#allocation4 + $0x8] sm:$0xf]  ;;  %v3276_v14 = vld [vmem:[#allocation4 + $0x14] sm:$0xf0]  ;;  %v453_v17 = vpack.c.bf16 %v445_v7, %v445_v7  ;;  %v447_v19 = vld [vmem:[%s3674_s7] sm:$0xff] }
  0x4e   : > { %657 = vmatpush.bf16.msra.mxu3 %v3835_v28  ;;  %v3877_v18 = vor.u32 %v3276_v14, %v3038_v13  ;;  %v449_v20 = vunpack.c.l.bf16 %v447_v19  ;;  %v450_v21 = vunpack.c.h.bf16 %v447_v19  ;;  %v448_v29 = vld [vmem:[%s3674_s7 + $0x8] sm:$0xff] }
  0x4f   : > { %644 = vmatpush.bf16.msra.mxu2 %v3841_v36  ;;  %v452_v33 = vunpack.c.h.bf16 %v448_v29  ;;  %v451_v57 = vunpack.c.l.bf16 %v448_v29 }
  0x51   : > { %619 = vmatpush.bf16.msra.mxu0 %v3839_v35  ;;  %632 = vmatpush.bf16.msra.mxu1 %v3845_v40 }
  0x52   : > { %658 = vmatpush.bf16.msra.mxu3 %v3847_v43 }
  0x53   : > { %645 = vmatpush.bf16.msra.mxu2 %v3853_v54 }
  0x55   : > { %620 = vmatpush.bf16.msra.mxu0 %v3851_v53  ;;  %633 = vmatpush.bf16.msra.mxu1 %v3857_v58 }
  0x56   : > { %659 = vmatpush.bf16.msra.mxu3 %v3859_v59 }
  0x57   : > { %646 = vmatpush.bf16.msra.mxu2 %v3865_v8 }
  0x59   : > { %621 = vmatpush.bf16.msra.mxu0 %v3863_v6  ;;  %634 = vmatpush.bf16.msra.mxu1 %v3869_v9 }
  0x5a   : > { %660 = vmatpush.bf16.msra.mxu3 %v3871_v10 }
  0x5b   : > { %647 = vmatpush.bf16.msra.mxu2 %v3877_v18 }
  0x5c   : > { %622 = vmatmul.bf16.vlgmr.msra.gmra.mxu0 %v453_v17  ;;  %635 = vmatmul.bf16.vlgmr.msra.gmra.mxu1 %v453_v17 }
  0x5d   : > { %661 = vmatmul.bf16.vlgmr.msra.gmra.mxu3 %v453_v17 }
  0x5e   : > { %648 = vmatmul.bf16.vlgmr.msra.gmra.mxu2 %v453_v17 }
  0xd9   : > { %v623_v22 = vpop.f32.mrf.mxu0  ;;  %v636_v26 = vpop.f32.mrf.mxu1 }
  0xda   : > { %v666_v25 = vadd.f32 %v623_v22, %v449_v20  ;;  %v667_v30 = vadd.f32 %v636_v26, %v450_v21 }
  0xdc   : > { %v3156_v31 = vmul.f32 -1.442695, %v666_v25  ;;  %v3157_v32 = vmul.f32 -1.442695, %v667_v30 }
  0xde   : > { %3329 = vpow2.f32 %v3156_v31 }
  0xdf   : > { %3331 = vpow2.f32 %v3157_v32 }
  0xe0   : > { %v662_v34 = vpop.f32.mrf.mxu3 }
  0xe1   : > { %v669_v38 = vadd.f32 %v662_v34, %v452_v33  ;;  %v625_v39 = vpop.f32.mrf.mxu0  ;;  %v638_v44 = vpop.f32.mrf.mxu1 }
  0xe2   : > { %v649_v48 = vpop.f32.mrf.mxu2  ;;  %v446_v44 = vld [vmem:[#allocation3] sm:$0xff] }
  0xe3   : > { %v3158_v45 = vmul.f32 -1.442695, %v669_v38  ;;  %v668_v63 = vadd.f32 %v649_v48, %v451_v57 }
  0xe4   : > { %v3330_v47 = vpop.eup %3329 }
  0xe5   : > { %v3332_v49 = vpop.eup %3331  ;;  %v673_v52 = vadd.f32 1.0, %v3330_v47  ;;  %3333 = vpow2.f32 %v3158_v45 }
  0xe6   : > { %v692_v56 = vadd.f32 1.0, %v3332_v49 }
  0xe7   : > { %3335 = vrcp.f32 %v673_v52  ;;  %v685_v20 = vand.u32 2147483648, %v673_v52  ;;  %v683_v25 = vand.u32 2147483647, %v673_v52  ;;  %vm679_vm2 = vweird.f32 %v673_v52 }
  0xe8   : > { %3337 = vrcp.f32 %v692_v56  ;;  %v664_v60 = vpop.f32.mrf.mxu3  ;;  %v704_v21 = vand.u32 2147483648, %v692_v56  ;;  %v702_v29 = vand.u32 2147483647, %v692_v56  ;;  %vm698_vm3 = vweird.f32 %v692_v56 }
  0xe9   : > { %v686_v34 = vor.u32 1.1754944e-38, %v685_v20  ;;  %vm684_vm6 = vcmp.eq.f32.partialorder %v683_v25, 8.507059e+37 }
  0xea   : > { %v651_v1 = vpop.f32.mrf.mxu2  ;;  %v705_v39 = vor.u32 1.1754944e-38, %v704_v21  ;;  %vm703_vm7 = vcmp.eq.f32.partialorder %v702_v29, 8.507059e+37 }
  0xeb   : > { %v3334_v61 = vpop.eup %3333 }
  0xec   : > { %v712_v0 = vadd.f32 1.0, %v3334_v61 }
  0xed   : > { %v3336_v5 = vpop.eup %3335 }
  0xee   : > { %v3338_v7 = vpop.eup %3337  ;;  %v675_v13 = vmul.f32 %v3336_v5, %v673_v52  ;;  %3339 = vrcp.f32 %v712_v0  ;;  %vm680_vm0 = vweird.f32 %v3336_v5  ;;  %vm718_vm9 = vweird.f32 %v712_v0 }
  0xef   : > { %v694_v14 = vmul.f32 %v3338_v7, %v692_v56  ;;  %3341 = vtanh.f32 %v668_v63  ;;  %vm699_vm1 = vweird.f32 %v3338_v7  ;;  %vm681_vm4 = vmor %vm679_vm2, %vm680_vm0  ;;  %v724_v56 = vand.u32 2147483648, %v712_v0 }
  0xf0   : > { %v676_v17 = vsub.f32 1.0, %v675_v13  ;;  %vm700_vm5 = vmor %vm698_vm3, %vm699_vm1  ;;  %v722_v13 = vand.u32 2147483647, %v712_v0 }
  0xf1   : > { %v695_v19 = vsub.f32 1.0, %v694_v14 }
  0xf2   : > { %v677_v22 = vmul.f32 %v3336_v5, %v676_v17  ;;  %v725_v17 = vor.u32 1.1754944e-38, %v724_v56  ;;  %vm723_vm11 = vcmp.eq.f32.partialorder %v722_v13, 8.507059e+37 }
  0xf3   : > { %v696_v26 = vmul.f32 %v3338_v7, %v695_v19 }
  0xf4   : > { %v3340_v30 = vpop.eup %3339  ;;  %v678_v31 = vadd.f32 %v3336_v5, %v677_v22 }
  0xf5   : > { %v3342_v32 = vpop.eup %3341  ;;  %v714_v33 = vmul.f32 %v3340_v30, %v712_v0  ;;  %v697_v38 = vadd.f32 %v3338_v7, %v696_v26  ;;  %vm719_vm8 = vweird.f32 %v3340_v30 }
  0xf6   : > { %v682_v45 = vsel %vm681_vm4, %v3336_v5, %v678_v31  ;;  %vm720_vm10 = vmor %vm718_vm9, %vm719_vm8 }
  0xf7   : > { %v715_v47 = vsub.f32 1.0, %v714_v33  ;;  %v687_v48 = vsel %vm684_vm6, %v686_v34, %v682_v45  ;;  %v701_v49 = vsel %vm700_vm5, %v3338_v7, %v697_v38 }
  0xf8   : > { %v706_v57 = vsel %vm703_vm7, %v705_v39, %v701_v49  ;;  %v729_v60 = vmul.f32 %v3342_v32, %v687_v48 }
  0xf9   : > { %v716_v61 = vmul.f32 %v3340_v30, %v715_v47  ;;  %v728_v63 = vmul.f32 %v706_v57, %v446_v44 }
  0xfb   : > { %v730_v52 = vadd.f32 %v729_v60, %v728_v63  ;;  %v717_v1 = vadd.f32 %v3340_v30, %v716_v61 }
  0xfd   : > { %3343 = vtanh.f32 %v730_v52  ;;  %v721_v14 = vsel %vm720_vm10, %v3340_v30, %v717_v1 }
  0xfe   : > { %v726_v19 = vsel %vm723_vm11, %v725_v17, %v721_v14 }
 0x100   : > { %737 = sbr.rel (%p3160_p6) target bundleno = 263 (0x107), region = 59 }
 0x103   : > { %v3344_v5 = vpop.eup %3343 }
 0x104   : > { %v732_v20 = vmul.f32 %v3344_v5, %v726_v19 }
 0x105   : > { %738 = vst [vmem:[#allocation3] sm:$0xff] %v730_v52 }
 0x106   : > { %739 = vst [vmem:[#allocation2] sm:$0xff] %v732_v20 }
 0x107 PF: > { %v740_v7 = vpack.c.bf16 %v732_v20, %v732_v20  ;;  %752 = vmatpush.bf16.msrb.mxu0 %v3784_v37  ;;  %765 = vmatpush.bf16.msrb.mxu1 %v3786_v41  ;;  %s871_s11 = sadd.s32 1, %s3667_s25  ;;  %v3161_v22 = vld [vmem:[%s3674_s7 + $0x10] sm:$0xff]  ;;  %v3162_v33 = vld [vmem:[%s3674_s7 + $0x18] sm:$0xff] }
 0x108   : > { %791 = vmatpush.bf16.msrb.mxu3 %v3788_v42  ;;  %778 = vmatpush.bf16.msrb.mxu2 %v3799_v55  ;;  %v747_v25 = vunpack.c.l.bf16 %v3161_v22  ;;  %v748_v26 = vunpack.c.h.bf16 %v3161_v22  ;;  %v750_v39 = vunpack.c.h.bf16 %v3162_v33  ;;  %v749_v1 = vunpack.c.l.bf16 %v3162_v33  ;;  %p3166_p7 = scmp.ge.s32.totalorder %s871_s11, 20 }
 0x109   : > { %741 = vst [vmem:[%s3679_s10] sm:$0xf] %v740_v7 }
 0x10b   : > { %753 = vmatpush.bf16.msrb.mxu0 %v3791_v46  ;;  %766 = vmatpush.bf16.msrb.mxu1 %v3795_v50 }
 0x10c   : > { %792 = vmatpush.bf16.msrb.mxu3 %v3797_v51  ;;  %779 = vmatpush.bf16.msrb.mxu2 %v3811_v4 }
 0x10d   : > { %v742_v0 = vld [vmem:[#allocation2] sm:$0xff] }
 0x10e   : > { %v751_v21 = vpack.c.bf16 %v742_v0, %v742_v0 }
 0x10f   : > { %754 = vmatpush.bf16.msrb.mxu0 %v3803_v62  ;;  %767 = vmatpush.bf16.msrb.mxu1 %v3807_v2 }
 0x110   : > { %793 = vmatpush.bf16.msrb.mxu3 %v3809_v3  ;;  %780 = vmatpush.bf16.msrb.mxu2 %v3817_v12 }
 0x113   : > { %755 = vmatpush.bf16.msrb.mxu0 %v3815_v11  ;;  %768 = vmatpush.bf16.msrb.mxu1 %v3821_v15 }
 0x114   : > { %794 = vmatpush.bf16.msrb.mxu3 %v3823_v16  ;;  %781 = vmatpush.bf16.msrb.mxu2 %v3829_v24 }
 0x117   : > { %756 = vmatpush.bf16.msrb.mxu0 %v3827_v23  ;;  %769 = vmatpush.bf16.msrb.mxu1 %v3833_v27 }
 0x118   : > { %795 = vmatpush.bf16.msrb.mxu3 %v3835_v28  ;;  %782 = vmatpush.bf16.msrb.mxu2 %v3841_v36 }
 0x11b   : > { %757 = vmatpush.bf16.msrb.mxu0 %v3839_v35  ;;  %770 = vmatpush.bf16.msrb.mxu1 %v3845_v40 }
 0x11c   : > { %796 = vmatpush.bf16.msrb.mxu3 %v3847_v43  ;;  %783 = vmatpush.bf16.msrb.mxu2 %v3853_v54 }
 0x11f   : > { %758 = vmatpush.bf16.msrb.mxu0 %v3851_v53  ;;  %771 = vmatpush.bf16.msrb.mxu1 %v3857_v58 }
 0x120   : > { %797 = vmatpush.bf16.msrb.mxu3 %v3859_v59  ;;  %784 = vmatpush.bf16.msrb.mxu2 %v3865_v8 }
 0x123   : > { %759 = vmatpush.bf16.msrb.mxu0 %v3863_v6  ;;  %772 = vmatpush.bf16.msrb.mxu1 %v3869_v9 }
 0x124   : > { %798 = vmatpush.bf16.msrb.mxu3 %v3871_v10  ;;  %785 = vmatpush.bf16.msrb.mxu2 %v3877_v18 }
 0x126   : > { %760 = vmatmul.bf16.vlgmr.msrb.gmra.mxu0 %v751_v21  ;;  %773 = vmatmul.bf16.vlgmr.msrb.gmra.mxu1 %v751_v21 }
 0x127   : > { %799 = vmatmul.bf16.vlgmr.msrb.gmra.mxu3 %v751_v21  ;;  %786 = vmatmul.bf16.vlgmr.msrb.gmra.mxu2 %v751_v21 }
 0x1a3   : > { %v761_v29 = vpop.f32.mrf.mxu0  ;;  %v774_v30 = vpop.f32.mrf.mxu1 }
 0x1a4   : > { %v804_v31 = vadd.f32 %v761_v29, %v747_v25  ;;  %v805_v32 = vadd.f32 %v774_v30, %v748_v26 }
 0x1a6   : > { %v3163_v34 = vmul.f32 -1.442695, %v804_v31  ;;  %v3164_v38 = vmul.f32 -1.442695, %v805_v32 }
 0x1a8   : > { %3345 = vpow2.f32 %v3163_v34 }
 0x1a9   : > { %3347 = vpow2.f32 %v3164_v38 }
 0x1aa   : > { %v800_v44 = vpop.f32.mrf.mxu3  ;;  %v787_v45 = vpop.f32.mrf.mxu2 }
 0x1ab   : > { %v807_v47 = vadd.f32 %v800_v44, %v750_v39  ;;  %v763_v48 = vpop.f32.mrf.mxu0  ;;  %v776_v49 = vpop.f32.mrf.mxu1  ;;  %v806_v17 = vadd.f32 %v787_v45, %v749_v1 }
 0x1ac   : > { %v743_v48 = vld [vmem:[#allocation3] sm:$0xff] }
 0x1ad   : > { %v3165_v57 = vmul.f32 -1.442695, %v807_v47 }
 0x1ae   : > { %v3346_v60 = vpop.eup %3345 }
 0x1af   : > { %v3348_v61 = vpop.eup %3347  ;;  %v811_v63 = vadd.f32 1.0, %v3346_v60  ;;  %3349 = vpow2.f32 %v3165_v57 }
 0x1b0   : > { %v830_v52 = vadd.f32 1.0, %v3348_v61 }
 0x1b1   : > { %3351 = vrcp.f32 %v811_v63  ;;  %v823_v25 = vand.u32 2147483648, %v811_v63  ;;  %v821_v30 = vand.u32 2147483647, %v811_v63  ;;  %vm817_vm14 = vweird.f32 %v811_v63 }
 0x1b2   : > { %3353 = vrcp.f32 %v830_v52  ;;  %v802_v56 = vpop.f32.mrf.mxu3  ;;  %v789_v13 = vpop.f32.mrf.mxu2  ;;  %v842_v26 = vand.u32 2147483648, %v830_v52  ;;  %v840_v32 = vand.u32 2147483647, %v830_v52  ;;  %vm836_vm15 = vweird.f32 %v830_v52 }
 0x1b3   : > { %v824_v44 = vor.u32 1.1754944e-38, %v823_v25  ;;  %vm822_vm2 = vcmp.eq.f32.partialorder %v821_v30, 8.507059e+37 }
 0x1b4   : > { %v843_v47 = vor.u32 1.1754944e-38, %v842_v26  ;;  %vm841_vm3 = vcmp.eq.f32.partialorder %v840_v32, 8.507059e+37 }
 0x1b5   : > { %v3350_v14 = vpop.eup %3349 }
 0x1b6   : > { %v850_v5 = vadd.f32 1.0, %v3350_v14 }
 0x1b7   : > { %v3352_v19 = vpop.eup %3351 }
 0x1b8   : > { %v3354_v20 = vpop.eup %3353  ;;  %v813_v7 = vmul.f32 %v3352_v19, %v811_v63  ;;  %3355 = vrcp.f32 %v850_v5  ;;  %vm818_vm12 = vweird.f32 %v3352_v19  ;;  %vm856_vm5 = vweird.f32 %v850_v5 }
 0x1b9   : > { %v832_v0 = vmul.f32 %v3354_v20, %v830_v52  ;;  %3357 = vtanh.f32 %v806_v17  ;;  %vm837_vm13 = vweird.f32 %v3354_v20  ;;  %vm819_vm0 = vmor %vm817_vm14, %vm818_vm12  ;;  %v862_v52 = vand.u32 2147483648, %v850_v5 }
 0x1ba   : > { %v814_v21 = vsub.f32 1.0, %v813_v7  ;;  %vm838_vm1 = vmor %vm836_vm15, %vm837_vm13  ;;  %v860_v7 = vand.u32 2147483647, %v850_v5 }
 0x1bb   : > { %v833_v22 = vsub.f32 1.0, %v832_v0 }
 0x1bc   : > { %v815_v29 = vmul.f32 %v3352_v19, %v814_v21  ;;  %v863_v21 = vor.u32 1.1754944e-38, %v862_v52  ;;  %vm861_vm7 = vcmp.eq.f32.partialorder %v860_v7, 8.507059e+37 }
 0x1bd   : > { %v834_v31 = vmul.f32 %v3354_v20, %v833_v22 }
 0x1be   : > { %v3356_v33 = vpop.eup %3355  ;;  %v816_v34 = vadd.f32 %v3352_v19, %v815_v29 }
 0x1bf   : > { %v3358_v38 = vpop.eup %3357  ;;  %v852_v39 = vmul.f32 %v3356_v33, %v850_v5  ;;  %v835_v45 = vadd.f32 %v3354_v20, %v834_v31  ;;  %vm857_vm4 = vweird.f32 %v3356_v33 }
 0x1c0   : > { %v820_v49 = vsel %vm819_vm0, %v3352_v19, %v816_v34  ;;  %vm858_vm6 = vmor %vm856_vm5, %vm857_vm4 }
 0x1c1   : > { %v853_v57 = vsub.f32 1.0, %v852_v39  ;;  %v825_v60 = vsel %vm822_vm2, %v824_v44, %v820_v49  ;;  %v839_v61 = vsel %vm838_vm1, %v3354_v20, %v835_v45 }
 0x1c2   : > { %v844_v1 = vsel %vm841_vm3, %v843_v47, %v839_v61  ;;  %v867_v56 = vmul.f32 %v3358_v38, %v825_v60 }
 0x1c3   : > { %v854_v13 = vmul.f32 %v3356_v33, %v853_v57  ;;  %v866_v14 = vmul.f32 %v844_v1, %v743_v48 }
 0x1c5   : > { %v868_v63 = vadd.f32 %v867_v56, %v866_v14  ;;  %v855_v17 = vadd.f32 %v3356_v33, %v854_v13 }
 0x1c7   : > { %3359 = vtanh.f32 %v868_v63  ;;  %v859_v0 = vsel %vm858_vm6, %v3356_v33, %v855_v17 }
 0x1c8   : > { %v864_v22 = vsel %vm861_vm7, %v863_v21, %v859_v0 }
 0x1ca   : > { %875 = sbr.rel (%p3166_p7) target bundleno = 465 (0x1d1), region = 63 }
 0x1cd   : > { %v3360_v19 = vpop.eup %3359 }
 0x1ce   : > { %v870_v25 = vmul.f32 %v3360_v19, %v864_v22 }
 0x1cf   : > { %876 = vst [vmem:[#allocation3] sm:$0xff] %v868_v63 }
 0x1d0   : > { %877 = vst [vmem:[#allocation2] sm:$0xff] %v870_v25 }
 0x1d1 PF: > { %v878_v20 = vpack.c.bf16 %v870_v25, %v870_v25  ;;  %891 = vmatpush.bf16.msra.mxu0 %v3784_v37  ;;  %904 = vmatpush.bf16.msra.mxu1 %v3786_v41  ;;  %s1010_s12 = sadd.s32 2, %s3667_s25  ;;  %v3168_v29 = vld [vmem:[%s3674_s7 + $0x20] sm:$0xff]  ;;  %v3169_v39 = vld [vmem:[%s3674_s7 + $0x28] sm:$0xff] }
 0x1d2   : > { %930 = vmatpush.bf16.msra.mxu3 %v3788_v42  ;;  %917 = vmatpush.bf16.msra.mxu2 %v3799_v55  ;;  %v886_v30 = vunpack.c.l.bf16 %v3168_v29  ;;  %v887_v31 = vunpack.c.h.bf16 %v3168_v29  ;;  %v889_v47 = vunpack.c.h.bf16 %v3169_v39  ;;  %v888_v17 = vunpack.c.l.bf16 %v3169_v39  ;;  %p3173_p8 = scmp.ge.s32.totalorder %s1010_s12, 20 }
 0x1d3   : > { %3167 = vst [vmem:[%s3679_s10 + $0x4] sm:$0xf] %v878_v20 }
 0x1d5   : > { %892 = vmatpush.bf16.msra.mxu0 %v3791_v46  ;;  %905 = vmatpush.bf16.msra.mxu1 %v3795_v50 }
 0x1d6   : > { %931 = vmatpush.bf16.msra.mxu3 %v3797_v51  ;;  %918 = vmatpush.bf16.msra.mxu2 %v3811_v4 }
 0x1d7   : > { %v881_v5 = vld [vmem:[#allocation2] sm:$0xff] }
 0x1d8   : > { %v890_v26 = vpack.c.bf16 %v881_v5, %v881_v5 }
 0x1d9   : > { %893 = vmatpush.bf16.msra.mxu0 %v3803_v62  ;;  %906 = vmatpush.bf16.msra.mxu1 %v3807_v2 }
 0x1da   : > { %932 = vmatpush.bf16.msra.mxu3 %v3809_v3  ;;  %919 = vmatpush.bf16.msra.mxu2 %v3817_v12 }
 0x1dd   : > { %894 = vmatpush.bf16.msra.mxu0 %v3815_v11  ;;  %907 = vmatpush.bf16.msra.mxu1 %v3821_v15 }
 0x1de   : > { %933 = vmatpush.bf16.msra.mxu3 %v3823_v16  ;;  %920 = vmatpush.bf16.msra.mxu2 %v3829_v24 }
 0x1e1   : > { %895 = vmatpush.bf16.msra.mxu0 %v3827_v23  ;;  %908 = vmatpush.bf16.msra.mxu1 %v3833_v27 }
 0x1e2   : > { %934 = vmatpush.bf16.msra.mxu3 %v3835_v28  ;;  %921 = vmatpush.bf16.msra.mxu2 %v3841_v36 }
 0x1e5   : > { %896 = vmatpush.bf16.msra.mxu0 %v3839_v35  ;;  %909 = vmatpush.bf16.msra.mxu1 %v3845_v40 }
 0x1e6   : > { %935 = vmatpush.bf16.msra.mxu3 %v3847_v43  ;;  %922 = vmatpush.bf16.msra.mxu2 %v3853_v54 }
 0x1e9   : > { %897 = vmatpush.bf16.msra.mxu0 %v3851_v53  ;;  %910 = vmatpush.bf16.msra.mxu1 %v3857_v58 }
 0x1ea   : > { %936 = vmatpush.bf16.msra.mxu3 %v3859_v59  ;;  %923 = vmatpush.bf16.msra.mxu2 %v3865_v8 }
 0x1ed   : > { %898 = vmatpush.bf16.msra.mxu0 %v3863_v6  ;;  %911 = vmatpush.bf16.msra.mxu1 %v3869_v9 }
 0x1ee   : > { %937 = vmatpush.bf16.msra.mxu3 %v3871_v10  ;;  %924 = vmatpush.bf16.msra.mxu2 %v3877_v18 }
 0x1f0   : > { %899 = vmatmul.bf16.vlgmr.msra.gmra.mxu0 %v890_v26  ;;  %912 = vmatmul.bf16.vlgmr.msra.gmra.mxu1 %v890_v26 }
 0x1f1   : > { %938 = vmatmul.bf16.vlgmr.msra.gmra.mxu3 %v890_v26  ;;  %925 = vmatmul.bf16.vlgmr.msra.gmra.mxu2 %v890_v26 }
 0x26d   : > { %v900_v32 = vpop.f32.mrf.mxu0  ;;  %v913_v33 = vpop.f32.mrf.mxu1 }
 0x26e   : > { %v943_v34 = vadd.f32 %v900_v32, %v886_v30  ;;  %v944_v38 = vadd.f32 %v913_v33, %v887_v31 }
 0x270   : > { %v3170_v44 = vmul.f32 -1.442695, %v943_v34  ;;  %v3171_v45 = vmul.f32 -1.442695, %v944_v38 }
 0x272   : > { %3361 = vpow2.f32 %v3170_v44 }
 0x273   : > { %3363 = vpow2.f32 %v3171_v45 }
 0x274   : > { %v939_v48 = vpop.f32.mrf.mxu3  ;;  %v926_v49 = vpop.f32.mrf.mxu2 }
 0x275   : > { %v946_v57 = vadd.f32 %v939_v48, %v889_v47  ;;  %v902_v60 = vpop.f32.mrf.mxu0  ;;  %v915_v61 = vpop.f32.mrf.mxu1  ;;  %v945_v21 = vadd.f32 %v926_v49, %v888_v17 }
 0x276   : > { %v882_v60 = vld [vmem:[#allocation3] sm:$0xff] }
 0x277   : > { %v3172_v1 = vmul.f32 -1.442695, %v946_v57 }
 0x278   : > { %v3362_v56 = vpop.eup %3361 }
 0x279   : > { %v3364_v13 = vpop.eup %3363  ;;  %v950_v14 = vadd.f32 1.0, %v3362_v56  ;;  %3365 = vpow2.f32 %v3172_v1 }
 0x27a   : > { %v969_v63 = vadd.f32 1.0, %v3364_v13 }
 0x27b   : > { %3367 = vrcp.f32 %v950_v14  ;;  %v962_v30 = vand.u32 2147483648, %v950_v14  ;;  %v960_v33 = vand.u32 2147483647, %v950_v14  ;;  %vm956_vm10 = vweird.f32 %v950_v14 }
 0x27c   : > { %3369 = vrcp.f32 %v969_v63  ;;  %v941_v52 = vpop.f32.mrf.mxu3  ;;  %v928_v7 = vpop.f32.mrf.mxu2  ;;  %v981_v31 = vand.u32 2147483648, %v969_v63  ;;  %v979_v38 = vand.u32 2147483647, %v969_v63  ;;  %vm975_vm11 = vweird.f32 %v969_v63 }
 0x27d   : > { %v963_v48 = vor.u32 1.1754944e-38, %v962_v30  ;;  %vm961_vm14 = vcmp.eq.f32.partialorder %v960_v33, 8.507059e+37 }
 0x27e   : > { %v982_v57 = vor.u32 1.1754944e-38, %v981_v31  ;;  %vm980_vm15 = vcmp.eq.f32.partialorder %v979_v38, 8.507059e+37 }
 0x27f   : > { %v3366_v0 = vpop.eup %3365 }
 0x280   : > { %v989_v19 = vadd.f32 1.0, %v3366_v0 }
 0x281   : > { %v3368_v22 = vpop.eup %3367 }
 0x282   : > { %v3370_v25 = vpop.eup %3369  ;;  %v952_v20 = vmul.f32 %v3368_v22, %v950_v14  ;;  %3371 = vrcp.f32 %v989_v19  ;;  %vm957_vm8 = vweird.f32 %v3368_v22  ;;  %vm995_vm1 = vweird.f32 %v989_v19 }
 0x283   : > { %v971_v5 = vmul.f32 %v3370_v25, %v969_v63  ;;  %3373 = vtanh.f32 %v945_v21  ;;  %vm976_vm9 = vweird.f32 %v3370_v25  ;;  %vm958_vm12 = vmor %vm956_vm10, %vm957_vm8  ;;  %v1001_v63 = vand.u32 2147483648, %v989_v19 }
 0x284   : > { %v953_v26 = vsub.f32 1.0, %v952_v20  ;;  %vm977_vm13 = vmor %vm975_vm11, %vm976_vm9  ;;  %v999_v20 = vand.u32 2147483647, %v989_v19 }
 0x285   : > { %v972_v29 = vsub.f32 1.0, %v971_v5 }
 0x286   : > { %v954_v32 = vmul.f32 %v3368_v22, %v953_v26  ;;  %v1002_v26 = vor.u32 1.1754944e-38, %v1001_v63  ;;  %vm1000_vm3 = vcmp.eq.f32.partialorder %v999_v20, 8.507059e+37 }
 0x287   : > { %v973_v34 = vmul.f32 %v3370_v25, %v972_v29 }
 0x288   : > { %v3372_v39 = vpop.eup %3371  ;;  %v955_v44 = vadd.f32 %v3368_v22, %v954_v32 }
 0x289   : > { %v3374_v45 = vpop.eup %3373  ;;  %v991_v47 = vmul.f32 %v3372_v39, %v989_v19  ;;  %v974_v49 = vadd.f32 %v3370_v25, %v973_v34  ;;  %vm996_vm0 = vweird.f32 %v3372_v39 }
 0x28a   : > { %v959_v61 = vsel %vm958_vm12, %v3368_v22, %v955_v44  ;;  %vm997_vm2 = vmor %vm995_vm1, %vm996_vm0 }
 0x28b   : > { %v992_v1 = vsub.f32 1.0, %v991_v47  ;;  %v964_v56 = vsel %vm961_vm14, %v963_v48, %v959_v61  ;;  %v978_v13 = vsel %vm977_vm13, %v3370_v25, %v974_v49 }
 0x28c   : > { %v983_v17 = vsel %vm980_vm15, %v982_v57, %v978_v13  ;;  %v1006_v52 = vmul.f32 %v3374_v45, %v964_v56 }
 0x28d   : > { %v993_v7 = vmul.f32 %v3372_v39, %v992_v1  ;;  %v1005_v0 = vmul.f32 %v983_v17, %v882_v60 }
 0x28f   : > { %v1007_v14 = vadd.f32 %v1006_v52, %v1005_v0  ;;  %v994_v21 = vadd.f32 %v3372_v39, %v993_v7 }
 0x291   : > { %3375 = vtanh.f32 %v1007_v14  ;;  %v998_v5 = vsel %vm997_vm2, %v3372_v39, %v994_v21 }
 0x292   : > { %v1003_v29 = vsel %vm1000_vm3, %v1002_v26, %v998_v5 }
 0x294   : > { %1014 = sbr.rel (%p3173_p8) target bundleno = 667 (0x29b), region = 67 }
 0x297   : > { %v3376_v22 = vpop.eup %3375 }
 0x298   : > { %v1009_v30 = vmul.f32 %v3376_v22, %v1003_v29 }
 0x299   : > { %1015 = vst [vmem:[#allocation3] sm:$0xff] %v1007_v14 }
 0x29a   : > { %1016 = vst [vmem:[#allocation2] sm:$0xff] %v1009_v30 }
 0x29b PF: > { %v1017_v25 = vpack.c.bf16 %v1009_v30, %v1009_v30  ;;  %1030 = vmatpush.bf16.msrb.mxu0 %v3784_v37  ;;  %1043 = vmatpush.bf16.msrb.mxu1 %v3786_v41  ;;  %s1149_s13 = sadd.s32 3, %s3667_s25  ;;  %v3175_v32 = vld [vmem:[%s3674_s7 + $0x30] sm:$0xff]  ;;  %v3176_v47 = vld [vmem:[%s3674_s7 + $0x38] sm:$0xff] }
 0x29c   : > { %1069 = vmatpush.bf16.msrb.mxu3 %v3788_v42  ;;  %1056 = vmatpush.bf16.msrb.mxu2 %v3799_v55  ;;  %v1025_v33 = vunpack.c.l.bf16 %v3175_v32  ;;  %v1026_v34 = vunpack.c.h.bf16 %v3175_v32  ;;  %v1028_v57 = vunpack.c.h.bf16 %v3176_v47  ;;  %v1027_v21 = vunpack.c.l.bf16 %v3176_v47  ;;  %p3180_p9 = scmp.ge.s32.totalorder %s1149_s13, 20 }
 0x29d   : > { %3174 = vst [vmem:[%s3679_s10 + $0x8] sm:$0xf] %v1017_v25 }
 0x29f   : > { %1031 = vmatpush.bf16.msrb.mxu0 %v3791_v46  ;;  %1044 = vmatpush.bf16.msrb.mxu1 %v3795_v50 }
 0x2a0   : > { %1070 = vmatpush.bf16.msrb.mxu3 %v3797_v51  ;;  %1057 = vmatpush.bf16.msrb.mxu2 %v3811_v4 }
 0x2a1   : > { %v1020_v19 = vld [vmem:[#allocation2] sm:$0xff] }
 0x2a2   : > { %v1029_v31 = vpack.c.bf16 %v1020_v19, %v1020_v19 }
 0x2a3   : > { %1032 = vmatpush.bf16.msrb.mxu0 %v3803_v62  ;;  %1045 = vmatpush.bf16.msrb.mxu1 %v3807_v2 }
 0x2a4   : > { %1071 = vmatpush.bf16.msrb.mxu3 %v3809_v3  ;;  %1058 = vmatpush.bf16.msrb.mxu2 %v3817_v12 }
 0x2a7   : > { %1033 = vmatpush.bf16.msrb.mxu0 %v3815_v11  ;;  %1046 = vmatpush.bf16.msrb.mxu1 %v3821_v15 }
 0x2a8   : > { %1072 = vmatpush.bf16.msrb.mxu3 %v3823_v16  ;;  %1059 = vmatpush.bf16.msrb.mxu2 %v3829_v24 }
 0x2ab   : > { %1034 = vmatpush.bf16.msrb.mxu0 %v3827_v23  ;;  %1047 = vmatpush.bf16.msrb.mxu1 %v3833_v27 }
 0x2ac   : > { %1073 = vmatpush.bf16.msrb.mxu3 %v3835_v28  ;;  %1060 = vmatpush.bf16.msrb.mxu2 %v3841_v36 }
 0x2af   : > { %1035 = vmatpush.bf16.msrb.mxu0 %v3839_v35  ;;  %1048 = vmatpush.bf16.msrb.mxu1 %v3845_v40 }
 0x2b0   : > { %1074 = vmatpush.bf16.msrb.mxu3 %v3847_v43  ;;  %1061 = vmatpush.bf16.msrb.mxu2 %v3853_v54 }
 0x2b3   : > { %1036 = vmatpush.bf16.msrb.mxu0 %v3851_v53  ;;  %1049 = vmatpush.bf16.msrb.mxu1 %v3857_v58 }
 0x2b4   : > { %1075 = vmatpush.bf16.msrb.mxu3 %v3859_v59  ;;  %1062 = vmatpush.bf16.msrb.mxu2 %v3865_v8 }
 0x2b7   : > { %1037 = vmatpush.bf16.msrb.mxu0 %v3863_v6  ;;  %1050 = vmatpush.bf16.msrb.mxu1 %v3869_v9 }
 0x2b8   : > { %1076 = vmatpush.bf16.msrb.mxu3 %v3871_v10  ;;  %1063 = vmatpush.bf16.msrb.mxu2 %v3877_v18 }
 0x2ba   : > { %1038 = vmatmul.bf16.vlgmr.msrb.gmra.mxu0 %v1029_v31  ;;  %1051 = vmatmul.bf16.vlgmr.msrb.gmra.mxu1 %v1029_v31 }
 0x2bb   : > { %1077 = vmatmul.bf16.vlgmr.msrb.gmra.mxu3 %v1029_v31  ;;  %1064 = vmatmul.bf16.vlgmr.msrb.gmra.mxu2 %v1029_v31 }
 0x337   : > { %v1039_v38 = vpop.f32.mrf.mxu0  ;;  %v1052_v39 = vpop.f32.mrf.mxu1 }
 0x338   : > { %v1082_v44 = vadd.f32 %v1039_v38, %v1025_v33  ;;  %v1083_v45 = vadd.f32 %v1052_v39, %v1026_v34 }
 0x33a   : > { %v3177_v48 = vmul.f32 -1.442695, %v1082_v44  ;;  %v3178_v49 = vmul.f32 -1.442695, %v1083_v45 }
 0x33c   : > { %3377 = vpow2.f32 %v3177_v48 }
 0x33d   : > { %3379 = vpow2.f32 %v3178_v49 }
 0x33e   : > { %v1078_v60 = vpop.f32.mrf.mxu3  ;;  %v1065_v61 = vpop.f32.mrf.mxu2 }
 0x33f   : > { %v1085_v1 = vadd.f32 %v1078_v60, %v1028_v57  ;;  %v1041_v56 = vpop.f32.mrf.mxu0  ;;  %v1054_v13 = vpop.f32.mrf.mxu1  ;;  %v1084_v26 = vadd.f32 %v1065_v61, %v1027_v21 }
 0x340   : > { %v1021_v56 = vld [vmem:[#allocation3] sm:$0xff] }
 0x341   : > { %v3179_v17 = vmul.f32 -1.442695, %v1085_v1 }
 0x342   : > { %v3378_v52 = vpop.eup %3377 }
 0x343   : > { %v3380_v7 = vpop.eup %3379  ;;  %v1089_v0 = vadd.f32 1.0, %v3378_v52  ;;  %3381 = vpow2.f32 %v3179_v17 }
 0x344   : > { %v1108_v14 = vadd.f32 1.0, %v3380_v7 }
 0x345   : > { %3383 = vrcp.f32 %v1089_v0  ;;  %v1101_v33 = vand.u32 2147483648, %v1089_v0  ;;  %v1099_v39 = vand.u32 2147483647, %v1089_v0  ;;  %vm1095_vm6 = vweird.f32 %v1089_v0 }
 0x346   : > { %3385 = vrcp.f32 %v1108_v14  ;;  %v1080_v63 = vpop.f32.mrf.mxu3  ;;  %v1067_v20 = vpop.f32.mrf.mxu2  ;;  %v1120_v34 = vand.u32 2147483648, %v1108_v14  ;;  %v1118_v45 = vand.u32 2147483647, %v1108_v14  ;;  %vm1114_vm7 = vweird.f32 %v1108_v14 }
 0x347   : > { %v1102_v60 = vor.u32 1.1754944e-38, %v1101_v33  ;;  %vm1100_vm10 = vcmp.eq.f32.partialorder %v1099_v39, 8.507059e+37 }
 0x348   : > { %v1121_v1 = vor.u32 1.1754944e-38, %v1120_v34  ;;  %vm1119_vm11 = vcmp.eq.f32.partialorder %v1118_v45, 8.507059e+37 }
 0x349   : > { %v3382_v5 = vpop.eup %3381 }
 0x34a   : > { %v1128_v22 = vadd.f32 1.0, %v3382_v5 }
 0x34b   : > { %v3384_v29 = vpop.eup %3383 }
 0x34c   : > { %v3386_v30 = vpop.eup %3385  ;;  %v1091_v25 = vmul.f32 %v3384_v29, %v1089_v0  ;;  %3387 = vrcp.f32 %v1128_v22  ;;  %vm1096_vm4 = vweird.f32 %v3384_v29  ;;  %vm1134_vm13 = vweird.f32 %v1128_v22 }
 0x34d   : > { %v1110_v19 = vmul.f32 %v3386_v30, %v1108_v14  ;;  %3389 = vtanh.f32 %v1084_v26  ;;  %vm1115_vm5 = vweird.f32 %v3386_v30  ;;  %vm1097_vm8 = vmor %vm1095_vm6, %vm1096_vm4  ;;  %v1140_v14 = vand.u32 2147483648, %v1128_v22 }
 0x34e   : > { %v1092_v31 = vsub.f32 1.0, %v1091_v25  ;;  %vm1116_vm9 = vmor %vm1114_vm7, %vm1115_vm5  ;;  %v1138_v25 = vand.u32 2147483647, %v1128_v22 }
 0x34f   : > { %v1111_v32 = vsub.f32 1.0, %v1110_v19 }
 0x350   : > { %v1093_v38 = vmul.f32 %v3384_v29, %v1092_v31  ;;  %v1141_v31 = vor.u32 1.1754944e-38, %v1140_v14  ;;  %vm1139_vm15 = vcmp.eq.f32.partialorder %v1138_v25, 8.507059e+37 }
 0x351   : > { %v1112_v44 = vmul.f32 %v3386_v30, %v1111_v32 }
 0x352   : > { %v3388_v47 = vpop.eup %3387  ;;  %v1094_v48 = vadd.f32 %v3384_v29, %v1093_v38 }
 0x353   : > { %v3390_v49 = vpop.eup %3389  ;;  %v1130_v57 = vmul.f32 %v3388_v47, %v1128_v22  ;;  %v1113_v61 = vadd.f32 %v3386_v30, %v1112_v44  ;;  %vm1135_vm12 = vweird.f32 %v3388_v47 }
 0x354   : > { %v1098_v13 = vsel %vm1097_vm8, %v3384_v29, %v1094_v48  ;;  %vm1136_vm14 = vmor %vm1134_vm13, %vm1135_vm12 }
 0x355   : > { %v1131_v17 = vsub.f32 1.0, %v1130_v57  ;;  %v1103_v52 = vsel %vm1100_vm10, %v1102_v60, %v1098_v13  ;;  %v1117_v7 = vsel %vm1116_vm9, %v3386_v30, %v1113_v61 }
 0x356   : > { %v1122_v21 = vsel %vm1119_vm11, %v1121_v1, %v1117_v7  ;;  %v1145_v63 = vmul.f32 %v3390_v49, %v1103_v52 }
 0x357   : > { %v1132_v20 = vmul.f32 %v3388_v47, %v1131_v17  ;;  %v1144_v5 = vmul.f32 %v1122_v21, %v1021_v56 }
 0x359   : > { %v1146_v0 = vadd.f32 %v1145_v63, %v1144_v5  ;;  %v1133_v26 = vadd.f32 %v3388_v47, %v1132_v20 }
 0x35b   : > { %3391 = vtanh.f32 %v1146_v0  ;;  %v1137_v19 = vsel %vm1136_vm14, %v3388_v47, %v1133_v26 }
 0x35c   : > { %v1142_v32 = vsel %vm1139_vm15, %v1141_v31, %v1137_v19 }
 0x35e   : > { %1153 = sbr.rel (%p3180_p9) target bundleno = 869 (0x365), region = 71 }
 0x361   : > { %v3392_v29 = vpop.eup %3391 }
 0x362   : > { %v1148_v33 = vmul.f32 %v3392_v29, %v1142_v32 }
 0x363   : > { %1154 = vst [vmem:[#allocation3] sm:$0xff] %v1146_v0 }
 0x364   : > { %1155 = vst [vmem:[#allocation2] sm:$0xff] %v1148_v33 }
 0x365 PF: > { %v1156_v30 = vpack.c.bf16 %v1148_v33, %v1148_v33  ;;  %1169 = vmatpush.bf16.msra.mxu0 %v3784_v37  ;;  %1182 = vmatpush.bf16.msra.mxu1 %v3786_v41  ;;  %s1288_s14 = sadd.s32 4, %s3667_s25  ;;  %v3182_v38 = vld [vmem:[%s3674_s7 + $0x40] sm:$0xff]  ;;  %v3183_v57 = vld [vmem:[%s3674_s7 + $0x48] sm:$0xff] }
 0x366   : > { %1208 = vmatpush.bf16.msra.mxu3 %v3788_v42  ;;  %1195 = vmatpush.bf16.msra.mxu2 %v3799_v55  ;;  %v1164_v39 = vunpack.c.l.bf16 %v3182_v38  ;;  %v1165_v44 = vunpack.c.h.bf16 %v3182_v38  ;;  %v1167_v1 = vunpack.c.h.bf16 %v3183_v57  ;;  %v1166_v26 = vunpack.c.l.bf16 %v3183_v57  ;;  %p3187_p10 = scmp.ge.s32.totalorder %s1288_s14, 20 }
 0x367   : > { %3181 = vst [vmem:[%s3679_s10 + $0xc] sm:$0xf] %v1156_v30 }
 0x369   : > { %1170 = vmatpush.bf16.msra.mxu0 %v3791_v46  ;;  %1183 = vmatpush.bf16.msra.mxu1 %v3795_v50 }
 0x36a   : > { %1209 = vmatpush.bf16.msra.mxu3 %v3797_v51  ;;  %1196 = vmatpush.bf16.msra.mxu2 %v3811_v4 }
 0x36b   : > { %v1159_v22 = vld [vmem:[#allocation2] sm:$0xff] }
 0x36c   : > { %v1168_v34 = vpack.c.bf16 %v1159_v22, %v1159_v22 }
 0x36d   : > { %1171 = vmatpush.bf16.msra.mxu0 %v3803_v62  ;;  %1184 = vmatpush.bf16.msra.mxu1 %v3807_v2 }
 0x36e   : > { %1210 = vmatpush.bf16.msra.mxu3 %v3809_v3  ;;  %1197 = vmatpush.bf16.msra.mxu2 %v3817_v12 }
 0x371   : > { %1172 = vmatpush.bf16.msra.mxu0 %v3815_v11  ;;  %1185 = vmatpush.bf16.msra.mxu1 %v3821_v15 }
 0x372   : > { %1211 = vmatpush.bf16.msra.mxu3 %v3823_v16  ;;  %1198 = vmatpush.bf16.msra.mxu2 %v3829_v24 }
 0x375   : > { %1173 = vmatpush.bf16.msra.mxu0 %v3827_v23  ;;  %1186 = vmatpush.bf16.msra.mxu1 %v3833_v27 }
 0x376   : > { %1212 = vmatpush.bf16.msra.mxu3 %v3835_v28  ;;  %1199 = vmatpush.bf16.msra.mxu2 %v3841_v36 }
 0x379   : > { %1174 = vmatpush.bf16.msra.mxu0 %v3839_v35  ;;  %1187 = vmatpush.bf16.msra.mxu1 %v3845_v40 }
 0x37a   : > { %1213 = vmatpush.bf16.msra.mxu3 %v3847_v43  ;;  %1200 = vmatpush.bf16.msra.mxu2 %v3853_v54 }
 0x37d   : > { %1175 = vmatpush.bf16.msra.mxu0 %v3851_v53  ;;  %1188 = vmatpush.bf16.msra.mxu1 %v3857_v58 }
 0x37e   : > { %1214 = vmatpush.bf16.msra.mxu3 %v3859_v59  ;;  %1201 = vmatpush.bf16.msra.mxu2 %v3865_v8 }
 0x381   : > { %1176 = vmatpush.bf16.msra.mxu0 %v3863_v6  ;;  %1189 = vmatpush.bf16.msra.mxu1 %v3869_v9 }
 0x382   : > { %1215 = vmatpush.bf16.msra.mxu3 %v3871_v10  ;;  %1202 = vmatpush.bf16.msra.mxu2 %v3877_v18 }
 0x384   : > { %1177 = vmatmul.bf16.vlgmr.msra.gmra.mxu0 %v1168_v34  ;;  %1190 = vmatmul.bf16.vlgmr.msra.gmra.mxu1 %v1168_v34 }
 0x385   : > { %1216 = vmatmul.bf16.vlgmr.msra.gmra.mxu3 %v1168_v34  ;;  %1203 = vmatmul.bf16.vlgmr.msra.gmra.mxu2 %v1168_v34 }
 0x401   : > { %v1178_v45 = vpop.f32.mrf.mxu0  ;;  %v1191_v47 = vpop.f32.mrf.mxu1 }
 0x402   : > { %v1221_v48 = vadd.f32 %v1178_v45, %v1164_v39  ;;  %v1222_v49 = vadd.f32 %v1191_v47, %v1165_v44 }
 0x404   : > { %v3184_v60 = vmul.f32 -1.442695, %v1221_v48  ;;  %v3185_v61 = vmul.f32 -1.442695, %v1222_v49 }
 0x406   : > { %3393 = vpow2.f32 %v3184_v60 }
 0x407   : > { %3395 = vpow2.f32 %v3185_v61 }
 0x408   : > { %v1217_v56 = vpop.f32.mrf.mxu3  ;;  %v1204_v13 = vpop.f32.mrf.mxu2 }
 0x409   : > { %v1224_v17 = vadd.f32 %v1217_v56, %v1167_v1  ;;  %v1180_v52 = vpop.f32.mrf.mxu0  ;;  %v1193_v7 = vpop.f32.mrf.mxu1  ;;  %v1223_v31 = vadd.f32 %v1204_v13, %v1166_v26 }
 0x40a   : > { %v1160_v52 = vld [vmem:[#allocation3] sm:$0xff] }
 0x40b   : > { %v3186_v21 = vmul.f32 -1.442695, %v1224_v17 }
 0x40c   : > { %v3394_v63 = vpop.eup %3393 }
 0x40d   : > { %v3396_v20 = vpop.eup %3395  ;;  %v1228_v5 = vadd.f32 1.0, %v3394_v63  ;;  %3397 = vpow2.f32 %v3186_v21 }
 0x40e   : > { %v1247_v0 = vadd.f32 1.0, %v3396_v20 }
 0x40f   : > { %3399 = vrcp.f32 %v1228_v5  ;;  %v1240_v39 = vand.u32 2147483648, %v1228_v5  ;;  %v1238_v47 = vand.u32 2147483647, %v1228_v5  ;;  %vm1234_vm2 = vweird.f32 %v1228_v5 }
 0x410   : > { %3401 = vrcp.f32 %v1247_v0  ;;  %v1219_v14 = vpop.f32.mrf.mxu3  ;;  %v1206_v25 = vpop.f32.mrf.mxu2  ;;  %v1259_v44 = vand.u32 2147483648, %v1247_v0  ;;  %v1257_v49 = vand.u32 2147483647, %v1247_v0  ;;  %vm1253_vm3 = vweird.f32 %v1247_v0 }
 0x411   : > { %v1241_v56 = vor.u32 1.1754944e-38, %v1240_v39  ;;  %vm1239_vm6 = vcmp.eq.f32.partialorder %v1238_v47, 8.507059e+37 }
 0x412   : > { %v1260_v17 = vor.u32 1.1754944e-38, %v1259_v44  ;;  %vm1258_vm7 = vcmp.eq.f32.partialorder %v1257_v49, 8.507059e+37 }
 0x413   : > { %v3398_v19 = vpop.eup %3397 }
 0x414   : > { %v1267_v29 = vadd.f32 1.0, %v3398_v19 }
 0x415   : > { %v3400_v32 = vpop.eup %3399 }
 0x416   : > { %v3402_v33 = vpop.eup %3401  ;;  %v1230_v30 = vmul.f32 %v3400_v32, %v1228_v5  ;;  %3403 = vrcp.f32 %v1267_v29  ;;  %vm1235_vm0 = vweird.f32 %v3400_v32  ;;  %vm1273_vm9 = vweird.f32 %v1267_v29 }
 0x417   : > { %v1249_v22 = vmul.f32 %v3402_v33, %v1247_v0  ;;  %3405 = vtanh.f32 %v1223_v31  ;;  %vm1254_vm1 = vweird.f32 %v3402_v33  ;;  %vm1236_vm4 = vmor %vm1234_vm2, %vm1235_vm0  ;;  %v1279_v0 = vand.u32 2147483648, %v1267_v29 }
 0x418   : > { %v1231_v34 = vsub.f32 1.0, %v1230_v30  ;;  %vm1255_vm5 = vmor %vm1253_vm3, %vm1254_vm1  ;;  %v1277_v30 = vand.u32 2147483647, %v1267_v29 }
 0x419   : > { %v1250_v38 = vsub.f32 1.0, %v1249_v22 }
 0x41a   : > { %v1232_v45 = vmul.f32 %v3400_v32, %v1231_v34  ;;  %v1280_v34 = vor.u32 1.1754944e-38, %v1279_v0  ;;  %vm1278_vm11 = vcmp.eq.f32.partialorder %v1277_v30, 8.507059e+37 }
 0x41b   : > { %v1251_v48 = vmul.f32 %v3402_v33, %v1250_v38 }
 0x41c   : > { %v3404_v57 = vpop.eup %3403  ;;  %v1233_v60 = vadd.f32 %v3400_v32, %v1232_v45 }
 0x41d   : > { %v3406_v61 = vpop.eup %3405  ;;  %v1269_v1 = vmul.f32 %v3404_v57, %v1267_v29  ;;  %v1252_v13 = vadd.f32 %v3402_v33, %v1251_v48  ;;  %vm1274_vm8 = vweird.f32 %v3404_v57 }
 0x41e   : > { %v1237_v7 = vsel %vm1236_vm4, %v3400_v32, %v1233_v60  ;;  %vm1275_vm10 = vmor %vm1273_vm9, %vm1274_vm8 }
 0x41f   : > { %v1270_v21 = vsub.f32 1.0, %v1269_v1  ;;  %v1242_v63 = vsel %vm1239_vm6, %v1241_v56, %v1237_v7  ;;  %v1256_v20 = vsel %vm1255_vm5, %v3402_v33, %v1252_v13 }
 0x420   : > { %v1261_v26 = vsel %vm1258_vm7, %v1260_v17, %v1256_v20  ;;  %v1284_v14 = vmul.f32 %v3406_v61, %v1242_v63 }
 0x421   : > { %v1271_v25 = vmul.f32 %v3404_v57, %v1270_v21  ;;  %v1283_v19 = vmul.f32 %v1261_v26, %v1160_v52 }
 0x423   : > { %v1285_v5 = vadd.f32 %v1284_v14, %v1283_v19  ;;  %v1272_v31 = vadd.f32 %v3404_v57, %v1271_v25 }
 0x425   : > { %3407 = vtanh.f32 %v1285_v5  ;;  %v1276_v22 = vsel %vm1275_vm10, %v3404_v57, %v1272_v31 }
 0x426   : > { %v1281_v38 = vsel %vm1278_vm11, %v1280_v34, %v1276_v22 }
 0x428   : > { %1292 = sbr.rel (%p3187_p10) target bundleno = 1071 (0x42f), region = 75 }
 0x42b   : > { %v3408_v32 = vpop.eup %3407 }
 0x42c   : > { %v1287_v39 = vmul.f32 %v3408_v32, %v1281_v38 }
 0x42d   : > { %1293 = vst [vmem:[#allocation3] sm:$0xff] %v1285_v5 }
 0x42e   : > { %1294 = vst [vmem:[#allocation2] sm:$0xff] %v1287_v39 }
 0x42f PF: > { %v1295_v33 = vpack.c.bf16 %v1287_v39, %v1287_v39  ;;  %1308 = vmatpush.bf16.msrb.mxu0 %v3784_v37  ;;  %1321 = vmatpush.bf16.msrb.mxu1 %v3786_v41  ;;  %s1427_s15 = sadd.s32 5, %s3667_s25  ;;  %v3189_v45 = vld [vmem:[%s3674_s7 + $0x50] sm:$0xff]  ;;  %v3190_v1 = vld [vmem:[%s3674_s7 + $0x58] sm:$0xff] }
 0x430   : > { %1347 = vmatpush.bf16.msrb.mxu3 %v3788_v42  ;;  %1334 = vmatpush.bf16.msrb.mxu2 %v3799_v55  ;;  %v1303_v47 = vunpack.c.l.bf16 %v3189_v45  ;;  %v1304_v48 = vunpack.c.h.bf16 %v3189_v45  ;;  %v1306_v17 = vunpack.c.h.bf16 %v3190_v1  ;;  %v1305_v31 = vunpack.c.l.bf16 %v3190_v1  ;;  %p3194_p11 = scmp.ge.s32.totalorder %s1427_s15, 20 }
 0x431   : > { %3188 = vst [vmem:[%s3679_s10 + $0x10] sm:$0xf] %v1295_v33 }
 0x433   : > { %1309 = vmatpush.bf16.msrb.mxu0 %v3791_v46  ;;  %1322 = vmatpush.bf16.msrb.mxu1 %v3795_v50 }
 0x434   : > { %1348 = vmatpush.bf16.msrb.mxu3 %v3797_v51  ;;  %1335 = vmatpush.bf16.msrb.mxu2 %v3811_v4 }
 0x435   : > { %v1298_v29 = vld [vmem:[#allocation2] sm:$0xff] }
 0x436   : > { %v1307_v44 = vpack.c.bf16 %v1298_v29, %v1298_v29 }
 0x437   : > { %1310 = vmatpush.bf16.msrb.mxu0 %v3803_v62  ;;  %1323 = vmatpush.bf16.msrb.mxu1 %v3807_v2 }
 0x438   : > { %1349 = vmatpush.bf16.msrb.mxu3 %v3809_v3  ;;  %1336 = vmatpush.bf16.msrb.mxu2 %v3817_v12 }
 0x43b   : > { %1311 = vmatpush.bf16.msrb.mxu0 %v3815_v11  ;;  %1324 = vmatpush.bf16.msrb.mxu1 %v3821_v15 }
 0x43c   : > { %1350 = vmatpush.bf16.msrb.mxu3 %v3823_v16  ;;  %1337 = vmatpush.bf16.msrb.mxu2 %v3829_v24 }
 0x43f   : > { %1312 = vmatpush.bf16.msrb.mxu0 %v3827_v23  ;;  %1325 = vmatpush.bf16.msrb.mxu1 %v3833_v27 }
 0x440   : > { %1351 = vmatpush.bf16.msrb.mxu3 %v3835_v28  ;;  %1338 = vmatpush.bf16.msrb.mxu2 %v3841_v36 }
 0x443   : > { %1313 = vmatpush.bf16.msrb.mxu0 %v3839_v35  ;;  %1326 = vmatpush.bf16.msrb.mxu1 %v3845_v40 }
 0x444   : > { %1352 = vmatpush.bf16.msrb.mxu3 %v3847_v43  ;;  %1339 = vmatpush.bf16.msrb.mxu2 %v3853_v54 }
 0x447   : > { %1314 = vmatpush.bf16.msrb.mxu0 %v3851_v53  ;;  %1327 = vmatpush.bf16.msrb.mxu1 %v3857_v58 }
 0x448   : > { %1353 = vmatpush.bf16.msrb.mxu3 %v3859_v59  ;;  %1340 = vmatpush.bf16.msrb.mxu2 %v3865_v8 }
 0x44b   : > { %1315 = vmatpush.bf16.msrb.mxu0 %v3863_v6  ;;  %1328 = vmatpush.bf16.msrb.mxu1 %v3869_v9 }
 0x44c   : > { %1354 = vmatpush.bf16.msrb.mxu3 %v3871_v10  ;;  %1341 = vmatpush.bf16.msrb.mxu2 %v3877_v18 }
 0x44e   : > { %1316 = vmatmul.bf16.vlgmr.msrb.gmra.mxu0 %v1307_v44  ;;  %1329 = vmatmul.bf16.vlgmr.msrb.gmra.mxu1 %v1307_v44 }
 0x44f   : > { %1355 = vmatmul.bf16.vlgmr.msrb.gmra.mxu3 %v1307_v44  ;;  %1342 = vmatmul.bf16.vlgmr.msrb.gmra.mxu2 %v1307_v44 }
 0x4cb   : > { %v1317_v49 = vpop.f32.mrf.mxu0  ;;  %v1330_v57 = vpop.f32.mrf.mxu1 }
 0x4cc   : > { %v1360_v60 = vadd.f32 %v1317_v49, %v1303_v47  ;;  %v1361_v61 = vadd.f32 %v1330_v57, %v1304_v48 }
 0x4ce   : > { %v3191_v56 = vmul.f32 -1.442695, %v1360_v60  ;;  %v3192_v13 = vmul.f32 -1.442695, %v1361_v61 }
 0x4d0   : > { %3409 = vpow2.f32 %v3191_v56 }
 0x4d1   : > { %3411 = vpow2.f32 %v3192_v13 }
 0x4d2   : > { %v1356_v52 = vpop.f32.mrf.mxu3  ;;  %v1343_v7 = vpop.f32.mrf.mxu2 }
 0x4d3   : > { %v1363_v21 = vadd.f32 %v1356_v52, %v1306_v17  ;;  %v1319_v63 = vpop.f32.mrf.mxu0  ;;  %v1332_v20 = vpop.f32.mrf.mxu1  ;;  %v1362_v34 = vadd.f32 %v1343_v7, %v1305_v31 }
 0x4d4   : > { %v1299_v63 = vld [vmem:[#allocation3] sm:$0xff] }
 0x4d5   : > { %v3193_v26 = vmul.f32 -1.442695, %v1363_v21 }
 0x4d6   : > { %v3410_v14 = vpop.eup %3409 }
 0x4d7   : > { %v3412_v25 = vpop.eup %3411  ;;  %v1367_v19 = vadd.f32 1.0, %v3410_v14  ;;  %3413 = vpow2.f32 %v3193_v26 }
 0x4d8   : > { %v1386_v5 = vadd.f32 1.0, %v3412_v25 }
 0x4d9   : > { %3415 = vrcp.f32 %v1367_v19  ;;  %v1379_v47 = vand.u32 2147483648, %v1367_v19  ;;  %v1377_v57 = vand.u32 2147483647, %v1367_v19  ;;  %vm1373_vm14 = vweird.f32 %v1367_v19 }
 0x4da   : > { %3417 = vrcp.f32 %v1386_v5  ;;  %v1358_v0 = vpop.f32.mrf.mxu3  ;;  %v1345_v30 = vpop.f32.mrf.mxu2  ;;  %v1398_v48 = vand.u32 2147483648, %v1386_v5  ;;  %v1396_v61 = vand.u32 2147483647, %v1386_v5  ;;  %vm1392_vm15 = vweird.f32 %v1386_v5 }
 0x4db   : > { %v1380_v52 = vor.u32 1.1754944e-38, %v1379_v47  ;;  %vm1378_vm2 = vcmp.eq.f32.partialorder %v1377_v57, 8.507059e+37 }
 0x4dc   : > { %v1399_v21 = vor.u32 1.1754944e-38, %v1398_v48  ;;  %vm1397_vm3 = vcmp.eq.f32.partialorder %v1396_v61, 8.507059e+37 }
 0x4dd   : > { %v3414_v22 = vpop.eup %3413 }
 0x4de   : > { %v1406_v32 = vadd.f32 1.0, %v3414_v22 }
 0x4df   : > { %v3416_v38 = vpop.eup %3415 }
 0x4e0   : > { %v3418_v39 = vpop.eup %3417  ;;  %v1369_v33 = vmul.f32 %v3416_v38, %v1367_v19  ;;  %3419 = vrcp.f32 %v1406_v32  ;;  %vm1374_vm12 = vweird.f32 %v3416_v38  ;;  %vm1412_vm5 = vweird.f32 %v1406_v32 }
 0x4e1   : > { %v1388_v29 = vmul.f32 %v3418_v39, %v1386_v5  ;;  %3421 = vtanh.f32 %v1362_v34  ;;  %vm1393_vm13 = vweird.f32 %v3418_v39  ;;  %vm1375_vm0 = vmor %vm1373_vm14, %vm1374_vm12  ;;  %v1418_v5 = vand.u32 2147483648, %v1406_v32 }
 0x4e2   : > { %v1370_v44 = vsub.f32 1.0, %v1369_v33  ;;  %vm1394_vm1 = vmor %vm1392_vm15, %vm1393_vm13  ;;  %v1416_v33 = vand.u32 2147483647, %v1406_v32 }
 0x4e3   : > { %v1389_v45 = vsub.f32 1.0, %v1388_v29 }
 0x4e4   : > { %v1371_v49 = vmul.f32 %v3416_v38, %v1370_v44  ;;  %v1419_v44 = vor.u32 1.1754944e-38, %v1418_v5  ;;  %vm1417_vm7 = vcmp.eq.f32.partialorder %v1416_v33, 8.507059e+37 }
 0x4e5   : > { %v1390_v60 = vmul.f32 %v3418_v39, %v1389_v45 }
 0x4e6   : > { %v3420_v1 = vpop.eup %3419  ;;  %v1372_v56 = vadd.f32 %v3416_v38, %v1371_v49 }
 0x4e7   : > { %v3422_v13 = vpop.eup %3421  ;;  %v1408_v17 = vmul.f32 %v3420_v1, %v1406_v32  ;;  %v1391_v7 = vadd.f32 %v3418_v39, %v1390_v60  ;;  %vm1413_vm4 = vweird.f32 %v3420_v1 }
 0x4e8   : > { %v1376_v20 = vsel %vm1375_vm0, %v3416_v38, %v1372_v56  ;;  %vm1414_vm6 = vmor %vm1412_vm5, %vm1413_vm4 }
 0x4e9   : > { %v1409_v26 = vsub.f32 1.0, %v1408_v17  ;;  %v1381_v14 = vsel %vm1378_vm2, %v1380_v52, %v1376_v20  ;;  %v1395_v25 = vsel %vm1394_vm1, %v3418_v39, %v1391_v7 }
 0x4ea   : > { %v1400_v31 = vsel %vm1397_vm3, %v1399_v21, %v1395_v25  ;;  %v1423_v0 = vmul.f32 %v3422_v13, %v1381_v14 }
 0x4eb   : > { %v1410_v30 = vmul.f32 %v3420_v1, %v1409_v26  ;;  %v1422_v22 = vmul.f32 %v1400_v31, %v1299_v63 }
 0x4ed   : > { %v1424_v19 = vadd.f32 %v1423_v0, %v1422_v22  ;;  %v1411_v34 = vadd.f32 %v3420_v1, %v1410_v30 }
 0x4ef   : > { %3423 = vtanh.f32 %v1424_v19  ;;  %v1415_v29 = vsel %vm1414_vm6, %v3420_v1, %v1411_v34 }
 0x4f0   : > { %v1420_v45 = vsel %vm1417_vm7, %v1419_v44, %v1415_v29 }
 0x4f2   : > { %1431 = sbr.rel (%p3194_p11) target bundleno = 1273 (0x4f9), region = 79 }
 0x4f5   : > { %v3424_v38 = vpop.eup %3423 }
 0x4f6   : > { %v1426_v47 = vmul.f32 %v3424_v38, %v1420_v45 }
 0x4f7   : > { %1432 = vst [vmem:[#allocation3] sm:$0xff] %v1424_v19 }
 0x4f8   : > { %1433 = vst [vmem:[#allocation2] sm:$0xff] %v1426_v47 }
 0x4f9 PF: > { %v1434_v39 = vpack.c.bf16 %v1426_v47, %v1426_v47  ;;  %1447 = vmatpush.bf16.msra.mxu0 %v3784_v37  ;;  %1460 = vmatpush.bf16.msra.mxu1 %v3786_v41  ;;  %s1566_s16 = sadd.s32 6, %s3667_s25  ;;  %v3196_v49 = vld [vmem:[%s3674_s7 + $0x60] sm:$0xff]  ;;  %v3197_v17 = vld [vmem:[%s3674_s7 + $0x68] sm:$0xff] }
 0x4fa   : > { %1486 = vmatpush.bf16.msra.mxu3 %v3788_v42  ;;  %1473 = vmatpush.bf16.msra.mxu2 %v3799_v55  ;;  %v1442_v57 = vunpack.c.l.bf16 %v3196_v49  ;;  %v1443_v60 = vunpack.c.h.bf16 %v3196_v49  ;;  %v1445_v21 = vunpack.c.h.bf16 %v3197_v17  ;;  %v1444_v34 = vunpack.c.l.bf16 %v3197_v17  ;;  %p3201_p12 = scmp.ge.s32.totalorder %s1566_s16, 20 }
 0x4fb   : > { %3195 = vst [vmem:[%s3679_s10 + $0x14] sm:$0xf] %v1434_v39 }
 0x4fd   : > { %1448 = vmatpush.bf16.msra.mxu0 %v3791_v46  ;;  %1461 = vmatpush.bf16.msra.mxu1 %v3795_v50 }
 0x4fe   : > { %1487 = vmatpush.bf16.msra.mxu3 %v3797_v51  ;;  %1474 = vmatpush.bf16.msra.mxu2 %v3811_v4 }
 0x4ff   : > { %v1437_v32 = vld [vmem:[#allocation2] sm:$0xff] }
 0x500   : > { %v1446_v48 = vpack.c.bf16 %v1437_v32, %v1437_v32 }
 0x501   : > { %1449 = vmatpush.bf16.msra.mxu0 %v3803_v62  ;;  %1462 = vmatpush.bf16.msra.mxu1 %v3807_v2 }
 0x502   : > { %1488 = vmatpush.bf16.msra.mxu3 %v3809_v3  ;;  %1475 = vmatpush.bf16.msra.mxu2 %v3817_v12 }
 0x505   : > { %1450 = vmatpush.bf16.msra.mxu0 %v3815_v11  ;;  %1463 = vmatpush.bf16.msra.mxu1 %v3821_v15 }
 0x506   : > { %1489 = vmatpush.bf16.msra.mxu3 %v3823_v16  ;;  %1476 = vmatpush.bf16.msra.mxu2 %v3829_v24 }
 0x509   : > { %1451 = vmatpush.bf16.msra.mxu0 %v3827_v23  ;;  %1464 = vmatpush.bf16.msra.mxu1 %v3833_v27 }
 0x50a   : > { %1490 = vmatpush.bf16.msra.mxu3 %v3835_v28  ;;  %1477 = vmatpush.bf16.msra.mxu2 %v3841_v36 }
 0x50d   : > { %1452 = vmatpush.bf16.msra.mxu0 %v3839_v35  ;;  %1465 = vmatpush.bf16.msra.mxu1 %v3845_v40 }
 0x50e   : > { %1491 = vmatpush.bf16.msra.mxu3 %v3847_v43  ;;  %1478 = vmatpush.bf16.msra.mxu2 %v3853_v54 }
 0x511   : > { %1453 = vmatpush.bf16.msra.mxu0 %v3851_v53  ;;  %1466 = vmatpush.bf16.msra.mxu1 %v3857_v58 }
 0x512   : > { %1492 = vmatpush.bf16.msra.mxu3 %v3859_v59  ;;  %1479 = vmatpush.bf16.msra.mxu2 %v3865_v8 }
 0x515   : > { %1454 = vmatpush.bf16.msra.mxu0 %v3863_v6  ;;  %1467 = vmatpush.bf16.msra.mxu1 %v3869_v9 }
 0x516   : > { %1493 = vmatpush.bf16.msra.mxu3 %v3871_v10  ;;  %1480 = vmatpush.bf16.msra.mxu2 %v3877_v18 }
 0x518   : > { %1455 = vmatmul.bf16.vlgmr.msra.gmra.mxu0 %v1446_v48  ;;  %1468 = vmatmul.bf16.vlgmr.msra.gmra.mxu1 %v1446_v48 }
 0x519   : > { %1494 = vmatmul.bf16.vlgmr.msra.gmra.mxu3 %v1446_v48  ;;  %1481 = vmatmul.bf16.vlgmr.msra.gmra.mxu2 %v1446_v48 }
 0x595   : > { %v1456_v61 = vpop.f32.mrf.mxu0  ;;  %v1469_v1 = vpop.f32.mrf.mxu1 }
 0x596   : > { %v1499_v56 = vadd.f32 %v1456_v61, %v1442_v57  ;;  %v1500_v13 = vadd.f32 %v1469_v1, %v1443_v60 }
 0x598   : > { %v3198_v52 = vmul.f32 -1.442695, %v1499_v56  ;;  %v3199_v7 = vmul.f32 -1.442695, %v1500_v13 }
 0x59a   : > { %3425 = vpow2.f32 %v3198_v52 }
 0x59b   : > { %3427 = vpow2.f32 %v3199_v7 }
 0x59c   : > { %v1495_v63 = vpop.f32.mrf.mxu3  ;;  %v1482_v20 = vpop.f32.mrf.mxu2 }
 0x59d   : > { %v1502_v26 = vadd.f32 %v1495_v63, %v1445_v21  ;;  %v1458_v14 = vpop.f32.mrf.mxu0  ;;  %v1471_v25 = vpop.f32.mrf.mxu1  ;;  %v1501_v44 = vadd.f32 %v1482_v20, %v1444_v34 }
 0x59e   : > { %v1438_v14 = vld [vmem:[#allocation3] sm:$0xff] }
 0x59f   : > { %v3200_v31 = vmul.f32 -1.442695, %v1502_v26 }
 0x5a0   : > { %v3426_v0 = vpop.eup %3425 }
 0x5a1   : > { %v3428_v30 = vpop.eup %3427  ;;  %v1506_v22 = vadd.f32 1.0, %v3426_v0  ;;  %3429 = vpow2.f32 %v3200_v31 }
 0x5a2   : > { %v1525_v19 = vadd.f32 1.0, %v3428_v30 }
 0x5a3   : > { %3431 = vrcp.f32 %v1506_v22  ;;  %v1518_v57 = vand.u32 2147483648, %v1506_v22  ;;  %v1516_v1 = vand.u32 2147483647, %v1506_v22  ;;  %vm1512_vm10 = vweird.f32 %v1506_v22 }
 0x5a4   : > { %3433 = vrcp.f32 %v1525_v19  ;;  %v1497_v5 = vpop.f32.mrf.mxu3  ;;  %v1484_v33 = vpop.f32.mrf.mxu2  ;;  %v1537_v60 = vand.u32 2147483648, %v1525_v19  ;;  %v1535_v13 = vand.u32 2147483647, %v1525_v19  ;;  %vm1531_vm11 = vweird.f32 %v1525_v19 }
 0x5a5   : > { %v1519_v63 = vor.u32 1.1754944e-38, %v1518_v57  ;;  %vm1517_vm14 = vcmp.eq.f32.partialorder %v1516_v1, 8.507059e+37 }
 0x5a6   : > { %v1538_v26 = vor.u32 1.1754944e-38, %v1537_v60  ;;  %vm1536_vm15 = vcmp.eq.f32.partialorder %v1535_v13, 8.507059e+37 }
 0x5a7   : > { %v3430_v29 = vpop.eup %3429 }
 0x5a8   : > { %v1545_v38 = vadd.f32 1.0, %v3430_v29 }
 0x5a9   : > { %v3432_v45 = vpop.eup %3431 }
 0x5aa   : > { %v3434_v47 = vpop.eup %3433  ;;  %v1508_v39 = vmul.f32 %v3432_v45, %v1506_v22  ;;  %3435 = vrcp.f32 %v1545_v38  ;;  %vm1513_vm8 = vweird.f32 %v3432_v45  ;;  %vm1551_vm1 = vweird.f32 %v1545_v38 }
 0x5ab   : > { %v1527_v32 = vmul.f32 %v3434_v47, %v1525_v19  ;;  %3437 = vtanh.f32 %v1501_v44  ;;  %vm1532_vm9 = vweird.f32 %v3434_v47  ;;  %vm1514_vm12 = vmor %vm1512_vm10, %vm1513_vm8  ;;  %v1557_v19 = vand.u32 2147483648, %v1545_v38 }
 0x5ac   : > { %v1509_v48 = vsub.f32 1.0, %v1508_v39  ;;  %vm1533_vm13 = vmor %vm1531_vm11, %vm1532_vm9  ;;  %v1555_v39 = vand.u32 2147483647, %v1545_v38 }
 0x5ad   : > { %v1528_v49 = vsub.f32 1.0, %v1527_v32 }
 0x5ae   : > { %v1510_v61 = vmul.f32 %v3432_v45, %v1509_v48  ;;  %v1558_v48 = vor.u32 1.1754944e-38, %v1557_v19  ;;  %vm1556_vm3 = vcmp.eq.f32.partialorder %v1555_v39, 8.507059e+37 }
 0x5af   : > { %v1529_v56 = vmul.f32 %v3434_v47, %v1528_v49 }
 0x5b0   : > { %v3436_v17 = vpop.eup %3435  ;;  %v1511_v52 = vadd.f32 %v3432_v45, %v1510_v61 }
 0x5b1   : > { %v3438_v7 = vpop.eup %3437  ;;  %v1547_v21 = vmul.f32 %v3436_v17, %v1545_v38  ;;  %v1530_v20 = vadd.f32 %v3434_v47, %v1529_v56  ;;  %vm1552_vm0 = vweird.f32 %v3436_v17 }
 0x5b2   : > { %v1515_v25 = vsel %vm1514_vm12, %v3432_v45, %v1511_v52  ;;  %vm1553_vm2 = vmor %vm1551_vm1, %vm1552_vm0 }
 0x5b3   : > { %v1548_v31 = vsub.f32 1.0, %v1547_v21  ;;  %v1520_v0 = vsel %vm1517_vm14, %v1519_v63, %v1515_v25  ;;  %v1534_v30 = vsel %vm1533_vm13, %v3434_v47, %v1530_v20 }
 0x5b4   : > { %v1539_v34 = vsel %vm1536_vm15, %v1538_v26, %v1534_v30  ;;  %v1562_v5 = vmul.f32 %v3438_v7, %v1520_v0 }
 0x5b5   : > { %v1549_v33 = vmul.f32 %v3436_v17, %v1548_v31  ;;  %v1561_v29 = vmul.f32 %v1539_v34, %v1438_v14 }
 0x5b7   : > { %v1563_v22 = vadd.f32 %v1562_v5, %v1561_v29  ;;  %v1550_v44 = vadd.f32 %v3436_v17, %v1549_v33 }
 0x5b9   : > { %3439 = vtanh.f32 %v1563_v22  ;;  %v1554_v32 = vsel %vm1553_vm2, %v3436_v17, %v1550_v44 }
 0x5ba   : > { %v1559_v49 = vsel %vm1556_vm3, %v1558_v48, %v1554_v32 }
 0x5bc   : > { %1570 = sbr.rel (%p3201_p12) target bundleno = 1475 (0x5c3), region = 83 }
 0x5bf   : > { %v3440_v45 = vpop.eup %3439 }
 0x5c0   : > { %v1565_v57 = vmul.f32 %v3440_v45, %v1559_v49 }
 0x5c1   : > { %1571 = vst [vmem:[#allocation3] sm:$0xff] %v1563_v22 }
 0x5c2   : > { %1572 = vst [vmem:[#allocation2] sm:$0xff] %v1565_v57 }
 0x5c3 PF: > { %v1573_v47 = vpack.c.bf16 %v1565_v57, %v1565_v57  ;;  %1586 = vmatpush.bf16.msrb.mxu0 %v3784_v37  ;;  %1599 = vmatpush.bf16.msrb.mxu1 %v3786_v41  ;;  %s1705_s17 = sadd.s32 7, %s3667_s25  ;;  %v3203_v61 = vld [vmem:[%s3674_s7 + $0x70] sm:$0xff]  ;;  %v3204_v21 = vld [vmem:[%s3674_s7 + $0x78] sm:$0xff] }
 0x5c4   : > { %1625 = vmatpush.bf16.msrb.mxu3 %v3788_v42  ;;  %1612 = vmatpush.bf16.msrb.mxu2 %v3799_v55  ;;  %v1581_v1 = vunpack.c.l.bf16 %v3203_v61  ;;  %v1582_v56 = vunpack.c.h.bf16 %v3203_v61  ;;  %v1584_v26 = vunpack.c.h.bf16 %v3204_v21  ;;  %v1583_v44 = vunpack.c.l.bf16 %v3204_v21  ;;  %p3208_p13 = scmp.ge.s32.totalorder %s1705_s17, 20 }
 0x5c5   : > { %3202 = vst [vmem:[%s3679_s10 + $0x18] sm:$0xf] %v1573_v47 }
 0x5c7   : > { %1587 = vmatpush.bf16.msrb.mxu0 %v3791_v46  ;;  %1600 = vmatpush.bf16.msrb.mxu1 %v3795_v50 }
 0x5c8   : > { %1626 = vmatpush.bf16.msrb.mxu3 %v3797_v51  ;;  %1613 = vmatpush.bf16.msrb.mxu2 %v3811_v4 }
 0x5c9   : > { %v1576_v38 = vld [vmem:[#allocation2] sm:$0xff] }
 0x5ca   : > { %v1585_v60 = vpack.c.bf16 %v1576_v38, %v1576_v38 }
 0x5cb   : > { %1588 = vmatpush.bf16.msrb.mxu0 %v3803_v62  ;;  %1601 = vmatpush.bf16.msrb.mxu1 %v3807_v2 }
 0x5cc   : > { %1627 = vmatpush.bf16.msrb.mxu3 %v3809_v3  ;;  %1614 = vmatpush.bf16.msrb.mxu2 %v3817_v12 }
 0x5cf   : > { %1589 = vmatpush.bf16.msrb.mxu0 %v3815_v11  ;;  %1602 = vmatpush.bf16.msrb.mxu1 %v3821_v15 }
 0x5d0   : > { %1628 = vmatpush.bf16.msrb.mxu3 %v3823_v16  ;;  %1615 = vmatpush.bf16.msrb.mxu2 %v3829_v24 }
 0x5d3   : > { %1590 = vmatpush.bf16.msrb.mxu0 %v3827_v23  ;;  %1603 = vmatpush.bf16.msrb.mxu1 %v3833_v27 }
 0x5d4   : > { %1629 = vmatpush.bf16.msrb.mxu3 %v3835_v28  ;;  %1616 = vmatpush.bf16.msrb.mxu2 %v3841_v36 }
 0x5d7   : > { %1591 = vmatpush.bf16.msrb.mxu0 %v3839_v35  ;;  %1604 = vmatpush.bf16.msrb.mxu1 %v3845_v40 }
 0x5d8   : > { %1630 = vmatpush.bf16.msrb.mxu3 %v3847_v43  ;;  %1617 = vmatpush.bf16.msrb.mxu2 %v3853_v54 }
 0x5db   : > { %1592 = vmatpush.bf16.msrb.mxu0 %v3851_v53  ;;  %1605 = vmatpush.bf16.msrb.mxu1 %v3857_v58 }
 0x5dc   : > { %1631 = vmatpush.bf16.msrb.mxu3 %v3859_v59  ;;  %1618 = vmatpush.bf16.msrb.mxu2 %v3865_v8 }
 0x5df   : > { %1593 = vmatpush.bf16.msrb.mxu0 %v3863_v6  ;;  %1606 = vmatpush.bf16.msrb.mxu1 %v3869_v9 }
 0x5e0   : > { %1632 = vmatpush.bf16.msrb.mxu3 %v3871_v10  ;;  %1619 = vmatpush.bf16.msrb.mxu2 %v3877_v18 }
 0x5e2   : > { %1594 = vmatmul.bf16.vlgmr.msrb.gmra.mxu0 %v1585_v60  ;;  %1607 = vmatmul.bf16.vlgmr.msrb.gmra.mxu1 %v1585_v60 }
 0x5e3   : > { %1633 = vmatmul.bf16.vlgmr.msrb.gmra.mxu3 %v1585_v60  ;;  %1620 = vmatmul.bf16.vlgmr.msrb.gmra.mxu2 %v1585_v60 }
 0x65f   : > { %v1595_v13 = vpop.f32.mrf.mxu0  ;;  %v1608_v17 = vpop.f32.mrf.mxu1 }
 0x660   : > { %v1638_v52 = vadd.f32 %v1595_v13, %v1581_v1  ;;  %v1639_v7 = vadd.f32 %v1608_v17, %v1582_v56 }
 0x662   : > { %v3205_v63 = vmul.f32 -1.442695, %v1638_v52  ;;  %v3206_v20 = vmul.f32 -1.442695, %v1639_v7 }
 0x664   : > { %3441 = vpow2.f32 %v3205_v63 }
 0x665   : > { %3443 = vpow2.f32 %v3206_v20 }
 0x666   : > { %v1634_v14 = vpop.f32.mrf.mxu3  ;;  %v1621_v25 = vpop.f32.mrf.mxu2 }
 0x667   : > { %v1641_v31 = vadd.f32 %v1634_v14, %v1584_v26  ;;  %v1597_v0 = vpop.f32.mrf.mxu0  ;;  %v1610_v30 = vpop.f32.mrf.mxu1  ;;  %v1640_v48 = vadd.f32 %v1621_v25, %v1583_v44 }
 0x668   : > { %v1577_v0 = vld [vmem:[#allocation3] sm:$0xff] }
 0x669   : > { %v3207_v34 = vmul.f32 -1.442695, %v1641_v31 }
 0x66a   : > { %v3442_v5 = vpop.eup %3441 }
 0x66b   : > { %v3444_v33 = vpop.eup %3443  ;;  %v1645_v29 = vadd.f32 1.0, %v3442_v5  ;;  %3445 = vpow2.f32 %v3207_v34 }
 0x66c   : > { %v1664_v22 = vadd.f32 1.0, %v3444_v33 }
 0x66d   : > { %3447 = vrcp.f32 %v1645_v29  ;;  %v1657_v1 = vand.u32 2147483648, %v1645_v29  ;;  %v1655_v17 = vand.u32 2147483647, %v1645_v29  ;;  %vm1651_vm6 = vweird.f32 %v1645_v29 }
 0x66e   : > { %3449 = vrcp.f32 %v1664_v22  ;;  %v1636_v19 = vpop.f32.mrf.mxu3  ;;  %v1623_v39 = vpop.f32.mrf.mxu2  ;;  %v1676_v56 = vand.u32 2147483648, %v1664_v22  ;;  %v1674_v7 = vand.u32 2147483647, %v1664_v22  ;;  %vm1670_vm7 = vweird.f32 %v1664_v22 }
 0x66f   : > { %v1658_v14 = vor.u32 1.1754944e-38, %v1657_v1  ;;  %vm1656_vm10 = vcmp.eq.f32.partialorder %v1655_v17, 8.507059e+37 }
 0x670   : > { %v1677_v31 = vor.u32 1.1754944e-38, %v1676_v56  ;;  %vm1675_vm11 = vcmp.eq.f32.partialorder %v1674_v7, 8.507059e+37 }
 0x671   : > { %v3446_v32 = vpop.eup %3445 }
 0x672   : > { %v1684_v45 = vadd.f32 1.0, %v3446_v32 }
 0x673   : > { %v3448_v49 = vpop.eup %3447 }
 0x674   : > { %v3450_v57 = vpop.eup %3449  ;;  %v1647_v47 = vmul.f32 %v3448_v49, %v1645_v29  ;;  %3451 = vrcp.f32 %v1684_v45  ;;  %vm1652_vm4 = vweird.f32 %v3448_v49  ;;  %vm1690_vm13 = vweird.f32 %v1684_v45 }
 0x675   : > { %v1666_v38 = vmul.f32 %v3450_v57, %v1664_v22  ;;  %3453 = vtanh.f32 %v1640_v48  ;;  %vm1671_vm5 = vweird.f32 %v3450_v57  ;;  %vm1653_vm8 = vmor %vm1651_vm6, %vm1652_vm4  ;;  %v1696_v22 = vand.u32 2147483648, %v1684_v45 }
 0x676   : > { %v1648_v60 = vsub.f32 1.0, %v1647_v47  ;;  %vm1672_vm9 = vmor %vm1670_vm7, %vm1671_vm5  ;;  %v1694_v47 = vand.u32 2147483647, %v1684_v45 }
 0x677   : > { %v1667_v61 = vsub.f32 1.0, %v1666_v38 }
 0x678   : > { %v1649_v13 = vmul.f32 %v3448_v49, %v1648_v60  ;;  %v1697_v60 = vor.u32 1.1754944e-38, %v1696_v22  ;;  %vm1695_vm15 = vcmp.eq.f32.partialorder %v1694_v47, 8.507059e+37 }
 0x679   : > { %v1668_v52 = vmul.f32 %v3450_v57, %v1667_v61 }
 0x67a   : > { %v3452_v21 = vpop.eup %3451  ;;  %v1650_v63 = vadd.f32 %v3448_v49, %v1649_v13 }
 0x67b   : > { %v3454_v20 = vpop.eup %3453  ;;  %v1686_v26 = vmul.f32 %v3452_v21, %v1684_v45  ;;  %v1669_v25 = vadd.f32 %v3450_v57, %v1668_v52  ;;  %vm1691_vm12 = vweird.f32 %v3452_v21 }
 0x67c   : > { %v1654_v30 = vsel %vm1653_vm8, %v3448_v49, %v1650_v63  ;;  %vm1692_vm14 = vmor %vm1690_vm13, %vm1691_vm12 }
 0x67d   : > { %v1687_v34 = vsub.f32 1.0, %v1686_v26  ;;  %v1659_v5 = vsel %vm1656_vm10, %v1658_v14, %v1654_v30  ;;  %v1673_v33 = vsel %vm1672_vm9, %v3450_v57, %v1669_v25 }
 0x67e   : > { %v1678_v44 = vsel %vm1675_vm11, %v1677_v31, %v1673_v33  ;;  %v1701_v19 = vmul.f32 %v3454_v20, %v1659_v5 }
 0x67f   : > { %v1688_v39 = vmul.f32 %v3452_v21, %v1687_v34  ;;  %v1700_v32 = vmul.f32 %v1678_v44, %v1577_v0 }
 0x681   : > { %v1702_v29 = vadd.f32 %v1701_v19, %v1700_v32  ;;  %v1689_v48 = vadd.f32 %v3452_v21, %v1688_v39 }
 0x683   : > { %3455 = vtanh.f32 %v1702_v29  ;;  %v1693_v38 = vsel %vm1692_vm14, %v3452_v21, %v1689_v48 }
 0x684   : > { %v1698_v61 = vsel %vm1695_vm15, %v1697_v60, %v1693_v38 }
 0x686   : > { %1709 = sbr.rel (%p3208_p13) target bundleno = 1677 (0x68d), region = 87 }
 0x689   : > { %v3456_v49 = vpop.eup %3455 }
 0x68a   : > { %v1704_v1 = vmul.f32 %v3456_v49, %v1698_v61 }
 0x68b   : > { %1710 = vst [vmem:[#allocation3] sm:$0xff] %v1702_v29 }
 0x68c   : > { %1711 = vst [vmem:[#allocation2] sm:$0xff] %v1704_v1 }
 0x68d PF: > { %v1712_v57 = vpack.c.bf16 %v1704_v1, %v1704_v1  ;;  %1725 = vmatpush.bf16.msra.mxu0 %v3784_v37  ;;  %1738 = vmatpush.bf16.msra.mxu1 %v3786_v41  ;;  %s1844_s18 = sadd.s32 8, %s3667_s25  ;;  %v3210_v13 = vld [vmem:[%s3674_s7 + $0x80] sm:$0xff]  ;;  %v3211_v26 = vld [vmem:[%s3674_s7 + $0x88] sm:$0xff] }
 0x68e   : > { %1764 = vmatpush.bf16.msra.mxu3 %v3788_v42  ;;  %1751 = vmatpush.bf16.msra.mxu2 %v3799_v55  ;;  %v1720_v17 = vunpack.c.l.bf16 %v3210_v13  ;;  %v1721_v52 = vunpack.c.h.bf16 %v3210_v13  ;;  %v1723_v31 = vunpack.c.h.bf16 %v3211_v26  ;;  %v1722_v48 = vunpack.c.l.bf16 %v3211_v26  ;;  %p3215_p0 = scmp.ge.s32.totalorder %s1844_s18, 20 }
 0x68f   : > { %3209 = vst [vmem:[%s3679_s10 + $0x1c] sm:$0xf] %v1712_v57 }
 0x691   : > { %1726 = vmatpush.bf16.msra.mxu0 %v3791_v46  ;;  %1739 = vmatpush.bf16.msra.mxu1 %v3795_v50 }
 0x692   : > { %1765 = vmatpush.bf16.msra.mxu3 %v3797_v51  ;;  %1752 = vmatpush.bf16.msra.mxu2 %v3811_v4 }
 0x693   : > { %v1715_v45 = vld [vmem:[#allocation2] sm:$0xff] }
 0x694   : > { %v1724_v56 = vpack.c.bf16 %v1715_v45, %v1715_v45 }
 0x695   : > { %1727 = vmatpush.bf16.msra.mxu0 %v3803_v62  ;;  %1740 = vmatpush.bf16.msra.mxu1 %v3807_v2 }
 0x696   : > { %1766 = vmatpush.bf16.msra.mxu3 %v3809_v3  ;;  %1753 = vmatpush.bf16.msra.mxu2 %v3817_v12 }
 0x699   : > { %1728 = vmatpush.bf16.msra.mxu0 %v3815_v11  ;;  %1741 = vmatpush.bf16.msra.mxu1 %v3821_v15 }
 0x69a   : > { %1767 = vmatpush.bf16.msra.mxu3 %v3823_v16  ;;  %1754 = vmatpush.bf16.msra.mxu2 %v3829_v24 }
 0x69d   : > { %1729 = vmatpush.bf16.msra.mxu0 %v3827_v23  ;;  %1742 = vmatpush.bf16.msra.mxu1 %v3833_v27 }
 0x69e   : > { %1768 = vmatpush.bf16.msra.mxu3 %v3835_v28  ;;  %1755 = vmatpush.bf16.msra.mxu2 %v3841_v36 }
 0x6a1   : > { %1730 = vmatpush.bf16.msra.mxu0 %v3839_v35  ;;  %1743 = vmatpush.bf16.msra.mxu1 %v3845_v40 }
 0x6a2   : > { %1769 = vmatpush.bf16.msra.mxu3 %v3847_v43  ;;  %1756 = vmatpush.bf16.msra.mxu2 %v3853_v54 }
 0x6a5   : > { %1731 = vmatpush.bf16.msra.mxu0 %v3851_v53  ;;  %1744 = vmatpush.bf16.msra.mxu1 %v3857_v58 }
 0x6a6   : > { %1770 = vmatpush.bf16.msra.mxu3 %v3859_v59  ;;  %1757 = vmatpush.bf16.msra.mxu2 %v3865_v8 }
 0x6a9   : > { %1732 = vmatpush.bf16.msra.mxu0 %v3863_v6  ;;  %1745 = vmatpush.bf16.msra.mxu1 %v3869_v9 }
 0x6aa   : > { %1771 = vmatpush.bf16.msra.mxu3 %v3871_v10  ;;  %1758 = vmatpush.bf16.msra.mxu2 %v3877_v18 }
 0x6ac   : > { %1733 = vmatmul.bf16.vlgmr.msra.gmra.mxu0 %v1724_v56  ;;  %1746 = vmatmul.bf16.vlgmr.msra.gmra.mxu1 %v1724_v56 }
 0x6ad   : > { %1772 = vmatmul.bf16.vlgmr.msra.gmra.mxu3 %v1724_v56  ;;  %1759 = vmatmul.bf16.vlgmr.msra.gmra.mxu2 %v1724_v56 }
 0x729   : > { %v1734_v7 = vpop.f32.mrf.mxu0  ;;  %v1747_v21 = vpop.f32.mrf.mxu1 }
 0x72a   : > { %v1777_v63 = vadd.f32 %v1734_v7, %v1720_v17  ;;  %v1778_v20 = vadd.f32 %v1747_v21, %v1721_v52 }
 0x72c   : > { %v3212_v14 = vmul.f32 -1.442695, %v1777_v63  ;;  %v3213_v25 = vmul.f32 -1.442695, %v1778_v20 }
 0x72e   : > { %3457 = vpow2.f32 %v3212_v14 }
 0x72f   : > { %3459 = vpow2.f32 %v3213_v25 }
 0x730   : > { %v1773_v0 = vpop.f32.mrf.mxu3  ;;  %v1760_v30 = vpop.f32.mrf.mxu2 }
 0x731   : > { %v1780_v34 = vadd.f32 %v1773_v0, %v1723_v31  ;;  %v1736_v5 = vpop.f32.mrf.mxu0  ;;  %v1749_v33 = vpop.f32.mrf.mxu1  ;;  %v1779_v60 = vadd.f32 %v1760_v30, %v1722_v48 }
 0x732   : > { %v1716_v5 = vld [vmem:[#allocation3] sm:$0xff] }
 0x733   : > { %v3214_v44 = vmul.f32 -1.442695, %v1780_v34 }
 0x734   : > { %v3458_v19 = vpop.eup %3457 }
 0x735   : > { %v3460_v39 = vpop.eup %3459  ;;  %v1784_v32 = vadd.f32 1.0, %v3458_v19  ;;  %3461 = vpow2.f32 %v3214_v44 }
 0x736   : > { %v1803_v29 = vadd.f32 1.0, %v3460_v39 }
 0x737   : > { %3463 = vrcp.f32 %v1784_v32  ;;  %v1796_v17 = vand.u32 2147483648, %v1784_v32  ;;  %v1794_v21 = vand.u32 2147483647, %v1784_v32  ;;  %vm1790_vm2 = vweird.f32 %v1784_v32 }
 0x738   : > { %3465 = vrcp.f32 %v1803_v29  ;;  %v1775_v22 = vpop.f32.mrf.mxu3  ;;  %v1762_v47 = vpop.f32.mrf.mxu2  ;;  %v1815_v52 = vand.u32 2147483648, %v1803_v29  ;;  %v1813_v20 = vand.u32 2147483647, %v1803_v29  ;;  %vm1809_vm3 = vweird.f32 %v1803_v29 }
 0x739   : > { %v1797_v0 = vor.u32 1.1754944e-38, %v1796_v17  ;;  %vm1795_vm6 = vcmp.eq.f32.partialorder %v1794_v21, 8.507059e+37 }
 0x73a   : > { %v1816_v34 = vor.u32 1.1754944e-38, %v1815_v52  ;;  %vm1814_vm7 = vcmp.eq.f32.partialorder %v1813_v20, 8.507059e+37 }
 0x73b   : > { %v3462_v38 = vpop.eup %3461 }
 0x73c   : > { %v1823_v49 = vadd.f32 1.0, %v3462_v38 }
 0x73d   : > { %v3464_v61 = vpop.eup %3463 }
 0x73e   : > { %v3466_v1 = vpop.eup %3465  ;;  %v1786_v57 = vmul.f32 %v3464_v61, %v1784_v32  ;;  %3467 = vrcp.f32 %v1823_v49  ;;  %vm1791_vm0 = vweird.f32 %v3464_v61  ;;  %vm1829_vm9 = vweird.f32 %v1823_v49 }
 0x73f   : > { %v1805_v45 = vmul.f32 %v3466_v1, %v1803_v29  ;;  %3469 = vtanh.f32 %v1779_v60  ;;  %vm1810_vm1 = vweird.f32 %v3466_v1  ;;  %vm1792_vm4 = vmor %vm1790_vm2, %vm1791_vm0  ;;  %v1835_v29 = vand.u32 2147483648, %v1823_v49 }
 0x740   : > { %v1787_v56 = vsub.f32 1.0, %v1786_v57  ;;  %vm1811_vm5 = vmor %vm1809_vm3, %vm1810_vm1  ;;  %v1833_v57 = vand.u32 2147483647, %v1823_v49 }
 0x741   : > { %v1806_v13 = vsub.f32 1.0, %v1805_v45 }
 0x742   : > { %v1788_v7 = vmul.f32 %v3464_v61, %v1787_v56  ;;  %v1836_v56 = vor.u32 1.1754944e-38, %v1835_v29  ;;  %vm1834_vm11 = vcmp.eq.f32.partialorder %v1833_v57, 8.507059e+37 }
 0x743   : > { %v1807_v63 = vmul.f32 %v3466_v1, %v1806_v13 }
 0x744   : > { %v3468_v26 = vpop.eup %3467  ;;  %v1789_v14 = vadd.f32 %v3464_v61, %v1788_v7 }
 0x745   : > { %v3470_v25 = vpop.eup %3469  ;;  %v1825_v31 = vmul.f32 %v3468_v26, %v1823_v49  ;;  %v1808_v30 = vadd.f32 %v3466_v1, %v1807_v63  ;;  %vm1830_vm8 = vweird.f32 %v3468_v26 }
 0x746   : > { %v1793_v33 = vsel %vm1792_vm4, %v3464_v61, %v1789_v14  ;;  %vm1831_vm10 = vmor %vm1829_vm9, %vm1830_vm8 }
 0x747   : > { %v1826_v44 = vsub.f32 1.0, %v1825_v31  ;;  %v1798_v19 = vsel %vm1795_vm6, %v1797_v0, %v1793_v33  ;;  %v1812_v39 = vsel %vm1811_vm5, %v3466_v1, %v1808_v30 }
 0x748   : > { %v1817_v48 = vsel %vm1814_vm7, %v1816_v34, %v1812_v39  ;;  %v1840_v22 = vmul.f32 %v3470_v25, %v1798_v19 }
 0x749   : > { %v1827_v47 = vmul.f32 %v3468_v26, %v1826_v44  ;;  %v1839_v38 = vmul.f32 %v1817_v48, %v1716_v5 }
 0x74b   : > { %v1841_v32 = vadd.f32 %v1840_v22, %v1839_v38  ;;  %v1828_v60 = vadd.f32 %v3468_v26, %v1827_v47 }
 0x74d   : > { %3471 = vtanh.f32 %v1841_v32  ;;  %v1832_v45 = vsel %vm1831_vm10, %v3468_v26, %v1828_v60 }
 0x74e   : > { %v1837_v13 = vsel %vm1834_vm11, %v1836_v56, %v1832_v45 }
 0x750   : > { %1848 = sbr.rel (%p3215_p0) target bundleno = 1879 (0x757), region = 91 }
 0x753   : > { %v3472_v61 = vpop.eup %3471 }
 0x754   : > { %v1843_v17 = vmul.f32 %v3472_v61, %v1837_v13 }
 0x755   : > { %1849 = vst [vmem:[#allocation3] sm:$0xff] %v1841_v32 }
 0x756   : > { %1850 = vst [vmem:[#allocation2] sm:$0xff] %v1843_v17 }
 0x757 PF: > { %v1851_v1 = vpack.c.bf16 %v1843_v17, %v1843_v17  ;;  %1864 = vmatpush.bf16.msrb.mxu0 %v3784_v37  ;;  %1877 = vmatpush.bf16.msrb.mxu1 %v3786_v41  ;;  %s1983_s19 = sadd.s32 9, %s3667_s25  ;;  %v3217_v7 = vld [vmem:[%s3674_s7 + $0x90] sm:$0xff]  ;;  %v3218_v31 = vld [vmem:[%s3674_s7 + $0x98] sm:$0xff] }
 0x758   : > { %1903 = vmatpush.bf16.msrb.mxu3 %v3788_v42  ;;  %1890 = vmatpush.bf16.msrb.mxu2 %v3799_v55  ;;  %v1859_v21 = vunpack.c.l.bf16 %v3217_v7  ;;  %v1860_v63 = vunpack.c.h.bf16 %v3217_v7  ;;  %v1862_v34 = vunpack.c.h.bf16 %v3218_v31  ;;  %v1861_v60 = vunpack.c.l.bf16 %v3218_v31  ;;  %p3222_p1 = scmp.ge.s32.totalorder %s1983_s19, 20 }
 0x759   : > { %3216 = vst [vmem:[%s3679_s10 + $0x20] sm:$0xf] %v1851_v1 }
 0x75b   : > { %1865 = vmatpush.bf16.msrb.mxu0 %v3791_v46  ;;  %1878 = vmatpush.bf16.msrb.mxu1 %v3795_v50 }
 0x75c   : > { %1904 = vmatpush.bf16.msrb.mxu3 %v3797_v51  ;;  %1891 = vmatpush.bf16.msrb.mxu2 %v3811_v4 }
 0x75d   : > { %v1854_v49 = vld [vmem:[#allocation2] sm:$0xff] }
 0x75e   : > { %v1863_v52 = vpack.c.bf16 %v1854_v49, %v1854_v49 }
 0x75f   : > { %1866 = vmatpush.bf16.msrb.mxu0 %v3803_v62  ;;  %1879 = vmatpush.bf16.msrb.mxu1 %v3807_v2 }
 0x760   : > { %1905 = vmatpush.bf16.msrb.mxu3 %v3809_v3  ;;  %1892 = vmatpush.bf16.msrb.mxu2 %v3817_v12 }
 0x763   : > { %1867 = vmatpush.bf16.msrb.mxu0 %v3815_v11  ;;  %1880 = vmatpush.bf16.msrb.mxu1 %v3821_v15 }
 0x764   : > { %1906 = vmatpush.bf16.msrb.mxu3 %v3823_v16  ;;  %1893 = vmatpush.bf16.msrb.mxu2 %v3829_v24 }
 0x767   : > { %1868 = vmatpush.bf16.msrb.mxu0 %v3827_v23  ;;  %1881 = vmatpush.bf16.msrb.mxu1 %v3833_v27 }
 0x768   : > { %1907 = vmatpush.bf16.msrb.mxu3 %v3835_v28  ;;  %1894 = vmatpush.bf16.msrb.mxu2 %v3841_v36 }
 0x76b   : > { %1869 = vmatpush.bf16.msrb.mxu0 %v3839_v35  ;;  %1882 = vmatpush.bf16.msrb.mxu1 %v3845_v40 }
 0x76c   : > { %1908 = vmatpush.bf16.msrb.mxu3 %v3847_v43  ;;  %1895 = vmatpush.bf16.msrb.mxu2 %v3853_v54 }
 0x76f   : > { %1870 = vmatpush.bf16.msrb.mxu0 %v3851_v53  ;;  %1883 = vmatpush.bf16.msrb.mxu1 %v3857_v58 }
 0x770   : > { %1909 = vmatpush.bf16.msrb.mxu3 %v3859_v59  ;;  %1896 = vmatpush.bf16.msrb.mxu2 %v3865_v8 }
 0x773   : > { %1871 = vmatpush.bf16.msrb.mxu0 %v3863_v6  ;;  %1884 = vmatpush.bf16.msrb.mxu1 %v3869_v9 }
 0x774   : > { %1910 = vmatpush.bf16.msrb.mxu3 %v3871_v10  ;;  %1897 = vmatpush.bf16.msrb.mxu2 %v3877_v18 }
 0x776   : > { %1872 = vmatmul.bf16.vlgmr.msrb.gmra.mxu0 %v1863_v52  ;;  %1885 = vmatmul.bf16.vlgmr.msrb.gmra.mxu1 %v1863_v52 }
 0x777   : > { %1911 = vmatmul.bf16.vlgmr.msrb.gmra.mxu3 %v1863_v52  ;;  %1898 = vmatmul.bf16.vlgmr.msrb.gmra.mxu2 %v1863_v52 }
 0x7f3   : > { %v1873_v20 = vpop.f32.mrf.mxu0  ;;  %v1886_v26 = vpop.f32.mrf.mxu1 }
 0x7f4   : > { %v1916_v14 = vadd.f32 %v1873_v20, %v1859_v21  ;;  %v1917_v25 = vadd.f32 %v1886_v26, %v1860_v63 }
 0x7f6   : > { %v3219_v0 = vmul.f32 -1.442695, %v1916_v14  ;;  %v3220_v30 = vmul.f32 -1.442695, %v1917_v25 }
 0x7f8   : > { %3473 = vpow2.f32 %v3219_v0 }
 0x7f9   : > { %3475 = vpow2.f32 %v3220_v30 }
 0x7fa   : > { %v1912_v5 = vpop.f32.mrf.mxu3  ;;  %v1899_v33 = vpop.f32.mrf.mxu2 }
 0x7fb   : > { %v1919_v44 = vadd.f32 %v1912_v5, %v1862_v34  ;;  %v1875_v19 = vpop.f32.mrf.mxu0  ;;  %v1888_v39 = vpop.f32.mrf.mxu1  ;;  %v1918_v56 = vadd.f32 %v1899_v33, %v1861_v60 }
 0x7fc   : > { %v1855_v19 = vld [vmem:[#allocation3] sm:$0xff] }
 0x7fd   : > { %v3221_v48 = vmul.f32 -1.442695, %v1919_v44 }
 0x7fe   : > { %v3474_v22 = vpop.eup %3473 }
 0x7ff   : > { %v3476_v47 = vpop.eup %3475  ;;  %v1923_v38 = vadd.f32 1.0, %v3474_v22  ;;  %3477 = vpow2.f32 %v3221_v48 }
 0x800   : > { %v1942_v32 = vadd.f32 1.0, %v3476_v47 }
 0x801   : > { %3479 = vrcp.f32 %v1923_v38  ;;  %v1935_v21 = vand.u32 2147483648, %v1923_v38  ;;  %v1933_v26 = vand.u32 2147483647, %v1923_v38  ;;  %vm1929_vm14 = vweird.f32 %v1923_v38 }
 0x802   : > { %3481 = vrcp.f32 %v1942_v32  ;;  %v1914_v29 = vpop.f32.mrf.mxu3  ;;  %v1901_v57 = vpop.f32.mrf.mxu2  ;;  %v1954_v63 = vand.u32 2147483648, %v1942_v32  ;;  %v1952_v25 = vand.u32 2147483647, %v1942_v32  ;;  %vm1948_vm15 = vweird.f32 %v1942_v32 }
 0x803   : > { %v1936_v5 = vor.u32 1.1754944e-38, %v1935_v21  ;;  %vm1934_vm2 = vcmp.eq.f32.partialorder %v1933_v26, 8.507059e+37 }
 0x804   : > { %v1955_v44 = vor.u32 1.1754944e-38, %v1954_v63  ;;  %vm1953_vm3 = vcmp.eq.f32.partialorder %v1952_v25, 8.507059e+37 }
 0x805   : > { %v3478_v45 = vpop.eup %3477 }
 0x806   : > { %v1962_v61 = vadd.f32 1.0, %v3478_v45 }
 0x807   : > { %v3480_v13 = vpop.eup %3479 }
 0x808   : > { %v3482_v17 = vpop.eup %3481  ;;  %v1925_v1 = vmul.f32 %v3480_v13, %v1923_v38  ;;  %3483 = vrcp.f32 %v1962_v61  ;;  %vm1930_vm12 = vweird.f32 %v3480_v13  ;;  %vm1968_vm5 = vweird.f32 %v1962_v61 }
 0x809   : > { %v1944_v49 = vmul.f32 %v3482_v17, %v1942_v32  ;;  %3485 = vtanh.f32 %v1918_v56  ;;  %vm1949_vm13 = vweird.f32 %v3482_v17  ;;  %vm1931_vm0 = vmor %vm1929_vm14, %vm1930_vm12  ;;  %v1974_v32 = vand.u32 2147483648, %v1962_v61 }
 0x80a   : > { %v1926_v52 = vsub.f32 1.0, %v1925_v1  ;;  %vm1950_vm1 = vmor %vm1948_vm15, %vm1949_vm13  ;;  %v1972_v1 = vand.u32 2147483647, %v1962_v61 }
 0x80b   : > { %v1945_v7 = vsub.f32 1.0, %v1944_v49 }
 0x80c   : > { %v1927_v20 = vmul.f32 %v3480_v13, %v1926_v52  ;;  %v1975_v52 = vor.u32 1.1754944e-38, %v1974_v32  ;;  %vm1973_vm7 = vcmp.eq.f32.partialorder %v1972_v1, 8.507059e+37 }
 0x80d   : > { %v1946_v14 = vmul.f32 %v3482_v17, %v1945_v7 }
 0x80e   : > { %v3484_v31 = vpop.eup %3483  ;;  %v1928_v0 = vadd.f32 %v3480_v13, %v1927_v20 }
 0x80f   : > { %v3486_v30 = vpop.eup %3485  ;;  %v1964_v34 = vmul.f32 %v3484_v31, %v1962_v61  ;;  %v1947_v33 = vadd.f32 %v3482_v17, %v1946_v14  ;;  %vm1969_vm4 = vweird.f32 %v3484_v31 }
 0x810   : > { %v1932_v39 = vsel %vm1931_vm0, %v3480_v13, %v1928_v0  ;;  %vm1970_vm6 = vmor %vm1968_vm5, %vm1969_vm4 }
 0x811   : > { %v1965_v48 = vsub.f32 1.0, %v1964_v34  ;;  %v1937_v22 = vsel %vm1934_vm2, %v1936_v5, %v1932_v39  ;;  %v1951_v47 = vsel %vm1950_vm1, %v3482_v17, %v1947_v33 }
 0x812   : > { %v1956_v60 = vsel %vm1953_vm3, %v1955_v44, %v1951_v47  ;;  %v1979_v29 = vmul.f32 %v3486_v30, %v1937_v22 }
 0x813   : > { %v1966_v57 = vmul.f32 %v3484_v31, %v1965_v48  ;;  %v1978_v45 = vmul.f32 %v1956_v60, %v1855_v19 }
 0x815   : > { %v1980_v38 = vadd.f32 %v1979_v29, %v1978_v45  ;;  %v1967_v56 = vadd.f32 %v3484_v31, %v1966_v57 }
 0x817   : > { %3487 = vtanh.f32 %v1980_v38  ;;  %v1971_v49 = vsel %vm1970_vm6, %v3484_v31, %v1967_v56 }
 0x818   : > { %v1976_v7 = vsel %vm1973_vm7, %v1975_v52, %v1971_v49 }
 0x81a   : > { %1987 = sbr.rel (%p3222_p1) target bundleno = 2081 (0x821), region = 95 }
 0x81d   : > { %v3488_v13 = vpop.eup %3487 }
 0x81e   : > { %v1982_v21 = vmul.f32 %v3488_v13, %v1976_v7 }
 0x81f   : > { %1988 = vst [vmem:[#allocation3] sm:$0xff] %v1980_v38 }
 0x820   : > { %1989 = vst [vmem:[#allocation2] sm:$0xff] %v1982_v21 }
 0x821 PF: > { %v1990_v17 = vpack.c.bf16 %v1982_v21, %v1982_v21  ;;  %2003 = vmatpush.bf16.msra.mxu0 %v3784_v37  ;;  %2016 = vmatpush.bf16.msra.mxu1 %v3786_v41  ;;  %s2122_s20 = sadd.s32 10, %s3667_s25  ;;  %v3224_v20 = vld [vmem:[%s3674_s7 + $0xa0] sm:$0xff]  ;;  %v3225_v34 = vld [vmem:[%s3674_s7 + $0xa8] sm:$0xff] }
 0x822   : > { %2042 = vmatpush.bf16.msra.mxu3 %v3788_v42  ;;  %2029 = vmatpush.bf16.msra.mxu2 %v3799_v55  ;;  %v1998_v26 = vunpack.c.l.bf16 %v3224_v20  ;;  %v1999_v14 = vunpack.c.h.bf16 %v3224_v20  ;;  %v2001_v44 = vunpack.c.h.bf16 %v3225_v34  ;;  %v2000_v56 = vunpack.c.l.bf16 %v3225_v34  ;;  %p3229_p2 = scmp.ge.s32.totalorder %s2122_s20, 20 }
 0x823   : > { %3223 = vst [vmem:[%s3679_s10 + $0x24] sm:$0xf] %v1990_v17 }
 0x825   : > { %2004 = vmatpush.bf16.msra.mxu0 %v3791_v46  ;;  %2017 = vmatpush.bf16.msra.mxu1 %v3795_v50 }
 0x826   : > { %2043 = vmatpush.bf16.msra.mxu3 %v3797_v51  ;;  %2030 = vmatpush.bf16.msra.mxu2 %v3811_v4 }
 0x827   : > { %v1993_v61 = vld [vmem:[#allocation2] sm:$0xff] }
 0x828   : > { %v2002_v63 = vpack.c.bf16 %v1993_v61, %v1993_v61 }
 0x829   : > { %2005 = vmatpush.bf16.msra.mxu0 %v3803_v62  ;;  %2018 = vmatpush.bf16.msra.mxu1 %v3807_v2 }
 0x82a   : > { %2044 = vmatpush.bf16.msra.mxu3 %v3809_v3  ;;  %2031 = vmatpush.bf16.msra.mxu2 %v3817_v12 }
 0x82d   : > { %2006 = vmatpush.bf16.msra.mxu0 %v3815_v11  ;;  %2019 = vmatpush.bf16.msra.mxu1 %v3821_v15 }
 0x82e   : > { %2045 = vmatpush.bf16.msra.mxu3 %v3823_v16  ;;  %2032 = vmatpush.bf16.msra.mxu2 %v3829_v24 }
 0x831   : > { %2007 = vmatpush.bf16.msra.mxu0 %v3827_v23  ;;  %2020 = vmatpush.bf16.msra.mxu1 %v3833_v27 }
 0x832   : > { %2046 = vmatpush.bf16.msra.mxu3 %v3835_v28  ;;  %2033 = vmatpush.bf16.msra.mxu2 %v3841_v36 }
 0x835   : > { %2008 = vmatpush.bf16.msra.mxu0 %v3839_v35  ;;  %2021 = vmatpush.bf16.msra.mxu1 %v3845_v40 }
 0x836   : > { %2047 = vmatpush.bf16.msra.mxu3 %v3847_v43  ;;  %2034 = vmatpush.bf16.msra.mxu2 %v3853_v54 }
 0x839   : > { %2009 = vmatpush.bf16.msra.mxu0 %v3851_v53  ;;  %2022 = vmatpush.bf16.msra.mxu1 %v3857_v58 }
 0x83a   : > { %2048 = vmatpush.bf16.msra.mxu3 %v3859_v59  ;;  %2035 = vmatpush.bf16.msra.mxu2 %v3865_v8 }
 0x83d   : > { %2010 = vmatpush.bf16.msra.mxu0 %v3863_v6  ;;  %2023 = vmatpush.bf16.msra.mxu1 %v3869_v9 }
 0x83e   : > { %2049 = vmatpush.bf16.msra.mxu3 %v3871_v10  ;;  %2036 = vmatpush.bf16.msra.mxu2 %v3877_v18 }
 0x840   : > { %2011 = vmatmul.bf16.vlgmr.msra.gmra.mxu0 %v2002_v63  ;;  %2024 = vmatmul.bf16.vlgmr.msra.gmra.mxu1 %v2002_v63 }
 0x841   : > { %2050 = vmatmul.bf16.vlgmr.msra.gmra.mxu3 %v2002_v63  ;;  %2037 = vmatmul.bf16.vlgmr.msra.gmra.mxu2 %v2002_v63 }
 0x8bd   : > { %v2012_v25 = vpop.f32.mrf.mxu0  ;;  %v2025_v31 = vpop.f32.mrf.mxu1 }
 0x8be   : > { %v2055_v0 = vadd.f32 %v2012_v25, %v1998_v26  ;;  %v2056_v30 = vadd.f32 %v2025_v31, %v1999_v14 }
 0x8c0   : > { %v3226_v5 = vmul.f32 -1.442695, %v2055_v0  ;;  %v3227_v33 = vmul.f32 -1.442695, %v2056_v30 }
 0x8c2   : > { %3489 = vpow2.f32 %v3226_v5 }
 0x8c3   : > { %3491 = vpow2.f32 %v3227_v33 }
 0x8c4   : > { %v2051_v19 = vpop.f32.mrf.mxu3  ;;  %v2038_v39 = vpop.f32.mrf.mxu2 }
 0x8c5   : > { %v2058_v48 = vadd.f32 %v2051_v19, %v2001_v44  ;;  %v2014_v22 = vpop.f32.mrf.mxu0  ;;  %v2027_v47 = vpop.f32.mrf.mxu1  ;;  %v2057_v52 = vadd.f32 %v2038_v39, %v2000_v56 }
 0x8c6   : > { %v1994_v22 = vld [vmem:[#allocation3] sm:$0xff] }
 0x8c7   : > { %v3228_v60 = vmul.f32 -1.442695, %v2058_v48 }
 0x8c8   : > { %v3490_v29 = vpop.eup %3489 }
 0x8c9   : > { %v3492_v57 = vpop.eup %3491  ;;  %v2062_v45 = vadd.f32 1.0, %v3490_v29  ;;  %3493 = vpow2.f32 %v3228_v60 }
 0x8ca   : > { %v2081_v38 = vadd.f32 1.0, %v3492_v57 }
 0x8cb   : > { %3495 = vrcp.f32 %v2062_v45  ;;  %v2074_v26 = vand.u32 2147483648, %v2062_v45  ;;  %v2072_v31 = vand.u32 2147483647, %v2062_v45  ;;  %vm2068_vm10 = vweird.f32 %v2062_v45 }
 0x8cc   : > { %3497 = vrcp.f32 %v2081_v38  ;;  %v2053_v32 = vpop.f32.mrf.mxu3  ;;  %v2040_v1 = vpop.f32.mrf.mxu2  ;;  %v2093_v14 = vand.u32 2147483648, %v2081_v38  ;;  %v2091_v30 = vand.u32 2147483647, %v2081_v38  ;;  %vm2087_vm11 = vweird.f32 %v2081_v38 }
 0x8cd   : > { %v2075_v19 = vor.u32 1.1754944e-38, %v2074_v26  ;;  %vm2073_vm14 = vcmp.eq.f32.partialorder %v2072_v31, 8.507059e+37 }
 0x8ce   : > { %v2094_v48 = vor.u32 1.1754944e-38, %v2093_v14  ;;  %vm2092_vm15 = vcmp.eq.f32.partialorder %v2091_v30, 8.507059e+37 }
 0x8cf   : > { %v3494_v49 = vpop.eup %3493 }
 0x8d0   : > { %v2101_v13 = vadd.f32 1.0, %v3494_v49 }
 0x8d1   : > { %v3496_v7 = vpop.eup %3495 }
 0x8d2   : > { %v3498_v21 = vpop.eup %3497  ;;  %v2064_v17 = vmul.f32 %v3496_v7, %v2062_v45  ;;  %3499 = vrcp.f32 %v2101_v13  ;;  %vm2069_vm8 = vweird.f32 %v3496_v7  ;;  %vm2107_vm1 = vweird.f32 %v2101_v13 }
 0x8d3   : > { %v2083_v61 = vmul.f32 %v3498_v21, %v2081_v38  ;;  %3501 = vtanh.f32 %v2057_v52  ;;  %vm2088_vm9 = vweird.f32 %v3498_v21  ;;  %vm2070_vm12 = vmor %vm2068_vm10, %vm2069_vm8  ;;  %v2113_v38 = vand.u32 2147483648, %v2101_v13 }
 0x8d4   : > { %v2065_v63 = vsub.f32 1.0, %v2064_v17  ;;  %vm2089_vm13 = vmor %vm2087_vm11, %vm2088_vm9  ;;  %v2111_v17 = vand.u32 2147483647, %v2101_v13 }
 0x8d5   : > { %v2084_v20 = vsub.f32 1.0, %v2083_v61 }
 0x8d6   : > { %v2066_v25 = vmul.f32 %v3496_v7, %v2065_v63  ;;  %v2114_v63 = vor.u32 1.1754944e-38, %v2113_v38  ;;  %vm2112_vm3 = vcmp.eq.f32.partialorder %v2111_v17, 8.507059e+37 }
 0x8d7   : > { %v2085_v0 = vmul.f32 %v3498_v21, %v2084_v20 }
 0x8d8   : > { %v3500_v34 = vpop.eup %3499  ;;  %v2067_v5 = vadd.f32 %v3496_v7, %v2066_v25 }
 0x8d9   : > { %v3502_v33 = vpop.eup %3501  ;;  %v2103_v44 = vmul.f32 %v3500_v34, %v2101_v13  ;;  %v2086_v39 = vadd.f32 %v3498_v21, %v2085_v0  ;;  %vm2108_vm0 = vweird.f32 %v3500_v34 }
 0x8da   : > { %v2071_v47 = vsel %vm2070_vm12, %v3496_v7, %v2067_v5  ;;  %vm2109_vm2 = vmor %vm2107_vm1, %vm2108_vm0 }
 0x8db   : > { %v2104_v60 = vsub.f32 1.0, %v2103_v44  ;;  %v2076_v29 = vsel %vm2073_vm14, %v2075_v19, %v2071_v47  ;;  %v2090_v57 = vsel %vm2089_vm13, %v3498_v21, %v2086_v39 }
 0x8dc   : > { %v2095_v56 = vsel %vm2092_vm15, %v2094_v48, %v2090_v57  ;;  %v2118_v32 = vmul.f32 %v3502_v33, %v2076_v29 }
 0x8dd   : > { %v2105_v1 = vmul.f32 %v3500_v34, %v2104_v60  ;;  %v2117_v49 = vmul.f32 %v2095_v56, %v1994_v22 }
 0x8df   : > { %v2119_v45 = vadd.f32 %v2118_v32, %v2117_v49  ;;  %v2106_v52 = vadd.f32 %v3500_v34, %v2105_v1 }
 0x8e1   : > { %3503 = vtanh.f32 %v2119_v45  ;;  %v2110_v61 = vsel %vm2109_vm2, %v3500_v34, %v2106_v52 }
 0x8e2   : > { %v2115_v20 = vsel %vm2112_vm3, %v2114_v63, %v2110_v61 }
 0x8e4   : > { %2126 = sbr.rel (%p3229_p2) target bundleno = 2283 (0x8eb), region = 99 }
 0x8e7   : > { %v3504_v7 = vpop.eup %3503 }
 0x8e8   : > { %v2121_v26 = vmul.f32 %v3504_v7, %v2115_v20 }
 0x8e9   : > { %2127 = vst [vmem:[#allocation3] sm:$0xff] %v2119_v45 }
 0x8ea   : > { %2128 = vst [vmem:[#allocation2] sm:$0xff] %v2121_v26 }
 0x8eb PF: > { %v2129_v21 = vpack.c.bf16 %v2121_v26, %v2121_v26  ;;  %2142 = vmatpush.bf16.msrb.mxu0 %v3784_v37  ;;  %2155 = vmatpush.bf16.msrb.mxu1 %v3786_v41  ;;  %s2261_s26 = sadd.s32 11, %s3667_s25  ;;  %v3231_v25 = vld [vmem:[%s3674_s7 + $0xb0] sm:$0xff]  ;;  %v3232_v44 = vld [vmem:[%s3674_s7 + $0xb8] sm:$0xff] }
 0x8ec   : > { %2181 = vmatpush.bf16.msrb.mxu3 %v3788_v42  ;;  %2168 = vmatpush.bf16.msrb.mxu2 %v3799_v55  ;;  %v2137_v31 = vunpack.c.l.bf16 %v3231_v25  ;;  %v2138_v0 = vunpack.c.h.bf16 %v3231_v25  ;;  %v2140_v48 = vunpack.c.h.bf16 %v3232_v44  ;;  %v2139_v52 = vunpack.c.l.bf16 %v3232_v44  ;;  %p3236_p3 = scmp.ge.s32.totalorder %s2261_s26, 20 }
 0x8ed   : > { %3230 = vst [vmem:[%s3679_s10 + $0x28] sm:$0xf] %v2129_v21 }
 0x8ef   : > { %2143 = vmatpush.bf16.msrb.mxu0 %v3791_v46  ;;  %2156 = vmatpush.bf16.msrb.mxu1 %v3795_v50 }
 0x8f0   : > { %2182 = vmatpush.bf16.msrb.mxu3 %v3797_v51  ;;  %2169 = vmatpush.bf16.msrb.mxu2 %v3811_v4 }
 0x8f1   : > { %v2132_v13 = vld [vmem:[#allocation2] sm:$0xff] }
 0x8f2   : > { %v2141_v14 = vpack.c.bf16 %v2132_v13, %v2132_v13 }
 0x8f3   : > { %2144 = vmatpush.bf16.msrb.mxu0 %v3803_v62  ;;  %2157 = vmatpush.bf16.msrb.mxu1 %v3807_v2 }
 0x8f4   : > { %2183 = vmatpush.bf16.msrb.mxu3 %v3809_v3  ;;  %2170 = vmatpush.bf16.msrb.mxu2 %v3817_v12 }
 0x8f7   : > { %2145 = vmatpush.bf16.msrb.mxu0 %v3815_v11  ;;  %2158 = vmatpush.bf16.msrb.mxu1 %v3821_v15 }
 0x8f8   : > { %2184 = vmatpush.bf16.msrb.mxu3 %v3823_v16  ;;  %2171 = vmatpush.bf16.msrb.mxu2 %v3829_v24 }
 0x8fb   : > { %2146 = vmatpush.bf16.msrb.mxu0 %v3827_v23  ;;  %2159 = vmatpush.bf16.msrb.mxu1 %v3833_v27 }
 0x8fc   : > { %2185 = vmatpush.bf16.msrb.mxu3 %v3835_v28  ;;  %2172 = vmatpush.bf16.msrb.mxu2 %v3841_v36 }
 0x8ff   : > { %2147 = vmatpush.bf16.msrb.mxu0 %v3839_v35  ;;  %2160 = vmatpush.bf16.msrb.mxu1 %v3845_v40 }
 0x900   : > { %2186 = vmatpush.bf16.msrb.mxu3 %v3847_v43  ;;  %2173 = vmatpush.bf16.msrb.mxu2 %v3853_v54 }
 0x903   : > { %2148 = vmatpush.bf16.msrb.mxu0 %v3851_v53  ;;  %2161 = vmatpush.bf16.msrb.mxu1 %v3857_v58 }
 0x904   : > { %2187 = vmatpush.bf16.msrb.mxu3 %v3859_v59  ;;  %2174 = vmatpush.bf16.msrb.mxu2 %v3865_v8 }
 0x907   : > { %2149 = vmatpush.bf16.msrb.mxu0 %v3863_v6  ;;  %2162 = vmatpush.bf16.msrb.mxu1 %v3869_v9 }
 0x908   : > { %2188 = vmatpush.bf16.msrb.mxu3 %v3871_v10  ;;  %2175 = vmatpush.bf16.msrb.mxu2 %v3877_v18 }
 0x90a   : > { %2150 = vmatmul.bf16.vlgmr.msrb.gmra.mxu0 %v2141_v14  ;;  %2163 = vmatmul.bf16.vlgmr.msrb.gmra.mxu1 %v2141_v14 }
 0x90b   : > { %2189 = vmatmul.bf16.vlgmr.msrb.gmra.mxu3 %v2141_v14  ;;  %2176 = vmatmul.bf16.vlgmr.msrb.gmra.mxu2 %v2141_v14 }
 0x987   : > { %v2151_v30 = vpop.f32.mrf.mxu0  ;;  %v2164_v34 = vpop.f32.mrf.mxu1 }
 0x988   : > { %v2194_v5 = vadd.f32 %v2151_v30, %v2137_v31  ;;  %v2195_v33 = vadd.f32 %v2164_v34, %v2138_v0 }
 0x98a   : > { %v3233_v19 = vmul.f32 -1.442695, %v2194_v5  ;;  %v3234_v39 = vmul.f32 -1.442695, %v2195_v33 }
 0x98c   : > { %3505 = vpow2.f32 %v3233_v19 }
 0x98d   : > { %3507 = vpow2.f32 %v3234_v39 }
 0x98e   : > { %v2190_v22 = vpop.f32.mrf.mxu3  ;;  %v2177_v47 = vpop.f32.mrf.mxu2 }
 0x98f   : > { %v2197_v60 = vadd.f32 %v2190_v22, %v2140_v48  ;;  %v2153_v29 = vpop.f32.mrf.mxu0  ;;  %v2166_v57 = vpop.f32.mrf.mxu1  ;;  %v2196_v63 = vadd.f32 %v2177_v47, %v2139_v52 }
 0x990   : > { %v2133_v29 = vld [vmem:[#allocation3] sm:$0xff] }
 0x991   : > { %v3235_v56 = vmul.f32 -1.442695, %v2197_v60 }
 0x992   : > { %v3506_v32 = vpop.eup %3505 }
 0x993   : > { %v3508_v1 = vpop.eup %3507  ;;  %v2201_v49 = vadd.f32 1.0, %v3506_v32  ;;  %3509 = vpow2.f32 %v3235_v56 }
 0x994   : > { %v2220_v45 = vadd.f32 1.0, %v3508_v1 }
 0x995   : > { %3511 = vrcp.f32 %v2201_v49  ;;  %v2213_v31 = vand.u32 2147483648, %v2201_v49  ;;  %v2211_v34 = vand.u32 2147483647, %v2201_v49  ;;  %vm2207_vm6 = vweird.f32 %v2201_v49 }
 0x996   : > { %3513 = vrcp.f32 %v2220_v45  ;;  %v2192_v38 = vpop.f32.mrf.mxu3  ;;  %v2179_v17 = vpop.f32.mrf.mxu2  ;;  %v2232_v0 = vand.u32 2147483648, %v2220_v45  ;;  %v2230_v33 = vand.u32 2147483647, %v2220_v45  ;;  %vm2226_vm7 = vweird.f32 %v2220_v45 }
 0x997   : > { %v2214_v22 = vor.u32 1.1754944e-38, %v2213_v31  ;;  %vm2212_vm10 = vcmp.eq.f32.partialorder %v2211_v34, 8.507059e+37 }
 0x998   : > { %v2233_v60 = vor.u32 1.1754944e-38, %v2232_v0  ;;  %vm2231_vm11 = vcmp.eq.f32.partialorder %v2230_v33, 8.507059e+37 }
 0x999   : > { %v3510_v61 = vpop.eup %3509 }
 0x99a   : > { %v2240_v7 = vadd.f32 1.0, %v3510_v61 }
 0x99b   : > { %v3512_v20 = vpop.eup %3511 }
 0x99c   : > { %v3514_v26 = vpop.eup %3513  ;;  %v2203_v21 = vmul.f32 %v3512_v20, %v2201_v49  ;;  %3515 = vrcp.f32 %v2240_v7  ;;  %vm2208_vm4 = vweird.f32 %v3512_v20  ;;  %vm2246_vm13 = vweird.f32 %v2240_v7 }
 0x99d   : > { %v2222_v13 = vmul.f32 %v3514_v26, %v2220_v45  ;;  %3517 = vtanh.f32 %v2196_v63  ;;  %vm2227_vm5 = vweird.f32 %v3514_v26  ;;  %vm2209_vm8 = vmor %vm2207_vm6, %vm2208_vm4  ;;  %v2252_v45 = vand.u32 2147483648, %v2240_v7 }
 0x99e   : > { %v2204_v14 = vsub.f32 1.0, %v2203_v21  ;;  %vm2228_vm9 = vmor %vm2226_vm7, %vm2227_vm5  ;;  %v2250_v21 = vand.u32 2147483647, %v2240_v7 }
 0x99f   : > { %v2223_v25 = vsub.f32 1.0, %v2222_v13 }
 0x9a0   : > { %v2205_v30 = vmul.f32 %v3512_v20, %v2204_v14  ;;  %v2253_v14 = vor.u32 1.1754944e-38, %v2252_v45  ;;  %vm2251_vm15 = vcmp.eq.f32.partialorder %v2250_v21, 8.507059e+37 }
 0x9a1   : > { %v2224_v5 = vmul.f32 %v3514_v26, %v2223_v25 }
 0x9a2   : > { %v3516_v44 = vpop.eup %3515  ;;  %v2206_v19 = vadd.f32 %v3512_v20, %v2205_v30 }
 0x9a3   : > { %v3518_v39 = vpop.eup %3517  ;;  %v2242_v48 = vmul.f32 %v3516_v44, %v2240_v7  ;;  %v2225_v47 = vadd.f32 %v3514_v26, %v2224_v5  ;;  %vm2247_vm12 = vweird.f32 %v3516_v44 }
 0x9a4   : > { %v2210_v57 = vsel %vm2209_vm8, %v3512_v20, %v2206_v19  ;;  %vm2248_vm14 = vmor %vm2246_vm13, %vm2247_vm12 }
 0x9a5   : > { %v2243_v56 = vsub.f32 1.0, %v2242_v48  ;;  %v2215_v32 = vsel %vm2212_vm10, %v2214_v22, %v2210_v57  ;;  %v2229_v1 = vsel %vm2228_vm9, %v3514_v26, %v2225_v47 }
 0x9a6   : > { %v2234_v52 = vsel %vm2231_vm11, %v2233_v60, %v2229_v1  ;;  %v2257_v38 = vmul.f32 %v3518_v39, %v2215_v32 }
 0x9a7   : > { %v2244_v17 = vmul.f32 %v3516_v44, %v2243_v56  ;;  %v2256_v61 = vmul.f32 %v2234_v52, %v2133_v29 }
 0x9a9   : > { %v2258_v49 = vadd.f32 %v2257_v38, %v2256_v61  ;;  %v2245_v63 = vadd.f32 %v3516_v44, %v2244_v17 }
 0x9ab   : > { %3519 = vtanh.f32 %v2258_v49  ;;  %v2249_v13 = vsel %vm2248_vm14, %v3516_v44, %v2245_v63 }
 0x9ac   : > { %v2254_v25 = vsel %vm2251_vm15, %v2253_v14, %v2249_v13 }
 0x9ae   : > { %2265 = sbr.rel (%p3236_p3) target bundleno = 2485 (0x9b5), region = 103 }
 0x9b1   : > { %v3520_v20 = vpop.eup %3519 }
 0x9b2   : > { %v2260_v31 = vmul.f32 %v3520_v20, %v2254_v25 }
 0x9b3   : > { %2266 = vst [vmem:[#allocation3] sm:$0xff] %v2258_v49 }
 0x9b4   : > { %2267 = vst [vmem:[#allocation2] sm:$0xff] %v2260_v31 }
 0x9b5 PF: > { %v2268_v26 = vpack.c.bf16 %v2260_v31, %v2260_v31  ;;  %2281 = vmatpush.bf16.msra.mxu0 %v3784_v37  ;;  %2294 = vmatpush.bf16.msra.mxu1 %v3786_v41  ;;  %s2400_s27 = sadd.s32 12, %s3667_s25  ;;  %v3238_v30 = vld [vmem:[%s3674_s7 + $0xc0] sm:$0xff]  ;;  %v3239_v48 = vld [vmem:[%s3674_s7 + $0xc8] sm:$0xff] }
 0x9b6   : > { %2320 = vmatpush.bf16.msra.mxu3 %v3788_v42  ;;  %2307 = vmatpush.bf16.msra.mxu2 %v3799_v55  ;;  %v2276_v34 = vunpack.c.l.bf16 %v3238_v30  ;;  %v2277_v5 = vunpack.c.h.bf16 %v3238_v30  ;;  %v2279_v60 = vunpack.c.h.bf16 %v3239_v48  ;;  %v2278_v63 = vunpack.c.l.bf16 %v3239_v48  ;;  %p3243_p4 = scmp.ge.s32.totalorder %s2400_s27, 20 }
 0x9b7   : > { %3237 = vst [vmem:[%s3679_s10 + $0x2c] sm:$0xf] %v2268_v26 }
 0x9b9   : > { %2282 = vmatpush.bf16.msra.mxu0 %v3791_v46  ;;  %2295 = vmatpush.bf16.msra.mxu1 %v3795_v50 }
 0x9ba   : > { %2321 = vmatpush.bf16.msra.mxu3 %v3797_v51  ;;  %2308 = vmatpush.bf16.msra.mxu2 %v3811_v4 }
 0x9bb   : > { %v2271_v7 = vld [vmem:[#allocation2] sm:$0xff] }
 0x9bc   : > { %v2280_v0 = vpack.c.bf16 %v2271_v7, %v2271_v7 }
 0x9bd   : > { %2283 = vmatpush.bf16.msra.mxu0 %v3803_v62  ;;  %2296 = vmatpush.bf16.msra.mxu1 %v3807_v2 }
 0x9be   : > { %2322 = vmatpush.bf16.msra.mxu3 %v3809_v3  ;;  %2309 = vmatpush.bf16.msra.mxu2 %v3817_v12 }
 0x9c1   : > { %2284 = vmatpush.bf16.msra.mxu0 %v3815_v11  ;;  %2297 = vmatpush.bf16.msra.mxu1 %v3821_v15 }
 0x9c2   : > { %2323 = vmatpush.bf16.msra.mxu3 %v3823_v16  ;;  %2310 = vmatpush.bf16.msra.mxu2 %v3829_v24 }
 0x9c5   : > { %2285 = vmatpush.bf16.msra.mxu0 %v3827_v23  ;;  %2298 = vmatpush.bf16.msra.mxu1 %v3833_v27 }
 0x9c6   : > { %2324 = vmatpush.bf16.msra.mxu3 %v3835_v28  ;;  %2311 = vmatpush.bf16.msra.mxu2 %v3841_v36 }
 0x9c9   : > { %2286 = vmatpush.bf16.msra.mxu0 %v3839_v35  ;;  %2299 = vmatpush.bf16.msra.mxu1 %v3845_v40 }
 0x9ca   : > { %2325 = vmatpush.bf16.msra.mxu3 %v3847_v43  ;;  %2312 = vmatpush.bf16.msra.mxu2 %v3853_v54 }
 0x9cd   : > { %2287 = vmatpush.bf16.msra.mxu0 %v3851_v53  ;;  %2300 = vmatpush.bf16.msra.mxu1 %v3857_v58 }
 0x9ce   : > { %2326 = vmatpush.bf16.msra.mxu3 %v3859_v59  ;;  %2313 = vmatpush.bf16.msra.mxu2 %v3865_v8 }
 0x9d1   : > { %2288 = vmatpush.bf16.msra.mxu0 %v3863_v6  ;;  %2301 = vmatpush.bf16.msra.mxu1 %v3869_v9 }
 0x9d2   : > { %2327 = vmatpush.bf16.msra.mxu3 %v3871_v10  ;;  %2314 = vmatpush.bf16.msra.mxu2 %v3877_v18 }
 0x9d4   : > { %2289 = vmatmul.bf16.vlgmr.msra.gmra.mxu0 %v2280_v0  ;;  %2302 = vmatmul.bf16.vlgmr.msra.gmra.mxu1 %v2280_v0 }
 0x9d5   : > { %2328 = vmatmul.bf16.vlgmr.msra.gmra.mxu3 %v2280_v0  ;;  %2315 = vmatmul.bf16.vlgmr.msra.gmra.mxu2 %v2280_v0 }
 0xa51   : > { %v2290_v33 = vpop.f32.mrf.mxu0  ;;  %v2303_v44 = vpop.f32.mrf.mxu1 }
 0xa52   : > { %v2333_v19 = vadd.f32 %v2290_v33, %v2276_v34  ;;  %v2334_v39 = vadd.f32 %v2303_v44, %v2277_v5 }
 0xa54   : > { %v3240_v22 = vmul.f32 -1.442695, %v2333_v19  ;;  %v3241_v47 = vmul.f32 -1.442695, %v2334_v39 }
 0xa56   : > { %3521 = vpow2.f32 %v3240_v22 }
 0xa57   : > { %3523 = vpow2.f32 %v3241_v47 }
 0xa58   : > { %v2329_v29 = vpop.f32.mrf.mxu3  ;;  %v2316_v57 = vpop.f32.mrf.mxu2 }
 0xa59   : > { %v2336_v56 = vadd.f32 %v2329_v29, %v2279_v60  ;;  %v2292_v32 = vpop.f32.mrf.mxu0  ;;  %v2305_v1 = vpop.f32.mrf.mxu1  ;;  %v2335_v14 = vadd.f32 %v2316_v57, %v2278_v63 }
 0xa5a   : > { %v2272_v32 = vld [vmem:[#allocation3] sm:$0xff] }
 0xa5b   : > { %v3242_v52 = vmul.f32 -1.442695, %v2336_v56 }
 0xa5c   : > { %v3522_v38 = vpop.eup %3521 }
 0xa5d   : > { %v3524_v17 = vpop.eup %3523  ;;  %v2340_v61 = vadd.f32 1.0, %v3522_v38  ;;  %3525 = vpow2.f32 %v3242_v52 }
 0xa5e   : > { %v2359_v49 = vadd.f32 1.0, %v3524_v17 }
 0xa5f   : > { %3527 = vrcp.f32 %v2340_v61  ;;  %v2352_v34 = vand.u32 2147483648, %v2340_v61  ;;  %v2350_v44 = vand.u32 2147483647, %v2340_v61  ;;  %vm2346_vm2 = vweird.f32 %v2340_v61 }
 0xa60   : > { %3529 = vrcp.f32 %v2359_v49  ;;  %v2331_v45 = vpop.f32.mrf.mxu3  ;;  %v2318_v21 = vpop.f32.mrf.mxu2  ;;  %v2371_v5 = vand.u32 2147483648, %v2359_v49  ;;  %v2369_v39 = vand.u32 2147483647, %v2359_v49  ;;  %vm2365_vm3 = vweird.f32 %v2359_v49 }
 0xa61   : > { %v2353_v29 = vor.u32 1.1754944e-38, %v2352_v34  ;;  %vm2351_vm6 = vcmp.eq.f32.partialorder %v2350_v44, 8.507059e+37 }
 0xa62   : > { %v2372_v56 = vor.u32 1.1754944e-38, %v2371_v5  ;;  %vm2370_vm7 = vcmp.eq.f32.partialorder %v2369_v39, 8.507059e+37 }
 0xa63   : > { %v3526_v13 = vpop.eup %3525 }
 0xa64   : > { %v2379_v20 = vadd.f32 1.0, %v3526_v13 }
 0xa65   : > { %v3528_v25 = vpop.eup %3527 }
 0xa66   : > { %v3530_v31 = vpop.eup %3529  ;;  %v2342_v26 = vmul.f32 %v3528_v25, %v2340_v61  ;;  %3531 = vrcp.f32 %v2379_v20  ;;  %vm2347_vm0 = vweird.f32 %v3528_v25  ;;  %vm2385_vm9 = vweird.f32 %v2379_v20 }
 0xa67   : > { %v2361_v7 = vmul.f32 %v3530_v31, %v2359_v49  ;;  %3533 = vtanh.f32 %v2335_v14  ;;  %vm2366_vm1 = vweird.f32 %v3530_v31  ;;  %vm2348_vm4 = vmor %vm2346_vm2, %vm2347_vm0  ;;  %v2391_v49 = vand.u32 2147483648, %v2379_v20 }
 0xa68   : > { %v2343_v0 = vsub.f32 1.0, %v2342_v26  ;;  %vm2367_vm5 = vmor %vm2365_vm3, %vm2366_vm1  ;;  %v2389_v26 = vand.u32 2147483647, %v2379_v20 }
 0xa69   : > { %v2362_v30 = vsub.f32 1.0, %v2361_v7 }
 0xa6a   : > { %v2344_v33 = vmul.f32 %v3528_v25, %v2343_v0  ;;  %v2392_v0 = vor.u32 1.1754944e-38, %v2391_v49  ;;  %vm2390_vm11 = vcmp.eq.f32.partialorder %v2389_v26, 8.507059e+37 }
 0xa6b   : > { %v2363_v19 = vmul.f32 %v3530_v31, %v2362_v30 }
 0xa6c   : > { %v3532_v48 = vpop.eup %3531  ;;  %v2345_v22 = vadd.f32 %v3528_v25, %v2344_v33 }
 0xa6d   : > { %v3534_v47 = vpop.eup %3533  ;;  %v2381_v60 = vmul.f32 %v3532_v48, %v2379_v20  ;;  %v2364_v57 = vadd.f32 %v3530_v31, %v2363_v19  ;;  %vm2386_vm8 = vweird.f32 %v3532_v48 }
 0xa6e   : > { %v2349_v1 = vsel %vm2348_vm4, %v3528_v25, %v2345_v22  ;;  %vm2387_vm10 = vmor %vm2385_vm9, %vm2386_vm8 }
 0xa6f   : > { %v2382_v52 = vsub.f32 1.0, %v2381_v60  ;;  %v2354_v38 = vsel %vm2351_vm6, %v2353_v29, %v2349_v1  ;;  %v2368_v17 = vsel %vm2367_vm5, %v3530_v31, %v2364_v57 }
 0xa70   : > { %v2373_v63 = vsel %vm2370_vm7, %v2372_v56, %v2368_v17  ;;  %v2396_v45 = vmul.f32 %v3534_v47, %v2354_v38 }
 0xa71   : > { %v2383_v21 = vmul.f32 %v3532_v48, %v2382_v52  ;;  %v2395_v13 = vmul.f32 %v2373_v63, %v2272_v32 }
 0xa73   : > { %v2397_v61 = vadd.f32 %v2396_v45, %v2395_v13  ;;  %v2384_v14 = vadd.f32 %v3532_v48, %v2383_v21 }
 0xa75   : > { %3535 = vtanh.f32 %v2397_v61  ;;  %v2388_v7 = vsel %vm2387_vm10, %v3532_v48, %v2384_v14 }
 0xa76   : > { %v2393_v30 = vsel %vm2390_vm11, %v2392_v0, %v2388_v7 }
 0xa78   : > { %2404 = sbr.rel (%p3243_p4) target bundleno = 2687 (0xa7f), region = 107 }
 0xa7b   : > { %v3536_v25 = vpop.eup %3535 }
 0xa7c   : > { %v2399_v34 = vmul.f32 %v3536_v25, %v2393_v30 }
 0xa7d   : > { %2405 = vst [vmem:[#allocation3] sm:$0xff] %v2397_v61 }
 0xa7e   : > { %2406 = vst [vmem:[#allocation2] sm:$0xff] %v2399_v34 }
 0xa7f PF: > { %v2407_v31 = vpack.c.bf16 %v2399_v34, %v2399_v34  ;;  %2420 = vmatpush.bf16.msrb.mxu0 %v3784_v37  ;;  %2433 = vmatpush.bf16.msrb.mxu1 %v3786_v41  ;;  %s2539_s28 = sadd.s32 13, %s3667_s25  ;;  %v3245_v33 = vld [vmem:[%s3674_s7 + $0xd0] sm:$0xff]  ;;  %v3246_v60 = vld [vmem:[%s3674_s7 + $0xd8] sm:$0xff] }
 0xa80   : > { %2459 = vmatpush.bf16.msrb.mxu3 %v3788_v42  ;;  %2446 = vmatpush.bf16.msrb.mxu2 %v3799_v55  ;;  %v2415_v44 = vunpack.c.l.bf16 %v3245_v33  ;;  %v2416_v19 = vunpack.c.h.bf16 %v3245_v33  ;;  %v2418_v56 = vunpack.c.h.bf16 %v3246_v60  ;;  %v2417_v14 = vunpack.c.l.bf16 %v3246_v60  ;;  %p3250_p5 = scmp.ge.s32.totalorder %s2539_s28, 20 }
 0xa81   : > { %3244 = vst [vmem:[%s3679_s10 + $0x30] sm:$0xf] %v2407_v31 }
 0xa83   : > { %2421 = vmatpush.bf16.msrb.mxu0 %v3791_v46  ;;  %2434 = vmatpush.bf16.msrb.mxu1 %v3795_v50 }
 0xa84   : > { %2460 = vmatpush.bf16.msrb.mxu3 %v3797_v51  ;;  %2447 = vmatpush.bf16.msrb.mxu2 %v3811_v4 }
 0xa85   : > { %v2410_v20 = vld [vmem:[#allocation2] sm:$0xff] }
 0xa86   : > { %v2419_v5 = vpack.c.bf16 %v2410_v20, %v2410_v20 }
 0xa87   : > { %2422 = vmatpush.bf16.msrb.mxu0 %v3803_v62  ;;  %2435 = vmatpush.bf16.msrb.mxu1 %v3807_v2 }
 0xa88   : > { %2461 = vmatpush.bf16.msrb.mxu3 %v3809_v3  ;;  %2448 = vmatpush.bf16.msrb.mxu2 %v3817_v12 }
 0xa8b   : > { %2423 = vmatpush.bf16.msrb.mxu0 %v3815_v11  ;;  %2436 = vmatpush.bf16.msrb.mxu1 %v3821_v15 }
 0xa8c   : > { %2462 = vmatpush.bf16.msrb.mxu3 %v3823_v16  ;;  %2449 = vmatpush.bf16.msrb.mxu2 %v3829_v24 }
 0xa8f   : > { %2424 = vmatpush.bf16.msrb.mxu0 %v3827_v23  ;;  %2437 = vmatpush.bf16.msrb.mxu1 %v3833_v27 }
 0xa90   : > { %2463 = vmatpush.bf16.msrb.mxu3 %v3835_v28  ;;  %2450 = vmatpush.bf16.msrb.mxu2 %v3841_v36 }
 0xa93   : > { %2425 = vmatpush.bf16.msrb.mxu0 %v3839_v35  ;;  %2438 = vmatpush.bf16.msrb.mxu1 %v3845_v40 }
 0xa94   : > { %2464 = vmatpush.bf16.msrb.mxu3 %v3847_v43  ;;  %2451 = vmatpush.bf16.msrb.mxu2 %v3853_v54 }
 0xa97   : > { %2426 = vmatpush.bf16.msrb.mxu0 %v3851_v53  ;;  %2439 = vmatpush.bf16.msrb.mxu1 %v3857_v58 }
 0xa98   : > { %2465 = vmatpush.bf16.msrb.mxu3 %v3859_v59  ;;  %2452 = vmatpush.bf16.msrb.mxu2 %v3865_v8 }
 0xa9b   : > { %2427 = vmatpush.bf16.msrb.mxu0 %v3863_v6  ;;  %2440 = vmatpush.bf16.msrb.mxu1 %v3869_v9 }
 0xa9c   : > { %2466 = vmatpush.bf16.msrb.mxu3 %v3871_v10  ;;  %2453 = vmatpush.bf16.msrb.mxu2 %v3877_v18 }
 0xa9e   : > { %2428 = vmatmul.bf16.vlgmr.msrb.gmra.mxu0 %v2419_v5  ;;  %2441 = vmatmul.bf16.vlgmr.msrb.gmra.mxu1 %v2419_v5 }
 0xa9f   : > { %2467 = vmatmul.bf16.vlgmr.msrb.gmra.mxu3 %v2419_v5  ;;  %2454 = vmatmul.bf16.vlgmr.msrb.gmra.mxu2 %v2419_v5 }
 0xb1b   : > { %v2429_v39 = vpop.f32.mrf.mxu0  ;;  %v2442_v48 = vpop.f32.mrf.mxu1 }
 0xb1c   : > { %v2472_v22 = vadd.f32 %v2429_v39, %v2415_v44  ;;  %v2473_v47 = vadd.f32 %v2442_v48, %v2416_v19 }
 0xb1e   : > { %v3247_v29 = vmul.f32 -1.442695, %v2472_v22  ;;  %v3248_v57 = vmul.f32 -1.442695, %v2473_v47 }
 0xb20   : > { %3537 = vpow2.f32 %v3247_v29 }
 0xb21   : > { %3539 = vpow2.f32 %v3248_v57 }
 0xb22   : > { %v2468_v32 = vpop.f32.mrf.mxu3  ;;  %v2455_v1 = vpop.f32.mrf.mxu2 }
 0xb23   : > { %v2475_v52 = vadd.f32 %v2468_v32, %v2418_v56  ;;  %v2431_v38 = vpop.f32.mrf.mxu0  ;;  %v2444_v17 = vpop.f32.mrf.mxu1  ;;  %v2474_v0 = vadd.f32 %v2455_v1, %v2417_v14 }
 0xb24   : > { %v2411_v38 = vld [vmem:[#allocation3] sm:$0xff] }
 0xb25   : > { %v3249_v63 = vmul.f32 -1.442695, %v2475_v52 }
 0xb26   : > { %v3538_v45 = vpop.eup %3537 }
 0xb27   : > { %v3540_v21 = vpop.eup %3539  ;;  %v2479_v13 = vadd.f32 1.0, %v3538_v45  ;;  %3541 = vpow2.f32 %v3249_v63 }
 0xb28   : > { %v2498_v61 = vadd.f32 1.0, %v3540_v21 }
 0xb29   : > { %3543 = vrcp.f32 %v2479_v13  ;;  %v2491_v44 = vand.u32 2147483648, %v2479_v13  ;;  %v2489_v48 = vand.u32 2147483647, %v2479_v13  ;;  %vm2485_vm14 = vweird.f32 %v2479_v13 }
 0xb2a   : > { %3545 = vrcp.f32 %v2498_v61  ;;  %v2470_v49 = vpop.f32.mrf.mxu3  ;;  %v2457_v26 = vpop.f32.mrf.mxu2  ;;  %v2510_v19 = vand.u32 2147483648, %v2498_v61  ;;  %v2508_v47 = vand.u32 2147483647, %v2498_v61  ;;  %vm2504_vm15 = vweird.f32 %v2498_v61 }
 0xb2b   : > { %v2492_v32 = vor.u32 1.1754944e-38, %v2491_v44  ;;  %vm2490_vm2 = vcmp.eq.f32.partialorder %v2489_v48, 8.507059e+37 }
 0xb2c   : > { %v2511_v52 = vor.u32 1.1754944e-38, %v2510_v19  ;;  %vm2509_vm3 = vcmp.eq.f32.partialorder %v2508_v47, 8.507059e+37 }
 0xb2d   : > { %v3542_v7 = vpop.eup %3541 }
 0xb2e   : > { %v2518_v25 = vadd.f32 1.0, %v3542_v7 }
 0xb2f   : > { %v3544_v30 = vpop.eup %3543 }
 0xb30   : > { %v3546_v34 = vpop.eup %3545  ;;  %v2481_v31 = vmul.f32 %v3544_v30, %v2479_v13  ;;  %3547 = vrcp.f32 %v2518_v25  ;;  %vm2486_vm12 = vweird.f32 %v3544_v30  ;;  %vm2524_vm5 = vweird.f32 %v2518_v25 }
 0xb31   : > { %v2500_v20 = vmul.f32 %v3546_v34, %v2498_v61  ;;  %3549 = vtanh.f32 %v2474_v0  ;;  %vm2505_vm13 = vweird.f32 %v3546_v34  ;;  %vm2487_vm0 = vmor %vm2485_vm14, %vm2486_vm12  ;;  %v2530_v61 = vand.u32 2147483648, %v2518_v25 }
 0xb32   : > { %v2482_v5 = vsub.f32 1.0, %v2481_v31  ;;  %vm2506_vm1 = vmor %vm2504_vm15, %vm2505_vm13  ;;  %v2528_v31 = vand.u32 2147483647, %v2518_v25 }
 0xb33   : > { %v2501_v33 = vsub.f32 1.0, %v2500_v20 }
 0xb34   : > { %v2483_v39 = vmul.f32 %v3544_v30, %v2482_v5  ;;  %v2531_v5 = vor.u32 1.1754944e-38, %v2530_v61  ;;  %vm2529_vm7 = vcmp.eq.f32.partialorder %v2528_v31, 8.507059e+37 }
 0xb35   : > { %v2502_v22 = vmul.f32 %v3546_v34, %v2501_v33 }
 0xb36   : > { %v3548_v60 = vpop.eup %3547  ;;  %v2484_v29 = vadd.f32 %v3544_v30, %v2483_v39 }
 0xb37   : > { %v3550_v57 = vpop.eup %3549  ;;  %v2520_v56 = vmul.f32 %v3548_v60, %v2518_v25  ;;  %v2503_v1 = vadd.f32 %v3546_v34, %v2502_v22  ;;  %vm2525_vm4 = vweird.f32 %v3548_v60 }
 0xb38   : > { %v2488_v17 = vsel %vm2487_vm0, %v3544_v30, %v2484_v29  ;;  %vm2526_vm6 = vmor %vm2524_vm5, %vm2525_vm4 }
 0xb39   : > { %v2521_v63 = vsub.f32 1.0, %v2520_v56  ;;  %v2493_v45 = vsel %vm2490_vm2, %v2492_v32, %v2488_v17  ;;  %v2507_v21 = vsel %vm2506_vm1, %v3546_v34, %v2503_v1 }
 0xb3a   : > { %v2512_v14 = vsel %vm2509_vm3, %v2511_v52, %v2507_v21  ;;  %v2535_v49 = vmul.f32 %v3550_v57, %v2493_v45 }
 0xb3b   : > { %v2522_v26 = vmul.f32 %v3548_v60, %v2521_v63  ;;  %v2534_v7 = vmul.f32 %v2512_v14, %v2411_v38 }
 0xb3d   : > { %v2536_v13 = vadd.f32 %v2535_v49, %v2534_v7  ;;  %v2523_v0 = vadd.f32 %v3548_v60, %v2522_v26 }
 0xb3f   : > { %3551 = vtanh.f32 %v2536_v13  ;;  %v2527_v20 = vsel %vm2526_vm6, %v3548_v60, %v2523_v0 }
 0xb40   : > { %v2532_v33 = vsel %vm2529_vm7, %v2531_v5, %v2527_v20 }
 0xb42   : > { %2543 = sbr.rel (%p3250_p5) target bundleno = 2889 (0xb49), region = 111 }
 0xb45   : > { %v3552_v30 = vpop.eup %3551 }
 0xb46   : > { %v2538_v44 = vmul.f32 %v3552_v30, %v2532_v33 }
 0xb47   : > { %2544 = vst [vmem:[#allocation3] sm:$0xff] %v2536_v13 }
 0xb48   : > { %2545 = vst [vmem:[#allocation2] sm:$0xff] %v2538_v44 }
 0xb49 PF: > { %v2546_v34 = vpack.c.bf16 %v2538_v44, %v2538_v44  ;;  %2559 = vmatpush.bf16.msra.mxu0 %v3784_v37  ;;  %2572 = vmatpush.bf16.msra.mxu1 %v3786_v41  ;;  %s2678_s29 = sadd.s32 14, %s3667_s25  ;;  %v3252_v39 = vld [vmem:[%s3674_s7 + $0xe0] sm:$0xff]  ;;  %v3253_v56 = vld [vmem:[%s3674_s7 + $0xe8] sm:$0xff] }
 0xb4a   : > { %2598 = vmatpush.bf16.msra.mxu3 %v3788_v42  ;;  %2585 = vmatpush.bf16.msra.mxu2 %v3799_v55  ;;  %v2554_v48 = vunpack.c.l.bf16 %v3252_v39  ;;  %v2555_v22 = vunpack.c.h.bf16 %v3252_v39  ;;  %v2557_v52 = vunpack.c.h.bf16 %v3253_v56  ;;  %v2556_v0 = vunpack.c.l.bf16 %v3253_v56  ;;  %p3257_p6 = scmp.ge.s32.totalorder %s2678_s29, 20 }
 0xb4b   : > { %3251 = vst [vmem:[%s3679_s10 + $0x34] sm:$0xf] %v2546_v34 }
 0xb4d   : > { %2560 = vmatpush.bf16.msra.mxu0 %v3791_v46  ;;  %2573 = vmatpush.bf16.msra.mxu1 %v3795_v50 }
 0xb4e   : > { %2599 = vmatpush.bf16.msra.mxu3 %v3797_v51  ;;  %2586 = vmatpush.bf16.msra.mxu2 %v3811_v4 }
 0xb4f   : > { %v2549_v25 = vld [vmem:[#allocation2] sm:$0xff] }
 0xb50   : > { %v2558_v19 = vpack.c.bf16 %v2549_v25, %v2549_v25 }
 0xb51   : > { %2561 = vmatpush.bf16.msra.mxu0 %v3803_v62  ;;  %2574 = vmatpush.bf16.msra.mxu1 %v3807_v2 }
 0xb52   : > { %2600 = vmatpush.bf16.msra.mxu3 %v3809_v3  ;;  %2587 = vmatpush.bf16.msra.mxu2 %v3817_v12 }
 0xb55   : > { %2562 = vmatpush.bf16.msra.mxu0 %v3815_v11  ;;  %2575 = vmatpush.bf16.msra.mxu1 %v3821_v15 }
 0xb56   : > { %2601 = vmatpush.bf16.msra.mxu3 %v3823_v16  ;;  %2588 = vmatpush.bf16.msra.mxu2 %v3829_v24 }
 0xb59   : > { %2563 = vmatpush.bf16.msra.mxu0 %v3827_v23  ;;  %2576 = vmatpush.bf16.msra.mxu1 %v3833_v27 }
 0xb5a   : > { %2602 = vmatpush.bf16.msra.mxu3 %v3835_v28  ;;  %2589 = vmatpush.bf16.msra.mxu2 %v3841_v36 }
 0xb5d   : > { %2564 = vmatpush.bf16.msra.mxu0 %v3839_v35  ;;  %2577 = vmatpush.bf16.msra.mxu1 %v3845_v40 }
 0xb5e   : > { %2603 = vmatpush.bf16.msra.mxu3 %v3847_v43  ;;  %2590 = vmatpush.bf16.msra.mxu2 %v3853_v54 }
 0xb61   : > { %2565 = vmatpush.bf16.msra.mxu0 %v3851_v53  ;;  %2578 = vmatpush.bf16.msra.mxu1 %v3857_v58 }
 0xb62   : > { %2604 = vmatpush.bf16.msra.mxu3 %v3859_v59  ;;  %2591 = vmatpush.bf16.msra.mxu2 %v3865_v8 }
 0xb65   : > { %2566 = vmatpush.bf16.msra.mxu0 %v3863_v6  ;;  %2579 = vmatpush.bf16.msra.mxu1 %v3869_v9 }
 0xb66   : > { %2605 = vmatpush.bf16.msra.mxu3 %v3871_v10  ;;  %2592 = vmatpush.bf16.msra.mxu2 %v3877_v18 }
 0xb68   : > { %2567 = vmatmul.bf16.vlgmr.msra.gmra.mxu0 %v2558_v19  ;;  %2580 = vmatmul.bf16.vlgmr.msra.gmra.mxu1 %v2558_v19 }
 0xb69   : > { %2606 = vmatmul.bf16.vlgmr.msra.gmra.mxu3 %v2558_v19  ;;  %2593 = vmatmul.bf16.vlgmr.msra.gmra.mxu2 %v2558_v19 }
 0xbe5   : > { %v2568_v47 = vpop.f32.mrf.mxu0  ;;  %v2581_v60 = vpop.f32.mrf.mxu1 }
 0xbe6   : > { %v2611_v29 = vadd.f32 %v2568_v47, %v2554_v48  ;;  %v2612_v57 = vadd.f32 %v2581_v60, %v2555_v22 }
 0xbe8   : > { %v3254_v32 = vmul.f32 -1.442695, %v2611_v29  ;;  %v3255_v1 = vmul.f32 -1.442695, %v2612_v57 }
 0xbea   : > { %3553 = vpow2.f32 %v3254_v32 }
 0xbeb   : > { %3555 = vpow2.f32 %v3255_v1 }
 0xbec   : > { %v2607_v38 = vpop.f32.mrf.mxu3  ;;  %v2594_v17 = vpop.f32.mrf.mxu2 }
 0xbed   : > { %v2614_v63 = vadd.f32 %v2607_v38, %v2557_v52  ;;  %v2570_v45 = vpop.f32.mrf.mxu0  ;;  %v2583_v21 = vpop.f32.mrf.mxu1  ;;  %v2613_v5 = vadd.f32 %v2594_v17, %v2556_v0 }
 0xbee   : > { %v2550_v45 = vld [vmem:[#allocation3] sm:$0xff] }
 0xbef   : > { %v3256_v14 = vmul.f32 -1.442695, %v2614_v63 }
 0xbf0   : > { %v3554_v49 = vpop.eup %3553 }
 0xbf1   : > { %v3556_v26 = vpop.eup %3555  ;;  %v2618_v7 = vadd.f32 1.0, %v3554_v49  ;;  %3557 = vpow2.f32 %v3256_v14 }
 0xbf2   : > { %v2637_v13 = vadd.f32 1.0, %v3556_v26 }
 0xbf3   : > { %3559 = vrcp.f32 %v2618_v7  ;;  %v2630_v48 = vand.u32 2147483648, %v2618_v7  ;;  %v2628_v60 = vand.u32 2147483647, %v2618_v7  ;;  %vm2624_vm10 = vweird.f32 %v2618_v7 }
 0xbf4   : > { %3561 = vrcp.f32 %v2637_v13  ;;  %v2609_v61 = vpop.f32.mrf.mxu3  ;;  %v2596_v31 = vpop.f32.mrf.mxu2  ;;  %v2649_v22 = vand.u32 2147483648, %v2637_v13  ;;  %v2647_v57 = vand.u32 2147483647, %v2637_v13  ;;  %vm2643_vm11 = vweird.f32 %v2637_v13 }
 0xbf5   : > { %v2631_v38 = vor.u32 1.1754944e-38, %v2630_v48  ;;  %vm2629_vm14 = vcmp.eq.f32.partialorder %v2628_v60, 8.507059e+37 }
 0xbf6   : > { %v2650_v63 = vor.u32 1.1754944e-38, %v2649_v22  ;;  %vm2648_vm15 = vcmp.eq.f32.partialorder %v2647_v57, 8.507059e+37 }
 0xbf7   : > { %v3558_v20 = vpop.eup %3557 }
 0xbf8   : > { %v2657_v30 = vadd.f32 1.0, %v3558_v20 }
 0xbf9   : > { %v3560_v33 = vpop.eup %3559 }
 0xbfa   : > { %v3562_v44 = vpop.eup %3561  ;;  %v2620_v34 = vmul.f32 %v3560_v33, %v2618_v7  ;;  %3563 = vrcp.f32 %v2657_v30  ;;  %vm2625_vm8 = vweird.f32 %v3560_v33  ;;  %vm2663_vm1 = vweird.f32 %v2657_v30 }
 0xbfb   : > { %v2639_v25 = vmul.f32 %v3562_v44, %v2637_v13  ;;  %3565 = vtanh.f32 %v2613_v5  ;;  %vm2644_vm9 = vweird.f32 %v3562_v44  ;;  %vm2626_vm12 = vmor %vm2624_vm10, %vm2625_vm8  ;;  %v2669_v13 = vand.u32 2147483648, %v2657_v30 }
 0xbfc   : > { %v2621_v19 = vsub.f32 1.0, %v2620_v34  ;;  %vm2645_vm13 = vmor %vm2643_vm11, %vm2644_vm9  ;;  %v2667_v34 = vand.u32 2147483647, %v2657_v30 }
 0xbfd   : > { %v2640_v39 = vsub.f32 1.0, %v2639_v25 }
 0xbfe   : > { %v2622_v47 = vmul.f32 %v3560_v33, %v2621_v19  ;;  %v2670_v19 = vor.u32 1.1754944e-38, %v2669_v13  ;;  %vm2668_vm3 = vcmp.eq.f32.partialorder %v2667_v34, 8.507059e+37 }
 0xbff   : > { %v2641_v29 = vmul.f32 %v3562_v44, %v2640_v39 }
 0xc00   : > { %v3564_v56 = vpop.eup %3563  ;;  %v2623_v32 = vadd.f32 %v3560_v33, %v2622_v47 }
 0xc01   : > { %v3566_v1 = vpop.eup %3565  ;;  %v2659_v52 = vmul.f32 %v3564_v56, %v2657_v30  ;;  %v2642_v17 = vadd.f32 %v3562_v44, %v2641_v29  ;;  %vm2664_vm0 = vweird.f32 %v3564_v56 }
 0xc02   : > { %v2627_v21 = vsel %vm2626_vm12, %v3560_v33, %v2623_v32  ;;  %vm2665_vm2 = vmor %vm2663_vm1, %vm2664_vm0 }
 0xc03   : > { %v2660_v14 = vsub.f32 1.0, %v2659_v52  ;;  %v2632_v49 = vsel %vm2629_vm14, %v2631_v38, %v2627_v21  ;;  %v2646_v26 = vsel %vm2645_vm13, %v3562_v44, %v2642_v17 }
 0xc04   : > { %v2651_v0 = vsel %vm2648_vm15, %v2650_v63, %v2646_v26  ;;  %v2674_v61 = vmul.f32 %v3566_v1, %v2632_v49 }
 0xc05   : > { %v2661_v31 = vmul.f32 %v3564_v56, %v2660_v14  ;;  %v2673_v20 = vmul.f32 %v2651_v0, %v2550_v45 }
 0xc07   : > { %v2675_v7 = vadd.f32 %v2674_v61, %v2673_v20  ;;  %v2662_v5 = vadd.f32 %v3564_v56, %v2661_v31 }
 0xc09   : > { %3567 = vtanh.f32 %v2675_v7  ;;  %v2666_v25 = vsel %vm2665_vm2, %v3564_v56, %v2662_v5 }
 0xc0a   : > { %v2671_v39 = vsel %vm2668_vm3, %v2670_v19, %v2666_v25 }
 0xc0c   : > { %2682 = sbr.rel (%p3257_p6) target bundleno = 3091 (0xc13), region = 115 }
 0xc0f   : > { %v3568_v33 = vpop.eup %3567 }
 0xc10   : > { %v2677_v48 = vmul.f32 %v3568_v33, %v2671_v39 }
 0xc11   : > { %2683 = vst [vmem:[#allocation3] sm:$0xff] %v2675_v7 }
 0xc12   : > { %2684 = vst [vmem:[#allocation2] sm:$0xff] %v2677_v48 }
 0xc13 PF: > { %v2685_v44 = vpack.c.bf16 %v2677_v48, %v2677_v48  ;;  %2698 = vmatpush.bf16.msrb.mxu0 %v3784_v37  ;;  %2711 = vmatpush.bf16.msrb.mxu1 %v3786_v41  ;;  %s2817_s30 = sadd.s32 15, %s3667_s25 }
 0xc14   : > { %2737 = vmatpush.bf16.msrb.mxu3 %v3788_v42  ;;  %2724 = vmatpush.bf16.msrb.mxu2 %v3799_v55  ;;  %v3259_v42 = vld [vmem:[%s3674_s7 + $0xf0] sm:$0xff]  ;;  %p3264_p7 = scmp.ge.s32.totalorder %s2817_s30, 20 }
 0xc15   : > { %3258 = vst [vmem:[%s3679_s10 + $0x38] sm:$0xf] %v2685_v44 }
 0xc17   : > { %2699 = vmatpush.bf16.msrb.mxu0 %v3791_v46  ;;  %2712 = vmatpush.bf16.msrb.mxu1 %v3795_v50  ;;  %v2693_v46 = vunpack.c.l.bf16 %v3259_v42  ;;  %v2694_v50 = vunpack.c.h.bf16 %v3259_v42 }
 0xc18   : > { %2738 = vmatpush.bf16.msrb.mxu3 %v3797_v51  ;;  %2725 = vmatpush.bf16.msrb.mxu2 %v3811_v4 }
 0xc19   : > { %v2688_v37 = vld [vmem:[#allocation2] sm:$0xff] }
 0xc1a   : > { %v2697_v41 = vpack.c.bf16 %v2688_v37, %v2688_v37  ;;  %v2689_v49 = vld [vmem:[#allocation3] sm:$0xff] }
 0xc1b   : > { %2700 = vmatpush.bf16.msrb.mxu0 %v3803_v62  ;;  %2713 = vmatpush.bf16.msrb.mxu1 %v3807_v2 }
 0xc1c   : > { %2739 = vmatpush.bf16.msrb.mxu3 %v3809_v3  ;;  %2726 = vmatpush.bf16.msrb.mxu2 %v3817_v12  ;;  %v3260_v3 = vld [vmem:[%s3674_s7 + $0xf8] sm:$0xff] }
 0xc1d   : > { %v2696_v12 = vunpack.c.h.bf16 %v3260_v3 }
 0xc1f   : > { %2701 = vmatpush.bf16.msrb.mxu0 %v3815_v11  ;;  %2714 = vmatpush.bf16.msrb.mxu1 %v3821_v15 }
 0xc20   : > { %2740 = vmatpush.bf16.msrb.mxu3 %v3823_v16  ;;  %2727 = vmatpush.bf16.msrb.mxu2 %v3829_v24 }
 0xc23   : > { %2702 = vmatpush.bf16.msrb.mxu0 %v3827_v23  ;;  %2715 = vmatpush.bf16.msrb.mxu1 %v3833_v27 }
 0xc24   : > { %2741 = vmatpush.bf16.msrb.mxu3 %v3835_v28  ;;  %2728 = vmatpush.bf16.msrb.mxu2 %v3841_v36 }
 0xc27   : > { %2703 = vmatpush.bf16.msrb.mxu0 %v3839_v35  ;;  %2716 = vmatpush.bf16.msrb.mxu1 %v3845_v40 }
 0xc28   : > { %2742 = vmatpush.bf16.msrb.mxu3 %v3847_v43  ;;  %2729 = vmatpush.bf16.msrb.mxu2 %v3853_v54 }
 0xc2b   : > { %2704 = vmatpush.bf16.msrb.mxu0 %v3851_v53  ;;  %2717 = vmatpush.bf16.msrb.mxu1 %v3857_v58  ;;  %v2695_v53 = vunpack.c.l.bf16 %v3260_v3 }
 0xc2c   : > { %2743 = vmatpush.bf16.msrb.mxu3 %v3859_v59  ;;  %2730 = vmatpush.bf16.msrb.mxu2 %v3865_v8 }
 0xc2f   : > { %2705 = vmatpush.bf16.msrb.mxu0 %v3863_v6  ;;  %2718 = vmatpush.bf16.msrb.mxu1 %v3869_v9 }
 0xc30   : > { %2744 = vmatpush.bf16.msrb.mxu3 %v3871_v10  ;;  %2731 = vmatpush.bf16.msrb.mxu2 %v3877_v18 }
 0xc32   : > { %2706 = vmatmul.bf16.vlgmr.msrb.gmra.mxu0 %v2697_v41  ;;  %2719 = vmatmul.bf16.vlgmr.msrb.gmra.mxu1 %v2697_v41 }
 0xc33   : > { %2745 = vmatmul.bf16.vlgmr.msrb.gmra.mxu3 %v2697_v41  ;;  %2732 = vmatmul.bf16.vlgmr.msrb.gmra.mxu2 %v2697_v41 }
 0xcaf   : > { %v2707_v51 = vpop.f32.mrf.mxu0  ;;  %v2720_v55 = vpop.f32.mrf.mxu1 }
 0xcb0   : > { %v2750_v62 = vadd.f32 %v2707_v51, %v2693_v46  ;;  %v2751_v2 = vadd.f32 %v2720_v55, %v2694_v50 }
 0xcb2   : > { %v3261_v4 = vmul.f32 -1.442695, %v2750_v62  ;;  %v3262_v11 = vmul.f32 -1.442695, %v2751_v2 }
 0xcb4   : > { %3569 = vpow2.f32 %v3261_v4 }
 0xcb5   : > { %3571 = vpow2.f32 %v3262_v11 }
 0xcb6   : > { %v2746_v15 = vpop.f32.mrf.mxu3  ;;  %v2733_v16 = vpop.f32.mrf.mxu2 }
 0xcb7   : > { %v2753_v23 = vadd.f32 %v2746_v15, %v2696_v12  ;;  %v2709_v24 = vpop.f32.mrf.mxu0  ;;  %v2722_v27 = vpop.f32.mrf.mxu1  ;;  %v2752_v6 = vadd.f32 %v2733_v16, %v2695_v53 }
 0xcb9   : > { %v3263_v28 = vmul.f32 -1.442695, %v2753_v23 }
 0xcba   : > { %v3570_v35 = vpop.eup %3569 }
 0xcbb   : > { %v3572_v36 = vpop.eup %3571  ;;  %v2757_v40 = vadd.f32 1.0, %v3570_v35  ;;  %3573 = vpow2.f32 %v3263_v28 }
 0xcbc   : > { %v2776_v43 = vadd.f32 1.0, %v3572_v36 }
 0xcbd   : > { %3575 = vrcp.f32 %v2757_v40  ;;  %v2769_v60 = vand.u32 2147483648, %v2757_v40  ;;  %v2767_v56 = vand.u32 2147483647, %v2757_v40  ;;  %vm2763_vm6 = vweird.f32 %v2757_v40 }
 0xcbe   : > { %3577 = vrcp.f32 %v2776_v43  ;;  %v2748_v54 = vpop.f32.mrf.mxu3  ;;  %v2735_v58 = vpop.f32.mrf.mxu2  ;;  %v2788_v29 = vand.u32 2147483648, %v2776_v43  ;;  %v2786_v1 = vand.u32 2147483647, %v2776_v43  ;;  %vm2782_vm7 = vweird.f32 %v2776_v43 }
 0xcbf   : > { %v2770_v45 = vor.u32 1.1754944e-38, %v2769_v60  ;;  %vm2768_vm10 = vcmp.eq.f32.partialorder %v2767_v56, 8.507059e+37 }
 0xcc0   : > { %v2789_v14 = vor.u32 1.1754944e-38, %v2788_v29  ;;  %vm2787_vm11 = vcmp.eq.f32.partialorder %v2786_v1, 8.507059e+37 }
 0xcc1   : > { %v3574_v59 = vpop.eup %3573 }
 0xcc2   : > { %v2796_v8 = vadd.f32 1.0, %v3574_v59 }
 0xcc3   : > { %v3576_v9 = vpop.eup %3575 }
 0xcc4   : > { %v3578_v10 = vpop.eup %3577  ;;  %v2759_v18 = vmul.f32 %v3576_v9, %v2757_v40  ;;  %3579 = vrcp.f32 %v2796_v8  ;;  %vm2764_vm4 = vweird.f32 %v3576_v9  ;;  %v2808_v19 = vand.u32 2147483648, %v2796_v8 }
 0xcc5   : > { %v2778_v30 = vmul.f32 %v3578_v10, %v2776_v43  ;;  %3581 = vtanh.f32 %v2752_v6  ;;  %vm2783_vm5 = vweird.f32 %v3578_v10  ;;  %vm2765_vm8 = vmor %vm2763_vm6, %vm2764_vm4  ;;  %vm2802_vm13 = vweird.f32 %v2796_v8 }
 0xcc6   : > { %v2760_v22 = vsub.f32 1.0, %v2759_v18  ;;  %vm2784_vm9 = vmor %vm2782_vm7, %vm2783_vm5  ;;  %v2806_v33 = vand.u32 2147483647, %v2796_v8  ;;  %v2809_v48 = vor.u32 1.1754944e-38, %v2808_v19 }
 0xcc7   : > { %v2779_v47 = vsub.f32 1.0, %v2778_v30 }
 0xcc8   : > { %v2761_v57 = vmul.f32 %v3576_v9, %v2760_v22  ;;  %vm2807_vm15 = vcmp.eq.f32.partialorder %v2806_v33, 8.507059e+37 }
 0xcc9   : > { %v2780_v32 = vmul.f32 %v3578_v10, %v2779_v47 }
 0xcca   : > { %v3580_v52 = vpop.eup %3579  ;;  %v2762_v38 = vadd.f32 %v3576_v9, %v2761_v57 }
 0xccb   : > { %v3582_v17 = vpop.eup %3581  ;;  %v2798_v63 = vmul.f32 %v3580_v52, %v2796_v8  ;;  %v2781_v21 = vadd.f32 %v3578_v10, %v2780_v32  ;;  %vm2803_vm12 = vweird.f32 %v3580_v52 }
 0xccc   : > { %v2766_v26 = vsel %vm2765_vm8, %v3576_v9, %v2762_v38  ;;  %vm2804_vm14 = vmor %vm2802_vm13, %vm2803_vm12 }
 0xccd   : > { %v2799_v0 = vsub.f32 1.0, %v2798_v63  ;;  %v2771_v61 = vsel %vm2768_vm10, %v2770_v45, %v2766_v26  ;;  %v2785_v31 = vsel %vm2784_vm9, %v3578_v10, %v2781_v21 }
 0xcce   : > { %v2790_v20 = vsel %vm2787_vm11, %v2789_v14, %v2785_v31  ;;  %v2813_v7 = vmul.f32 %v3582_v17, %v2771_v61 }
 0xccf   : > { %v2800_v5 = vmul.f32 %v3580_v52, %v2799_v0  ;;  %v2812_v13 = vmul.f32 %v2790_v20, %v2689_v49 }
 0xcd1   : > { %v2814_v34 = vadd.f32 %v2813_v7, %v2812_v13  ;;  %v2801_v25 = vadd.f32 %v3580_v52, %v2800_v5 }
 0xcd3   : > { %3583 = vtanh.f32 %v2814_v34  ;;  %v2805_v39 = vsel %vm2804_vm14, %v3580_v52, %v2801_v25 }
 0xcd4   : > { %v2810_v37 = vsel %vm2807_vm15, %v2809_v48, %v2805_v39 }
 0xcd6   : > { %2821 = sbr.rel (%p3264_p7) target bundleno = 3293 (0xcdd), region = 119 }
 0xcd9   : > { %v3584_v44 = vpop.eup %3583 }
 0xcda   : > { %v2816_v41 = vmul.f32 %v3584_v44, %v2810_v37 }
 0xcdb   : > { %2822 = vst [vmem:[#allocation3] sm:$0xff] %v2814_v34 }
 0xcdc   : > { %2823 = vst [vmem:[#allocation2] sm:$0xff] %v2816_v41 }
 0xcdd PF: > { %v2824_v42 = vpack.c.bf16 %v2816_v41, %v2816_v41  ;;  %p3266_p8 = scmp.ne.s32.totalorder %s3601_s21, 1 }
 0xcdf   : > { %3265 = vst [vmem:[%s3679_s10 + $0x3c] sm:$0xf] %v2824_v42  ;;  %2830 = sbr.rel (%p3266_p8) target bundleno = 3303 (0xce7), region = 123 }
 0xce4   : > { %v2831_v46 = vld [vmem:[#allocation2] sm:$0xff]  ;;  %v2833_v50 = vld [vmem:[#allocation3] sm:$0xff] }
 0xce5   : > { %2832 = vst [vmem:[%s4475_s5] sm:$0xff] %v2831_v46 }
 0xce6   : > { %2834 = vst [vmem:[%s4476_s6] sm:$0xff] %v2833_v50 }
 0xce7 PF: > { %s17_s23 = sadd.s32 1, %s3609_s23   ;;  %s4477_s21 = smov %s3605_s22 }
 0xce8   : > { %p14_p9 = scmp.ge.s32.totalorder %s17_s23, 4   ;;  %s4478_s22 = smov %s4480_s24 }
 0xcea   :  { %16 = sbr.rel (!%p14_p9) target bundleno = 2 (0x2), region = 217 }
 0xcef   :  { %2891 = vsyncmov [#allocation5] }
 0xcf2   :  { %s2892_s25 = vpop.sfrf %2891 }
 0xcf3   :  { %p3271_p10 = scmp.ne.s32.totalorder %s2892_s25, 0 }
 0xcf5   :  { %2896 = shalt.err (%p3271_p10)  }

</bundles_post_ra>
